<compile_context>
chip_gen: v7x
topology: tpu7x:2x2x1
jax: 0.10.0
libtpu: 0.0.40
codegen_flags: <defaults>
</compile_context>

<pallas_src>
import functools

import jax
import jax.numpy as jnp
import numpy as np
from jax import lax
from jax.experimental import pallas as pl
from jax.experimental.pallas import tpu as pltpu


# ----------------------------- scaled-down "args" ------------------------------
class Args:
    attention_heads = 4
    head_dim = 8
    X_dim = 32
    attention_dropout = 0.0          # identity at inference
    embed_dropout = 0.0              # identity at inference
    patch_size = 8
    embed_size = 64                  # must be divisible by patch_size
    depth_interact_attention = 2
    microbe_offset = 1373            # literal "+ 1373" from the reference forward
    num_microbes = 4
    latdim = microbe_offset + num_microbes   # rows in the embedding table
    fc_out = 128                     # original: 512

    @property
    def patchs(self):
        return self.embed_size // self.patch_size


ARGS = Args()


# ------------------------------- fused Pallas kernel ----------------------------
def _intert_fused_kernel(pe_ref, wpe_ref, bpe_ref, wq_ref, bq_ref, wk_ref, bk_ref,
                         wvo_ref, bo_ref, wfc_ref, bfc_ref, mask_ref, gt_ref, y_ref,
                         *, B, N, heads, depth, fc_out):
    """Whole InterT forward for all batch elements / both streams, one block."""
    f32 = jnp.float32
    dotf = functools.partial(jnp.dot, preferred_element_type=f32)
    contract_last = (((1,), (1,)), ((), ()))       # a @ b^T without a transpose
    BLK = 2 * B * N                                # rows of x / rows per head block

    # Loaded ONCE, reused by both interact layers.
    mask = mask_ref[...]                           # (R, R) additive block-diag mask
    g_t = gt_ref[...]                              # (2, R) drug/microbe key segments
    bq = bq_ref[...]                               # (R, hd) stacked q bias (scale folded)
    bk = bk_ref[...]                               # (R, hd) stacked k bias
    bo = bo_ref[...]                               # (1, X)  effective out bias (bo + bv@Wo)

    # ---- patch embedding: both streams, all batch elements, one MXU pass ------
    x = dotf(pe_ref[...], wpe_ref[...]) + bpe_ref[...]            # (BLK, X)

    # ---- interact blocks (static unroll over depth) ----------------------------
    for _ in range(depth):
        # q / k per head from head-split weights, stacked on the sublane axis.
        q = jnp.concatenate([dotf(x, wq_ref[h]) for h in range(heads)], axis=0) + bq
        k = jnp.concatenate([dotf(x, wk_ref[h]) for h in range(heads)], axis=0) + bk
        # Values pre-multiplied by 0.5 * Wv_h @ Wo_h (folded in the wrapper).
        vproj = jnp.concatenate([dotf(x, wvo_ref[h]) for h in range(heads)], axis=0)

        # ONE score matmul covering every (batch, head) block; the additive mask
        # keeps attention block-diagonal (same batch, same head).
        s = lax.dot_general(q, k, contract_last, preferred_element_type=f32) + mask
        e = jnp.exp(s - jnp.max(s, axis=-1, keepdims=True))       # (R, R)
        # Per-row softmax denominators, separately over drug / microbe key segments
        # (covers m1..m4 of the reference with a single exp pass).
        denom = lax.dot_general(e, g_t, contract_last, preferred_element_type=f32)  # (R, 2)
        p = e * dotf(pl.reciprocal(denom, approx=True), g_t)      # (R, R)

        # ONE attn @ V matmul; heads are summed back via aligned sublane blocks.
        av = dotf(p, vproj)                                        # (R, X)
        acc = av[0:BLK, :]
        for h in range(1, heads):
            acc = acc + av[h * BLK:(h + 1) * BLK, :]
        x = acc + bo                                               # (BLK, X)

    # ---- final Linear(N*X -> fc_out), block-accumulated over tokens ------------
    y = jnp.zeros((2 * B, fc_out), f32) + bfc_ref[...]
    for n in range(N):                                             # 8-row aligned slices
        y = y + dotf(x[n * 2 * B:(n + 1) * 2 * B, :], wfc_ref[n])
    # LeakyReLU + single lane-dense store.
    y_ref[...] = jnp.where(y >= 0.0, y, 0.01 * y)


# ------------------------------ parameters / glue -------------------------------
def _linear_params(key, fan_in, fan_out):
    kw, kb = jax.random.split(key)
    bound = 1.0 / np.sqrt(fan_in)
    w = jax.random.uniform(kw, (fan_in, fan_out), jnp.float32, -bound, bound)
    b = jax.random.uniform(kb, (1, fan_out), jnp.float32, -bound, bound)
    return w, b


def init_params(key, args):
    HD = args.attention_heads * args.head_dim
    F = args.patchs * args.X_dim
    keys = jax.random.split(key, 6)
    p = {}
    p["w_pe"], p["b_pe"] = _linear_params(keys[0], args.patch_size, args.X_dim)
    p["wq"], p["bq"] = _linear_params(keys[1], args.X_dim, HD)
    p["wk"], p["bk"] = _linear_params(keys[2], args.X_dim, HD)
    p["wv"], p["bv"] = _linear_params(keys[3], args.X_dim, HD)
    p["wo"], p["bo"] = _linear_params(keys[4], HD, args.X_dim)
    p["w_fc"], p["b_fc"] = _linear_params(keys[5], F, args.fc_out)
    return p


def inter_t_forward(x1, x2, embeds, params, args):
    B = x1.shape[0]
    N, P, X = args.patchs, args.patch_size, args.X_dim
    heads, hd = args.attention_heads, args.head_dim
    fc_out = args.fc_out
    BLK = 2 * B * N
    R = heads * BLK
    scale = X ** (-0.5)

    # ---- embedding-row gather + patch rearrange (thin JAX glue) -----------------
    zero = jnp.zeros((args.latdim, 4), jnp.float32)
    embed = jnp.concatenate([embeds, zero], axis=1)                # (latdim, embed_size)
    drug_rows = embed[x1]                                          # (B, embed_size)
    mic_rows = embed[x2 + args.microbe_offset]                     # (B, embed_size)
    both = jnp.stack([drug_rows, mic_rows], axis=1)                # (B, 2, embed_size)
    # Rows ordered (token n, batch b, stream s) so every kernel slice is 8-row aligned.
    pe_in = both.reshape(B, 2, P, N).transpose(3, 0, 1, 2).reshape(BLK, P)

    # ---- weight plumbing (free, wrapper-side) -----------------------------------
    wq = (params["wq"] * scale).reshape(X, heads, hd).transpose(1, 0, 2)   # (H, X, hd)
    wk = params["wk"].reshape(X, heads, hd).transpose(1, 0, 2)             # (H, X, hd)
    bq = jnp.broadcast_to((params["bq"] * scale).reshape(heads, 1, hd),
                          (heads, BLK, hd)).reshape(R, hd)
    bk = jnp.broadcast_to(params["bk"].reshape(heads, 1, hd),
                          (heads, BLK, hd)).reshape(R, hd)
    wv_h = params["wv"].reshape(X, heads, hd).transpose(1, 0, 2)           # (H, X, hd)
    wo_h = params["wo"].reshape(heads, hd, X)                              # (H, hd, X)
    wvo = 0.5 * jnp.einsum("hxd,hdy->hxy", wv_h, wo_h)                     # (H, X, X)
    bo_eff = params["bo"] + params["bv"] @ params["wo"]                    # (1, X)
    wfc = params["w_fc"].reshape(N, X, fc_out)                             # (N, X, fc_out)

    # ---- block-diagonal mask + drug/microbe key-segment indicators (static) -----
    idx = np.arange(R)
    h_idx, local = idx // BLK, idx % BLK
    b_idx, s_idx = (local // 2) % B, local % 2
    same = (h_idx[:, None] == h_idx[None, :]) & (b_idx[:, None] == b_idx[None, :])
    mask = jnp.asarray(np.where(same, 0.0, -1e30), jnp.float32)            # (R, R)
    g_t = jnp.asarray(np.stack([s_idx == 0, s_idx == 1]).astype(np.float32))  # (2, R)

    ins = (pe_in, params["w_pe"], params["b_pe"], wq, bq, wk, bk, wvo, bo_eff,
           wfc, params["b_fc"], mask, g_t)
    kernel = functools.partial(_intert_fused_kernel, B=B, N=N, heads=heads,
                               depth=args.depth_interact_attention, fc_out=fc_out)

    def _full_block(shape):
        nd = len(shape)
        return pl.BlockSpec(shape, lambda i: (0,) * nd)

    y = pl.pallas_call(
        kernel,
        out_shape=jax.ShapeDtypeStruct((2 * B, fc_out), jnp.float32),
        grid=(1,),
        in_specs=[_full_block(a.shape) for a in ins],
        out_specs=pl.BlockSpec((2 * B, fc_out), lambda i: (0, 0)),
        compiler_params=pltpu.CompilerParams(dimension_semantics=("arbitrary",)),
    )(*ins)
    # y rows are (2*b + stream); matches cat([x_drug, x_microbe], dim=2) layout.
    return y.reshape(B, 1, 2, fc_out)


# ------------------------------ pure-JAX reference ------------------------------
def _ref_interact(xd, xm, params, heads, head_dim, scale):
    B, N, _ = xd.shape
    HD = heads * head_dim

    def heads_split(t):
        return t.reshape(B, N, heads, head_dim).transpose(0, 2, 1, 3)

    qd = heads_split(xd @ params["wq"] + params["bq"])
    qm = heads_split(xm @ params["wq"] + params["bq"])
    kd = heads_split(xd @ params["wk"] + params["bk"])
    km = heads_split(xm @ params["wk"] + params["bk"])
    vd = heads_split(xd @ params["wv"] + params["bv"])
    vm = heads_split(xm @ params["wv"] + params["bv"])

    def attn(q, k, v):
        s = jnp.einsum('bhid,bhjd->bhij', q, k) * scale
        m = jax.nn.softmax(s, axis=-1)
        o = jnp.einsum('bhij,bhjd->bhid', m, v)
        return o.transpose(0, 2, 1, 3).reshape(B, N, HD)

    p1 = attn(qd, kd, vd) @ params["wo"] + params["bo"]
    p2 = attn(qd, km, vm) @ params["wo"] + params["bo"]
    p3 = attn(qm, km, vm) @ params["wo"] + params["bo"]
    p4 = attn(qm, kd, vd) @ params["wo"] + params["bo"]
    return (p1 + p2) / 2, (p3 + p4) / 2


def reference_forward(x1, x2, embeds, params, args):
    B = x1.shape[0]
    zero = jnp.zeros((args.latdim, 4), jnp.float32)
    embed = jnp.concatenate([embeds, zero], axis=1)
    drug_rows = embed[x1]
    mic_rows = embed[x2 + args.microbe_offset]

    def to_patch_embed(rows):
        x = rows.reshape(B, args.patch_size, args.patchs).transpose(0, 2, 1)
        return x @ params["w_pe"] + params["b_pe"]

    xd, xm = to_patch_embed(drug_rows), to_patch_embed(mic_rows)
    scale = args.X_dim ** (-0.5)
    for _ in range(args.depth_interact_attention):
        xd, xm = _ref_interact(xd, xm, params, args.attention_heads, args.head_dim, scale)

    F = args.patchs * args.X_dim
    xt = jnp.stack([xd.reshape(B, F), xm.reshape(B, F)], axis=1)
    y = xt.reshape(B * 2, F) @ params["w_fc"] + params["b_fc"]
    y = jnp.where(y >= 0, y, 0.01 * y)
    return y.reshape(B, 1, 2, args.fc_out)


# ------------------------------------ main --------------------------------------
if __name__ == "__main__":
    args = ARGS
    key = jax.random.PRNGKey(0)
    k_emb, k_par = jax.random.split(key)

    B = 4
    embeds = jax.random.normal(k_emb, (args.latdim, args.embed_size - 4), jnp.float32)
    x1 = jnp.array([5, 10, 42, 777], dtype=jnp.int32)      # drug indices
    x2 = jnp.array([0, 2, 1, 3], dtype=jnp.int32)          # microbe indices (+1373 offset)
    params = init_params(k_par, args)

    fwd = jax.jit(lambda a, b, e, p: inter_t_forward(a, b, e, p, args))
    out = jax.block_until_ready(fwd(x1, x2, embeds, params))

    assert out.shape == (B, 1, 2, args.fc_out), out.shape
    assert bool(jnp.all(jnp.isfinite(out)))

    ref = jax.block_until_ready(reference_forward(x1, x2, embeds, params, args))
    np.testing.assert_allclose(np.asarray(out), np.asarray(ref), rtol=5e-2, atol=5e-2)

    print("KERNEL_OK")
</pallas_src>

<mosaic_0001>
module attributes {stable_mosaic.version = 11 : i64} {
  func.func @_intert_fused_kernel(%arg0: i32, %arg1: memref<64x8xf32, #tpu.memory_space<vmem>>, %arg2: memref<8x32xf32, #tpu.memory_space<vmem>>, %arg3: memref<1x32xf32, #tpu.memory_space<vmem>>, %arg4: memref<4x32x8xf32, #tpu.memory_space<vmem>>, %arg5: memref<256x8xf32, #tpu.memory_space<vmem>>, %arg6: memref<4x32x8xf32, #tpu.memory_space<vmem>>, %arg7: memref<256x8xf32, #tpu.memory_space<vmem>>, %arg8: memref<4x32x32xf32, #tpu.memory_space<vmem>>, %arg9: memref<1x32xf32, #tpu.memory_space<vmem>>, %arg10: memref<8x32x128xf32, #tpu.memory_space<vmem>>, %arg11: memref<1x128xf32, #tpu.memory_space<vmem>>, %arg12: memref<256x256xf32, #tpu.memory_space<vmem>>, %arg13: memref<2x256xf32, #tpu.memory_space<vmem>>, %arg14: memref<8x128xf32, #tpu.memory_space<vmem>>) attributes {dimension_semantics = [#tpu.dimension_semantics<arbitrary>], iteration_bounds = array<i64: 1>, scalar_prefetch = 0 : i64, scratch_operands = 0 : i64, tpu.core_type = #tpu.core_type<tc>, window_params = [{pipeline_mode = #tpu.pipeline_mode<synchronous>, transform_indices = @transform_0, window_bounds = array<i64: 64, 8>}, {pipeline_mode = #tpu.pipeline_mode<synchronous>, transform_indices = @transform_1, window_bounds = array<i64: 8, 32>}, {pipeline_mode = #tpu.pipeline_mode<synchronous>, transform_indices = @transform_2, window_bounds = array<i64: 1, 32>}, {pipeline_mode = #tpu.pipeline_mode<synchronous>, transform_indices = @transform_3, window_bounds = array<i64: 4, 32, 8>}, {pipeline_mode = #tpu.pipeline_mode<synchronous>, transform_indices = @transform_4, window_bounds = array<i64: 256, 8>}, {pipeline_mode = #tpu.pipeline_mode<synchronous>, transform_indices = @transform_5, window_bounds = array<i64: 4, 32, 8>}, {pipeline_mode = #tpu.pipeline_mode<synchronous>, transform_indices = @transform_6, window_bounds = array<i64: 256, 8>}, {pipeline_mode = #tpu.pipeline_mode<synchronous>, transform_indices = @transform_7, window_bounds = array<i64: 4, 32, 32>}, {pipeline_mode = #tpu.pipeline_mode<synchronous>, transform_indices = @transform_8, window_bounds = array<i64: 1, 32>}, {pipeline_mode = #tpu.pipeline_mode<synchronous>, transform_indices = @transform_9, window_bounds = array<i64: 8, 32, 128>}, {pipeline_mode = #tpu.pipeline_mode<synchronous>, transform_indices = @transform_10, window_bounds = array<i64: 1, 128>}, {pipeline_mode = #tpu.pipeline_mode<synchronous>, transform_indices = @transform_11, window_bounds = array<i64: 256, 256>}, {pipeline_mode = #tpu.pipeline_mode<synchronous>, transform_indices = @transform_12, window_bounds = array<i64: 2, 256>}, {pipeline_mode = #tpu.pipeline_mode<synchronous>, transform_indices = @transform_13, window_bounds = array<i64: 8, 128>}]} {
    %c0 = arith.constant 0 : index
    %c0_0 = arith.constant 0 : index
    %0 = vector.load %arg12[%c0, %c0_0] : memref<256x256xf32, #tpu.memory_space<vmem>>, vector<256x256xf32>
    %c0_1 = arith.constant 0 : index
    %c0_2 = arith.constant 0 : index
    %1 = vector.load %arg13[%c0_1, %c0_2] : memref<2x256xf32, #tpu.memory_space<vmem>>, vector<2x256xf32>
    %c0_3 = arith.constant 0 : index
    %c0_4 = arith.constant 0 : index
    %2 = vector.load %arg5[%c0_3, %c0_4] : memref<256x8xf32, #tpu.memory_space<vmem>>, vector<256x8xf32>
    %c0_5 = arith.constant 0 : index
    %c0_6 = arith.constant 0 : index
    %3 = vector.load %arg7[%c0_5, %c0_6] : memref<256x8xf32, #tpu.memory_space<vmem>>, vector<256x8xf32>
    %c0_7 = arith.constant 0 : index
    %c0_8 = arith.constant 0 : index
    %4 = vector.load %arg9[%c0_7, %c0_8] : memref<1x32xf32, #tpu.memory_space<vmem>>, vector<1x32xf32>
    %c0_9 = arith.constant 0 : index
    %c0_10 = arith.constant 0 : index
    %5 = vector.load %arg1[%c0_9, %c0_10] : memref<64x8xf32, #tpu.memory_space<vmem>>, vector<64x8xf32>
    %c0_11 = arith.constant 0 : index
    %c0_12 = arith.constant 0 : index
    %6 = vector.load %arg2[%c0_11, %c0_12] : memref<8x32xf32, #tpu.memory_space<vmem>>, vector<8x32xf32>
    %cst = arith.constant dense<0.000000e+00> : vector<64x32xf32>
    %7 = tpu.matmul %5, %6, %cst {dimension_numbers = #tpu.dot_dimension_numbers<[1], [0], [0], [1], [0, 0, 1, 1], [], []>} : vector<64x8xf32>, vector<8x32xf32>, vector<64x32xf32> -> vector<64x32xf32>
    %c0_13 = arith.constant 0 : index
    %c0_14 = arith.constant 0 : index
    %8 = vector.load %arg3[%c0_13, %c0_14] : memref<1x32xf32, #tpu.memory_space<vmem>>, vector<1x32xf32>
    %9 = vector.broadcast %8 : vector<1x32xf32> to vector<64x32xf32>
    %10 = arith.addf %7, %9 : vector<64x32xf32>
    %c0_15 = arith.constant 0 : index
    %c0_16 = arith.constant 0 : index
    %c0_17 = arith.constant 0 : index
    %11 = vector.load %arg4[%c0_15, %c0_16, %c0_17] : memref<4x32x8xf32, #tpu.memory_space<vmem>>, vector<1x32x8xf32>
    %12 = vector.shape_cast %11 : vector<1x32x8xf32> to vector<32x8xf32>
    %cst_18 = arith.constant dense<0.000000e+00> : vector<64x8xf32>
    %13 = tpu.matmul %10, %12, %cst_18 {dimension_numbers = #tpu.dot_dimension_numbers<[1], [0], [0], [1], [0, 0, 1, 1], [], []>} : vector<64x32xf32>, vector<32x8xf32>, vector<64x8xf32> -> vector<64x8xf32>
    %c1 = arith.constant 1 : index
    %c0_19 = arith.constant 0 : index
    %c0_20 = arith.constant 0 : index
    %14 = vector.load %arg4[%c1, %c0_19, %c0_20] : memref<4x32x8xf32, #tpu.memory_space<vmem>>, vector<1x32x8xf32>
    %15 = vector.shape_cast %14 : vector<1x32x8xf32> to vector<32x8xf32>
    %cst_21 = arith.constant dense<0.000000e+00> : vector<64x8xf32>
    %16 = tpu.matmul %10, %15, %cst_21 {dimension_numbers = #tpu.dot_dimension_numbers<[1], [0], [0], [1], [0, 0, 1, 1], [], []>} : vector<64x32xf32>, vector<32x8xf32>, vector<64x8xf32> -> vector<64x8xf32>
    %c2 = arith.constant 2 : index
    %c0_22 = arith.constant 0 : index
    %c0_23 = arith.constant 0 : index
    %17 = vector.load %arg4[%c2, %c0_22, %c0_23] : memref<4x32x8xf32, #tpu.memory_space<vmem>>, vector<1x32x8xf32>
    %18 = vector.shape_cast %17 : vector<1x32x8xf32> to vector<32x8xf32>
    %cst_24 = arith.constant dense<0.000000e+00> : vector<64x8xf32>
    %19 = tpu.matmul %10, %18, %cst_24 {dimension_numbers = #tpu.dot_dimension_numbers<[1], [0], [0], [1], [0, 0, 1, 1], [], []>} : vector<64x32xf32>, vector<32x8xf32>, vector<64x8xf32> -> vector<64x8xf32>
    %c3 = arith.constant 3 : index
    %c0_25 = arith.constant 0 : index
    %c0_26 = arith.constant 0 : index
    %20 = vector.load %arg4[%c3, %c0_25, %c0_26] : memref<4x32x8xf32, #tpu.memory_space<vmem>>, vector<1x32x8xf32>
    %21 = vector.shape_cast %20 : vector<1x32x8xf32> to vector<32x8xf32>
    %cst_27 = arith.constant dense<0.000000e+00> : vector<64x8xf32>
    %22 = tpu.matmul %10, %21, %cst_27 {dimension_numbers = #tpu.dot_dimension_numbers<[1], [0], [0], [1], [0, 0, 1, 1], [], []>} : vector<64x32xf32>, vector<32x8xf32>, vector<64x8xf32> -> vector<64x8xf32>
    %23 = tpu.concatenate %13, %16, %19, %22 in 0 : vector<64x8xf32>, vector<64x8xf32>, vector<64x8xf32>, vector<64x8xf32> -> vector<256x8xf32>
    %24 = arith.addf %23, %2 : vector<256x8xf32>
    %c0_28 = arith.constant 0 : index
    %c0_29 = arith.constant 0 : index
    %c0_30 = arith.constant 0 : index
    %25 = vector.load %arg6[%c0_28, %c0_29, %c0_30] : memref<4x32x8xf32, #tpu.memory_space<vmem>>, vector<1x32x8xf32>
    %26 = vector.shape_cast %25 : vector<1x32x8xf32> to vector<32x8xf32>
    %cst_31 = arith.constant dense<0.000000e+00> : vector<64x8xf32>
    %27 = tpu.matmul %10, %26, %cst_31 {dimension_numbers = #tpu.dot_dimension_numbers<[1], [0], [0], [1], [0, 0, 1, 1], [], []>} : vector<64x32xf32>, vector<32x8xf32>, vector<64x8xf32> -> vector<64x8xf32>
    %c1_32 = arith.constant 1 : index
    %c0_33 = arith.constant 0 : index
    %c0_34 = arith.constant 0 : index
    %28 = vector.load %arg6[%c1_32, %c0_33, %c0_34] : memref<4x32x8xf32, #tpu.memory_space<vmem>>, vector<1x32x8xf32>
    %29 = vector.shape_cast %28 : vector<1x32x8xf32> to vector<32x8xf32>
    %cst_35 = arith.constant dense<0.000000e+00> : vector<64x8xf32>
    %30 = tpu.matmul %10, %29, %cst_35 {dimension_numbers = #tpu.dot_dimension_numbers<[1], [0], [0], [1], [0, 0, 1, 1], [], []>} : vector<64x32xf32>, vector<32x8xf32>, vector<64x8xf32> -> vector<64x8xf32>
    %c2_36 = arith.constant 2 : index
    %c0_37 = arith.constant 0 : index
    %c0_38 = arith.constant 0 : index
    %31 = vector.load %arg6[%c2_36, %c0_37, %c0_38] : memref<4x32x8xf32, #tpu.memory_space<vmem>>, vector<1x32x8xf32>
    %32 = vector.shape_cast %31 : vector<1x32x8xf32> to vector<32x8xf32>
    %cst_39 = arith.constant dense<0.000000e+00> : vector<64x8xf32>
    %33 = tpu.matmul %10, %32, %cst_39 {dimension_numbers = #tpu.dot_dimension_numbers<[1], [0], [0], [1], [0, 0, 1, 1], [], []>} : vector<64x32xf32>, vector<32x8xf32>, vector<64x8xf32> -> vector<64x8xf32>
    %c3_40 = arith.constant 3 : index
    %c0_41 = arith.constant 0 : index
    %c0_42 = arith.constant 0 : index
    %34 = vector.load %arg6[%c3_40, %c0_41, %c0_42] : memref<4x32x8xf32, #tpu.memory_space<vmem>>, vector<1x32x8xf32>
    %35 = vector.shape_cast %34 : vector<1x32x8xf32> to vector<32x8xf32>
    %cst_43 = arith.constant dense<0.000000e+00> : vector<64x8xf32>
    %36 = tpu.matmul %10, %35, %cst_43 {dimension_numbers = #tpu.dot_dimension_numbers<[1], [0], [0], [1], [0, 0, 1, 1], [], []>} : vector<64x32xf32>, vector<32x8xf32>, vector<64x8xf32> -> vector<64x8xf32>
    %37 = tpu.concatenate %27, %30, %33, %36 in 0 : vector<64x8xf32>, vector<64x8xf32>, vector<64x8xf32>, vector<64x8xf32> -> vector<256x8xf32>
    %38 = arith.addf %37, %3 : vector<256x8xf32>
    %c0_44 = arith.constant 0 : index
    %c0_45 = arith.constant 0 : index
    %c0_46 = arith.constant 0 : index
    %39 = vector.load %arg8[%c0_44, %c0_45, %c0_46] : memref<4x32x32xf32, #tpu.memory_space<vmem>>, vector<1x32x32xf32>
    %40 = vector.shape_cast %39 : vector<1x32x32xf32> to vector<32x32xf32>
    %cst_47 = arith.constant dense<0.000000e+00> : vector<64x32xf32>
    %41 = tpu.matmul %10, %40, %cst_47 {dimension_numbers = #tpu.dot_dimension_numbers<[1], [0], [0], [1], [0, 0, 1, 1], [], []>} : vector<64x32xf32>, vector<32x32xf32>, vector<64x32xf32> -> vector<64x32xf32>
    %c1_48 = arith.constant 1 : index
    %c0_49 = arith.constant 0 : index
    %c0_50 = arith.constant 0 : index
    %42 = vector.load %arg8[%c1_48, %c0_49, %c0_50] : memref<4x32x32xf32, #tpu.memory_space<vmem>>, vector<1x32x32xf32>
    %43 = vector.shape_cast %42 : vector<1x32x32xf32> to vector<32x32xf32>
    %cst_51 = arith.constant dense<0.000000e+00> : vector<64x32xf32>
    %44 = tpu.matmul %10, %43, %cst_51 {dimension_numbers = #tpu.dot_dimension_numbers<[1], [0], [0], [1], [0, 0, 1, 1], [], []>} : vector<64x32xf32>, vector<32x32xf32>, vector<64x32xf32> -> vector<64x32xf32>
    %c2_52 = arith.constant 2 : index
    %c0_53 = arith.constant 0 : index
    %c0_54 = arith.constant 0 : index
    %45 = vector.load %arg8[%c2_52, %c0_53, %c0_54] : memref<4x32x32xf32, #tpu.memory_space<vmem>>, vector<1x32x32xf32>
    %46 = vector.shape_cast %45 : vector<1x32x32xf32> to vector<32x32xf32>
    %cst_55 = arith.constant dense<0.000000e+00> : vector<64x32xf32>
    %47 = tpu.matmul %10, %46, %cst_55 {dimension_numbers = #tpu.dot_dimension_numbers<[1], [0], [0], [1], [0, 0, 1, 1], [], []>} : vector<64x32xf32>, vector<32x32xf32>, vector<64x32xf32> -> vector<64x32xf32>
    %c3_56 = arith.constant 3 : index
    %c0_57 = arith.constant 0 : index
    %c0_58 = arith.constant 0 : index
    %48 = vector.load %arg8[%c3_56, %c0_57, %c0_58] : memref<4x32x32xf32, #tpu.memory_space<vmem>>, vector<1x32x32xf32>
    %49 = vector.shape_cast %48 : vector<1x32x32xf32> to vector<32x32xf32>
    %cst_59 = arith.constant dense<0.000000e+00> : vector<64x32xf32>
    %50 = tpu.matmul %10, %49, %cst_59 {dimension_numbers = #tpu.dot_dimension_numbers<[1], [0], [0], [1], [0, 0, 1, 1], [], []>} : vector<64x32xf32>, vector<32x32xf32>, vector<64x32xf32> -> vector<64x32xf32>
    %51 = tpu.concatenate %41, %44, %47, %50 in 0 : vector<64x32xf32>, vector<64x32xf32>, vector<64x32xf32>, vector<64x32xf32> -> vector<256x32xf32>
    %cst_60 = arith.constant dense<0.000000e+00> : vector<256x256xf32>
    %52 = tpu.matmul %24, %38, %cst_60 {dimension_numbers = #tpu.dot_dimension_numbers<[1], [1], [0], [0], [0, 0, 1, 0], [], []>} : vector<256x8xf32>, vector<256x8xf32>, vector<256x256xf32> -> vector<256x256xf32>
    %53 = arith.addf %52, %0 : vector<256x256xf32>
    %cst_61 = arith.constant dense<0xFF800000> : vector<256xf32>
    %54 = vector.multi_reduction <maximumf>, %53, %cst_61 [1] : vector<256x256xf32> to vector<256xf32>
    %55 = vector.shape_cast %54 : vector<256xf32> to vector<256x1xf32>
    %56 = vector.broadcast %55 : vector<256x1xf32> to vector<256x256xf32>
    %57 = arith.subf %53, %56 : vector<256x256xf32>
    %58 = math.exp %57 : vector<256x256xf32>
    %cst_62 = arith.constant dense<0.000000e+00> : vector<256x2xf32>
    %59 = tpu.matmul %58, %1, %cst_62 {dimension_numbers = #tpu.dot_dimension_numbers<[1], [1], [0], [0], [0, 0, 1, 0], [], []>} : vector<256x256xf32>, vector<2x256xf32>, vector<256x2xf32> -> vector<256x2xf32>
    %60 = tpu.reciprocal %59 {approx = true} : vector<256x2xf32> -> vector<256x2xf32>
    %cst_63 = arith.constant dense<0.000000e+00> : vector<256x256xf32>
    %61 = tpu.matmul %60, %1, %cst_63 {dimension_numbers = #tpu.dot_dimension_numbers<[1], [0], [0], [1], [0, 0, 1, 1], [], []>} : vector<256x2xf32>, vector<2x256xf32>, vector<256x256xf32> -> vector<256x256xf32>
    %62 = arith.mulf %58, %61 : vector<256x256xf32>
    %cst_64 = arith.constant dense<0.000000e+00> : vector<256x32xf32>
    %63 = tpu.matmul %62, %51, %cst_64 {dimension_numbers = #tpu.dot_dimension_numbers<[1], [0], [0], [1], [0, 0, 1, 1], [], []>} : vector<256x256xf32>, vector<256x32xf32>, vector<256x32xf32> -> vector<256x32xf32>
    %64 = vector.extract_strided_slice %63 {offsets = [0, 0], sizes = [64, 32], strides = [1, 1]} : vector<256x32xf32> to vector<64x32xf32>
    %65 = vector.extract_strided_slice %63 {offsets = [64, 0], sizes = [64, 32], strides = [1, 1]} : vector<256x32xf32> to vector<64x32xf32>
    %66 = arith.addf %64, %65 : vector<64x32xf32>
    %67 = vector.extract_strided_slice %63 {offsets = [128, 0], sizes = [64, 32], strides = [1, 1]} : vector<256x32xf32> to vector<64x32xf32>
    %68 = arith.addf %66, %67 : vector<64x32xf32>
    %69 = vector.extract_strided_slice %63 {offsets = [192, 0], sizes = [64, 32], strides = [1, 1]} : vector<256x32xf32> to vector<64x32xf32>
    %70 = arith.addf %68, %69 : vector<64x32xf32>
    %71 = vector.broadcast %4 : vector<1x32xf32> to vector<64x32xf32>
    %72 = arith.addf %70, %71 : vector<64x32xf32>
    %c0_65 = arith.constant 0 : index
    %c0_66 = arith.constant 0 : index
    %c0_67 = arith.constant 0 : index
    %73 = vector.load %arg4[%c0_65, %c0_66, %c0_67] : memref<4x32x8xf32, #tpu.memory_space<vmem>>, vector<1x32x8xf32>
    %74 = vector.shape_cast %73 : vector<1x32x8xf32> to vector<32x8xf32>
    %cst_68 = arith.constant dense<0.000000e+00> : vector<64x8xf32>
    %75 = tpu.matmul %72, %74, %cst_68 {dimension_numbers = #tpu.dot_dimension_numbers<[1], [0], [0], [1], [0, 0, 1, 1], [], []>} : vector<64x32xf32>, vector<32x8xf32>, vector<64x8xf32> -> vector<64x8xf32>
    %c1_69 = arith.constant 1 : index
    %c0_70 = arith.constant 0 : index
    %c0_71 = arith.constant 0 : index
    %76 = vector.load %arg4[%c1_69, %c0_70, %c0_71] : memref<4x32x8xf32, #tpu.memory_space<vmem>>, vector<1x32x8xf32>
    %77 = vector.shape_cast %76 : vector<1x32x8xf32> to vector<32x8xf32>
    %cst_72 = arith.constant dense<0.000000e+00> : vector<64x8xf32>
    %78 = tpu.matmul %72, %77, %cst_72 {dimension_numbers = #tpu.dot_dimension_numbers<[1], [0], [0], [1], [0, 0, 1, 1], [], []>} : vector<64x32xf32>, vector<32x8xf32>, vector<64x8xf32> -> vector<64x8xf32>
    %c2_73 = arith.constant 2 : index
    %c0_74 = arith.constant 0 : index
    %c0_75 = arith.constant 0 : index
    %79 = vector.load %arg4[%c2_73, %c0_74, %c0_75] : memref<4x32x8xf32, #tpu.memory_space<vmem>>, vector<1x32x8xf32>
    %80 = vector.shape_cast %79 : vector<1x32x8xf32> to vector<32x8xf32>
    %cst_76 = arith.constant dense<0.000000e+00> : vector<64x8xf32>
    %81 = tpu.matmul %72, %80, %cst_76 {dimension_numbers = #tpu.dot_dimension_numbers<[1], [0], [0], [1], [0, 0, 1, 1], [], []>} : vector<64x32xf32>, vector<32x8xf32>, vector<64x8xf32> -> vector<64x8xf32>
    %c3_77 = arith.constant 3 : index
    %c0_78 = arith.constant 0 : index
    %c0_79 = arith.constant 0 : index
    %82 = vector.load %arg4[%c3_77, %c0_78, %c0_79] : memref<4x32x8xf32, #tpu.memory_space<vmem>>, vector<1x32x8xf32>
    %83 = vector.shape_cast %82 : vector<1x32x8xf32> to vector<32x8xf32>
    %cst_80 = arith.constant dense<0.000000e+00> : vector<64x8xf32>
    %84 = tpu.matmul %72, %83, %cst_80 {dimension_numbers = #tpu.dot_dimension_numbers<[1], [0], [0], [1], [0, 0, 1, 1], [], []>} : vector<64x32xf32>, vector<32x8xf32>, vector<64x8xf32> -> vector<64x8xf32>
    %85 = tpu.concatenate %75, %78, %81, %84 in 0 : vector<64x8xf32>, vector<64x8xf32>, vector<64x8xf32>, vector<64x8xf32> -> vector<256x8xf32>
    %86 = arith.addf %85, %2 : vector<256x8xf32>
    %c0_81 = arith.constant 0 : index
    %c0_82 = arith.constant 0 : index
    %c0_83 = arith.constant 0 : index
    %87 = vector.load %arg6[%c0_81, %c0_82, %c0_83] : memref<4x32x8xf32, #tpu.memory_space<vmem>>, vector<1x32x8xf32>
    %88 = vector.shape_cast %87 : vector<1x32x8xf32> to vector<32x8xf32>
    %cst_84 = arith.constant dense<0.000000e+00> : vector<64x8xf32>
    %89 = tpu.matmul %72, %88, %cst_84 {dimension_numbers = #tpu.dot_dimension_numbers<[1], [0], [0], [1], [0, 0, 1, 1], [], []>} : vector<64x32xf32>, vector<32x8xf32>, vector<64x8xf32> -> vector<64x8xf32>
    %c1_85 = arith.constant 1 : index
    %c0_86 = arith.constant 0 : index
    %c0_87 = arith.constant 0 : index
    %90 = vector.load %arg6[%c1_85, %c0_86, %c0_87] : memref<4x32x8xf32, #tpu.memory_space<vmem>>, vector<1x32x8xf32>
    %91 = vector.shape_cast %90 : vector<1x32x8xf32> to vector<32x8xf32>
    %cst_88 = arith.constant dense<0.000000e+00> : vector<64x8xf32>
    %92 = tpu.matmul %72, %91, %cst_88 {dimension_numbers = #tpu.dot_dimension_numbers<[1], [0], [0], [1], [0, 0, 1, 1], [], []>} : vector<64x32xf32>, vector<32x8xf32>, vector<64x8xf32> -> vector<64x8xf32>
    %c2_89 = arith.constant 2 : index
    %c0_90 = arith.constant 0 : index
    %c0_91 = arith.constant 0 : index
    %93 = vector.load %arg6[%c2_89, %c0_90, %c0_91] : memref<4x32x8xf32, #tpu.memory_space<vmem>>, vector<1x32x8xf32>
    %94 = vector.shape_cast %93 : vector<1x32x8xf32> to vector<32x8xf32>
    %cst_92 = arith.constant dense<0.000000e+00> : vector<64x8xf32>
    %95 = tpu.matmul %72, %94, %cst_92 {dimension_numbers = #tpu.dot_dimension_numbers<[1], [0], [0], [1], [0, 0, 1, 1], [], []>} : vector<64x32xf32>, vector<32x8xf32>, vector<64x8xf32> -> vector<64x8xf32>
    %c3_93 = arith.constant 3 : index
    %c0_94 = arith.constant 0 : index
    %c0_95 = arith.constant 0 : index
    %96 = vector.load %arg6[%c3_93, %c0_94, %c0_95] : memref<4x32x8xf32, #tpu.memory_space<vmem>>, vector<1x32x8xf32>
    %97 = vector.shape_cast %96 : vector<1x32x8xf32> to vector<32x8xf32>
    %cst_96 = arith.constant dense<0.000000e+00> : vector<64x8xf32>
    %98 = tpu.matmul %72, %97, %cst_96 {dimension_numbers = #tpu.dot_dimension_numbers<[1], [0], [0], [1], [0, 0, 1, 1], [], []>} : vector<64x32xf32>, vector<32x8xf32>, vector<64x8xf32> -> vector<64x8xf32>
    %99 = tpu.concatenate %89, %92, %95, %98 in 0 : vector<64x8xf32>, vector<64x8xf32>, vector<64x8xf32>, vector<64x8xf32> -> vector<256x8xf32>
    %100 = arith.addf %99, %3 : vector<256x8xf32>
    %c0_97 = arith.constant 0 : index
    %c0_98 = arith.constant 0 : index
    %c0_99 = arith.constant 0 : index
    %101 = vector.load %arg8[%c0_97, %c0_98, %c0_99] : memref<4x32x32xf32, #tpu.memory_space<vmem>>, vector<1x32x32xf32>
    %102 = vector.shape_cast %101 : vector<1x32x32xf32> to vector<32x32xf32>
    %cst_100 = arith.constant dense<0.000000e+00> : vector<64x32xf32>
    %103 = tpu.matmul %72, %102, %cst_100 {dimension_numbers = #tpu.dot_dimension_numbers<[1], [0], [0], [1], [0, 0, 1, 1], [], []>} : vector<64x32xf32>, vector<32x32xf32>, vector<64x32xf32> -> vector<64x32xf32>
    %c1_101 = arith.constant 1 : index
    %c0_102 = arith.constant 0 : index
    %c0_103 = arith.constant 0 : index
    %104 = vector.load %arg8[%c1_101, %c0_102, %c0_103] : memref<4x32x32xf32, #tpu.memory_space<vmem>>, vector<1x32x32xf32>
    %105 = vector.shape_cast %104 : vector<1x32x32xf32> to vector<32x32xf32>
    %cst_104 = arith.constant dense<0.000000e+00> : vector<64x32xf32>
    %106 = tpu.matmul %72, %105, %cst_104 {dimension_numbers = #tpu.dot_dimension_numbers<[1], [0], [0], [1], [0, 0, 1, 1], [], []>} : vector<64x32xf32>, vector<32x32xf32>, vector<64x32xf32> -> vector<64x32xf32>
    %c2_105 = arith.constant 2 : index
    %c0_106 = arith.constant 0 : index
    %c0_107 = arith.constant 0 : index
    %107 = vector.load %arg8[%c2_105, %c0_106, %c0_107] : memref<4x32x32xf32, #tpu.memory_space<vmem>>, vector<1x32x32xf32>
    %108 = vector.shape_cast %107 : vector<1x32x32xf32> to vector<32x32xf32>
    %cst_108 = arith.constant dense<0.000000e+00> : vector<64x32xf32>
    %109 = tpu.matmul %72, %108, %cst_108 {dimension_numbers = #tpu.dot_dimension_numbers<[1], [0], [0], [1], [0, 0, 1, 1], [], []>} : vector<64x32xf32>, vector<32x32xf32>, vector<64x32xf32> -> vector<64x32xf32>
    %c3_109 = arith.constant 3 : index
    %c0_110 = arith.constant 0 : index
    %c0_111 = arith.constant 0 : index
    %110 = vector.load %arg8[%c3_109, %c0_110, %c0_111] : memref<4x32x32xf32, #tpu.memory_space<vmem>>, vector<1x32x32xf32>
    %111 = vector.shape_cast %110 : vector<1x32x32xf32> to vector<32x32xf32>
    %cst_112 = arith.constant dense<0.000000e+00> : vector<64x32xf32>
    %112 = tpu.matmul %72, %111, %cst_112 {dimension_numbers = #tpu.dot_dimension_numbers<[1], [0], [0], [1], [0, 0, 1, 1], [], []>} : vector<64x32xf32>, vector<32x32xf32>, vector<64x32xf32> -> vector<64x32xf32>
    %113 = tpu.concatenate %103, %106, %109, %112 in 0 : vector<64x32xf32>, vector<64x32xf32>, vector<64x32xf32>, vector<64x32xf32> -> vector<256x32xf32>
    %cst_113 = arith.constant dense<0.000000e+00> : vector<256x256xf32>
    %114 = tpu.matmul %86, %100, %cst_113 {dimension_numbers = #tpu.dot_dimension_numbers<[1], [1], [0], [0], [0, 0, 1, 0], [], []>} : vector<256x8xf32>, vector<256x8xf32>, vector<256x256xf32> -> vector<256x256xf32>
    %115 = arith.addf %114, %0 : vector<256x256xf32>
    %cst_114 = arith.constant dense<0xFF800000> : vector<256xf32>
    %116 = vector.multi_reduction <maximumf>, %115, %cst_114 [1] : vector<256x256xf32> to vector<256xf32>
    %117 = vector.shape_cast %116 : vector<256xf32> to vector<256x1xf32>
    %118 = vector.broadcast %117 : vector<256x1xf32> to vector<256x256xf32>
    %119 = arith.subf %115, %118 : vector<256x256xf32>
    %120 = math.exp %119 : vector<256x256xf32>
    %cst_115 = arith.constant dense<0.000000e+00> : vector<256x2xf32>
    %121 = tpu.matmul %120, %1, %cst_115 {dimension_numbers = #tpu.dot_dimension_numbers<[1], [1], [0], [0], [0, 0, 1, 0], [], []>} : vector<256x256xf32>, vector<2x256xf32>, vector<256x2xf32> -> vector<256x2xf32>
    %122 = tpu.reciprocal %121 {approx = true} : vector<256x2xf32> -> vector<256x2xf32>
    %cst_116 = arith.constant dense<0.000000e+00> : vector<256x256xf32>
    %123 = tpu.matmul %122, %1, %cst_116 {dimension_numbers = #tpu.dot_dimension_numbers<[1], [0], [0], [1], [0, 0, 1, 1], [], []>} : vector<256x2xf32>, vector<2x256xf32>, vector<256x256xf32> -> vector<256x256xf32>
    %124 = arith.mulf %120, %123 : vector<256x256xf32>
    %cst_117 = arith.constant dense<0.000000e+00> : vector<256x32xf32>
    %125 = tpu.matmul %124, %113, %cst_117 {dimension_numbers = #tpu.dot_dimension_numbers<[1], [0], [0], [1], [0, 0, 1, 1], [], []>} : vector<256x256xf32>, vector<256x32xf32>, vector<256x32xf32> -> vector<256x32xf32>
    %126 = vector.extract_strided_slice %125 {offsets = [0, 0], sizes = [64, 32], strides = [1, 1]} : vector<256x32xf32> to vector<64x32xf32>
    %127 = vector.extract_strided_slice %125 {offsets = [64, 0], sizes = [64, 32], strides = [1, 1]} : vector<256x32xf32> to vector<64x32xf32>
    %128 = arith.addf %126, %127 : vector<64x32xf32>
    %129 = vector.extract_strided_slice %125 {offsets = [128, 0], sizes = [64, 32], strides = [1, 1]} : vector<256x32xf32> to vector<64x32xf32>
    %130 = arith.addf %128, %129 : vector<64x32xf32>
    %131 = vector.extract_strided_slice %125 {offsets = [192, 0], sizes = [64, 32], strides = [1, 1]} : vector<256x32xf32> to vector<64x32xf32>
    %132 = arith.addf %130, %131 : vector<64x32xf32>
    %133 = vector.broadcast %4 : vector<1x32xf32> to vector<64x32xf32>
    %134 = arith.addf %132, %133 : vector<64x32xf32>
    %cst_118 = arith.constant 0.000000e+00 : f32
    %135 = vector.broadcast %cst_118 : f32 to vector<8x128xf32>
    %c0_119 = arith.constant 0 : index
    %c0_120 = arith.constant 0 : index
    %136 = vector.load %arg11[%c0_119, %c0_120] : memref<1x128xf32, #tpu.memory_space<vmem>>, vector<1x128xf32>
    %137 = vector.broadcast %136 : vector<1x128xf32> to vector<8x128xf32>
    %138 = arith.addf %135, %137 : vector<8x128xf32>
    %139 = vector.extract_strided_slice %134 {offsets = [0, 0], sizes = [8, 32], strides = [1, 1]} : vector<64x32xf32> to vector<8x32xf32>
    %c0_121 = arith.constant 0 : index
    %c0_122 = arith.constant 0 : index
    %c0_123 = arith.constant 0 : index
    %140 = vector.load %arg10[%c0_121, %c0_122, %c0_123] : memref<8x32x128xf32, #tpu.memory_space<vmem>>, vector<1x32x128xf32>
    %141 = vector.shape_cast %140 : vector<1x32x128xf32> to vector<32x128xf32>
    %cst_124 = arith.constant dense<0.000000e+00> : vector<8x128xf32>
    %142 = tpu.matmul %139, %141, %cst_124 {dimension_numbers = #tpu.dot_dimension_numbers<[1], [0], [0], [1], [0, 0, 1, 1], [], []>} : vector<8x32xf32>, vector<32x128xf32>, vector<8x128xf32> -> vector<8x128xf32>
    %143 = arith.addf %138, %142 : vector<8x128xf32>
    %144 = vector.extract_strided_slice %134 {offsets = [8, 0], sizes = [8, 32], strides = [1, 1]} : vector<64x32xf32> to vector<8x32xf32>
    %c1_125 = arith.constant 1 : index
    %c0_126 = arith.constant 0 : index
    %c0_127 = arith.constant 0 : index
    %145 = vector.load %arg10[%c1_125, %c0_126, %c0_127] : memref<8x32x128xf32, #tpu.memory_space<vmem>>, vector<1x32x128xf32>
    %146 = vector.shape_cast %145 : vector<1x32x128xf32> to vector<32x128xf32>
    %cst_128 = arith.constant dense<0.000000e+00> : vector<8x128xf32>
    %147 = tpu.matmul %144, %146, %cst_128 {dimension_numbers = #tpu.dot_dimension_numbers<[1], [0], [0], [1], [0, 0, 1, 1], [], []>} : vector<8x32xf32>, vector<32x128xf32>, vector<8x128xf32> -> vector<8x128xf32>
    %148 = arith.addf %143, %147 : vector<8x128xf32>
    %149 = vector.extract_strided_slice %134 {offsets = [16, 0], sizes = [8, 32], strides = [1, 1]} : vector<64x32xf32> to vector<8x32xf32>
    %c2_129 = arith.constant 2 : index
    %c0_130 = arith.constant 0 : index
    %c0_131 = arith.constant 0 : index
    %150 = vector.load %arg10[%c2_129, %c0_130, %c0_131] : memref<8x32x128xf32, #tpu.memory_space<vmem>>, vector<1x32x128xf32>
    %151 = vector.shape_cast %150 : vector<1x32x128xf32> to vector<32x128xf32>
    %cst_132 = arith.constant dense<0.000000e+00> : vector<8x128xf32>
    %152 = tpu.matmul %149, %151, %cst_132 {dimension_numbers = #tpu.dot_dimension_numbers<[1], [0], [0], [1], [0, 0, 1, 1], [], []>} : vector<8x32xf32>, vector<32x128xf32>, vector<8x128xf32> -> vector<8x128xf32>
    %153 = arith.addf %148, %152 : vector<8x128xf32>
    %154 = vector.extract_strided_slice %134 {offsets = [24, 0], sizes = [8, 32], strides = [1, 1]} : vector<64x32xf32> to vector<8x32xf32>
    %c3_133 = arith.constant 3 : index
    %c0_134 = arith.constant 0 : index
    %c0_135 = arith.constant 0 : index
    %155 = vector.load %arg10[%c3_133, %c0_134, %c0_135] : memref<8x32x128xf32, #tpu.memory_space<vmem>>, vector<1x32x128xf32>
    %156 = vector.shape_cast %155 : vector<1x32x128xf32> to vector<32x128xf32>
    %cst_136 = arith.constant dense<0.000000e+00> : vector<8x128xf32>
    %157 = tpu.matmul %154, %156, %cst_136 {dimension_numbers = #tpu.dot_dimension_numbers<[1], [0], [0], [1], [0, 0, 1, 1], [], []>} : vector<8x32xf32>, vector<32x128xf32>, vector<8x128xf32> -> vector<8x128xf32>
    %158 = arith.addf %153, %157 : vector<8x128xf32>
    %159 = vector.extract_strided_slice %134 {offsets = [32, 0], sizes = [8, 32], strides = [1, 1]} : vector<64x32xf32> to vector<8x32xf32>
    %c4 = arith.constant 4 : index
    %c0_137 = arith.constant 0 : index
    %c0_138 = arith.constant 0 : index
    %160 = vector.load %arg10[%c4, %c0_137, %c0_138] : memref<8x32x128xf32, #tpu.memory_space<vmem>>, vector<1x32x128xf32>
    %161 = vector.shape_cast %160 : vector<1x32x128xf32> to vector<32x128xf32>
    %cst_139 = arith.constant dense<0.000000e+00> : vector<8x128xf32>
    %162 = tpu.matmul %159, %161, %cst_139 {dimension_numbers = #tpu.dot_dimension_numbers<[1], [0], [0], [1], [0, 0, 1, 1], [], []>} : vector<8x32xf32>, vector<32x128xf32>, vector<8x128xf32> -> vector<8x128xf32>
    %163 = arith.addf %158, %162 : vector<8x128xf32>
    %164 = vector.extract_strided_slice %134 {offsets = [40, 0], sizes = [8, 32], strides = [1, 1]} : vector<64x32xf32> to vector<8x32xf32>
    %c5 = arith.constant 5 : index
    %c0_140 = arith.constant 0 : index
    %c0_141 = arith.constant 0 : index
    %165 = vector.load %arg10[%c5, %c0_140, %c0_141] : memref<8x32x128xf32, #tpu.memory_space<vmem>>, vector<1x32x128xf32>
    %166 = vector.shape_cast %165 : vector<1x32x128xf32> to vector<32x128xf32>
    %cst_142 = arith.constant dense<0.000000e+00> : vector<8x128xf32>
    %167 = tpu.matmul %164, %166, %cst_142 {dimension_numbers = #tpu.dot_dimension_numbers<[1], [0], [0], [1], [0, 0, 1, 1], [], []>} : vector<8x32xf32>, vector<32x128xf32>, vector<8x128xf32> -> vector<8x128xf32>
    %168 = arith.addf %163, %167 : vector<8x128xf32>
    %169 = vector.extract_strided_slice %134 {offsets = [48, 0], sizes = [8, 32], strides = [1, 1]} : vector<64x32xf32> to vector<8x32xf32>
    %c6 = arith.constant 6 : index
    %c0_143 = arith.constant 0 : index
    %c0_144 = arith.constant 0 : index
    %170 = vector.load %arg10[%c6, %c0_143, %c0_144] : memref<8x32x128xf32, #tpu.memory_space<vmem>>, vector<1x32x128xf32>
    %171 = vector.shape_cast %170 : vector<1x32x128xf32> to vector<32x128xf32>
    %cst_145 = arith.constant dense<0.000000e+00> : vector<8x128xf32>
    %172 = tpu.matmul %169, %171, %cst_145 {dimension_numbers = #tpu.dot_dimension_numbers<[1], [0], [0], [1], [0, 0, 1, 1], [], []>} : vector<8x32xf32>, vector<32x128xf32>, vector<8x128xf32> -> vector<8x128xf32>
    %173 = arith.addf %168, %172 : vector<8x128xf32>
    %174 = vector.extract_strided_slice %134 {offsets = [56, 0], sizes = [8, 32], strides = [1, 1]} : vector<64x32xf32> to vector<8x32xf32>
    %c7 = arith.constant 7 : index
    %c0_146 = arith.constant 0 : index
    %c0_147 = arith.constant 0 : index
    %175 = vector.load %arg10[%c7, %c0_146, %c0_147] : memref<8x32x128xf32, #tpu.memory_space<vmem>>, vector<1x32x128xf32>
    %176 = vector.shape_cast %175 : vector<1x32x128xf32> to vector<32x128xf32>
    %cst_148 = arith.constant dense<0.000000e+00> : vector<8x128xf32>
    %177 = tpu.matmul %174, %176, %cst_148 {dimension_numbers = #tpu.dot_dimension_numbers<[1], [0], [0], [1], [0, 0, 1, 1], [], []>} : vector<8x32xf32>, vector<32x128xf32>, vector<8x128xf32> -> vector<8x128xf32>
    %178 = arith.addf %173, %177 : vector<8x128xf32>
    %cst_149 = arith.constant 0.000000e+00 : f32
    %179 = vector.broadcast %cst_149 : f32 to vector<8x128xf32>
    %180 = arith.cmpf oge, %178, %179 : vector<8x128xf32>
    %cst_150 = arith.constant 0.00999999977 : f32
    %181 = vector.broadcast %cst_150 : f32 to vector<8x128xf32>
    %182 = arith.mulf %181, %178 : vector<8x128xf32>
    %183 = arith.select %180, %178, %182 : vector<8x128xi1>, vector<8x128xf32>
    %c0_151 = arith.constant 0 : index
    %c0_152 = arith.constant 0 : index
    %184 = vector.load %arg14[%c0_151, %c0_152] : memref<8x128xf32, #tpu.memory_space<vmem>>, vector<8x128xf32>
    tpu.vector_store %arg14[%c0_151, %c0_152], %183 {strides = array<i32>} : memref<8x128xf32, #tpu.memory_space<vmem>>, vector<8x128xf32>,
    return
  }
  func.func @transform_0(%arg0: i32) -> (i32, i32) {
    %c0_i32 = arith.constant 0 : i32
    %c0_i32_0 = arith.constant 0 : i32
    %c0_i32_1 = arith.constant 0 : i32
    return %c0_i32, %c0_i32_0 : i32, i32
  }
  func.func @transform_1(%arg0: i32) -> (i32, i32) {
    %c0_i32 = arith.constant 0 : i32
    %c0_i32_0 = arith.constant 0 : i32
    %c0_i32_1 = arith.constant 0 : i32
    return %c0_i32, %c0_i32_0 : i32, i32
  }
  func.func @transform_2(%arg0: i32) -> (i32, i32) {
    %c0_i32 = arith.constant 0 : i32
    %c0_i32_0 = arith.constant 0 : i32
    %c0_i32_1 = arith.constant 0 : i32
    return %c0_i32, %c0_i32_0 : i32, i32
  }
  func.func @transform_3(%arg0: i32) -> (i32, i32, i32) {
    %c0_i32 = arith.constant 0 : i32
    %c0_i32_0 = arith.constant 0 : i32
    %c0_i32_1 = arith.constant 0 : i32
    %c0_i32_2 = arith.constant 0 : i32
    return %c0_i32, %c0_i32_0, %c0_i32_1 : i32, i32, i32
  }
  func.func @transform_4(%arg0: i32) -> (i32, i32) {
    %c0_i32 = arith.constant 0 : i32
    %c0_i32_0 = arith.constant 0 : i32
    %c0_i32_1 = arith.constant 0 : i32
    return %c0_i32, %c0_i32_0 : i32, i32
  }
  func.func @transform_5(%arg0: i32) -> (i32, i32, i32) {
    %c0_i32 = arith.constant 0 : i32
    %c0_i32_0 = arith.constant 0 : i32
    %c0_i32_1 = arith.constant 0 : i32
    %c0_i32_2 = arith.constant 0 : i32
    return %c0_i32, %c0_i32_0, %c0_i32_1 : i32, i32, i32
  }
  func.func @transform_6(%arg0: i32) -> (i32, i32) {
    %c0_i32 = arith.constant 0 : i32
    %c0_i32_0 = arith.constant 0 : i32
    %c0_i32_1 = arith.constant 0 : i32
    return %c0_i32, %c0_i32_0 : i32, i32
  }
  func.func @transform_7(%arg0: i32) -> (i32, i32, i32) {
    %c0_i32 = arith.constant 0 : i32
    %c0_i32_0 = arith.constant 0 : i32
    %c0_i32_1 = arith.constant 0 : i32
    %c0_i32_2 = arith.constant 0 : i32
    return %c0_i32, %c0_i32_0, %c0_i32_1 : i32, i32, i32
  }
  func.func @transform_8(%arg0: i32) -> (i32, i32) {
    %c0_i32 = arith.constant 0 : i32
    %c0_i32_0 = arith.constant 0 : i32
    %c0_i32_1 = arith.constant 0 : i32
    return %c0_i32, %c0_i32_0 : i32, i32
  }
  func.func @transform_9(%arg0: i32) -> (i32, i32, i32) {
    %c0_i32 = arith.constant 0 : i32
    %c0_i32_0 = arith.constant 0 : i32
    %c0_i32_1 = arith.constant 0 : i32
    %c0_i32_2 = arith.constant 0 : i32
    return %c0_i32, %c0_i32_0, %c0_i32_1 : i32, i32, i32
  }
  func.func @transform_10(%arg0: i32) -> (i32, i32) {
    %c0_i32 = arith.constant 0 : i32
    %c0_i32_0 = arith.constant 0 : i32
    %c0_i32_1 = arith.constant 0 : i32
    return %c0_i32, %c0_i32_0 : i32, i32
  }
  func.func @transform_11(%arg0: i32) -> (i32, i32) {
    %c0_i32 = arith.constant 0 : i32
    %c0_i32_0 = arith.constant 0 : i32
    %c0_i32_1 = arith.constant 0 : i32
    return %c0_i32, %c0_i32_0 : i32, i32
  }
  func.func @transform_12(%arg0: i32) -> (i32, i32) {
    %c0_i32 = arith.constant 0 : i32
    %c0_i32_0 = arith.constant 0 : i32
    %c0_i32_1 = arith.constant 0 : i32
    return %c0_i32, %c0_i32_0 : i32, i32
  }
  func.func @transform_13(%arg0: i32) -> (i32, i32) {
    %c0_i32 = arith.constant 0 : i32
    %c0_i32_0 = arith.constant 0 : i32
    %c0_i32_1 = arith.constant 0 : i32
    return %c0_i32, %c0_i32_0 : i32, i32
  }
}

</mosaic_0001>

<bundles_post_ra>
// kernel: _lambda_.1
= control target key start
LH: loop header
LB: loop body
LE: loop exit
PB: predicated region body
PF: predicated region fallthrough
CT: control target
= control target key end

     0   :  { %vm191_vm0 = vcmask 64512   ;;  %s13447_s0 = inlined_call_operand.vmem [shape: f32[64,8], index: 0, kind: input, shape index: {}]   ;;  %s13448_s1 = inlined_call_operand.vmem [shape: f32[8,32], index: 1, kind: input, shape index: {}]   ;;  %s13449_s2 = inlined_call_operand.vmem [shape: f32[1,32], index: 2, kind: input, shape index: {}]   ;;  %s13450_s3 = inlined_call_operand.vmem [shape: f32[4,32,8], index: 3, kind: input, shape index: {}]   ;;  %s13451_s4 = inlined_call_operand.vmem [shape: f32[256,8], index: 4, kind: input, shape index: {}]   ;;  %s13452_s5 = inlined_call_operand.vmem [shape: f32[4,32,8], index: 5, kind: input, shape index: {}]   ;;  %s13453_s6 = inlined_call_operand.vmem [shape: f32[256,8], index: 6, kind: input, shape index: {}]   ;;  %s13454_s7 = inlined_call_operand.vmem [shape: f32[4,32,32], index: 7, kind: input, shape index: {}]   ;;  %s13455_s8 = inlined_call_operand.vmem [shape: f32[1,32], index: 8, kind: input, shape index: {}]   ;;  %s13456_s9 = inlined_call_operand.vmem [shape: f32[8,32,128], index: 9, kind: input, shape index: {}]   ;;  %s13457_s10 = inlined_call_operand.vmem [shape: f32[1,128], index: 10, kind: input, shape index: {}]   ;;  %s13458_s11 = inlined_call_operand.vmem [shape: f32[256,256], index: 11, kind: input, shape index: {}]   ;;  %s13459_s12 = inlined_call_operand.vmem [shape: f32[2,256], index: 12, kind: input, shape index: {}]   ;;  %s13460_s13 = inlined_call_operand.hbm [shape: f32[8,128], index: 13, kind: output, shape index: {}]  }
   0x1   :  { %v183_v0 = vld [vmem:[%s13448_s1] sm:$0xff]  ;;  %v176_v2 = vld [vmem:[%s13447_s0 + $0x8] sm:$0xff]  ;;  %v177_v3 = vld [vmem:[%s13447_s0 + $0x10] sm:$0xff] }
   0x2   :  { %v175_v1 = vld [vmem:[%s13447_s0] sm:$0xff]  ;;  %8092 = vmatprep.subr.mxu0 %v183_v0  ;;  %v322_v5 = vld [vmem:[%s13450_s3 + $0x8] sm:$0xff] }
   0x3   :  { %8094 = vmatprep.mubr.msk.f32.mxu0 %vm191_vm0, %v175_v1  ;;  %8093 = vmatpush3.msra.mxu0 %v183_v0  ;;  %v321_v4 = vld [vmem:[%s13450_s3] sm:$0xff] }
   0x4   :  { %8095 = vmatmul.mubr.msk.f32.vlgmr.msra.gmra.mrb[0].mxu0 %vm191_vm0, %v176_v2 }
   0x5   :  { %18 = vsyncpa [#allocation3], 0  ;;  %8097 = vmatprep.mubr.msk.f32.mxu0 %vm191_vm0, %v177_v3  ;;  %v178_v6 = vld [vmem:[%s13447_s0 + $0x18] sm:$0xff]  ;;  %v9766_v7 = vpack.c.bf16 %v322_v5, %v321_v4  ;;  %v179_v8 = vld [vmem:[%s13447_s0 + $0x20] sm:$0xff]  ;;  %vm325_vm1 = vcmask 261120   ;;  %vm2829_vm3 = vcmask 1041408  }
   0x6   :  { %v180_v9 = vld [vmem:[%s13447_s0 + $0x28] sm:$0xff]  ;;  %v181_v10 = vld [vmem:[%s13447_s0 + $0x30] sm:$0xff]  ;;  %v182_v11 = vld [vmem:[%s13447_s0 + $0x38] sm:$0xff]  ;;  %vm2732_vm4 = vcmask 15360   ;;  %vm9670_vm5 = vmmov 0  }
   0x7   :  { %13573 = vst [vmem:[#allocation5_spill] sm:$0xff] %v9766_v7  ;;  %8675 = vmatprep.subr.bf16.mxu0 %v9766_v7  ;;  %9106 = vmatprep.subr.bf16.mxu1 %v9766_v7  ;;  %v323_v12 = vld [vmem:[%s13450_s3 + $0x10] sm:$0xff]  ;;  %v324_v13 = vld [vmem:[%s13450_s3 + $0x18] sm:$0xff]  ;;  %v7108_v15 = vld [vmem:[%s13450_s3 + $0x20] sm:$0xff] }
   0x8   :  { %8098 = vmatmul.mubr.msk.f32.gmra.mrb[2].mxu0 %vm191_vm0, %v178_v6  ;;  %9108 = vmatpush3.bf16.msra.mxu1 %v9766_v7  ;;  %v9795_v14 = vpack.c.bf16 %v324_v13, %v323_v12  ;;  %v7109_v16 = vld [vmem:[%s13450_s3 + $0x28] sm:$0xff]  ;;  %v7120_v18 = vld [vmem:[%s13450_s3 + $0x40] sm:$0xff]  ;;  %v7110_v23 = vld [vmem:[%s13450_s3 + $0x30] sm:$0xff] }
   0x9   :  { %8100 = vmatprep.mubr.msk.f32.mxu0 %vm191_vm0, %v179_v8  ;;  %8677 = vmatpush3.bf16.msra.mxu0 %v9766_v7  ;;  %v9807_v17 = vpack.c.bf16 %v7109_v16, %v7108_v15  ;;  %v7121_v19 = vld [vmem:[%s13450_s3 + $0x48] sm:$0xff]  ;;  %v7091_v21 = vld [vmem:[%s13449_s2] ss:$0 sm:$0xff]  ;;  %v7111_v24 = vld [vmem:[%s13450_s3 + $0x38] sm:$0xff] }
   0xa   :  { %13574 = vst [vmem:[#allocation6_spill] sm:$0xff] %v9795_v14  ;;  %8679 = vmatprep.subr.bf16.mxu0 %v9795_v14  ;;  %9107 = vmatprep.subr.bf16.mxu1 %v9795_v14  ;;  %v9816_v20 = vpack.c.bf16 %v7121_v19, %v7120_v18  ;;  %v9832_v28 = vpack.c.bf16 %v7111_v24, %v7110_v23  ;;  %v7132_v30 = vld [vmem:[%s13450_s3 + $0x60] sm:$0xff]  ;;  %v7133_v31 = vld [vmem:[%s13450_s3 + $0x68] sm:$0xff]  ;;  %v7122_v37 = vld [vmem:[%s13450_s3 + $0x50] sm:$0xff] }
   0xb   :  { %13575 = vst [vmem:[#allocation7_spill] sm:$0xff] %v9807_v17  ;;  %v9850_v35 = vpack.c.bf16 %v7133_v31, %v7132_v30  ;;  %v7123_v38 = vld [vmem:[%s13450_s3 + $0x58] sm:$0xff]  ;;  %v7134_v40 = vld [vmem:[%s13450_s3 + $0x70] sm:$0xff]  ;;  %v817_v46 = vld [vmem:[%s13452_s5] sm:$0xff] }
   0xc   :  { %8101 = vmatmul.mubr.msk.f32.gmra.mrb[4].mxu0 %vm191_vm0, %v180_v9  ;;  %9109 = vmatpush3.bf16.msra.mxu1 %v9795_v14  ;;  %13576 = vst [vmem:[#allocation8_spill] sm:$0xff] %v9816_v20  ;;  %13577 = vst [vmem:[#allocation9_spill] sm:$0xff] %v9832_v28  ;;  %v7135_v41 = vld [vmem:[%s13450_s3 + $0x78] sm:$0xff]  ;;  %v9875_v44 = vpack.c.bf16 %v7123_v38, %v7122_v37  ;;  %v818_v47 = vld [vmem:[%s13452_s5 + $0x8] sm:$0xff] }
   0xd   :  { %8103 = vmatprep.mubr.msk.f32.mxu0 %vm191_vm0, %v181_v10  ;;  %8681 = vmatpush3.bf16.msra.mxu0 %v9795_v14  ;;  %13578 = vst [vmem:[#allocation10_spill] sm:$0xff] %v9850_v35  ;;  %v9886_v48 = vpack.c.bf16 %v7135_v41, %v7134_v40  ;;  %v9900_v52 = vpack.c.bf16 %v818_v47, %v817_v46  ;;  %v819_v53 = vld [vmem:[%s13452_s5 + $0x10] sm:$0xff]  ;;  %v820_v54 = vld [vmem:[%s13452_s5 + $0x18] sm:$0xff]  ;;  %v7152_v55 = vld [vmem:[%s13452_s5 + $0x20] sm:$0xff] }
   0xe   :  { %8683 = vmatprep.subr.bf16.mxu0 %v9807_v17  ;;  %8691 = vmatprep.subr.bf16.mxu1 %v9816_v20  ;;  %13579 = vst [vmem:[#allocation11_spill] sm:$0xff] %v9875_v44  ;;  %v7153_v56 = vld [vmem:[%s13452_s5 + $0x28] sm:$0xff]  ;;  %v9928_v57 = vpack.c.bf16 %v820_v54, %v819_v53  ;;  %v7164_v59 = vld [vmem:[%s13452_s5 + $0x40] sm:$0xff]  ;;  %v7154_v62 = vld [vmem:[%s13452_s5 + $0x30] sm:$0xff] }
   0xf   :  { %13580 = vst [vmem:[#allocation12_spill] sm:$0xff] %v9886_v48  ;;  %13581 = vst [vmem:[#allocation13_spill] sm:$0xff] %v9900_v52  ;;  %v9931_v58 = vpack.c.bf16 %v7153_v56, %v7152_v55  ;;  %v7165_v60 = vld [vmem:[%s13452_s5 + $0x48] sm:$0xff]  ;;  %v7155_v63 = vld [vmem:[%s13452_s5 + $0x38] sm:$0xff] }
  0x10   :  { %8104 = vmatmul.mubr.msk.f32.gmra.mrb[6].mxu0 %vm191_vm0, %v182_v11  ;;  %13582 = vst [vmem:[#allocation14_spill] sm:$0xff] %v9928_v57  ;;  %v9949_v61 = vpack.c.bf16 %v7165_v60, %v7164_v59  ;;  %v9968_v0 = vpack.c.bf16 %v7155_v63, %v7154_v62  ;;  %v7176_v1 = vld [vmem:[%s13452_s5 + $0x60] sm:$0xff]  ;;  %v7177_v2 = vld [vmem:[%s13452_s5 + $0x68] sm:$0xff]  ;;  %v7166_v3 = vld [vmem:[%s13452_s5 + $0x50] sm:$0xff] }
  0x11   :  { %13583 = vst [vmem:[#allocation15_spill] sm:$0xff] %v9931_v58  ;;  %v7167_v4 = vld [vmem:[%s13452_s5 + $0x58] sm:$0xff]  ;;  %v9992_v5 = vpack.c.bf16 %v7177_v2, %v7176_v1  ;;  %v1288_v8 = vld [vmem:[%s13454_s7] sm:$0xff]  ;;  %v1289_v9 = vld [vmem:[%s13454_s7 + $0x8] sm:$0xff] }
  0x12   :  { %13584 = vst [vmem:[#allocation16_spill] sm:$0xff] %v9949_v61  ;;  %13585 = vst [vmem:[#allocation17_spill] sm:$0xff] %v9968_v0  ;;  %v10003_v6 = vpack.c.bf16 %v7167_v4, %v7166_v3  ;;  %v10022_v10 = vpack.c.bf16 %v1289_v9, %v1288_v8  ;;  %v7178_v11 = vld [vmem:[%s13452_s5 + $0x70] sm:$0xff]  ;;  %v7179_v12 = vld [vmem:[%s13452_s5 + $0x78] sm:$0xff] }
  0x13   :  { %13586 = vst [vmem:[#allocation18_spill] sm:$0xff] %v9992_v5  ;;  %v10039_v13 = vpack.c.bf16 %v7179_v12, %v7178_v11  ;;  %v7196_v15 = vld [vmem:[%s13454_s7 + $0x20] sm:$0xff]  ;;  %v7197_v16 = vld [vmem:[%s13454_s7 + $0x28] sm:$0xff]  ;;  %v1290_v19 = vld [vmem:[%s13454_s7 + $0x10] sm:$0xff] }
  0x14   :  { %13587 = vst [vmem:[#allocation19_spill] sm:$0xff] %v10003_v6  ;;  %13588 = vst [vmem:[#allocation20_spill] sm:$0xff] %v10022_v10  ;;  %v10058_v18 = vpack.c.bf16 %v7197_v16, %v7196_v15  ;;  %v7208_v23 = vld [vmem:[%s13454_s7 + $0x40] sm:$0xff]  ;;  %v7209_v24 = vld [vmem:[%s13454_s7 + $0x48] sm:$0xff] }
  0x15   :  { %13589 = vst [vmem:[#allocation21_spill] sm:$0xff] %v10039_v13  ;;  %v7199_v30 = vld [vmem:[%s13454_s7 + $0x38] sm:$0xff]  ;;  %v7210_v38 = vld [vmem:[%s13454_s7 + $0x50] sm:$0xff]  ;;  %vm10403_vm2 = vmpackc.low %vm191_vm0, %vm191_vm0 }
  0x16   :  { %13590 = vst [vmem:[#allocation22_spill] sm:$0xff] %v10058_v18  ;;  %v7222_v41 = vld [vmem:[%s13454_s7 + $0x70] sm:$0xff] }
  0xd7   :  { %v8096_v22 = vpop.f32.mrb[0].mxu0 }
  0xd8   :  { %v282_v25 = vpop.f32.mrb[1].mxu0  ;;  %v9830_v27 = vadd.f32 %v8096_v22, %v7091_v21 }
  0xd9   :  { %v9828_v26 = vadd.f32 %v7091_v21, %v282_v25  ;;  %v10094_v25 = vpack.c.bf16 %v7209_v24, %v7208_v23  ;;  %v143_v23 = vld [vmem:[%s13453_s6 + $0x8] sm:$0xff]  ;;  %v142_v24 = vld [vmem:[%s13453_s6] sm:$0xff] }
  0xdb   :  { %v8099_v29 = vpop.f32.mrb[2].mxu0  ;;  %8114 = vmatprep.mubr.msk.f32.mxu0 %vm325_vm1, %v9828_v26  ;;  %13592 = vst [vmem:[#allocation24_spill] sm:$0xff] %v10094_v25 }
  0xdc   :  { %v292_v32 = vpop.f32.mrb[3].mxu0  ;;  %8115 = vmatmul.mubr.msk.f32.vlgmr.msra.gmra.mrb[8].mxu0 %vm325_vm1, %v9830_v27  ;;  %v9847_v34 = vadd.f32 %v8099_v29, %v7091_v21  ;;  %v7198_v29 = vld [vmem:[%s13454_s7 + $0x30] sm:$0xff] }
  0xdd   :  { %v9844_v33 = vadd.f32 %v7091_v21, %v292_v32  ;;  %8685 = vmatpush3.bf16.msra.mxu0 %v9807_v17  ;;  %v10111_v31 = vpack.c.bf16 %v7199_v30, %v7198_v29  ;;  %v7220_v32 = vld [vmem:[%s13454_s7 + $0x60] sm:$0xff] }
  0xde   :  { %8687 = vmatprep.subr.bf16.mxu0 %v9832_v28 }
  0xdf   :  { %v8102_v36 = vpop.f32.mrb[4].mxu0  ;;  %8117 = vmatprep.mubr.msk.f32.mxu0 %vm325_vm1, %v9844_v33  ;;  %13593 = vst [vmem:[#allocation25_spill] sm:$0xff] %v10111_v31 }
  0xe0   :  { %v302_v39 = vpop.f32.mrb[5].mxu0  ;;  %8118 = vmatmul.mubr.msk.f32.gmra.mrb[10].mxu0 %vm325_vm1, %v9847_v34  ;;  %v9873_v43 = vadd.f32 %v8102_v36, %v7091_v21  ;;  %v7221_v36 = vld [vmem:[%s13454_s7 + $0x68] sm:$0xff] }
  0xe1   :  { %v9868_v42 = vadd.f32 %v7091_v21, %v302_v39  ;;  %8689 = vmatpush3.bf16.msra.mxu0 %v9832_v28  ;;  %8134 = vmatprep.mubr.msk.f32.mxu0 %vm325_vm1, %v9828_v26  ;;  %v10130_v37 = vpack.c.bf16 %v7221_v36, %v7220_v32  ;;  %v7211_v39 = vld [vmem:[%s13454_s7 + $0x58] sm:$0xff] }
  0xe2   :  { %8699 = vmatprep.subr.bf16.mxu0 %v9850_v35  ;;  %v10147_v40 = vpack.c.bf16 %v7211_v39, %v7210_v38 }
  0xe3   :  { %v8105_v45 = vpop.f32.mrb[6].mxu0  ;;  %8120 = vmatprep.mubr.msk.f32.mxu1 %vm325_vm1, %v9868_v42  ;;  %13594 = vst [vmem:[#allocation26_spill] sm:$0xff] %v10130_v37 }
  0xe4   :  { %v312_v49 = vpop.f32.mrb[7].mxu0  ;;  %8121 = vmatmul.mubr.msk.f32.vlgmr.msra.gmra.mrb[0].mxu1 %vm325_vm1, %v9873_v43  ;;  %8135 = vmatmul.mubr.msk.f32.vlgmr.msra.gmra.mrb[12].mxu0 %vm325_vm1, %v9830_v27  ;;  %v9897_v51 = vadd.f32 %v8105_v45, %v7091_v21  ;;  %13595 = vst [vmem:[#allocation27_spill] sm:$0xff] %v10147_v40  ;;  %v7223_v45 = vld [vmem:[%s13454_s7 + $0x78] sm:$0xff] }
  0xe5   :  { %v9892_v50 = vadd.f32 %v7091_v21, %v312_v49  ;;  %8693 = vmatpush3.bf16.msra.mxu1 %v9816_v20  ;;  %8137 = vmatprep.mubr.msk.f32.mxu0 %vm325_vm1, %v9844_v33  ;;  %v1291_v21 = vld [vmem:[%s13454_s7 + $0x18] sm:$0xff]  ;;  %v10175_v46 = vpack.c.bf16 %v7223_v45, %v7222_v41  ;;  %v144_v45 = vld [vmem:[%s13453_s6 + $0x10] sm:$0xff] }
  0xe6   :  { %8695 = vmatprep.subr.bf16.mxu1 %v9875_v44  ;;  %8701 = vmatpush3.bf16.msra.mxu0 %v9850_v35  ;;  %v10075_v22 = vpack.c.bf16 %v1291_v21, %v1290_v19  ;;  %v145_v41 = vld [vmem:[%s13453_s6 + $0x18] sm:$0xff] }
  0xe7   :  { %8123 = vmatprep.mubr.msk.f32.mxu1 %vm325_vm1, %v9892_v50  ;;  %8703 = vmatprep.subr.bf16.mxu0 %v9886_v48  ;;  %13596 = vst [vmem:[#allocation28_spill] sm:$0xff] %v10175_v46 }
  0xe8   :  { %8124 = vmatmul.mubr.msk.f32.gmra.mrb[2].mxu1 %vm325_vm1, %v9897_v51  ;;  %8138 = vmatmul.mubr.msk.f32.gmra.mrb[14].mxu0 %vm325_vm1, %v9847_v34  ;;  %13591 = vst [vmem:[#allocation23_spill] sm:$0xff] %v10075_v22 }
  0xe9   :  { %8697 = vmatpush3.bf16.msra.mxu1 %v9875_v44  ;;  %8140 = vmatprep.mubr.msk.f32.mxu0 %vm325_vm1, %v9868_v42 }
  0xea   :  { %8154 = vmatprep.mubr.msk.f32.mxu1 %vm325_vm1, %v9828_v26  ;;  %8707 = vmatprep.subr.bf16.mxu1 %v9900_v52 }
  0xeb   :  { %8705 = vmatpush3.bf16.msra.mxu0 %v9886_v48 }
  0xec   :  { %8141 = vmatmul.mubr.msk.f32.gmra.mrb[16].mxu0 %vm325_vm1, %v9873_v43  ;;  %8155 = vmatmul.mubr.msk.f32.vlgmr.msra.gmra.mrb[4].mxu1 %vm325_vm1, %v9830_v27 }
  0xed   :  { %8709 = vmatpush3.bf16.msra.mxu1 %v9900_v52  ;;  %8143 = vmatprep.mubr.msk.f32.mxu0 %vm325_vm1, %v9892_v50 }
  0xee   :  { %8157 = vmatprep.mubr.msk.f32.mxu1 %vm325_vm1, %v9844_v33  ;;  %8711 = vmatprep.subr.bf16.mxu1 %v9928_v57 }
  0xef   :  { %8715 = vmatprep.subr.bf16.mxu0 %v9931_v58 }
  0xf0   :  { %8144 = vmatmul.mubr.msk.f32.gmra.mrb[18].mxu0 %vm325_vm1, %v9897_v51  ;;  %8158 = vmatmul.mubr.msk.f32.gmra.mrb[6].mxu1 %vm325_vm1, %v9847_v34 }
  0xf1   :  { %8160 = vmatprep.mubr.msk.f32.mxu1 %vm325_vm1, %v9868_v42  ;;  %8174 = vmatprep.mubr.msk.f32.mxu0 %vm325_vm1, %v9828_v26 }
  0xf2   :  { %8713 = vmatpush3.bf16.msra.mxu1 %v9928_v57  ;;  %v149_v57 = vld [vmem:[%s13453_s6 + $0x38] sm:$0xff] }
  0xf3   :  { %8723 = vmatprep.subr.bf16.mxu1 %v9949_v61 }
  0xf4   :  { %8161 = vmatmul.mubr.msk.f32.gmra.mrb[8].mxu1 %vm325_vm1, %v9873_v43  ;;  %8175 = vmatmul.mubr.msk.f32.vlgmr.msra.gmra.mrb[20].mxu0 %vm325_vm1, %v9830_v27 }
  0xf5   :  { %8163 = vmatprep.mubr.msk.f32.mxu1 %vm325_vm1, %v9892_v50  ;;  %8177 = vmatprep.mubr.msk.f32.mxu0 %vm325_vm1, %v9844_v33 }
  0xf6   :  { %8717 = vmatpush3.bf16.msra.mxu0 %v9931_v58  ;;  %v157_v58 = vld [vmem:[%s13453_s6 + $0x78] sm:$0xff] }
  0xf7   :  { %8719 = vmatprep.subr.bf16.mxu0 %v9968_v0 }
  0xf8   :  { %8164 = vmatmul.mubr.msk.f32.gmra.mrb[10].mxu1 %vm325_vm1, %v9897_v51  ;;  %8178 = vmatmul.mubr.msk.f32.gmra.mrb[22].mxu0 %vm325_vm1, %v9847_v34 }
  0xf9   :  { %8180 = vmatprep.mubr.msk.f32.mxu0 %vm325_vm1, %v9868_v42  ;;  %8194 = vmatprep.mubr.msk.f32.mxu1 %vm325_vm1, %v9828_v26 }
  0xfa   :  { %8721 = vmatpush3.bf16.msra.mxu0 %v9968_v0 }
  0xfb   :  { %8731 = vmatprep.subr.bf16.mxu0 %v9992_v5 }
  0xfc   :  { %8181 = vmatmul.mubr.msk.f32.gmra.mrb[24].mxu0 %vm325_vm1, %v9873_v43  ;;  %8195 = vmatmul.mubr.msk.f32.vlgmr.msra.gmra.mrb[12].mxu1 %vm325_vm1, %v9830_v27 }
  0xfd   :  { %8725 = vmatpush3.bf16.msra.mxu1 %v9949_v61  ;;  %8183 = vmatprep.mubr.msk.f32.mxu0 %vm325_vm1, %v9892_v50 }
  0xfe   :  { %8197 = vmatprep.mubr.msk.f32.mxu1 %vm325_vm1, %v9844_v33  ;;  %8727 = vmatprep.subr.bf16.mxu1 %v10003_v6 }
 0x100   :  { %8184 = vmatmul.mubr.msk.f32.gmra.mrb[26].mxu0 %vm325_vm1, %v9897_v51  ;;  %8198 = vmatmul.mubr.msk.f32.gmra.mrb[14].mxu1 %vm325_vm1, %v9847_v34 }
 0x101   :  { %8200 = vmatprep.mubr.msk.f32.mxu1 %vm325_vm1, %v9868_v42  ;;  %8214 = vmatprep.mubr.msk.f32.mxu0 %vm325_vm1, %v9828_v26 }
 0x102   :  { %8729 = vmatpush3.bf16.msra.mxu1 %v10003_v6 }
 0x103   :  { %8739 = vmatprep.subr.bf16.mxu1 %v10022_v10 }
 0x104   :  { %8201 = vmatmul.mubr.msk.f32.gmra.mrb[16].mxu1 %vm325_vm1, %v9873_v43  ;;  %8215 = vmatmul.mubr.msk.f32.vlgmr.msra.gmra.mrb[28].mxu0 %vm325_vm1, %v9830_v27 }
 0x105   :  { %8203 = vmatprep.mubr.msk.f32.mxu1 %vm325_vm1, %v9892_v50  ;;  %8217 = vmatprep.mubr.msk.f32.mxu0 %vm325_vm1, %v9844_v33 }
 0x106   :  { %8733 = vmatpush3.bf16.msra.mxu0 %v9992_v5  ;;  %v155_v5 = vld [vmem:[%s13453_s6 + $0x68] sm:$0xff] }
 0x107   :  { %8735 = vmatprep.subr.bf16.mxu0 %v10039_v13 }
 0x108   :  { %8204 = vmatmul.mubr.msk.f32.gmra.mrb[18].mxu1 %vm325_vm1, %v9897_v51  ;;  %8218 = vmatmul.mubr.msk.f32.gmra.mrb[30].mxu0 %vm325_vm1, %v9847_v34 }
 0x109   :  { %8220 = vmatprep.mubr.msk.f32.mxu0 %vm325_vm1, %v9868_v42  ;;  %8234 = vmatprep.mubr.msk.f32.mxu1 %vm325_vm1, %v9828_v26 }
 0x10a   :  { %8737 = vmatpush3.bf16.msra.mxu0 %v10039_v13 }
 0x10b   :  { %8747 = vmatprep.subr.bf16.mxu0 %v10058_v18 }
 0x10c   :  { %8221 = vmatmul.mubr.msk.f32.gmra.mrb[32].mxu0 %vm325_vm1, %v9873_v43  ;;  %8235 = vmatmul.mubr.msk.f32.vlgmr.msra.gmra.mrb[20].mxu1 %vm325_vm1, %v9830_v27 }
 0x10d   :  { %8223 = vmatprep.mubr.msk.f32.mxu0 %vm325_vm1, %v9892_v50  ;;  %8237 = vmatprep.mubr.msk.f32.mxu1 %vm325_vm1, %v9844_v33 }
 0x10e   :  { %8741 = vmatpush3.bf16.msra.mxu1 %v10022_v10 }
 0x10f   :  { %8743 = vmatprep.subr.bf16.mxu1 %v10075_v22 }
 0x110   :  { %8224 = vmatmul.mubr.msk.f32.gmra.mrb[34].mxu0 %vm325_vm1, %v9897_v51  ;;  %8238 = vmatmul.mubr.msk.f32.gmra.mrb[22].mxu1 %vm325_vm1, %v9847_v34 }
 0x111   :  { %8240 = vmatprep.mubr.msk.f32.mxu1 %vm325_vm1, %v9868_v42  ;;  %8254 = vmatprep.mubr.msk.f32.mxu0 %vm325_vm1, %v9828_v26 }
 0x112   :  { %8745 = vmatpush3.bf16.msra.mxu1 %v10075_v22  ;;  %v151_v22 = vld [vmem:[%s13453_s6 + $0x48] sm:$0xff] }
 0x113   :  { %8755 = vmatprep.subr.bf16.mxu1 %v10094_v25 }
 0x114   :  { %8241 = vmatmul.mubr.msk.f32.gmra.mrb[24].mxu1 %vm325_vm1, %v9873_v43  ;;  %8255 = vmatmul.mubr.msk.f32.vlgmr.msra.gmra.mrb[36].mxu0 %vm325_vm1, %v9830_v27 }
 0x115   :  { %8243 = vmatprep.mubr.msk.f32.mxu1 %vm325_vm1, %v9892_v50  ;;  %8257 = vmatprep.mubr.msk.f32.mxu0 %vm325_vm1, %v9844_v33 }
 0x116   :  { %8749 = vmatpush3.bf16.msra.mxu0 %v10058_v18 }
 0x117   :  { %8751 = vmatprep.subr.bf16.mxu0 %v10111_v31 }
 0x118   :  { %8244 = vmatmul.mubr.msk.f32.gmra.mrb[26].mxu1 %vm325_vm1, %v9897_v51  ;;  %8258 = vmatmul.mubr.msk.f32.gmra.mrb[38].mxu0 %vm325_vm1, %v9847_v34 }
 0x119   :  { %8260 = vmatprep.mubr.msk.f32.mxu0 %vm325_vm1, %v9868_v42  ;;  %8274 = vmatprep.mubr.msk.f32.mxu1 %vm325_vm1, %v9828_v26 }
 0x11a   :  { %8753 = vmatpush3.bf16.msra.mxu0 %v10111_v31 }
 0x11b   :  { %8763 = vmatprep.subr.bf16.mxu0 %v10130_v37 }
 0x11c   :  { %8261 = vmatmul.mubr.msk.f32.gmra.mrb[40].mxu0 %vm325_vm1, %v9873_v43  ;;  %8275 = vmatmul.mubr.msk.f32.vlgmr.msra.gmra.mrb[28].mxu1 %vm325_vm1, %v9830_v27 }
 0x11d   :  { %8263 = vmatprep.mubr.msk.f32.mxu0 %vm325_vm1, %v9892_v50  ;;  %8277 = vmatprep.mubr.msk.f32.mxu1 %vm325_vm1, %v9844_v33 }
 0x11e   :  { %8757 = vmatpush3.bf16.msra.mxu1 %v10094_v25  ;;  %v147_v25 = vld [vmem:[%s13453_s6 + $0x28] sm:$0xff] }
 0x11f   :  { %8759 = vmatprep.subr.bf16.mxu1 %v10147_v40 }
 0x120   :  { %8264 = vmatmul.mubr.msk.f32.gmra.mrb[42].mxu0 %vm325_vm1, %v9897_v51  ;;  %8278 = vmatmul.mubr.msk.f32.gmra.mrb[30].mxu1 %vm325_vm1, %v9847_v34 }
 0x121   :  { %8280 = vmatprep.mubr.msk.f32.mxu1 %vm325_vm1, %v9868_v42  ;;  %8294 = vmatprep.mubr.msk.f32.mxu0 %vm325_vm1, %v9828_v26 }
 0x122   :  { %8761 = vmatpush3.bf16.msra.mxu1 %v10147_v40 }
 0x124   :  { %8281 = vmatmul.mubr.msk.f32.gmra.mrb[32].mxu1 %vm325_vm1, %v9873_v43  ;;  %8295 = vmatmul.mubr.msk.f32.vlgmr.msra.gmra.mrb[44].mxu0 %vm325_vm1, %v9830_v27 }
 0x125   :  { %8283 = vmatprep.mubr.msk.f32.mxu1 %vm325_vm1, %v9892_v50  ;;  %8297 = vmatprep.mubr.msk.f32.mxu0 %vm325_vm1, %v9844_v33 }
 0x126   :  { %8765 = vmatpush3.bf16.msra.mxu0 %v10130_v37 }
 0x127   :  { %8767 = vmatprep.subr.bf16.mxu0 %v10175_v46 }
 0x128   :  { %8284 = vmatmul.mubr.msk.f32.gmra.mrb[34].mxu1 %vm325_vm1, %v9897_v51  ;;  %8298 = vmatmul.mubr.msk.f32.gmra.mrb[46].mxu0 %vm325_vm1, %v9847_v34 }
 0x129   :  { %8300 = vmatprep.mubr.msk.f32.mxu0 %vm325_vm1, %v9868_v42  ;;  %8314 = vmatprep.mubr.msk.f32.mxu1 %vm325_vm1, %v9828_v26 }
 0x12a   :  { %8769 = vmatpush3.bf16.msra.mxu0 %v10175_v46 }
 0x12c   :  { %8301 = vmatmul.mubr.msk.f32.gmra.mrb[48].mxu0 %vm325_vm1, %v9873_v43  ;;  %8315 = vmatmul.mubr.msk.f32.vlgmr.msra.gmra.mrb[36].mxu1 %vm325_vm1, %v9830_v27 }
 0x12d   :  { %8303 = vmatprep.mubr.msk.f32.mxu0 %vm325_vm1, %v9892_v50  ;;  %8317 = vmatprep.mubr.msk.f32.mxu1 %vm325_vm1, %v9844_v33 }
 0x130   :  { %8304 = vmatmul.mubr.msk.f32.gmra.mrb[50].mxu0 %vm325_vm1, %v9897_v51  ;;  %8318 = vmatmul.mubr.msk.f32.gmra.mrb[38].mxu1 %vm325_vm1, %v9847_v34 }
 0x131   :  { %8320 = vmatprep.mubr.msk.f32.mxu1 %vm325_vm1, %v9868_v42  ;;  %8334 = vmatprep.mubr.msk.f32.mxu0 %vm325_vm1, %v9828_v26  ;;  %v110_v26 = vld [vmem:[%s13451_s4] sm:$0xff] }
 0x134   :  { %8321 = vmatmul.mubr.msk.f32.gmra.mrb[40].mxu1 %vm325_vm1, %v9873_v43  ;;  %8335 = vmatmul.mubr.msk.f32.vlgmr.msra.gmra.mrb[52].mxu0 %vm325_vm1, %v9830_v27 }
 0x135   :  { %8323 = vmatprep.mubr.msk.f32.mxu1 %vm325_vm1, %v9892_v50  ;;  %8337 = vmatprep.mubr.msk.f32.mxu0 %vm325_vm1, %v9844_v33 }
 0x138   :  { %8324 = vmatmul.mubr.msk.f32.gmra.mrb[42].mxu1 %vm325_vm1, %v9897_v51  ;;  %8338 = vmatmul.mubr.msk.f32.gmra.mrb[54].mxu0 %vm325_vm1, %v9847_v34 }
 0x139   :  { %8340 = vmatprep.mubr.msk.f32.mxu0 %vm325_vm1, %v9868_v42 }
 0x13c   :  { %8341 = vmatmul.mubr.msk.f32.gmra.mrb[56].mxu0 %vm325_vm1, %v9873_v43 }
 0x13d   :  { %8343 = vmatprep.mubr.msk.f32.mxu0 %vm325_vm1, %v9892_v50 }
 0x140   :  { %8344 = vmatmul.mubr.msk.f32.gmra.mrb[58].mxu0 %vm325_vm1, %v9897_v51 }
 0x1af   :  { %v10235_v27 = vpop.f32.mrb[8].mxu0 }
 0x1b0   :  { %v416_v33 = vpop.f32.mrb[9].mxu0 }
 0x1b1   :  { %v10237_v34 = vadd.f32 %v416_v33, %v110_v26  ;;  %v146_v26 = vld [vmem:[%s13453_s6 + $0x20] sm:$0xff] }
 0x1b3   :  { %v10239_v47 = vpop.f32.mrb[10].mxu0  ;;  %7748 = vmatprep.mubr.msk.f32.mxu1 %vm191_vm0, %v10237_v34 }
 0x1b4   :  { %v10243_v42 = vpop.f32.mrb[11].mxu0 }
 0x1b7   :  { %v10245_v43 = vpop.f32.mrb[0].mxu1  ;;  %v10247_v49 = vpop.f32.mrb[12].mxu0 }
 0x1b8   :  { %v10249_v50 = vpop.f32.mrb[1].mxu1  ;;  %v10251_v51 = vpop.f32.mrb[13].mxu0 }
 0x1bb   :  { %v10253_v53 = vpop.f32.mrb[2].mxu1  ;;  %v10255_v54 = vpop.f32.mrb[14].mxu0 }
 0x1bc   :  { %v10257_v55 = vpop.f32.mrb[3].mxu1  ;;  %v10259_v56 = vpop.f32.mrb[15].mxu0 }
 0x1bf   :  { %v10261_v59 = vpop.f32.mrb[16].mxu0  ;;  %v10263_v60 = vpop.f32.mrb[4].mxu1 }
 0x1c0   :  { %v10265_v62 = vpop.f32.mrb[17].mxu0  ;;  %v10267_v63 = vpop.f32.mrb[5].mxu1 }
 0x1c3   :  { %v10269_v1 = vpop.f32.mrb[18].mxu0  ;;  %v10271_v2 = vpop.f32.mrb[6].mxu1 }
 0x1c4   :  { %13597 = vst [vmem:[#allocation29_spill] sm:$0xff] %v10271_v2  ;;  %v10273_v3 = vpop.f32.mrb[19].mxu0  ;;  %v10275_v4 = vpop.f32.mrb[7].mxu1 }
 0x1c7   :  { %v10277_v8 = vpop.f32.mrb[8].mxu1  ;;  %v10279_v9 = vpop.f32.mrb[20].mxu0 }
 0x1c8   :  { %13598 = vst [vmem:[#allocation30_spill] sm:$0xff] %v10277_v8  ;;  %13599 = vst [vmem:[#allocation31_spill] sm:$0xff] %v10279_v9  ;;  %v10281_v11 = vpop.f32.mrb[9].mxu1  ;;  %v10283_v12 = vpop.f32.mrb[21].mxu0 }
 0x1c9   :  { %13600 = vst [vmem:[#allocation32_spill] sm:$0xff] %v10281_v11  ;;  %13601 = vst [vmem:[#allocation33_spill] sm:$0xff] %v10283_v12 }
 0x1cb   :  { %v10285_v15 = vpop.f32.mrb[10].mxu1  ;;  %v10287_v16 = vpop.f32.mrb[22].mxu0 }
 0x1cc   :  { %13602 = vst [vmem:[#allocation34_spill] sm:$0xff] %v10285_v15  ;;  %13603 = vst [vmem:[#allocation35_spill] sm:$0xff] %v10287_v16  ;;  %v10289_v19 = vpop.f32.mrb[11].mxu1  ;;  %v10291_v21 = vpop.f32.mrb[23].mxu0 }
 0x1cd   :  { %13604 = vst [vmem:[#allocation36_spill] sm:$0xff] %v10289_v19  ;;  %13605 = vst [vmem:[#allocation37_spill] sm:$0xff] %v10291_v21 }
 0x1cf   :  { %v10299_v29 = vpop.f32.mrb[24].mxu0  ;;  %v8196_v30 = vpop.f32.mrb[12].mxu1 }
 0x1d0   :  { %13606 = vst [vmem:[#allocation38_spill] sm:$0xff] %v10299_v29  ;;  %v10301_v32 = vadd.f32 %v8196_v30, %v143_v23  ;;  %v10303_v36 = vpop.f32.mrb[25].mxu0  ;;  %v887_v38 = vpop.f32.mrb[13].mxu1  ;;  %v171_v29 = vld [vmem:[%s13453_s6 + $0xe8] sm:$0xff] }
 0x1d1   :  { %13607 = vst [vmem:[#allocation39_spill] sm:$0xff] %v10303_v36  ;;  %v10305_v39 = vadd.f32 %v887_v38, %v142_v24 }
 0x1d3   :  { %v10315_v33 = vpop.f32.mrb[26].mxu0  ;;  %v8199_v23 = vpop.f32.mrb[14].mxu1 }
 0x1d4   :  { %13608 = vst [vmem:[#allocation40_spill] sm:$0xff] %v10315_v33  ;;  %v10317_v30 = vadd.f32 %v8199_v23, %v145_v41  ;;  %v10319_v40 = vpop.f32.mrb[27].mxu0  ;;  %v897_v24 = vpop.f32.mrb[15].mxu1  ;;  %v150_v41 = vld [vmem:[%s13453_s6 + $0x40] sm:$0xff]  ;;  %v163_v33 = vld [vmem:[%s13453_s6 + $0xa8] sm:$0xff] }
 0x1d5   :  { %13609 = vst [vmem:[#allocation41_spill] sm:$0xff] %v10319_v40  ;;  %v10321_v38 = vadd.f32 %v897_v24, %v144_v45  ;;  %v153_v45 = vld [vmem:[%s13453_s6 + $0x58] sm:$0xff] }
 0x1d7   :  { %v8202_v23 = vpop.f32.mrb[16].mxu1  ;;  %v8216_v24 = vpop.f32.mrb[28].mxu0  ;;  %v13614_v36 = vpack.c.bf16 %v10317_v30, %v10321_v38  ;;  %v173_v38 = vld [vmem:[%s13453_s6 + $0xf8] sm:$0xff] }
 0x1d8   :  { %v10337_v10 = vadd.f32 %v8202_v23, %v147_v25  ;;  %v10339_v46 = vadd.f32 %v8216_v24, %v151_v22  ;;  %v907_v6 = vpop.f32.mrb[17].mxu1  ;;  %v997_v37 = vpop.f32.mrb[29].mxu0  ;;  %v148_v25 = vld [vmem:[%s13453_s6 + $0x30] sm:$0xff] }
 0x1d9   :  { %v10341_v61 = vadd.f32 %v907_v6, %v146_v26  ;;  %v10343_v31 = vadd.f32 %v997_v37, %v150_v41  ;;  %v152_v22 = vld [vmem:[%s13453_s6 + $0x50] sm:$0xff]  ;;  %v159_v37 = vld [vmem:[%s13453_s6 + $0x88] sm:$0xff] }
 0x1db   :  { %v8205_v26 = vpop.f32.mrb[18].mxu1  ;;  %v8219_v41 = vpop.f32.mrb[30].mxu0 }
 0x1dc   :  { %v10361_v23 = vadd.f32 %v8205_v26, %v149_v57  ;;  %v10363_v24 = vadd.f32 %v8219_v41, %v153_v45  ;;  %v917_v18 = vpop.f32.mrb[19].mxu1  ;;  %v1007_v52 = vpop.f32.mrb[31].mxu0  ;;  %v154_v57 = vld [vmem:[%s13453_s6 + $0x60] sm:$0xff] }
 0x1dd   :  { %v10365_v13 = vadd.f32 %v917_v18, %v148_v25  ;;  %v10367_v44 = vadd.f32 %v1007_v52, %v152_v22  ;;  %v158_v45 = vld [vmem:[%s13453_s6 + $0x80] sm:$0xff]  ;;  %v161_v52 = vld [vmem:[%s13453_s6 + $0x98] sm:$0xff]  ;;  %v156_v18 = vld [vmem:[%s13453_s6 + $0x70] sm:$0xff] }
 0x1df   :  { %v8222_v25 = vpop.f32.mrb[32].mxu0  ;;  %v8236_v22 = vpop.f32.mrb[20].mxu1  ;;  %v13618_v16 = vpack.c.bf16 %v10363_v24, %v10367_v44  ;;  %v111_v44 = vld [vmem:[%s13451_s4 + $0x8] sm:$0xff] }
 0x1e0   :  { %v10385_v26 = vadd.f32 %v8222_v25, %v155_v5  ;;  %v1273_v41 = vadd.f32 %v8236_v22, %v159_v37  ;;  %v1017_v6 = vpop.f32.mrb[33].mxu0  ;;  %v1107_v20 = vpop.f32.mrb[21].mxu1  ;;  %v160_v5 = vld [vmem:[%s13453_s6 + $0x90] sm:$0xff] }
 0x1e1   :  { %v10387_v0 = vadd.f32 %v1017_v6, %v154_v57  ;;  %v1272_v28 = vadd.f32 %v1107_v20, %v158_v45  ;;  %v13610_v20 = vmov 0  ;;  %v165_v6 = vld [vmem:[%s13453_s6 + $0xb8] sm:$0xff] }
 0x1e2   :  { %v13611_v20 = vsel %vm10403_vm2, 4294967295, %v13610_v20 }
 0x1e3   :  { %13612 = vst [vmem:[#allocation42_spill] sm:$0xff] %v13611_v20  ;;  %v8770_v37 = vpack.c.bf16 %v1273_v41, %v1272_v28  ;;  %v8225_v57 = vpop.f32.mrb[34].mxu0  ;;  %v8239_v45 = vpop.f32.mrb[22].mxu1  ;;  %v167_v28 = vld [vmem:[%s13453_s6 + $0xc8] sm:$0xff] }
 0x1e4   :  { %v10409_v25 = vadd.f32 %v8225_v57, %v157_v58  ;;  %v1275_v22 = vadd.f32 %v8239_v45, %v161_v52  ;;  %v1027_v48 = vpop.f32.mrb[35].mxu0  ;;  %v1117_v17 = vpop.f32.mrb[23].mxu1  ;;  %v13613_v58 = vpack.c.bf16 %v10301_v32, %v10305_v39  ;;  %v169_v52 = vld [vmem:[%s13453_s6 + $0xd8] sm:$0xff] }
 0x1e5   :  { %v10411_v14 = vadd.f32 %v1027_v48, %v156_v18  ;;  %v1274_v7 = vadd.f32 %v1117_v17, %v160_v5  ;;  %8772 = vmatprep.subr.msk.bf16.mxu1 %vm10403_vm2, %v8770_v37  ;;  %v162_v17 = vld [vmem:[%s13453_s6 + $0xa0] sm:$0xff] }
 0x1e6   :  { %8775 = vmatpush3.bf16.xpose.msk.msra.mxu1 %vm10403_vm2, %v13613_v58  ;;  %v166_v48 = vld [vmem:[%s13453_s6 + $0xc0] sm:$0xff] }
 0x1e7   :  { %v8776_v18 = vpack.c.bf16 %v1275_v22, %v1274_v7  ;;  %v8242_v41 = vpop.f32.mrb[24].mxu1  ;;  %v8256_v5 = vpop.f32.mrb[36].mxu0  ;;  %v164_v7 = vld [vmem:[%s13453_s6 + $0xb0] sm:$0xff]  ;;  %v13620_v24 = vpack.c.bf16 %v10409_v25, %v10411_v14 }
 0x1e8   :  { %v1277_v37 = vadd.f32 %v8242_v41, %v163_v33  ;;  %v1281_v57 = vadd.f32 %v8256_v5, %v167_v28  ;;  %v1127_v32 = vpop.f32.mrb[25].mxu1  ;;  %v1217_v39 = vpop.f32.mrb[37].mxu0  ;;  %v168_v33 = vld [vmem:[%s13453_s6 + $0xd0] sm:$0xff] }
 0x1e9   :  { %v1276_v45 = vadd.f32 %v1127_v32, %v162_v17  ;;  %v1280_v58 = vadd.f32 %v1217_v39, %v166_v48  ;;  %8778 = vmatprep.subr.msk.bf16.mxu1 %vm10403_vm2, %v8776_v18 }
 0x1eb   :  { %v8782_v22 = vpack.c.bf16 %v1277_v37, %v1276_v45  ;;  %v8794_v28 = vpack.c.bf16 %v1281_v57, %v1280_v58  ;;  %v8245_v17 = vpop.f32.mrb[26].mxu1  ;;  %v8259_v48 = vpop.f32.mrb[38].mxu0  ;;  %v170_v37 = vld [vmem:[%s13453_s6 + $0xe0] sm:$0xff] }
 0x1ec   :  { %v1279_v18 = vadd.f32 %v8245_v17, %v165_v6  ;;  %v1283_v41 = vadd.f32 %v8259_v48, %v169_v52  ;;  %v1137_v5 = vpop.f32.mrb[27].mxu1  ;;  %v1227_v32 = vpop.f32.mrb[39].mxu0 }
 0x1ed   :  { %v1278_v39 = vadd.f32 %v1137_v5, %v164_v7  ;;  %v1282_v40 = vadd.f32 %v1227_v32, %v168_v33 }
 0x1ee   :  { %8781 = vmatpush3.bf16.xpose.msk.msra.mxu1 %vm10403_vm2, %v13614_v36 }
 0x1ef   :  { %v8788_v6 = vpack.c.bf16 %v1279_v18, %v1278_v39  ;;  %v8800_v52 = vpack.c.bf16 %v1283_v41, %v1282_v40  ;;  %v8262_v57 = vpop.f32.mrb[40].mxu0  ;;  %v10459_v45 = vpop.f32.mrb[28].mxu1  ;;  %8784 = vmatprep.subr.msk.bf16.mxu1 %vm10403_vm2, %v8782_v22  ;;  %v172_v40 = vld [vmem:[%s13453_s6 + $0xf0] sm:$0xff]  ;;  %v13615_v39 = vpack.c.bf16 %v10337_v10, %v10341_v61 }
 0x1f0   :  { %v1285_v58 = vadd.f32 %v8262_v57, %v171_v29  ;;  %v1237_v7 = vpop.f32.mrb[41].mxu0  ;;  %v10463_v33 = vpop.f32.mrb[29].mxu1 }
 0x1f1   :  { %v1284_v30 = vadd.f32 %v1237_v7, %v170_v37  ;;  %v13621_v14 = vpack.c.bf16 %v10459_v45, %v10463_v33 }
 0x1f3   :  { %v8806_v17 = vpack.c.bf16 %v1285_v58, %v1284_v30  ;;  %v8265_v48 = vpop.f32.mrb[42].mxu0  ;;  %v10473_v18 = vpop.f32.mrb[30].mxu1 }
 0x1f4   :  { %v1287_v29 = vadd.f32 %v8265_v48, %v173_v38  ;;  %v1247_v22 = vpop.f32.mrb[43].mxu0  ;;  %v10475_v41 = vpop.f32.mrb[31].mxu1 }
 0x1f5   :  { %v1286_v5 = vadd.f32 %v1247_v22, %v172_v40  ;;  %v13617_v22 = vpack.c.bf16 %v10339_v46, %v10343_v31 }
 0x1f6   :  { %8787 = vmatpush3.bf16.xpose.msk.msra.mxu1 %vm10403_vm2, %v13615_v39 }
 0x1f7   :  { %v8812_v37 = vpack.c.bf16 %v1287_v29, %v1286_v5  ;;  %v10484_v57 = vpop.f32.mrb[32].mxu1  ;;  %v10486_v58 = vpop.f32.mrb[44].mxu0  ;;  %8790 = vmatprep.subr.msk.bf16.mxu1 %vm10403_vm2, %v8788_v6  ;;  %v13616_v5 = vpack.c.bf16 %v10361_v23, %v10365_v13 }
 0x1f8   :  { %v10490_v7 = vpop.f32.mrb[33].mxu1  ;;  %v10492_v30 = vpop.f32.mrb[45].mxu0 }
 0x1f9   :  { %v13623_v33 = vpack.c.bf16 %v10484_v57, %v10490_v7  ;;  %v13625_v57 = vpack.c.bf16 %v10486_v58, %v10492_v30 }
 0x1fb   :  { %v10498_v10 = vpop.f32.mrb[34].mxu1  ;;  %v10500_v40 = vpop.f32.mrb[46].mxu0 }
 0x1fc   :  { %v10502_v48 = vpop.f32.mrb[35].mxu1  ;;  %v10504_v29 = vpop.f32.mrb[47].mxu0 }
 0x1fe   :  { %8793 = vmatpush3.bf16.xpose.msk.msra.mxu1 %vm10403_vm2, %v13616_v5 }
 0x1ff   :  { %v10515_v39 = vpop.f32.mrb[48].mxu0  ;;  %v10517_v61 = vpop.f32.mrb[36].mxu1  ;;  %8796 = vmatprep.subr.msk.bf16.mxu1 %vm10403_vm2, %v8794_v28 }
 0x200   :  { %v10521_v38 = vpop.f32.mrb[49].mxu0  ;;  %v10523_v32 = vpop.f32.mrb[37].mxu1 }
 0x201   :  { %v13627_v30 = vpack.c.bf16 %v10515_v39, %v10521_v38 }
 0x203   :  { %v10529_v23 = vpop.f32.mrb[50].mxu0  ;;  %v10531_v5 = vpop.f32.mrb[38].mxu1 }
 0x204   :  { %v10533_v6 = vpop.f32.mrb[51].mxu0  ;;  %v10535_v36 = vpop.f32.mrb[39].mxu1 }
 0x205   :  { %v13630_v39 = vpack.c.bf16 %v10531_v5, %v10535_v36 }
 0x206   :  { %8799 = vmatpush3.bf16.xpose.msk.msra.mxu1 %vm10403_vm2, %v13617_v22 }
 0x207   :  { %v10546_v13 = vpop.f32.mrb[40].mxu1  ;;  %v10548_v21 = vpop.f32.mrb[52].mxu0  ;;  %8802 = vmatprep.subr.msk.bf16.mxu1 %vm10403_vm2, %v8800_v52 }
 0x208   :  { %v10552_v9 = vpop.f32.mrb[41].mxu1  ;;  %v10554_v12 = vpop.f32.mrb[53].mxu0 }
 0x20b   :  { %v10560_v46 = vpop.f32.mrb[42].mxu1  ;;  %v10562_v22 = vpop.f32.mrb[54].mxu0 }
 0x20c   :  { %v10564_v28 = vpop.f32.mrb[43].mxu1  ;;  %v10566_v15 = vpop.f32.mrb[55].mxu0 }
 0x20d   :  { %v8858_v19 = vpack.c.bf16 %v10562_v22, %v10566_v15  ;;  %v13637_v22 = vld [vmem:[#allocation30_spill] sm:$0xff] }
 0x20e   :  { %8805 = vmatpush3.bf16.xpose.msk.msra.mxu1 %vm10403_vm2, %v13618_v16  ;;  %v13619_v16 = vpack.c.bf16 %v10385_v26, %v10387_v0  ;;  %v786_v0 = vadd.f32 %v10235_v27, %v111_v44  ;;  %v112_v26 = vld [vmem:[%s13451_s4 + $0x10] sm:$0xff]  ;;  %v113_v27 = vld [vmem:[%s13451_s4 + $0x18] sm:$0xff] }
 0x20f   :  { %v10577_v31 = vpop.f32.mrb[56].mxu0  ;;  %8808 = vmatprep.subr.msk.bf16.mxu1 %vm10403_vm2, %v8806_v17  ;;  %v13507_v17 = vmov 0.0|0.0   ;;  %v787_v25 = vadd.f32 %v10243_v42, %v112_v26  ;;  %v788_v45 = vadd.f32 %v10239_v47, %v113_v27  ;;  %v114_v42 = vld [vmem:[%s13451_s4 + $0x20] sm:$0xff]  ;;  %v115_v47 = vld [vmem:[%s13451_s4 + $0x28] sm:$0xff]  ;;  %v132_v44 = vld [vmem:[%s13451_s4 + $0xb0] sm:$0xff] }
 0x210   :  { %v10581_v8 = vpop.f32.mrb[57].mxu0  ;;  %v13639_v26 = vld [vmem:[#allocation34_spill] sm:$0xff]  ;;  %v13640_v27 = vld [vmem:[#allocation33_spill] sm:$0xff] }
 0x211   :  { %v8861_v11 = vpack.c.bf16 %v10577_v31, %v10581_v8  ;;  %v13636_v31 = vld [vmem:[#allocation32_spill] sm:$0xff] }
 0x213   :  { %v10585_v52 = vpop.f32.mrb[58].mxu0 }
 0x214   :  { %v10587_v2 = vpop.f32.mrb[59].mxu0 }
 0x216   :  { %8811 = vmatpush3.bf16.xpose.msk.msra.mxu1 %vm10403_vm2, %v13619_v16  ;;  %v13638_v16 = vld [vmem:[#allocation36_spill] sm:$0xff] }
 0x217   :  { %8814 = vmatprep.subr.msk.bf16.mxu1 %vm10403_vm2, %v8812_v37  ;;  %v790_v37 = vadd.f32 %v10245_v43, %v115_v47  ;;  %v117_v43 = vld [vmem:[%s13451_s4 + $0x38] sm:$0xff]  ;;  %v13642_v47 = vld [vmem:[#allocation37_spill] sm:$0xff] }
 0x218   :  { %v792_v58 = vadd.f32 %v10253_v53, %v117_v43  ;;  %v119_v53 = vld [vmem:[%s13451_s4 + $0x48] sm:$0xff]  ;;  %v13644_v43 = vld [vmem:[#allocation39_spill] sm:$0xff] }
 0x219   :  { %v794_v38 = vadd.f32 %v10247_v49, %v119_v53  ;;  %v121_v49 = vld [vmem:[%s13451_s4 + $0x58] sm:$0xff]  ;;  %v13646_v53 = vld [vmem:[#allocation41_spill] sm:$0xff] }
 0x21e   :  { %8817 = vmatpush3.bf16.xpose.msk.msra.mxu1 %vm10403_vm2, %v13620_v24  ;;  %v807_v24 = vadd.f32 %v13638_v16, %v132_v44 }
 0x21f   :  { %8818 = vmatprep.subr.bf16.mxu1 %v13507_v17 }
 0x225   :  { %7749 = vmatmul.mubr.msk.f32.vlgmr.msra.gmra.mrb[44].mxu1 %vm191_vm0, %v10237_v34  ;;  %v13622_v34 = vpack.c.bf16 %v10473_v18, %v10475_v41  ;;  %v789_v18 = vadd.f32 %v10249_v50, %v114_v42  ;;  %v13624_v41 = vpack.c.bf16 %v10498_v10, %v10502_v48  ;;  %v116_v50 = vld [vmem:[%s13451_s4 + $0x30] sm:$0xff]  ;;  %v13626_v10 = vpack.c.bf16 %v10500_v40, %v10504_v29  ;;  %v13641_v42 = vld [vmem:[#allocation31_spill] sm:$0xff] }
 0x226   :  { %7750 = vmatprep.mubr.msk.f32.mxu1 %vm191_vm0, %v786_v0  ;;  %8820 = vmatpush1.bf16.msra.mxu1 %v13621_v14  ;;  %v791_v7 = vadd.f32 %v10257_v55, %v116_v50  ;;  %v118_v55 = vld [vmem:[%s13451_s4 + $0x40] sm:$0xff]  ;;  %v13628_v48 = vpack.c.bf16 %v10529_v23, %v10533_v6  ;;  %v13629_v29 = vpack.c.bf16 %v10517_v61, %v10523_v32  ;;  %v13643_v50 = vld [vmem:[#allocation35_spill] sm:$0xff] }
 0x227   :  { %8821 = vmatprep.subr.bf16.mxu1 %v13507_v17  ;;  %v793_v40 = vadd.f32 %v10251_v51, %v118_v55  ;;  %v120_v51 = vld [vmem:[%s13451_s4 + $0x50] sm:$0xff]  ;;  %v796_v32 = vadd.f32 %v10255_v54, %v121_v49  ;;  %v13631_v61 = vpack.c.bf16 %v10546_v13, %v10552_v9  ;;  %v123_v54 = vld [vmem:[%s13451_s4 + $0x68] sm:$0xff]  ;;  %v13632_v23 = vpack.c.bf16 %v10560_v46, %v10564_v28  ;;  %v130_v28 = vld [vmem:[%s13451_s4 + $0xa0] sm:$0xff] }
 0x228   :  { %v795_v6 = vadd.f32 %v10259_v56, %v120_v51  ;;  %v122_v56 = vld [vmem:[%s13451_s4 + $0x60] sm:$0xff]  ;;  %v798_v9 = vadd.f32 %v10261_v59, %v123_v54  ;;  %v13633_v13 = vpack.c.bf16 %v10548_v21, %v10554_v12  ;;  %v125_v59 = vld [vmem:[%s13451_s4 + $0x78] sm:$0xff]  ;;  %v131_v46 = vld [vmem:[%s13451_s4 + $0xa8] sm:$0xff] }
 0x229   :  { %7751 = vmatmul.mubr.msk.f32.gmra.mrb[46].mxu1 %vm191_vm0, %v786_v0  ;;  %v797_v36 = vadd.f32 %v10265_v62, %v122_v56  ;;  %v124_v62 = vld [vmem:[%s13451_s4 + $0x70] sm:$0xff]  ;;  %v800_v12 = vadd.f32 %v10269_v1, %v125_v59  ;;  %v127_v1 = vld [vmem:[%s13451_s4 + $0x88] sm:$0xff]  ;;  %v129_v21 = vld [vmem:[%s13451_s4 + $0x98] sm:$0xff] }
 0x22a   :  { %7752 = vmatprep.mubr.msk.f32.mxu1 %vm191_vm0, %v787_v25  ;;  %8823 = vmatpush1.bf16.msra.mxu1 %v13622_v34  ;;  %v799_v5 = vadd.f32 %v10273_v3, %v124_v62  ;;  %v126_v3 = vld [vmem:[%s13451_s4 + $0x80] sm:$0xff]  ;;  %v802_v8 = vadd.f32 %v10263_v60, %v127_v1  ;;  %v133_v0 = vld [vmem:[%s13451_s4 + $0xb8] sm:$0xff]  ;;  %v13645_v55 = vld [vmem:[#allocation38_spill] sm:$0xff] }
 0x22b   :  { %8824 = vmatprep.subr.bf16.mxu1 %v13507_v17  ;;  %v801_v15 = vadd.f32 %v10267_v63, %v126_v3  ;;  %v128_v63 = vld [vmem:[%s13451_s4 + $0x90] sm:$0xff]  ;;  %v808_v14 = vadd.f32 %v13639_v26, %v133_v0  ;;  %v13647_v51 = vld [vmem:[#allocation40_spill] sm:$0xff]  ;;  %v46_v49 = vld [vmem:[%s13458_s11 + $0x8] sm:$0xff] }
 0x22c   :  { %v10872_v54 = vld.sshfl [vmem:[%s13459_s12] sm:$0x33 pattern:$0x76325410] }
 0x22d   :  { %7753 = vmatmul.mubr.msk.f32.gmra.mrb[48].mxu1 %vm191_vm0, %v787_v25  ;;  %v134_v25 = vld [vmem:[%s13451_s4 + $0xc0] sm:$0xff] }
 0x22e   :  { %7754 = vmatprep.mubr.msk.f32.mxu1 %vm191_vm0, %v788_v45  ;;  %8826 = vmatpush1.bf16.msra.mxu1 %v13623_v33  ;;  %v809_v34 = vadd.f32 %v13640_v27, %v134_v25  ;;  %v49_v3 = vld [vmem:[%s13458_s11 + $0x20] sm:$0xff]  ;;  %v56_v25 = vld [vmem:[%s13458_s11 + $0x58] sm:$0xff] }
 0x22f   :  { %8827 = vmatprep.subr.bf16.mxu1 %v13507_v17 }
 0x231   :  { %7755 = vmatmul.mubr.msk.f32.gmra.mrb[50].mxu1 %vm191_vm0, %v788_v45  ;;  %v135_v45 = vld [vmem:[%s13451_s4 + $0xc8] sm:$0xff] }
 0x232   :  { %7756 = vmatprep.mubr.msk.f32.mxu1 %vm191_vm0, %v789_v18  ;;  %8829 = vmatpush1.bf16.msra.mxu1 %v13624_v41  ;;  %v810_v33 = vadd.f32 %v13641_v42, %v135_v45 }
 0x233   :  { %8830 = vmatprep.subr.bf16.mxu1 %v13507_v17 }
 0x235   :  { %7757 = vmatmul.mubr.msk.f32.gmra.mrb[52].mxu1 %vm191_vm0, %v789_v18  ;;  %v136_v18 = vld [vmem:[%s13451_s4 + $0xd0] sm:$0xff] }
 0x236   :  { %7758 = vmatprep.mubr.msk.f32.mxu1 %vm191_vm0, %v790_v37  ;;  %8832 = vmatpush1.bf16.msra.mxu1 %v13625_v57  ;;  %v811_v41 = vadd.f32 %v13642_v47, %v136_v18  ;;  %v57_v18 = vld [vmem:[%s13458_s11 + $0x60] sm:$0xff]  ;;  %v58_v47 = vld [vmem:[%s13458_s11 + $0x68] sm:$0xff] }
 0x237   :  { %8833 = vmatprep.subr.bf16.mxu1 %v13507_v17 }
 0x239   :  { %7759 = vmatmul.mubr.msk.f32.gmra.mrb[54].mxu1 %vm191_vm0, %v790_v37  ;;  %v137_v37 = vld [vmem:[%s13451_s4 + $0xd8] sm:$0xff] }
 0x23a   :  { %7760 = vmatprep.mubr.msk.f32.mxu1 %vm191_vm0, %v791_v7  ;;  %8835 = vmatpush1.bf16.msra.mxu1 %v13626_v10  ;;  %v812_v57 = vadd.f32 %v13643_v50, %v137_v37 }
 0x23b   :  { %8836 = vmatprep.subr.bf16.mxu1 %v13507_v17 }
 0x23d   :  { %7761 = vmatmul.mubr.msk.f32.gmra.mrb[56].mxu1 %vm191_vm0, %v791_v7  ;;  %v138_v7 = vld [vmem:[%s13451_s4 + $0xe0] sm:$0xff] }
 0x23e   :  { %7762 = vmatprep.mubr.msk.f32.mxu1 %vm191_vm0, %v792_v58  ;;  %8838 = vmatpush1.bf16.msra.mxu1 %v13627_v30  ;;  %v813_v10 = vadd.f32 %v13644_v43, %v138_v7  ;;  %v59_v43 = vld [vmem:[%s13458_s11 + $0x70] sm:$0xff] }
 0x23f   :  { %8839 = vmatprep.subr.bf16.mxu1 %v13507_v17 }
 0x241   :  { %7763 = vmatmul.mubr.msk.f32.gmra.mrb[58].mxu1 %vm191_vm0, %v792_v58  ;;  %v139_v58 = vld [vmem:[%s13451_s4 + $0xe8] sm:$0xff] }
 0x242   :  { %7764 = vmatprep.mubr.msk.f32.mxu1 %vm191_vm0, %v793_v40  ;;  %8841 = vmatpush1.bf16.msra.mxu1 %v13628_v48  ;;  %v814_v30 = vadd.f32 %v13645_v55, %v139_v58 }
 0x243   :  { %8842 = vmatprep.subr.bf16.mxu1 %v13507_v17 }
 0x245   :  { %7765 = vmatmul.mubr.msk.f32.gmra.mrb[60].mxu1 %vm191_vm0, %v793_v40  ;;  %v140_v40 = vld [vmem:[%s13451_s4 + $0xf0] sm:$0xff] }
 0x246   :  { %7766 = vmatprep.mubr.msk.f32.mxu1 %vm191_vm0, %v794_v38  ;;  %8844 = vmatpush1.bf16.msra.mxu1 %v13629_v29  ;;  %v815_v48 = vadd.f32 %v13646_v53, %v140_v40 }
 0x247   :  { %8845 = vmatprep.subr.bf16.mxu1 %v13507_v17 }
 0x249   :  { %7767 = vmatmul.mubr.msk.f32.gmra.mrb[62].mxu1 %vm191_vm0, %v794_v38  ;;  %v141_v38 = vld [vmem:[%s13451_s4 + $0xf8] sm:$0xff] }
 0x24a   :  { %7768 = vmatprep.mubr.msk.f32.mxu1 %vm191_vm0, %v795_v6  ;;  %8847 = vmatpush1.bf16.msra.mxu1 %v13630_v39  ;;  %v816_v29 = vadd.f32 %v13647_v51, %v141_v38  ;;  %v62_v38 = vld [vmem:[%s13458_s11 + $0x88] sm:$0xff] }
 0x24b   :  { %8848 = vmatprep.subr.bf16.mxu1 %v13507_v17 }
 0x24d   :  { %7769 = vmatmul.mubr.msk.f32.gmra.mrb[64].mxu1 %vm191_vm0, %v795_v6  ;;  %v45_v6 = vld [vmem:[%s13458_s11] sm:$0xff] }
 0x24e   :  { %7770 = vmatprep.mubr.msk.f32.mxu1 %vm191_vm0, %v796_v32  ;;  %8850 = vmatpush1.bf16.msra.mxu1 %v13631_v61 }
 0x24f   :  { %8851 = vmatprep.subr.bf16.mxu1 %v13507_v17 }
 0x251   :  { %7771 = vmatmul.mubr.msk.f32.gmra.mrb[66].mxu1 %vm191_vm0, %v796_v32 }
 0x252   :  { %7772 = vmatprep.mubr.msk.f32.mxu1 %vm191_vm0, %v797_v36  ;;  %8853 = vmatpush1.bf16.msra.mxu1 %v13632_v23  ;;  %v48_v23 = vld [vmem:[%s13458_s11 + $0x18] sm:$0xff] }
 0x253   :  { %8854 = vmatprep.subr.bf16.mxu1 %v13507_v17 }
 0x255   :  { %7773 = vmatmul.mubr.msk.f32.gmra.mrb[68].mxu1 %vm191_vm0, %v797_v36  ;;  %v47_v36 = vld [vmem:[%s13458_s11 + $0x10] sm:$0xff] }
 0x256   :  { %7774 = vmatprep.mubr.msk.f32.mxu1 %vm191_vm0, %v798_v9  ;;  %8856 = vmatpush1.bf16.msra.mxu1 %v13633_v13 }
 0x257   :  { %8857 = vmatprep.subr.bf16.mxu1 %v13507_v17 }
 0x259   :  { %7775 = vmatmul.mubr.msk.f32.gmra.mrb[70].mxu1 %vm191_vm0, %v798_v9  ;;  %v10879_v9 = vcombine.high %v10872_v54, %v10872_v54 }
 0x25a   :  { %7776 = vmatprep.mubr.msk.f32.mxu1 %vm191_vm0, %v799_v5  ;;  %8859 = vmatpush1.bf16.msra.mxu1 %v8858_v19  ;;  %v13634_v19 = vpack.c.bf16 %v10585_v52, %v10587_v2  ;;  %v13635_v2 = vld [vmem:[#allocation29_spill] sm:$0xff]  ;;  %v806_v52 = vadd.f32 %v13637_v22, %v131_v46  ;;  %v53_v22 = vld [vmem:[%s13458_s11 + $0x40] sm:$0xff] }
 0x25b   :  { %8860 = vmatprep.subr.bf16.mxu1 %v13507_v17  ;;  %v804_v60 = vadd.f32 %v13635_v2, %v129_v21  ;;  %13648 = vst [vmem:[#allocation29_spill] sm:$0xff] %v10879_v9  ;;  %2475 = vmatprep.subr.mxu0 %v10879_v9  ;;  %v51_v21 = vld [vmem:[%s13458_s11 + $0x30] sm:$0xff]  ;;  %v52_v2 = vld [vmem:[%s13458_s11 + $0x38] sm:$0xff] }
 0x25c   :  { %2476 = vmatpush1.xpose.msra.mxu0 %v10872_v54 }
 0x25d   :  { %7777 = vmatmul.mubr.msk.f32.gmra.mrb[72].mxu1 %vm191_vm0, %v799_v5  ;;  %7297 = vmatprep.subr.msk.mxu0 %vm2829_vm3, %v10879_v9 }
 0x25e   :  { %7778 = vmatprep.mubr.msk.f32.mxu1 %vm191_vm0, %v800_v12  ;;  %8862 = vmatpush1.bf16.msra.mxu1 %v8861_v11  ;;  %v803_v11 = vadd.f32 %v10275_v4, %v128_v63  ;;  %v805_v4 = vadd.f32 %v13636_v31, %v130_v28 }
 0x25f   :  { %8863 = vmatprep.subr.bf16.mxu1 %v13507_v17 }
 0x261   :  { %7779 = vmatmul.mubr.msk.f32.gmra.mrb[74].mxu1 %vm191_vm0, %v800_v12 }
 0x262   :  { %7780 = vmatprep.mubr.msk.f32.mxu1 %vm191_vm0, %v801_v15  ;;  %8865 = vmatpush1.bf16.msra.mxu1 %v13634_v19 }
 0x263   :  { %8891 = vmatprep.subr.bf16.mxu1 %v9850_v35 }
 0x265   :  { %7781 = vmatmul.mubr.msk.f32.gmra.mrb[76].mxu1 %vm191_vm0, %v801_v15  ;;  %v50_v15 = vld [vmem:[%s13458_s11 + $0x28] sm:$0xff] }
 0x266   :  { %7782 = vmatprep.mubr.msk.f32.mxu1 %vm191_vm0, %v802_v8 }
 0x269   :  { %7783 = vmatmul.mubr.msk.f32.gmra.mrb[78].mxu1 %vm191_vm0, %v802_v8 }
 0x26a   :  { %7784 = vmatprep.mubr.msk.f32.mxu1 %vm191_vm0, %v803_v11 }
 0x26d   :  { %7785 = vmatmul.mubr.msk.f32.gmra.mrb[80].mxu1 %vm191_vm0, %v803_v11 }
 0x26e   :  { %7786 = vmatprep.mubr.msk.f32.mxu1 %vm191_vm0, %v804_v60 }
 0x271   :  { %7787 = vmatmul.mubr.msk.f32.gmra.mrb[82].mxu1 %vm191_vm0, %v804_v60 }
 0x272   :  { %7788 = vmatprep.mubr.msk.f32.mxu1 %vm191_vm0, %v805_v4 }
 0x275   :  { %7789 = vmatmul.mubr.msk.f32.gmra.mrb[84].mxu1 %vm191_vm0, %v805_v4 }
 0x276   :  { %7790 = vmatprep.mubr.msk.f32.mxu1 %vm191_vm0, %v806_v52 }
 0x279   :  { %7791 = vmatmul.mubr.msk.f32.gmra.mrb[86].mxu1 %vm191_vm0, %v806_v52  ;;  %v54_v52 = vld [vmem:[%s13458_s11 + $0x48] sm:$0xff] }
 0x27a   :  { %7792 = vmatprep.mubr.msk.f32.mxu1 %vm191_vm0, %v807_v24 }
 0x27d   :  { %7793 = vmatmul.mubr.msk.f32.gmra.mrb[88].mxu1 %vm191_vm0, %v807_v24 }
 0x27e   :  { %7794 = vmatprep.mubr.msk.f32.mxu1 %vm191_vm0, %v808_v14 }
 0x281   :  { %7795 = vmatmul.mubr.msk.f32.gmra.mrb[90].mxu1 %vm191_vm0, %v808_v14  ;;  %v55_v14 = vld [vmem:[%s13458_s11 + $0x50] sm:$0xff] }
 0x282   :  { %7796 = vmatprep.mubr.msk.f32.mxu1 %vm191_vm0, %v809_v34 }
 0x285   :  { %7797 = vmatmul.mubr.msk.f32.gmra.mrb[92].mxu1 %vm191_vm0, %v809_v34 }
 0x286   :  { %7798 = vmatprep.mubr.msk.f32.mxu1 %vm191_vm0, %v810_v33 }
 0x289   :  { %7799 = vmatmul.mubr.msk.f32.gmra.mrb[94].mxu1 %vm191_vm0, %v810_v33 }
 0x28a   :  { %7800 = vmatprep.mubr.msk.f32.mxu1 %vm191_vm0, %v811_v41 }
 0x28d   :  { %7801 = vmatmul.mubr.msk.f32.gmra.mrb[96].mxu1 %vm191_vm0, %v811_v41 }
 0x28e   :  { %7802 = vmatprep.mubr.msk.f32.mxu1 %vm191_vm0, %v812_v57 }
 0x291   :  { %7803 = vmatmul.mubr.msk.f32.gmra.mrb[98].mxu1 %vm191_vm0, %v812_v57 }
 0x292   :  { %7804 = vmatprep.mubr.msk.f32.mxu1 %vm191_vm0, %v813_v10 }
 0x295   :  { %7805 = vmatmul.mubr.msk.f32.gmra.mrb[100].mxu1 %vm191_vm0, %v813_v10  ;;  %v60_v10 = vld [vmem:[%s13458_s11 + $0x78] sm:$0xff] }
 0x296   :  { %7806 = vmatprep.mubr.msk.f32.mxu1 %vm191_vm0, %v814_v30 }
 0x299   :  { %7807 = vmatmul.mubr.msk.f32.gmra.mrb[102].mxu1 %vm191_vm0, %v814_v30 }
 0x29a   :  { %7808 = vmatprep.mubr.msk.f32.mxu1 %vm191_vm0, %v815_v48 }
 0x29d   :  { %7809 = vmatmul.mubr.msk.f32.gmra.mrb[104].mxu1 %vm191_vm0, %v815_v48  ;;  %v61_v48 = vld [vmem:[%s13458_s11 + $0x80] sm:$0xff] }
 0x29e   :  { %7810 = vmatprep.mubr.msk.f32.mxu1 %vm191_vm0, %v816_v29 }
 0x2a1   :  { %7811 = vmatmul.mubr.msk.f32.gmra.mrb[106].mxu1 %vm191_vm0, %v816_v29 }
 0x2f8   :  { %v1985_v39 = vpop.f32.mrb[44].mxu1 }
 0x2f9   :  { %v1987_v32 = vpop.f32.mrb[45].mxu1  ;;  %v10862_v56 = vadd.f32 %v1985_v39, %v45_v6 }
 0x2fa   :  { %v10864_v61 = vadd.f32 %v1987_v32, %v46_v49  ;;  %v63_v32 = vld [vmem:[%s13458_s11 + $0x90] sm:$0xff] }
 0x2fc   :  { %v1991_v62 = vpop.f32.mrb[46].mxu1  ;;  %v2176_v13 = vmax.f32 %v10862_v56, %v10864_v61 }
 0x2fd   :  { %v1993_v5 = vpop.f32.mrb[47].mxu1  ;;  %v10883_v59 = vadd.f32 %v1991_v62, %v47_v36  ;;  %v64_v36 = vld [vmem:[%s13458_s11 + $0x98] sm:$0xff] }
 0x2fe   :  { %2177 = vmax.xlane.f32.xlu0 %v2176_v13  ;;  %v10886_v12 = vadd.f32 %v1993_v5, %v48_v23 }
 0x300   :  { %v1997_v1 = vpop.f32.mrb[48].mxu1  ;;  %v2179_v19 = vmax.f32 %v10883_v59, %v10886_v12 }
 0x301   :  { %v1999_v8 = vpop.f32.mrb[49].mxu1  ;;  %v10897_v63 = vadd.f32 %v1997_v1, %v49_v3  ;;  %v66_v1 = vld [vmem:[%s13458_s11 + $0xa8] sm:$0xff] }
 0x302   :  { %2180 = vmax.xlane.f32.xlu0 %v2179_v19  ;;  %v10899_v11 = vadd.f32 %v1999_v8, %v50_v15  ;;  %v65_v15 = vld [vmem:[%s13458_s11 + $0xa0] sm:$0xff] }
 0x304   :  { %v2003_v60 = vpop.f32.mrb[50].mxu1  ;;  %v2182_v28 = vmax.f32 %v10897_v63, %v10899_v11 }
 0x305   :  { %v2005_v31 = vpop.f32.mrb[51].mxu1  ;;  %v10909_v4 = vadd.f32 %v2003_v60, %v51_v21 }
 0x306   :  { %2183 = vmax.xlane.f32.xlu1 %v2182_v28  ;;  %v10911_v46 = vadd.f32 %v2005_v31, %v52_v2  ;;  %v67_v28 = vld [vmem:[%s13458_s11 + $0xb0] sm:$0xff]  ;;  %v68_v31 = vld [vmem:[%s13458_s11 + $0xb8] sm:$0xff] }
 0x308   :  { %v2009_v44 = vpop.f32.mrb[52].mxu1  ;;  %v2185_v16 = vmax.f32 %v10909_v4, %v10911_v46 }
 0x309   :  { %v2011_v24 = vpop.f32.mrb[53].mxu1  ;;  %v10921_v0 = vadd.f32 %v2009_v44, %v53_v22 }
 0x30a   :  { %2186 = vmax.xlane.f32.xlu1 %v2185_v16  ;;  %v10923_v26 = vadd.f32 %v2011_v24, %v54_v52 }
 0x30c   :  { %v2015_v27 = vpop.f32.mrb[54].mxu1  ;;  %v2188_v34 = vmax.f32 %v10921_v0, %v10923_v26 }
 0x30d   :  { %v2017_v45 = vpop.f32.mrb[55].mxu1  ;;  %v10933_v42 = vadd.f32 %v2015_v27, %v55_v14  ;;  %v69_v14 = vld [vmem:[%s13458_s11 + $0xc0] sm:$0xff] }
 0x30e   :  { %2189 = vmax.xlane.f32.xlu0 %v2188_v34  ;;  %v10935_v33 = vadd.f32 %v2017_v45, %v56_v25  ;;  %v70_v25 = vld [vmem:[%s13458_s11 + $0xc8] sm:$0xff] }
 0x310   :  { %v2021_v41 = vpop.f32.mrb[56].mxu1  ;;  %v2191_v37 = vmax.f32 %v10933_v42, %v10935_v33 }
 0x311   :  { %v2023_v50 = vpop.f32.mrb[57].mxu1  ;;  %v10945_v57 = vadd.f32 %v2021_v41, %v57_v18  ;;  %v71_v41 = vld [vmem:[%s13458_s11 + $0xd0] sm:$0xff] }
 0x312   :  { %2192 = vmax.xlane.f32.xlu1 %v2191_v37  ;;  %v10947_v7 = vadd.f32 %v2023_v50, %v58_v47  ;;  %v72_v37 = vld [vmem:[%s13458_s11 + $0xd8] sm:$0xff] }
 0x314   :  { %v2027_v58 = vpop.f32.mrb[58].mxu1  ;;  %v2194_v55 = vmax.f32 %v10945_v57, %v10947_v7 }
 0x315   :  { %v2029_v30 = vpop.f32.mrb[59].mxu1  ;;  %v10957_v40 = vadd.f32 %v2027_v58, %v59_v43 }
 0x316   :  { %2195 = vmax.xlane.f32.xlu0 %v2194_v55  ;;  %v10959_v53 = vadd.f32 %v2029_v30, %v60_v10  ;;  %v73_v30 = vld [vmem:[%s13458_s11 + $0xe0] sm:$0xff] }
 0x318   :  { %v2033_v51 = vpop.f32.mrb[60].mxu1  ;;  %v2197_v29 = vmax.f32 %v10957_v40, %v10959_v53 }
 0x319   :  { %v2035_v6 = vpop.f32.mrb[61].mxu1  ;;  %v10969_v49 = vadd.f32 %v2033_v51, %v61_v48  ;;  %v74_v48 = vld [vmem:[%s13458_s11 + $0xe8] sm:$0xff] }
 0x31a   :  { %2198 = vmax.xlane.f32.xlu1 %v2197_v29  ;;  %v10971_v39 = vadd.f32 %v2035_v6, %v62_v38 }
 0x31c   :  { %v2039_v23 = vpop.f32.mrb[62].mxu1  ;;  %v2200_v62 = vmax.f32 %v10969_v49, %v10971_v39 }
 0x31d   :  { %v2041_v13 = vpop.f32.mrb[63].mxu1  ;;  %v10981_v5 = vadd.f32 %v2039_v23, %v63_v32  ;;  %v76_v23 = vld [vmem:[%s13458_s11 + $0xf8] sm:$0xff] }
 0x31e   :  { %2201 = vmax.xlane.f32.xlu0 %v2200_v62  ;;  %v10983_v3 = vadd.f32 %v2041_v13, %v64_v36  ;;  %v75_v36 = vld [vmem:[%s13458_s11 + $0xf0] sm:$0xff] }
 0x320   :  { %v2045_v19 = vpop.f32.mrb[64].mxu1  ;;  %v2203_v8 = vmax.f32 %v10981_v5, %v10983_v3 }
 0x321   :  { %v2047_v21 = vpop.f32.mrb[65].mxu1  ;;  %v10993_v2 = vadd.f32 %v2045_v19, %v65_v15 }
 0x322   :  { %2204 = vmax.xlane.f32.xlu1 %v2203_v8  ;;  %v10995_v60 = vadd.f32 %v2047_v21, %v66_v1  ;;  %v77_v8 = vld [vmem:[%s13458_s11 + $0x100] sm:$0xff]  ;;  %v78_v21 = vld [vmem:[%s13458_s11 + $0x108] sm:$0xff] }
 0x324   :  { %v2051_v22 = vpop.f32.mrb[66].mxu1  ;;  %v2206_v52 = vmax.f32 %v10993_v2, %v10995_v60 }
 0x325   :  { %v2053_v44 = vpop.f32.mrb[67].mxu1  ;;  %v11005_v16 = vadd.f32 %v2051_v22, %v67_v28 }
 0x326   :  { %2207 = vmax.xlane.f32.xlu0 %v2206_v52  ;;  %v11007_v24 = vadd.f32 %v2053_v44, %v68_v31 }
 0x328   :  { %v2057_v27 = vpop.f32.mrb[68].mxu1  ;;  %v2209_v34 = vmax.f32 %v11005_v16, %v11007_v24 }
 0x329   :  { %v2059_v45 = vpop.f32.mrb[69].mxu1  ;;  %v11017_v18 = vadd.f32 %v2057_v27, %v69_v14  ;;  %v79_v14 = vld [vmem:[%s13458_s11 + $0x110] sm:$0xff] }
 0x32a   :  { %2210 = vmax.xlane.f32.xlu1 %v2209_v34  ;;  %v11019_v47 = vadd.f32 %v2059_v45, %v70_v25  ;;  %v80_v25 = vld [vmem:[%s13458_s11 + $0x118] sm:$0xff] }
 0x32c   :  { %v2063_v50 = vpop.f32.mrb[70].mxu1  ;;  %v2212_v43 = vmax.f32 %v11017_v18, %v11019_v47 }
 0x32d   :  { %v2065_v10 = vpop.f32.mrb[71].mxu1  ;;  %v11029_v58 = vadd.f32 %v2063_v50, %v71_v41  ;;  %v81_v50 = vld [vmem:[%s13458_s11 + $0x120] sm:$0xff] }
 0x32e   :  { %2213 = vmax.xlane.f32.xlu0 %v2212_v43  ;;  %v11031_v55 = vadd.f32 %v2065_v10, %v72_v37  ;;  %v82_v43 = vld [vmem:[%s13458_s11 + $0x128] sm:$0xff] }
 0x330   :  { %v2069_v38 = vpop.f32.mrb[72].mxu1  ;;  %v2215_v51 = vmax.f32 %v11029_v58, %v11031_v55 }
 0x331   :  { %v2071_v29 = vpop.f32.mrb[73].mxu1  ;;  %v11041_v6 = vadd.f32 %v2069_v38, %v73_v30 }
 0x332   :  { %2216 = vmax.xlane.f32.xlu1 %v2215_v51  ;;  %v11043_v32 = vadd.f32 %v2071_v29, %v74_v48  ;;  %v83_v29 = vld [vmem:[%s13458_s11 + $0x130] sm:$0xff] }
 0x334   :  { %v2075_v62 = vpop.f32.mrb[74].mxu1  ;;  %v2218_v13 = vmax.f32 %v11041_v6, %v11043_v32 }
 0x335   :  { %v2077_v15 = vpop.f32.mrb[75].mxu1  ;;  %v11053_v1 = vadd.f32 %v2075_v62, %v75_v36  ;;  %v84_v36 = vld [vmem:[%s13458_s11 + $0x138] sm:$0xff] }
 0x336   :  { %2219 = vmax.xlane.f32.xlu0 %v2218_v13  ;;  %v11055_v19 = vadd.f32 %v2077_v15, %v76_v23 }
 0x338   :  { %v2081_v28 = vpop.f32.mrb[76].mxu1  ;;  %v2221_v31 = vmax.f32 %v11053_v1, %v11055_v19 }
 0x339   :  { %v2083_v22 = vpop.f32.mrb[77].mxu1  ;;  %v11065_v52 = vadd.f32 %v2081_v28, %v77_v8  ;;  %v86_v28 = vld [vmem:[%s13458_s11 + $0x148] sm:$0xff] }
 0x33a   :  { %2222 = vmax.xlane.f32.xlu1 %v2221_v31  ;;  %v11067_v44 = vadd.f32 %v2083_v22, %v78_v21  ;;  %v85_v21 = vld [vmem:[%s13458_s11 + $0x140] sm:$0xff] }
 0x33c   :  { %v2087_v27 = vpop.f32.mrb[78].mxu1  ;;  %v2224_v34 = vmax.f32 %v11065_v52, %v11067_v44 }
 0x33d   :  { %v2089_v45 = vpop.f32.mrb[79].mxu1  ;;  %v11077_v41 = vadd.f32 %v2087_v27, %v79_v14  ;;  %v87_v27 = vld [vmem:[%s13458_s11 + $0x150] sm:$0xff] }
 0x33e   :  { %2225 = vmax.xlane.f32.xlu0 %v2224_v34  ;;  %v11079_v37 = vadd.f32 %v2089_v45, %v80_v25  ;;  %v88_v45 = vld [vmem:[%s13458_s11 + $0x158] sm:$0xff] }
 0x340   :  { %v2093_v10 = vpop.f32.mrb[80].mxu1  ;;  %v2227_v30 = vmax.f32 %v11077_v41, %v11079_v37 }
 0x341   :  { %v2095_v48 = vpop.f32.mrb[81].mxu1  ;;  %v11089_v38 = vadd.f32 %v2093_v10, %v81_v50 }
 0x342   :  { %2228 = vmax.xlane.f32.xlu1 %v2227_v30  ;;  %v11091_v51 = vadd.f32 %v2095_v48, %v82_v43 }
 0x344   :  { %v2099_v23 = vpop.f32.mrb[82].mxu1  ;;  %v2230_v62 = vmax.f32 %v11089_v38, %v11091_v51 }
 0x345   :  { %v2101_v13 = vpop.f32.mrb[83].mxu1  ;;  %v11101_v15 = vadd.f32 %v2099_v23, %v83_v29  ;;  %v89_v29 = vld [vmem:[%s13458_s11 + $0x160] sm:$0xff] }
 0x346   :  { %2231 = vmax.xlane.f32.xlu0 %v2230_v62  ;;  %v11103_v8 = vadd.f32 %v2101_v13, %v84_v36  ;;  %v90_v36 = vld [vmem:[%s13458_s11 + $0x168] sm:$0xff] }
 0x348   :  { %v2105_v31 = vpop.f32.mrb[84].mxu1  ;;  %v2233_v22 = vmax.f32 %v11101_v15, %v11103_v8 }
 0x349   :  { %v2107_v14 = vpop.f32.mrb[85].mxu1  ;;  %v11113_v25 = vadd.f32 %v2105_v31, %v85_v21  ;;  %v91_v31 = vld [vmem:[%s13458_s11 + $0x170] sm:$0xff] }
 0x34a   :  { %2234 = vmax.xlane.f32.xlu1 %v2233_v22  ;;  %v11118_v34 = vadd.f32 %v2107_v14, %v86_v28  ;;  %v92_v22 = vld [vmem:[%s13458_s11 + $0x178] sm:$0xff] }
 0x34c   :  { %v2111_v50 = vpop.f32.mrb[86].mxu1  ;;  %v2236_v43 = vmax.f32 %v11113_v25, %v11118_v34 }
 0x34d   :  { %v11125_v10 = vadd.f32 %v2111_v50, %v87_v27  ;;  %v2113_v30 = vpop.f32.mrb[87].mxu1 }
 0x34e   :  { %v11127_v48 = vadd.f32 %v2113_v30, %v88_v45  ;;  %2237 = vmax.xlane.f32.xlu0 %v2236_v43  ;;  %v93_v30 = vld [vmem:[%s13458_s11 + $0x180] sm:$0xff] }
 0x350   :  { %v2117_v23 = vpop.f32.mrb[88].mxu1  ;;  %v2239_v62 = vmax.f32 %v11125_v10, %v11127_v48 }
 0x351   :  { %v11137_v13 = vadd.f32 %v2117_v23, %v89_v29  ;;  %v2119_v21 = vpop.f32.mrb[89].mxu1  ;;  %v94_v29 = vld [vmem:[%s13458_s11 + $0x188] sm:$0xff] }
 0x352   :  { %v11139_v28 = vadd.f32 %v2119_v21, %v90_v36  ;;  %2240 = vmax.xlane.f32.xlu1 %v2239_v62 }
 0x354   :  { %v2123_v14 = vpop.f32.mrb[90].mxu1  ;;  %v2242_v27 = vmax.f32 %v11137_v13, %v11139_v28 }
 0x355   :  { %v11149_v45 = vadd.f32 %v2123_v14, %v91_v31  ;;  %v2125_v50 = vpop.f32.mrb[91].mxu1  ;;  %v96_v14 = vld [vmem:[%s13458_s11 + $0x198] sm:$0xff] }
 0x356   :  { %v11151_v43 = vadd.f32 %v2125_v50, %v92_v22  ;;  %2243 = vmax.xlane.f32.xlu0 %v2242_v27  ;;  %v95_v22 = vld [vmem:[%s13458_s11 + $0x190] sm:$0xff] }
 0x358   :  { %v2129_v36 = vpop.f32.mrb[92].mxu1  ;;  %v2245_v23 = vmax.f32 %v11149_v45, %v11151_v43 }
 0x359   :  { %v11161_v62 = vadd.f32 %v2129_v36, %v93_v30  ;;  %v2131_v21 = vpop.f32.mrb[93].mxu1 }
 0x35a   :  { %v11163_v31 = vadd.f32 %v2131_v21, %v94_v29  ;;  %2246 = vmax.xlane.f32.xlu1 %v2245_v23  ;;  %v97_v29 = vld [vmem:[%s13458_s11 + $0x1a0] sm:$0xff]  ;;  %v98_v23 = vld [vmem:[%s13458_s11 + $0x1a8] sm:$0xff] }
 0x35b   :  { %13649 = vst [vmem:[#allocation32_spill] sm:$0xff] %v11161_v62 }
 0x35c   :  { %13650 = vst [vmem:[#allocation30_spill] sm:$0xff] %v11163_v31  ;;  %v2135_v27 = vpop.f32.mrb[94].mxu1  ;;  %v2248_v50 = vmax.f32 %v11161_v62, %v11163_v31 }
 0x35d   :  { %v11173_v17 = vadd.f32 %v2135_v27, %v95_v22  ;;  %v2137_v30 = vpop.f32.mrb[95].mxu1 }
 0x35e   :  { %v11175_v36 = vadd.f32 %v2137_v30, %v96_v14  ;;  %2249 = vmax.xlane.f32.xlu0 %v2248_v50  ;;  %v99_v14 = vld [vmem:[%s13458_s11 + $0x1b0] sm:$0xff]  ;;  %v100_v50 = vld [vmem:[%s13458_s11 + $0x1b8] sm:$0xff] }
 0x35f   :  { %13651 = vst [vmem:[#allocation36_spill] sm:$0xff] %v11173_v17 }
 0x360   :  { %13652 = vst [vmem:[#allocation34_spill] sm:$0xff] %v11175_v36  ;;  %v2141_v21 = vpop.f32.mrb[96].mxu1  ;;  %v2251_v20 = vmax.f32 %v11173_v17, %v11175_v36 }
 0x361   :  { %v11185_v35 = vadd.f32 %v2141_v21, %v97_v29  ;;  %v2143_v22 = vpop.f32.mrb[97].mxu1 }
 0x362   :  { %v11187_v27 = vadd.f32 %v2143_v22, %v98_v23  ;;  %2252 = vmax.xlane.f32.xlu1 %v2251_v20  ;;  %v101_v20 = vld [vmem:[%s13458_s11 + $0x1c0] sm:$0xff]  ;;  %v102_v23 = vld [vmem:[%s13458_s11 + $0x1c8] sm:$0xff] }
 0x363   :  { %13653 = vst [vmem:[#allocation33_spill] sm:$0xff] %v11185_v35 }
 0x364   :  { %13654 = vst [vmem:[#allocation31_spill] sm:$0xff] %v11187_v27  ;;  %v2147_v30 = vpop.f32.mrb[98].mxu1  ;;  %v2254_v31 = vmax.f32 %v11185_v35, %v11187_v27 }
 0x365   :  { %v11197_v62 = vadd.f32 %v2147_v30, %v99_v14  ;;  %v2149_v29 = vpop.f32.mrb[99].mxu1 }
 0x366   :  { %v11199_v21 = vadd.f32 %v2149_v29, %v100_v50  ;;  %2255 = vmax.xlane.f32.xlu0 %v2254_v31  ;;  %v103_v31 = vld [vmem:[%s13458_s11 + $0x1d0] sm:$0xff]  ;;  %v104_v50 = vld [vmem:[%s13458_s11 + $0x1d8] sm:$0xff] }
 0x367   :  { %13655 = vst [vmem:[#allocation37_spill] sm:$0xff] %v11197_v62 }
 0x368   :  { %13656 = vst [vmem:[#allocation35_spill] sm:$0xff] %v11199_v21  ;;  %v2153_v22 = vpop.f32.mrb[100].mxu1  ;;  %v2257_v36 = vmax.f32 %v11197_v62, %v11199_v21 }
 0x369   :  { %v11209_v17 = vadd.f32 %v2153_v22, %v101_v20  ;;  %v2155_v14 = vpop.f32.mrb[101].mxu1 }
 0x36a   :  { %v11211_v30 = vadd.f32 %v2155_v14, %v102_v23  ;;  %2258 = vmax.xlane.f32.xlu1 %v2257_v36  ;;  %v105_v36 = vld [vmem:[%s13458_s11 + $0x1e0] sm:$0xff]  ;;  %v106_v23 = vld [vmem:[%s13458_s11 + $0x1e8] sm:$0xff] }
 0x36b   :  { %13657 = vst [vmem:[#allocation39_spill] sm:$0xff] %v11209_v17 }
 0x36c   :  { %13658 = vst [vmem:[#allocation38_spill] sm:$0xff] %v11211_v30  ;;  %v2159_v29 = vpop.f32.mrb[102].mxu1  ;;  %v2260_v27 = vmax.f32 %v11209_v17, %v11211_v30 }
 0x36d   :  { %v11221_v35 = vadd.f32 %v2159_v29, %v103_v31  ;;  %v2161_v20 = vpop.f32.mrb[103].mxu1 }
 0x36e   :  { %v11223_v22 = vadd.f32 %v2161_v20, %v104_v50  ;;  %2261 = vmax.xlane.f32.xlu0 %v2260_v27  ;;  %v107_v27 = vld [vmem:[%s13458_s11 + $0x1f0] sm:$0xff]  ;;  %v108_v50 = vld [vmem:[%s13458_s11 + $0x1f8] sm:$0xff] }
 0x370   :  { %13659 = vst [vmem:[#allocation41_spill] sm:$0xff] %v11223_v22  ;;  %v2165_v14 = vpop.f32.mrb[104].mxu1  ;;  %v2263_v21 = vmax.f32 %v11221_v35, %v11223_v22 }
 0x371   :  { %v11233_v62 = vadd.f32 %v2165_v14, %v105_v36  ;;  %v2167_v31 = vpop.f32.mrb[105].mxu1 }
 0x372   :  { %v11235_v29 = vadd.f32 %v2167_v31, %v106_v23  ;;  %2264 = vmax.xlane.f32.xlu1 %v2263_v21 }
 0x374   :  { %13660 = vst [vmem:[#allocation40_spill] sm:$0xff] %v11235_v29  ;;  %v2171_v20 = vpop.f32.mrb[106].mxu1  ;;  %v2266_v30 = vmax.f32 %v11233_v62, %v11235_v29 }
 0x375   :  { %v11245_v17 = vadd.f32 %v2171_v20, %v107_v27  ;;  %v2173_v36 = vpop.f32.mrb[107].mxu1 }
 0x376   :  { %v11247_v14 = vadd.f32 %v2173_v36, %v108_v50  ;;  %2267 = vmax.xlane.f32.xlu0 %v2266_v30 }
 0x377   :  { %13661 = vst [vmem:[#allocation43_spill] sm:$0xff] %v11245_v17 }
 0x378   :  { %13662 = vst [vmem:[#allocation44_spill] sm:$0xff] %v11247_v14  ;;  %v2269_v21 = vmax.f32 %v11245_v17, %v11247_v14 }
 0x37a   :  { %2270 = vmax.xlane.f32.xlu1 %v2269_v21 }
 0x38b   :  { %v2178_v23 = vpop.xlane.xlu0 %2177 }
 0x38c   :  { %v2272_v31 = vsub.f32 %v10862_v56, %v2178_v23  ;;  %v2273_v22 = vsub.f32 %v10864_v61, %v2178_v23 }
 0x38e   :  { %v2336_v29 = vmul.f32 1.442695, %v2272_v31  ;;  %v2338_v27 = vmul.f32 1.442695, %v2273_v22 }
 0x38f   :  { %v2181_v20 = vpop.xlane.xlu0 %2180 }
 0x390   :  { %9129 = vpow2.f32 %v2336_v29  ;;  %v2274_v50 = vsub.f32 %v10883_v59, %v2181_v20  ;;  %v2275_v30 = vsub.f32 %v10886_v12, %v2181_v20 }
 0x391   :  { %9131 = vpow2.f32 %v2338_v27 }
 0x392   :  { %v2340_v36 = vmul.f32 1.442695, %v2274_v50  ;;  %v2342_v21 = vmul.f32 1.442695, %v2275_v30  ;;  %v13663_v50 = vld [vmem:[#allocation5_spill] sm:$0xff] }
 0x393   :  { %v2184_v14 = vpop.xlane.xlu1 %2183 }
 0x394   :  { %9133 = vpow2.f32 %v2340_v36  ;;  %v2276_v9 = vsub.f32 %v10897_v63, %v2184_v14  ;;  %v2277_v17 = vsub.f32 %v10899_v11, %v2184_v14 }
 0x395   :  { %9135 = vpow2.f32 %v2342_v21 }
 0x396   :  { %v2344_v56 = vmul.f32 1.442695, %v2276_v9  ;;  %v2346_v61 = vmul.f32 1.442695, %v2277_v17 }
 0x397   :  { %v2187_v23 = vpop.xlane.xlu1 %2186 }
 0x398   :  { %9137 = vpow2.f32 %v2344_v56  ;;  %v2278_v22 = vsub.f32 %v10909_v4, %v2187_v23  ;;  %v2279_v59 = vsub.f32 %v10911_v46, %v2187_v23 }
 0x399   :  { %9139 = vpow2.f32 %v2346_v61 }
 0x39a   :  { %v11261_v12 = vpop.eup %9129  ;;  %v2348_v29 = vmul.f32 1.442695, %v2278_v22  ;;  %v2350_v31 = vmul.f32 1.442695, %v2279_v59 }
 0x39b   :  { %v11263_v27 = vpop.eup %9131  ;;  %v2190_v20 = vpop.xlane.xlu0 %2189 }
 0x39c   :  { %9141 = vpow2.f32 %v2348_v29  ;;  %2539 = vmatprep.mubr.f32.mxu0 %v11263_v27  ;;  %v2280_v9 = vsub.f32 %v10921_v0, %v2190_v20  ;;  %v2281_v17 = vsub.f32 %v10923_v26, %v2190_v20 }
 0x39d   :  { %9143 = vpow2.f32 %v2350_v31  ;;  %2540 = vmatmul.mubr.f32.vlgmr.msra.gmra.mrb[60].mxu0 %v11261_v12 }
 0x39e   :  { %v11269_v63 = vpop.eup %9133  ;;  %v2352_v11 = vmul.f32 1.442695, %v2280_v9  ;;  %v2354_v4 = vmul.f32 1.442695, %v2281_v17  ;;  %7298 = vmatpush1.msk.msra.mxu0 %vm2829_vm3, %v10872_v54 }
 0x39f   :  { %v11273_v46 = vpop.eup %9135  ;;  %v2193_v14 = vpop.xlane.xlu1 %2192  ;;  %8867 = vmatprep.subr.bf16.mxu0 %v13663_v50 }
 0x3a0   :  { %9145 = vpow2.f32 %v2352_v11  ;;  %v2282_v0 = vsub.f32 %v10933_v42, %v2193_v14  ;;  %v2283_v26 = vsub.f32 %v10935_v33, %v2193_v14  ;;  %2544 = vmatprep.mubr.f32.mxu0 %v11273_v46 }
 0x3a1   :  { %9147 = vpow2.f32 %v2354_v4  ;;  %2545 = vmatmul.mubr.f32.gmra.mrb[62].mxu0 %v11269_v63 }
 0x3a2   :  { %v11280_v30 = vpop.eup %9137  ;;  %v2356_v36 = vmul.f32 1.442695, %v2282_v0  ;;  %v2358_v21 = vmul.f32 1.442695, %v2283_v26 }
 0x3a3   :  { %v11282_v54 = vpop.eup %9139  ;;  %v2196_v56 = vpop.xlane.xlu0 %2195 }
 0x3a4   :  { %9149 = vpow2.f32 %v2356_v36  ;;  %2549 = vmatprep.mubr.f32.mxu0 %v11282_v54  ;;  %v2284_v61 = vsub.f32 %v10945_v57, %v2196_v56  ;;  %v2285_v42 = vsub.f32 %v10947_v7, %v2196_v56 }
 0x3a5   :  { %9151 = vpow2.f32 %v2358_v21  ;;  %2550 = vmatmul.mubr.f32.gmra.mrb[64].mxu0 %v11280_v30 }
 0x3a6   :  { %v11288_v33 = vpop.eup %9141  ;;  %v2360_v23 = vmul.f32 1.442695, %v2284_v61  ;;  %v2362_v22 = vmul.f32 1.442695, %v2285_v42 }
 0x3a7   :  { %v11290_v59 = vpop.eup %9143  ;;  %v2199_v29 = vpop.xlane.xlu1 %2198 }
 0x3a8   :  { %9153 = vpow2.f32 %v2360_v23  ;;  %v2286_v31 = vsub.f32 %v10957_v40, %v2199_v29  ;;  %v2287_v20 = vsub.f32 %v10959_v53, %v2199_v29  ;;  %2554 = vmatprep.mubr.f32.mxu0 %v11290_v59 }
 0x3a9   :  { %9155 = vpow2.f32 %v2362_v22  ;;  %2555 = vmatmul.mubr.f32.gmra.mrb[66].mxu0 %v11288_v33 }
 0x3aa   :  { %v11296_v57 = vpop.eup %9145  ;;  %v2364_v7 = vmul.f32 1.442695, %v2286_v31  ;;  %v2366_v9 = vmul.f32 1.442695, %v2287_v20 }
 0x3ab   :  { %v11298_v17 = vpop.eup %9147  ;;  %v2202_v11 = vpop.xlane.xlu0 %2201 }
 0x3ac   :  { %9157 = vpow2.f32 %v2364_v7  ;;  %2559 = vmatprep.mubr.f32.mxu0 %v11298_v17  ;;  %v2288_v4 = vsub.f32 %v10969_v49, %v2202_v11  ;;  %v2289_v40 = vsub.f32 %v10971_v39, %v2202_v11 }
 0x3ad   :  { %9159 = vpow2.f32 %v2366_v9  ;;  %2560 = vmatmul.mubr.f32.gmra.mrb[68].mxu0 %v11296_v57 }
 0x3ae   :  { %v11304_v53 = vpop.eup %9149  ;;  %v2368_v14 = vmul.f32 1.442695, %v2288_v4  ;;  %v2370_v0 = vmul.f32 1.442695, %v2289_v40 }
 0x3af   :  { %v11306_v26 = vpop.eup %9151  ;;  %v2205_v36 = vpop.xlane.xlu1 %2204 }
 0x3b0   :  { %9161 = vpow2.f32 %v2368_v14  ;;  %v2290_v21 = vsub.f32 %v10981_v5, %v2205_v36  ;;  %v2291_v56 = vsub.f32 %v10983_v3, %v2205_v36  ;;  %2564 = vmatprep.mubr.f32.mxu0 %v11306_v26 }
 0x3b1   :  { %9163 = vpow2.f32 %v2370_v0  ;;  %2565 = vmatmul.mubr.f32.gmra.mrb[70].mxu0 %v11304_v53 }
 0x3b2   :  { %v11312_v49 = vpop.eup %9153  ;;  %v2372_v39 = vmul.f32 1.442695, %v2290_v21  ;;  %v2374_v61 = vmul.f32 1.442695, %v2291_v56 }
 0x3b3   :  { %v11314_v42 = vpop.eup %9155  ;;  %v2208_v23 = vpop.xlane.xlu0 %2207 }
 0x3b4   :  { %9165 = vpow2.f32 %v2372_v39  ;;  %2569 = vmatprep.mubr.f32.mxu0 %v11314_v42  ;;  %v2292_v22 = vsub.f32 %v10993_v2, %v2208_v23  ;;  %v2293_v5 = vsub.f32 %v10995_v60, %v2208_v23 }
 0x3b5   :  { %9167 = vpow2.f32 %v2374_v61  ;;  %2570 = vmatmul.mubr.f32.gmra.mrb[72].mxu0 %v11312_v49 }
 0x3b6   :  { %v11320_v3 = vpop.eup %9157  ;;  %v2376_v29 = vmul.f32 1.442695, %v2292_v22  ;;  %v2378_v31 = vmul.f32 1.442695, %v2293_v5 }
 0x3b7   :  { %v11322_v20 = vpop.eup %9159  ;;  %v2211_v7 = vpop.xlane.xlu1 %2210 }
 0x3b8   :  { %9169 = vpow2.f32 %v2376_v29  ;;  %v2294_v9 = vsub.f32 %v11005_v16, %v2211_v7  ;;  %v2295_v11 = vsub.f32 %v11007_v24, %v2211_v7  ;;  %2574 = vmatprep.mubr.f32.mxu0 %v11322_v20 }
 0x3b9   :  { %9171 = vpow2.f32 %v2378_v31  ;;  %2575 = vmatmul.mubr.f32.gmra.mrb[74].mxu0 %v11320_v3 }
 0x3ba   :  { %v11328_v2 = vpop.eup %9161  ;;  %v2380_v60 = vmul.f32 1.442695, %v2294_v9  ;;  %v2382_v4 = vmul.f32 1.442695, %v2295_v11 }
 0x3bb   :  { %v11330_v40 = vpop.eup %9163  ;;  %v2214_v14 = vpop.xlane.xlu0 %2213 }
 0x3bc   :  { %9173 = vpow2.f32 %v2380_v60  ;;  %2579 = vmatprep.mubr.f32.mxu0 %v11330_v40  ;;  %v2296_v0 = vsub.f32 %v11017_v18, %v2214_v14  ;;  %v2297_v16 = vsub.f32 %v11019_v47, %v2214_v14 }
 0x3bd   :  { %9175 = vpow2.f32 %v2382_v4  ;;  %2580 = vmatmul.mubr.f32.gmra.mrb[76].mxu0 %v11328_v2 }
 0x3be   :  { %v11336_v24 = vpop.eup %9165  ;;  %v2384_v36 = vmul.f32 1.442695, %v2296_v0  ;;  %v2386_v21 = vmul.f32 1.442695, %v2297_v16 }
 0x3bf   :  { %v11338_v56 = vpop.eup %9167  ;;  %v2217_v39 = vpop.xlane.xlu1 %2216 }
 0x3c0   :  { %9177 = vpow2.f32 %v2384_v36  ;;  %v2298_v61 = vsub.f32 %v11029_v58, %v2217_v39  ;;  %v2299_v23 = vsub.f32 %v11031_v55, %v2217_v39  ;;  %2584 = vmatprep.mubr.f32.mxu0 %v11338_v56 }
 0x3c1   :  { %9179 = vpow2.f32 %v2386_v21  ;;  %2585 = vmatmul.mubr.f32.gmra.mrb[78].mxu0 %v11336_v24 }
 0x3c2   :  { %v11344_v18 = vpop.eup %9169  ;;  %v2388_v47 = vmul.f32 1.442695, %v2298_v61  ;;  %v2390_v22 = vmul.f32 1.442695, %v2299_v23 }
 0x3c3   :  { %v11346_v5 = vpop.eup %9171  ;;  %v2220_v29 = vpop.xlane.xlu0 %2219 }
 0x3c4   :  { %9181 = vpow2.f32 %v2388_v47  ;;  %2589 = vmatprep.mubr.f32.mxu0 %v11346_v5  ;;  %v2300_v31 = vsub.f32 %v11041_v6, %v2220_v29  ;;  %v2301_v58 = vsub.f32 %v11043_v32, %v2220_v29 }
 0x3c5   :  { %9183 = vpow2.f32 %v2390_v22  ;;  %2590 = vmatmul.mubr.f32.gmra.mrb[80].mxu0 %v11344_v18 }
 0x3c6   :  { %v11352_v55 = vpop.eup %9173  ;;  %v2392_v7 = vmul.f32 1.442695, %v2300_v31  ;;  %v2394_v9 = vmul.f32 1.442695, %v2301_v58 }
 0x3c7   :  { %v11354_v11 = vpop.eup %9175  ;;  %v2223_v60 = vpop.xlane.xlu1 %2222 }
 0x3c8   :  { %9185 = vpow2.f32 %v2392_v7  ;;  %v2302_v4 = vsub.f32 %v11053_v1, %v2223_v60  ;;  %v2303_v14 = vsub.f32 %v11055_v19, %v2223_v60  ;;  %2594 = vmatprep.mubr.f32.mxu0 %v11354_v11 }
 0x3c9   :  { %9187 = vpow2.f32 %v2394_v9  ;;  %2595 = vmatmul.mubr.f32.gmra.mrb[82].mxu0 %v11352_v55 }
 0x3ca   :  { %v11360_v6 = vpop.eup %9177  ;;  %v2396_v32 = vmul.f32 1.442695, %v2302_v4  ;;  %v2398_v0 = vmul.f32 1.442695, %v2303_v14 }
 0x3cb   :  { %v11362_v16 = vpop.eup %9179  ;;  %v2226_v36 = vpop.xlane.xlu0 %2225 }
 0x3cc   :  { %9189 = vpow2.f32 %v2396_v32  ;;  %2599 = vmatprep.mubr.f32.mxu0 %v11362_v16  ;;  %v2304_v21 = vsub.f32 %v11065_v52, %v2226_v36  ;;  %v2305_v1 = vsub.f32 %v11067_v44, %v2226_v36 }
 0x3cd   :  { %9191 = vpow2.f32 %v2398_v0  ;;  %2600 = vmatmul.mubr.f32.gmra.mrb[84].mxu0 %v11360_v6 }
 0x3ce   :  { %v11368_v19 = vpop.eup %9181  ;;  %v2400_v39 = vmul.f32 1.442695, %v2304_v21  ;;  %v2402_v61 = vmul.f32 1.442695, %v2305_v1 }
 0x3cf   :  { %v11370_v23 = vpop.eup %9183  ;;  %v2229_v47 = vpop.xlane.xlu1 %2228 }
 0x3d0   :  { %9193 = vpow2.f32 %v2400_v39  ;;  %v2306_v22 = vsub.f32 %v11077_v41, %v2229_v47  ;;  %v2307_v29 = vsub.f32 %v11079_v37, %v2229_v47  ;;  %2604 = vmatprep.mubr.f32.mxu0 %v11370_v23 }
 0x3d1   :  { %9195 = vpow2.f32 %v2402_v61  ;;  %2605 = vmatmul.mubr.f32.gmra.mrb[86].mxu0 %v11368_v19 }
 0x3d2   :  { %v11376_v52 = vpop.eup %9185  ;;  %v2404_v44 = vmul.f32 1.442695, %v2306_v22  ;;  %v2406_v31 = vmul.f32 1.442695, %v2307_v29 }
 0x3d3   :  { %v11378_v58 = vpop.eup %9187  ;;  %v2232_v7 = vpop.xlane.xlu0 %2231 }
 0x3d4   :  { %9197 = vpow2.f32 %v2404_v44  ;;  %2609 = vmatprep.mubr.f32.mxu0 %v11378_v58  ;;  %v2308_v9 = vsub.f32 %v11089_v38, %v2232_v7  ;;  %v2309_v41 = vsub.f32 %v11091_v51, %v2232_v7 }
 0x3d5   :  { %9199 = vpow2.f32 %v2406_v31  ;;  %2610 = vmatmul.mubr.f32.gmra.mrb[88].mxu0 %v11376_v52 }
 0x3d6   :  { %v11384_v37 = vpop.eup %9189  ;;  %v2408_v60 = vmul.f32 1.442695, %v2308_v9  ;;  %v2410_v4 = vmul.f32 1.442695, %v2309_v41 }
 0x3d7   :  { %v11386_v14 = vpop.eup %9191  ;;  %v2235_v32 = vpop.xlane.xlu1 %2234 }
 0x3d8   :  { %9201 = vpow2.f32 %v2408_v60  ;;  %v2310_v0 = vsub.f32 %v11101_v15, %v2235_v32  ;;  %v2311_v36 = vsub.f32 %v11103_v8, %v2235_v32  ;;  %2614 = vmatprep.mubr.f32.mxu0 %v11386_v14 }
 0x3d9   :  { %9203 = vpow2.f32 %v2410_v4  ;;  %2615 = vmatmul.mubr.f32.gmra.mrb[90].mxu0 %v11384_v37 }
 0x3da   :  { %v11392_v38 = vpop.eup %9193  ;;  %v2412_v51 = vmul.f32 1.442695, %v2310_v0  ;;  %v2414_v21 = vmul.f32 1.442695, %v2311_v36 }
 0x3db   :  { %v11394_v1 = vpop.eup %9195  ;;  %v2238_v39 = vpop.xlane.xlu0 %2237 }
 0x3dc   :  { %9205 = vpow2.f32 %v2412_v51  ;;  %2619 = vmatprep.mubr.f32.mxu0 %v11394_v1  ;;  %v2312_v61 = vsub.f32 %v11113_v25, %v2238_v39  ;;  %v2313_v15 = vsub.f32 %v11118_v34, %v2238_v39 }
 0x3dd   :  { %9207 = vpow2.f32 %v2414_v21  ;;  %2620 = vmatmul.mubr.f32.gmra.mrb[92].mxu0 %v11392_v38 }
 0x3de   :  { %v11400_v8 = vpop.eup %9197  ;;  %v2416_v47 = vmul.f32 1.442695, %v2312_v61  ;;  %v2418_v22 = vmul.f32 1.442695, %v2313_v15 }
 0x3df   :  { %v11402_v29 = vpop.eup %9199  ;;  %v2241_v44 = vpop.xlane.xlu1 %2240 }
 0x3e0   :  { %9209 = vpow2.f32 %v2416_v47  ;;  %v2314_v31 = vsub.f32 %v11125_v10, %v2241_v44  ;;  %v2315_v7 = vsub.f32 %v11127_v48, %v2241_v44  ;;  %2624 = vmatprep.mubr.f32.mxu0 %v11402_v29 }
 0x3e1   :  { %9211 = vpow2.f32 %v2418_v22  ;;  %2625 = vmatmul.mubr.f32.gmra.mrb[94].mxu0 %v11400_v8  ;;  %v13664_v22 = vld [vmem:[#allocation32_spill] sm:$0xff] }
 0x3e2   :  { %v11408_v25 = vpop.eup %9201  ;;  %v2420_v34 = vmul.f32 1.442695, %v2314_v31  ;;  %v2422_v9 = vmul.f32 1.442695, %v2315_v7 }
 0x3e3   :  { %v11410_v41 = vpop.eup %9203  ;;  %v2244_v60 = vpop.xlane.xlu0 %2243 }
 0x3e4   :  { %9213 = vpow2.f32 %v2420_v34  ;;  %2629 = vmatprep.mubr.f32.mxu0 %v11410_v41  ;;  %v2316_v4 = vsub.f32 %v11137_v13, %v2244_v60  ;;  %v2317_v10 = vsub.f32 %v11139_v28, %v2244_v60 }
 0x3e5   :  { %9215 = vpow2.f32 %v2422_v9  ;;  %2630 = vmatmul.mubr.f32.gmra.mrb[96].mxu0 %v11408_v25 }
 0x3e6   :  { %v11416_v48 = vpop.eup %9205  ;;  %v2424_v32 = vmul.f32 1.442695, %v2316_v4  ;;  %v2426_v0 = vmul.f32 1.442695, %v2317_v10  ;;  %v13666_v4 = vld [vmem:[#allocation36_spill] sm:$0xff] }
 0x3e7   :  { %v11418_v36 = vpop.eup %9207  ;;  %v2247_v51 = vpop.xlane.xlu1 %2246 }
 0x3e8   :  { %9217 = vpow2.f32 %v2424_v32  ;;  %v2318_v21 = vsub.f32 %v11149_v45, %v2247_v51  ;;  %v2319_v39 = vsub.f32 %v11151_v43, %v2247_v51  ;;  %2634 = vmatprep.mubr.f32.mxu0 %v11418_v36  ;;  %v13665_v45 = vld [vmem:[#allocation30_spill] sm:$0xff] }
 0x3e9   :  { %9219 = vpow2.f32 %v2426_v0  ;;  %2635 = vmatmul.mubr.f32.gmra.mrb[98].mxu0 %v11416_v48  ;;  %v13667_v32 = vld [vmem:[#allocation34_spill] sm:$0xff] }
 0x3ea   :  { %v11424_v13 = vpop.eup %9209  ;;  %v2428_v28 = vmul.f32 1.442695, %v2318_v21  ;;  %v2430_v61 = vmul.f32 1.442695, %v2319_v39 }
 0x3eb   :  { %v11426_v15 = vpop.eup %9211  ;;  %v2250_v47 = vpop.xlane.xlu0 %2249 }
 0x3ec   :  { %9221 = vpow2.f32 %v2428_v28  ;;  %2639 = vmatprep.mubr.f32.mxu0 %v11426_v15  ;;  %v2320_v44 = vsub.f32 %v13664_v22, %v2250_v47  ;;  %v2321_v31 = vsub.f32 %v13665_v45, %v2250_v47  ;;  %v13669_v47 = vld [vmem:[#allocation33_spill] sm:$0xff] }
 0x3ed   :  { %9223 = vpow2.f32 %v2430_v61  ;;  %2640 = vmatmul.mubr.f32.gmra.mrb[100].mxu0 %v11424_v13 }
 0x3ee   :  { %v11432_v43 = vpop.eup %9213  ;;  %v2432_v7 = vmul.f32 1.442695, %v2320_v44  ;;  %v2434_v34 = vmul.f32 1.442695, %v2321_v31  ;;  %v13670_v44 = vld [vmem:[#allocation31_spill] sm:$0xff] }
 0x3ef   :  { %v11434_v9 = vpop.eup %9215  ;;  %v2253_v60 = vpop.xlane.xlu1 %2252 }
 0x3f0   :  { %9225 = vpow2.f32 %v2432_v7  ;;  %v2322_v10 = vsub.f32 %v13666_v4, %v2253_v60  ;;  %v2323_v0 = vsub.f32 %v13667_v32, %v2253_v60  ;;  %2644 = vmatprep.mubr.f32.mxu0 %v11434_v9 }
 0x3f1   :  { %9227 = vpow2.f32 %v2434_v34  ;;  %2645 = vmatmul.mubr.f32.gmra.mrb[102].mxu0 %v11432_v43 }
 0x3f2   :  { %v11440_v51 = vpop.eup %9217  ;;  %v2436_v21 = vmul.f32 1.442695, %v2322_v10  ;;  %v2438_v39 = vmul.f32 1.442695, %v2323_v0  ;;  %v13673_v10 = vld [vmem:[#allocation37_spill] sm:$0xff]  ;;  %v13674_v0 = vld [vmem:[#allocation35_spill] sm:$0xff] }
 0x3f3   :  { %13668 = vst [vmem:[#allocation5_spill] sm:$0xff] %v11440_v51  ;;  %v11442_v28 = vpop.eup %9219  ;;  %v2256_v61 = vpop.xlane.xlu0 %2255 }
 0x3f4   :  { %9229 = vpow2.f32 %v2436_v21  ;;  %2649 = vmatprep.mubr.f32.mxu0 %v11442_v28  ;;  %v2324_v22 = vsub.f32 %v13669_v47, %v2256_v61  ;;  %v2325_v45 = vsub.f32 %v13670_v44, %v2256_v61 }
 0x3f5   :  { %9231 = vpow2.f32 %v2438_v39  ;;  %2650 = vmatmul.mubr.f32.gmra.mrb[104].mxu0 %v11440_v51 }
 0x3f6   :  { %v11448_v31 = vpop.eup %9221  ;;  %v2440_v7 = vmul.f32 1.442695, %v2324_v22  ;;  %v2442_v34 = vmul.f32 1.442695, %v2325_v45  ;;  %v13676_v45 = vld [vmem:[#allocation39_spill] sm:$0xff] }
 0x3f7   :  { %13671 = vst [vmem:[#allocation32_spill] sm:$0xff] %v11448_v31  ;;  %v11450_v60 = vpop.eup %9223  ;;  %v2259_v4 = vpop.xlane.xlu1 %2258 }
 0x3f8   :  { %13672 = vst [vmem:[#allocation30_spill] sm:$0xff] %v11450_v60  ;;  %9233 = vpow2.f32 %v2440_v7  ;;  %v2326_v32 = vsub.f32 %v13673_v10, %v2259_v4  ;;  %v2327_v21 = vsub.f32 %v13674_v0, %v2259_v4  ;;  %2654 = vmatprep.mubr.f32.mxu0 %v11450_v60  ;;  %v13677_v10 = vld [vmem:[#allocation38_spill] sm:$0xff] }
 0x3f9   :  { %9235 = vpow2.f32 %v2442_v34  ;;  %2655 = vmatmul.mubr.f32.gmra.mrb[106].mxu0 %v11448_v31 }
 0x3fa   :  { %v11456_v39 = vpop.eup %9225  ;;  %v2444_v61 = vmul.f32 1.442695, %v2326_v32  ;;  %v2446_v47 = vmul.f32 1.442695, %v2327_v21 }
 0x3fb   :  { %13675 = vst [vmem:[#allocation36_spill] sm:$0xff] %v11456_v39  ;;  %v11458_v44 = vpop.eup %9227  ;;  %v2262_v22 = vpop.xlane.xlu0 %2261 }
 0x3fc   :  { %9237 = vpow2.f32 %v2444_v61  ;;  %2659 = vmatprep.mubr.f32.mxu0 %v11458_v44  ;;  %v2328_v7 = vsub.f32 %v13676_v45, %v2262_v22  ;;  %v2329_v51 = vsub.f32 %v13677_v10, %v2262_v22  ;;  %v13680_v61 = vld [vmem:[#allocation41_spill] sm:$0xff] }
 0x3fd   :  { %9239 = vpow2.f32 %v2446_v47  ;;  %2660 = vmatmul.mubr.f32.gmra.mrb[108].mxu0 %v11456_v39 }
 0x3fe   :  { %v11464_v34 = vpop.eup %9229  ;;  %v2448_v4 = vmul.f32 1.442695, %v2328_v7  ;;  %v2450_v0 = vmul.f32 1.442695, %v2329_v51 }
 0x3ff   :  { %13678 = vst [vmem:[#allocation34_spill] sm:$0xff] %v11464_v34  ;;  %v11466_v31 = vpop.eup %9231  ;;  %v2265_v32 = vpop.xlane.xlu1 %2264 }
 0x400   :  { %13679 = vst [vmem:[#allocation33_spill] sm:$0xff] %v11466_v31  ;;  %9241 = vpow2.f32 %v2448_v4  ;;  %v2330_v21 = vsub.f32 %v11221_v35, %v2265_v32  ;;  %v2331_v60 = vsub.f32 %v13680_v61, %v2265_v32  ;;  %2664 = vmatprep.mubr.f32.mxu0 %v11466_v31  ;;  %v13681_v35 = vld [vmem:[#allocation40_spill] sm:$0xff] }
 0x401   :  { %9243 = vpow2.f32 %v2450_v0  ;;  %2665 = vmatmul.mubr.f32.gmra.mrb[110].mxu0 %v11464_v34 }
 0x402   :  { %v11472_v47 = vpop.eup %9233  ;;  %v2452_v22 = vmul.f32 1.442695, %v2330_v21  ;;  %v2454_v45 = vmul.f32 1.442695, %v2331_v60  ;;  %v13682_v21 = vld [vmem:[#allocation43_spill] sm:$0xff] }
 0x403   :  { %v11474_v10 = vpop.eup %9235  ;;  %v2268_v51 = vpop.xlane.xlu0 %2267 }
 0x404   :  { %9245 = vpow2.f32 %v2452_v22  ;;  %2669 = vmatprep.mubr.f32.mxu0 %v11474_v10  ;;  %v2332_v7 = vsub.f32 %v11233_v62, %v2268_v51  ;;  %v2333_v4 = vsub.f32 %v13681_v35, %v2268_v51  ;;  %v13683_v22 = vld [vmem:[#allocation44_spill] sm:$0xff] }
 0x405   :  { %9247 = vpow2.f32 %v2454_v45  ;;  %2670 = vmatmul.mubr.f32.gmra.mrb[112].mxu0 %v11472_v47 }
 0x406   :  { %v11480_v0 = vpop.eup %9237  ;;  %v2456_v32 = vmul.f32 1.442695, %v2332_v7  ;;  %v2458_v61 = vmul.f32 1.442695, %v2333_v4 }
 0x407   :  { %v11482_v34 = vpop.eup %9239  ;;  %v2271_v60 = vpop.xlane.xlu1 %2270 }
 0x408   :  { %9249 = vpow2.f32 %v2456_v32  ;;  %v2334_v31 = vsub.f32 %v13682_v21, %v2271_v60  ;;  %v2335_v39 = vsub.f32 %v13683_v22, %v2271_v60  ;;  %2674 = vmatprep.mubr.f32.mxu0 %v11482_v34  ;;  %v13540_v60 = vmov 0.0  }
 0x409   :  { %9251 = vpow2.f32 %v2458_v61  ;;  %2675 = vmatmul.mubr.f32.gmra.mrb[114].mxu0 %v11480_v0 }
 0x40a   :  { %v11488_v62 = vpop.eup %9241  ;;  %v2460_v45 = vmul.f32 1.442695, %v2334_v31  ;;  %v2462_v51 = vmul.f32 1.442695, %v2335_v39 }
 0x40b   :  { %v11490_v35 = vpop.eup %9243 }
 0x40c   :  { %9253 = vpow2.f32 %v2460_v45  ;;  %2679 = vmatprep.mubr.f32.mxu0 %v11490_v35 }
 0x40d   :  { %9255 = vpow2.f32 %v2462_v51  ;;  %2680 = vmatmul.mubr.f32.gmra.mrb[116].mxu0 %v11488_v62 }
 0x40e   :  { %v11494_v7 = vpop.eup %9245 }
 0x40f   :  { %13684 = vst [vmem:[#allocation31_spill] sm:$0xff] %v11494_v7  ;;  %v11496_v4 = vpop.eup %9247 }
 0x410   :  { %13685 = vst [vmem:[#allocation37_spill] sm:$0xff] %v11496_v4  ;;  %2684 = vmatprep.mubr.f32.mxu0 %v11496_v4 }
 0x411   :  { %2685 = vmatmul.mubr.f32.gmra.mrb[118].mxu0 %v11494_v7 }
 0x412   :  { %v11500_v32 = vpop.eup %9249 }
 0x413   :  { %13686 = vst [vmem:[#allocation35_spill] sm:$0xff] %v11500_v32  ;;  %v11502_v31 = vpop.eup %9251 }
 0x414   :  { %13687 = vst [vmem:[#allocation39_spill] sm:$0xff] %v11502_v31  ;;  %2689 = vmatprep.mubr.f32.mxu0 %v11502_v31 }
 0x415   :  { %2690 = vmatmul.mubr.f32.gmra.mrb[120].mxu0 %v11500_v32 }
 0x416   :  { %v11506_v39 = vpop.eup %9253 }
 0x417   :  { %13688 = vst [vmem:[#allocation38_spill] sm:$0xff] %v11506_v39  ;;  %v11508_v61 = vpop.eup %9255 }
 0x418   :  { %13689 = vst [vmem:[#allocation41_spill] sm:$0xff] %v11508_v61  ;;  %2694 = vmatprep.mubr.f32.mxu0 %v11508_v61 }
 0x419   :  { %2695 = vmatmul.mubr.f32.gmra.mrb[122].mxu0 %v11506_v39  ;;  %v13690_v39 = vld [vmem:[#allocation6_spill] sm:$0xff] }
 0x41a   :  { %2898 = vmatprep.mubr.f32.mxu0 %v13540_v60 }
 0x470   :  { %v2541_v21 = vpop.f32.mrb[60].mxu0 }
 0x471   :  { %9257 = vrcp.f32 %v2541_v21  ;;  %v2543_v22 = vpop.f32.mrb[61].mxu0 }
 0x474   :  { %v2546_v45 = vpop.f32.mrb[62].mxu0 }
 0x475   :  { %9259 = vrcp.f32 %v2546_v45  ;;  %v2548_v51 = vpop.f32.mrb[63].mxu0 }
 0x478   :  { %v2551_v31 = vpop.f32.mrb[64].mxu0 }
 0x479   :  { %9261 = vrcp.f32 %v2551_v31  ;;  %v2553_v32 = vpop.f32.mrb[65].mxu0 }
 0x47a   :  { %v13691_v32 = vld [vmem:[#allocation7_spill] sm:$0xff] }
 0x47b   :  { %v9258_v7 = vpop.eup %9257 }
 0x47c   :  { %v2556_v4 = vpop.f32.mrb[66].mxu0  ;;  %7299 = vmatmul.mubr.msk.f32.vlgmr.msra.gmra.mrb[124].mxu0 %vm2732_vm4, %v9258_v7 }
 0x47d   :  { %9263 = vrcp.f32 %v2556_v4  ;;  %v2558_v61 = vpop.f32.mrb[67].mxu0  ;;  %2904 = vmatprep.mubr.f32.mxu0 %v13540_v60  ;;  %8869 = vmatpush3.bf16.msra.mxu0 %v13663_v50 }
 0x47e   :  { %8871 = vmatprep.subr.bf16.mxu0 %v13690_v39 }
 0x47f   :  { %v9260_v21 = vpop.eup %9259 }
 0x480   :  { %v2561_v22 = vpop.f32.mrb[68].mxu0  ;;  %7300 = vmatmul.mubr.msk.f32.gmra.mrb[126].mxu0 %vm2732_vm4, %v9260_v21 }
 0x481   :  { %9265 = vrcp.f32 %v2561_v22  ;;  %v2563_v31 = vpop.f32.mrb[69].mxu0  ;;  %2910 = vmatprep.mubr.f32.mxu0 %v13540_v60  ;;  %8873 = vmatpush3.bf16.msra.mxu0 %v13690_v39 }
 0x482   :  { %8875 = vmatprep.subr.bf16.mxu0 %v13691_v32 }
 0x483   :  { %v9262_v7 = vpop.eup %9261 }
 0x484   :  { %v2566_v4 = vpop.f32.mrb[70].mxu0  ;;  %7301 = vmatmul.mubr.msk.f32.gmra.mrb[128].mxu0 %vm2732_vm4, %v9262_v7 }
 0x485   :  { %9267 = vrcp.f32 %v2566_v4  ;;  %v2568_v50 = vpop.f32.mrb[71].mxu0  ;;  %2916 = vmatprep.mubr.f32.mxu0 %v13540_v60 }
 0x487   :  { %v9264_v61 = vpop.eup %9263 }
 0x488   :  { %v2571_v45 = vpop.f32.mrb[72].mxu0  ;;  %7302 = vmatmul.mubr.msk.f32.gmra.mrb[130].mxu0 %vm2732_vm4, %v9264_v61 }
 0x489   :  { %9269 = vrcp.f32 %v2571_v45  ;;  %v2573_v51 = vpop.f32.mrb[73].mxu0  ;;  %2922 = vmatprep.mubr.f32.mxu0 %v13540_v60 }
 0x48b   :  { %v9266_v21 = vpop.eup %9265 }
 0x48c   :  { %v2576_v39 = vpop.f32.mrb[74].mxu0  ;;  %7303 = vmatmul.mubr.msk.f32.gmra.mrb[132].mxu0 %vm2732_vm4, %v9266_v21 }
 0x48d   :  { %9271 = vrcp.f32 %v2576_v39  ;;  %v2578_v22 = vpop.f32.mrb[75].mxu0  ;;  %2928 = vmatprep.mubr.f32.mxu0 %v13540_v60 }
 0x48f   :  { %v9268_v31 = vpop.eup %9267 }
 0x490   :  { %v2581_v7 = vpop.f32.mrb[76].mxu0  ;;  %7304 = vmatmul.mubr.msk.f32.gmra.mrb[134].mxu0 %vm2732_vm4, %v9268_v31 }
 0x491   :  { %9273 = vrcp.f32 %v2581_v7  ;;  %v2583_v4 = vpop.f32.mrb[77].mxu0  ;;  %2934 = vmatprep.mubr.f32.mxu0 %v13540_v60 }
 0x493   :  { %v9270_v50 = vpop.eup %9269 }
 0x494   :  { %v2586_v61 = vpop.f32.mrb[78].mxu0  ;;  %7305 = vmatmul.mubr.msk.f32.gmra.mrb[136].mxu0 %vm2732_vm4, %v9270_v50 }
 0x495   :  { %9275 = vrcp.f32 %v2586_v61  ;;  %v2588_v45 = vpop.f32.mrb[79].mxu0  ;;  %2940 = vmatprep.mubr.f32.mxu0 %v13540_v60 }
 0x497   :  { %v9272_v51 = vpop.eup %9271 }
 0x498   :  { %v2591_v21 = vpop.f32.mrb[80].mxu0  ;;  %7306 = vmatmul.mubr.msk.f32.gmra.mrb[138].mxu0 %vm2732_vm4, %v9272_v51 }
 0x499   :  { %9277 = vrcp.f32 %v2591_v21  ;;  %v2593_v39 = vpop.f32.mrb[81].mxu0  ;;  %2946 = vmatprep.mubr.f32.mxu0 %v13540_v60 }
 0x49b   :  { %v9274_v22 = vpop.eup %9273 }
 0x49c   :  { %v2596_v31 = vpop.f32.mrb[82].mxu0  ;;  %7307 = vmatmul.mubr.msk.f32.gmra.mrb[140].mxu0 %vm2732_vm4, %v9274_v22 }
 0x49d   :  { %9279 = vrcp.f32 %v2596_v31  ;;  %v2598_v7 = vpop.f32.mrb[83].mxu0  ;;  %2952 = vmatprep.mubr.f32.mxu0 %v13540_v60 }
 0x49f   :  { %v9276_v4 = vpop.eup %9275 }
 0x4a0   :  { %v2601_v50 = vpop.f32.mrb[84].mxu0  ;;  %7308 = vmatmul.mubr.msk.f32.gmra.mrb[142].mxu0 %vm2732_vm4, %v9276_v4 }
 0x4a1   :  { %9281 = vrcp.f32 %v2601_v50  ;;  %v2603_v61 = vpop.f32.mrb[85].mxu0  ;;  %2958 = vmatprep.mubr.f32.mxu0 %v13540_v60 }
 0x4a3   :  { %v9278_v45 = vpop.eup %9277 }
 0x4a4   :  { %v2606_v51 = vpop.f32.mrb[86].mxu0  ;;  %7309 = vmatmul.mubr.msk.f32.gmra.mrb[144].mxu0 %vm2732_vm4, %v9278_v45 }
 0x4a5   :  { %9283 = vrcp.f32 %v2606_v51  ;;  %v2608_v21 = vpop.f32.mrb[87].mxu0  ;;  %2964 = vmatprep.mubr.f32.mxu0 %v13540_v60 }
 0x4a7   :  { %v9280_v39 = vpop.eup %9279 }
 0x4a8   :  { %v2611_v22 = vpop.f32.mrb[88].mxu0  ;;  %7310 = vmatmul.mubr.msk.f32.gmra.mrb[146].mxu0 %vm2732_vm4, %v9280_v39 }
 0x4a9   :  { %9285 = vrcp.f32 %v2611_v22  ;;  %v2613_v31 = vpop.f32.mrb[89].mxu0  ;;  %2970 = vmatprep.mubr.f32.mxu0 %v13540_v60 }
 0x4ab   :  { %v9282_v7 = vpop.eup %9281 }
 0x4ac   :  { %v2616_v4 = vpop.f32.mrb[90].mxu0  ;;  %7311 = vmatmul.mubr.msk.f32.gmra.mrb[148].mxu0 %vm2732_vm4, %v9282_v7 }
 0x4ad   :  { %9287 = vrcp.f32 %v2616_v4  ;;  %v2618_v50 = vpop.f32.mrb[91].mxu0  ;;  %2976 = vmatprep.mubr.f32.mxu0 %v13540_v60 }
 0x4af   :  { %v9284_v61 = vpop.eup %9283 }
 0x4b0   :  { %v2621_v45 = vpop.f32.mrb[92].mxu0  ;;  %7312 = vmatmul.mubr.msk.f32.gmra.mrb[150].mxu0 %vm2732_vm4, %v9284_v61 }
 0x4b1   :  { %9289 = vrcp.f32 %v2621_v45  ;;  %v2623_v51 = vpop.f32.mrb[93].mxu0  ;;  %2982 = vmatprep.mubr.f32.mxu0 %v13540_v60 }
 0x4b3   :  { %v9286_v21 = vpop.eup %9285 }
 0x4b4   :  { %v2626_v39 = vpop.f32.mrb[94].mxu0  ;;  %7313 = vmatmul.mubr.msk.f32.gmra.mrb[152].mxu0 %vm2732_vm4, %v9286_v21 }
 0x4b5   :  { %9291 = vrcp.f32 %v2626_v39  ;;  %v2628_v22 = vpop.f32.mrb[95].mxu0  ;;  %2988 = vmatprep.mubr.f32.mxu0 %v13540_v60 }
 0x4b7   :  { %v9288_v31 = vpop.eup %9287 }
 0x4b8   :  { %v2631_v7 = vpop.f32.mrb[96].mxu0  ;;  %7314 = vmatmul.mubr.msk.f32.gmra.mrb[154].mxu0 %vm2732_vm4, %v9288_v31 }
 0x4b9   :  { %9293 = vrcp.f32 %v2631_v7  ;;  %v2633_v4 = vpop.f32.mrb[97].mxu0  ;;  %2994 = vmatprep.mubr.f32.mxu0 %v13540_v60 }
 0x4bb   :  { %v9290_v50 = vpop.eup %9289 }
 0x4bc   :  { %v2636_v61 = vpop.f32.mrb[98].mxu0  ;;  %7315 = vmatmul.mubr.msk.f32.gmra.mrb[156].mxu0 %vm2732_vm4, %v9290_v50 }
 0x4bd   :  { %9295 = vrcp.f32 %v2636_v61  ;;  %v2638_v45 = vpop.f32.mrb[99].mxu0  ;;  %3000 = vmatprep.mubr.f32.mxu0 %v13540_v60 }
 0x4bf   :  { %v9292_v51 = vpop.eup %9291 }
 0x4c0   :  { %v2641_v21 = vpop.f32.mrb[100].mxu0  ;;  %7316 = vmatmul.mubr.msk.f32.gmra.mrb[158].mxu0 %vm2732_vm4, %v9292_v51 }
 0x4c1   :  { %9297 = vrcp.f32 %v2641_v21  ;;  %v2643_v39 = vpop.f32.mrb[101].mxu0  ;;  %3006 = vmatprep.mubr.f32.mxu0 %v13540_v60 }
 0x4c3   :  { %v9294_v22 = vpop.eup %9293 }
 0x4c4   :  { %v2646_v31 = vpop.f32.mrb[102].mxu0  ;;  %7317 = vmatmul.mubr.msk.f32.gmra.mrb[160].mxu0 %vm2732_vm4, %v9294_v22 }
 0x4c5   :  { %9299 = vrcp.f32 %v2646_v31  ;;  %v2648_v7 = vpop.f32.mrb[103].mxu0  ;;  %3012 = vmatprep.mubr.f32.mxu0 %v13540_v60 }
 0x4c7   :  { %v9296_v4 = vpop.eup %9295 }
 0x4c8   :  { %v2651_v50 = vpop.f32.mrb[104].mxu0  ;;  %7318 = vmatmul.mubr.msk.f32.gmra.mrb[162].mxu0 %vm2732_vm4, %v9296_v4 }
 0x4c9   :  { %9301 = vrcp.f32 %v2651_v50  ;;  %v2653_v61 = vpop.f32.mrb[105].mxu0  ;;  %3018 = vmatprep.mubr.f32.mxu0 %v13540_v60 }
 0x4cb   :  { %v9298_v45 = vpop.eup %9297 }
 0x4cc   :  { %v2656_v51 = vpop.f32.mrb[106].mxu0  ;;  %7319 = vmatmul.mubr.msk.f32.gmra.mrb[164].mxu0 %vm2732_vm4, %v9298_v45 }
 0x4cd   :  { %9303 = vrcp.f32 %v2656_v51  ;;  %v2658_v21 = vpop.f32.mrb[107].mxu0  ;;  %3024 = vmatprep.mubr.f32.mxu0 %v13540_v60 }
 0x4cf   :  { %v9300_v39 = vpop.eup %9299 }
 0x4d0   :  { %v2661_v22 = vpop.f32.mrb[108].mxu0  ;;  %7320 = vmatmul.mubr.msk.f32.gmra.mrb[166].mxu0 %vm2732_vm4, %v9300_v39 }
 0x4d1   :  { %9305 = vrcp.f32 %v2661_v22  ;;  %v2663_v31 = vpop.f32.mrb[109].mxu0  ;;  %3030 = vmatprep.mubr.f32.mxu0 %v13540_v60 }
 0x4d3   :  { %v9302_v7 = vpop.eup %9301 }
 0x4d4   :  { %v2666_v4 = vpop.f32.mrb[110].mxu0  ;;  %7321 = vmatmul.mubr.msk.f32.gmra.mrb[168].mxu0 %vm2732_vm4, %v9302_v7 }
 0x4d5   :  { %9307 = vrcp.f32 %v2666_v4  ;;  %v2668_v50 = vpop.f32.mrb[111].mxu0  ;;  %3036 = vmatprep.mubr.f32.mxu0 %v13540_v60 }
 0x4d7   :  { %v9304_v61 = vpop.eup %9303 }
 0x4d8   :  { %v2671_v45 = vpop.f32.mrb[112].mxu0  ;;  %7322 = vmatmul.mubr.msk.f32.gmra.mrb[170].mxu0 %vm2732_vm4, %v9304_v61 }
 0x4d9   :  { %9309 = vrcp.f32 %v2671_v45  ;;  %v2673_v51 = vpop.f32.mrb[113].mxu0  ;;  %3042 = vmatprep.mubr.f32.mxu0 %v13540_v60 }
 0x4db   :  { %v9306_v21 = vpop.eup %9305 }
 0x4dc   :  { %v2676_v39 = vpop.f32.mrb[114].mxu0  ;;  %7323 = vmatmul.mubr.msk.f32.gmra.mrb[172].mxu0 %vm2732_vm4, %v9306_v21 }
 0x4dd   :  { %9311 = vrcp.f32 %v2676_v39  ;;  %v2678_v22 = vpop.f32.mrb[115].mxu0  ;;  %3048 = vmatprep.mubr.f32.mxu0 %v13540_v60 }
 0x4df   :  { %v9308_v31 = vpop.eup %9307 }
 0x4e0   :  { %v2681_v7 = vpop.f32.mrb[116].mxu0  ;;  %7324 = vmatmul.mubr.msk.f32.gmra.mrb[174].mxu0 %vm2732_vm4, %v9308_v31 }
 0x4e1   :  { %9313 = vrcp.f32 %v2681_v7  ;;  %v2683_v4 = vpop.f32.mrb[117].mxu0  ;;  %3054 = vmatprep.mubr.f32.mxu0 %v13540_v60 }
 0x4e3   :  { %v9310_v50 = vpop.eup %9309 }
 0x4e4   :  { %v2686_v61 = vpop.f32.mrb[118].mxu0  ;;  %7325 = vmatmul.mubr.msk.f32.gmra.mrb[176].mxu0 %vm2732_vm4, %v9310_v50 }
 0x4e5   :  { %9315 = vrcp.f32 %v2686_v61  ;;  %v2688_v45 = vpop.f32.mrb[119].mxu0  ;;  %3060 = vmatprep.mubr.f32.mxu0 %v13540_v60 }
 0x4e7   :  { %v9312_v51 = vpop.eup %9311 }
 0x4e8   :  { %v2691_v21 = vpop.f32.mrb[120].mxu0  ;;  %7326 = vmatmul.mubr.msk.f32.gmra.mrb[178].mxu0 %vm2732_vm4, %v9312_v51 }
 0x4e9   :  { %9317 = vrcp.f32 %v2691_v21  ;;  %v2693_v39 = vpop.f32.mrb[121].mxu0  ;;  %3066 = vmatprep.mubr.f32.mxu0 %v13540_v60 }
 0x4eb   :  { %v9314_v22 = vpop.eup %9313 }
 0x4ec   :  { %v2696_v31 = vpop.f32.mrb[122].mxu0  ;;  %7327 = vmatmul.mubr.msk.f32.gmra.mrb[180].mxu0 %vm2732_vm4, %v9314_v22 }
 0x4ed   :  { %9319 = vrcp.f32 %v2696_v31  ;;  %v2698_v7 = vpop.f32.mrb[123].mxu0  ;;  %3072 = vmatprep.mubr.f32.mxu0 %v13540_v60 }
 0x4ef   :  { %v9316_v4 = vpop.eup %9315 }
 0x4f0   :  { %7328 = vmatmul.mubr.msk.f32.gmra.mrb[182].mxu0 %vm2732_vm4, %v9316_v4  ;;  %v13692_v4 = vld [vmem:[#allocation10_spill] sm:$0xff] }
 0x4f1   :  { %3078 = vmatprep.mubr.f32.mxu0 %v13540_v60 }
 0x4f3   :  { %v9318_v50 = vpop.eup %9317 }
 0x4f4   :  { %7329 = vmatmul.mubr.msk.f32.gmra.mrb[184].mxu0 %vm2732_vm4, %v9318_v50 }
 0x4f5   :  { %3084 = vmatprep.mubr.f32.mxu0 %v13540_v60  ;;  %v13693_v60 = vld [vmem:[#allocation12_spill] sm:$0xff] }
 0x4f7   :  { %v9320_v61 = vpop.eup %9319 }
 0x4f8   :  { %7330 = vmatmul.mubr.msk.f32.gmra.mrb[186].mxu0 %vm2732_vm4, %v9320_v61 }
 0x54f   :  { %v2900_v45 = vpop.f32.mrb[124].mxu0 }
 0x550   :  { %v2902_v51 = vpop.f32.mrb[125].mxu0  ;;  %v3091_v39 = vmul.f32 %v11261_v12, %v2900_v45  ;;  %v13694_v45 = vld [vmem:[#allocation15_spill] sm:$0xff] }
 0x551   :  { %v3092_v21 = vmul.f32 %v11263_v27, %v2902_v51 }
 0x553   :  { %v2906_v22 = vpop.f32.mrb[126].mxu0  ;;  %3219 = vmatprep.mubr.f32.mxu1 %v3092_v21 }
 0x554   :  { %v2908_v31 = vpop.f32.mrb[127].mxu0  ;;  %3220 = vmatmul.mubr.f32.vlgmr.msra.gmra.mrb[108].mxu1 %v3091_v39  ;;  %v3093_v50 = vmul.f32 %v11269_v63, %v2906_v22 }
 0x555   :  { %v3094_v7 = vmul.f32 %v11273_v46, %v2908_v31  ;;  %8893 = vmatpush3.bf16.msra.mxu1 %v13692_v4 }
 0x556   :  { %8895 = vmatprep.subr.bf16.mxu1 %v13693_v60 }
 0x557   :  { %v2912_v32 = vpop.f32.mrb[128].mxu0  ;;  %3224 = vmatprep.mubr.f32.mxu1 %v3094_v7 }
 0x558   :  { %v2914_v61 = vpop.f32.mrb[129].mxu0  ;;  %3225 = vmatmul.mubr.f32.gmra.mrb[110].mxu1 %v3093_v50  ;;  %v3095_v12 = vmul.f32 %v11280_v30, %v2912_v32 }
 0x559   :  { %v3096_v27 = vmul.f32 %v11282_v54, %v2914_v61  ;;  %8897 = vmatpush3.bf16.msra.mxu1 %v13693_v60 }
 0x55a   :  { %8907 = vmatprep.subr.bf16.mxu1 %v13694_v45 }
 0x55b   :  { %v2918_v51 = vpop.f32.mrb[130].mxu0  ;;  %3229 = vmatprep.mubr.f32.mxu1 %v3096_v27 }
 0x55c   :  { %v2920_v46 = vpop.f32.mrb[131].mxu0  ;;  %3230 = vmatmul.mubr.f32.gmra.mrb[112].mxu1 %v3095_v12  ;;  %v3097_v21 = vmul.f32 %v11288_v33, %v2918_v51 }
 0x55d   :  { %v3098_v63 = vmul.f32 %v11290_v59, %v2920_v46 }
 0x55f   :  { %v2924_v39 = vpop.f32.mrb[132].mxu0  ;;  %3234 = vmatprep.mubr.f32.mxu1 %v3098_v63 }
 0x560   :  { %v2926_v22 = vpop.f32.mrb[133].mxu0  ;;  %3235 = vmatmul.mubr.f32.gmra.mrb[114].mxu1 %v3097_v21  ;;  %v3099_v60 = vmul.f32 %v11296_v57, %v2924_v39 }
 0x561   :  { %v3100_v54 = vmul.f32 %v11298_v17, %v2926_v22 }
 0x563   :  { %v2930_v31 = vpop.f32.mrb[134].mxu0  ;;  %3239 = vmatprep.mubr.f32.mxu1 %v3100_v54 }
 0x564   :  { %v2932_v30 = vpop.f32.mrb[135].mxu0  ;;  %3240 = vmatmul.mubr.f32.gmra.mrb[116].mxu1 %v3099_v60  ;;  %v3101_v7 = vmul.f32 %v11304_v53, %v2930_v31 }
 0x565   :  { %v3102_v32 = vmul.f32 %v11306_v26, %v2932_v30 }
 0x567   :  { %v2936_v4 = vpop.f32.mrb[136].mxu0  ;;  %3244 = vmatprep.mubr.f32.mxu1 %v3102_v32 }
 0x568   :  { %v2938_v59 = vpop.f32.mrb[137].mxu0  ;;  %3245 = vmatmul.mubr.f32.gmra.mrb[118].mxu1 %v3101_v7  ;;  %v3103_v50 = vmul.f32 %v11312_v49, %v2936_v4 }
 0x569   :  { %v3104_v33 = vmul.f32 %v11314_v42, %v2938_v59 }
 0x56b   :  { %v2942_v61 = vpop.f32.mrb[138].mxu0  ;;  %3249 = vmatprep.mubr.f32.mxu1 %v3104_v33 }
 0x56c   :  { %v2944_v17 = vpop.f32.mrb[139].mxu0  ;;  %3250 = vmatmul.mubr.f32.gmra.mrb[120].mxu1 %v3103_v50  ;;  %v3105_v27 = vmul.f32 %v11320_v3, %v2942_v61 }
 0x56d   :  { %v3106_v57 = vmul.f32 %v11322_v20, %v2944_v17 }
 0x56f   :  { %v2948_v12 = vpop.f32.mrb[140].mxu0  ;;  %3254 = vmatprep.mubr.f32.mxu1 %v3106_v57 }
 0x570   :  { %v2950_v26 = vpop.f32.mrb[141].mxu0  ;;  %3255 = vmatmul.mubr.f32.gmra.mrb[122].mxu1 %v3105_v27  ;;  %v3107_v51 = vmul.f32 %v11328_v2, %v2948_v12 }
 0x571   :  { %v3108_v53 = vmul.f32 %v11330_v40, %v2950_v26 }
 0x573   :  { %v2954_v46 = vpop.f32.mrb[142].mxu0  ;;  %3259 = vmatprep.mubr.f32.mxu1 %v3108_v53 }
 0x574   :  { %v2956_v42 = vpop.f32.mrb[143].mxu0  ;;  %3260 = vmatmul.mubr.f32.gmra.mrb[124].mxu1 %v3107_v51  ;;  %v3109_v63 = vmul.f32 %v11336_v24, %v2954_v46 }
 0x575   :  { %v3110_v49 = vmul.f32 %v11338_v56, %v2956_v42 }
 0x577   :  { %v2960_v21 = vpop.f32.mrb[144].mxu0  ;;  %3264 = vmatprep.mubr.f32.mxu1 %v3110_v49 }
 0x578   :  { %v2962_v20 = vpop.f32.mrb[145].mxu0  ;;  %3265 = vmatmul.mubr.f32.gmra.mrb[126].mxu1 %v3109_v63  ;;  %v3111_v39 = vmul.f32 %v11344_v18, %v2960_v21  ;;  %v13695_v21 = vld [vmem:[#allocation5_spill] sm:$0xff] }
 0x579   :  { %v3112_v3 = vmul.f32 %v11346_v5, %v2962_v20 }
 0x57b   :  { %v2966_v22 = vpop.f32.mrb[146].mxu0  ;;  %3269 = vmatprep.mubr.f32.mxu1 %v3112_v3 }
 0x57c   :  { %v2968_v40 = vpop.f32.mrb[147].mxu0  ;;  %3270 = vmatmul.mubr.f32.gmra.mrb[128].mxu1 %v3111_v39  ;;  %v3113_v54 = vmul.f32 %v11352_v55, %v2966_v22  ;;  %v13697_v22 = vld [vmem:[#allocation32_spill] sm:$0xff] }
 0x57d   :  { %v3114_v2 = vmul.f32 %v11354_v11, %v2968_v40 }
 0x57f   :  { %v2972_v60 = vpop.f32.mrb[148].mxu0  ;;  %3274 = vmatprep.mubr.f32.mxu1 %v3114_v2 }
 0x580   :  { %v2974_v56 = vpop.f32.mrb[149].mxu0  ;;  %3275 = vmatmul.mubr.f32.gmra.mrb[130].mxu1 %v3113_v54  ;;  %v3115_v31 = vmul.f32 %v11360_v6, %v2972_v60  ;;  %v13698_v54 = vld [vmem:[#allocation36_spill] sm:$0xff] }
 0x581   :  { %v3116_v24 = vmul.f32 %v11362_v16, %v2974_v56 }
 0x583   :  { %v2978_v30 = vpop.f32.mrb[150].mxu0  ;;  %3279 = vmatprep.mubr.f32.mxu1 %v3116_v24  ;;  %v13699_v24 = vld [vmem:[#allocation33_spill] sm:$0xff] }
 0x584   :  { %v2980_v5 = vpop.f32.mrb[151].mxu0  ;;  %3280 = vmatmul.mubr.f32.gmra.mrb[132].mxu1 %v3115_v31  ;;  %v3117_v32 = vmul.f32 %v11368_v19, %v2978_v30  ;;  %v13700_v30 = vld [vmem:[#allocation34_spill] sm:$0xff] }
 0x585   :  { %v3118_v18 = vmul.f32 %v11370_v23, %v2980_v5 }
 0x587   :  { %v2984_v7 = vpop.f32.mrb[152].mxu0  ;;  %3284 = vmatprep.mubr.f32.mxu1 %v3118_v18 }
 0x588   :  { %v2986_v11 = vpop.f32.mrb[153].mxu0  ;;  %3285 = vmatmul.mubr.f32.gmra.mrb[134].mxu1 %v3117_v32  ;;  %v3119_v4 = vmul.f32 %v11376_v52, %v2984_v7 }
 0x589   :  { %v3120_v55 = vmul.f32 %v11378_v58, %v2986_v11 }
 0x58b   :  { %v2990_v59 = vpop.f32.mrb[154].mxu0  ;;  %3289 = vmatprep.mubr.f32.mxu1 %v3120_v55 }
 0x58c   :  { %v2992_v16 = vpop.f32.mrb[155].mxu0  ;;  %3290 = vmatmul.mubr.f32.gmra.mrb[136].mxu1 %v3119_v4  ;;  %v3121_v33 = vmul.f32 %v11384_v37, %v2990_v59 }
 0x58d   :  { %v3122_v6 = vmul.f32 %v11386_v14, %v2992_v16 }
 0x58f   :  { %v2996_v50 = vpop.f32.mrb[156].mxu0  ;;  %3294 = vmatprep.mubr.f32.mxu1 %v3122_v6 }
 0x590   :  { %v2998_v23 = vpop.f32.mrb[157].mxu0  ;;  %3295 = vmatmul.mubr.f32.gmra.mrb[138].mxu1 %v3121_v33  ;;  %v3123_v61 = vmul.f32 %v11392_v38, %v2996_v50 }
 0x591   :  { %v3124_v19 = vmul.f32 %v11394_v1, %v2998_v23 }
 0x593   :  { %v3002_v17 = vpop.f32.mrb[158].mxu0  ;;  %3299 = vmatprep.mubr.f32.mxu1 %v3124_v19 }
 0x594   :  { %v3004_v58 = vpop.f32.mrb[159].mxu0  ;;  %3300 = vmatmul.mubr.f32.gmra.mrb[140].mxu1 %v3123_v61  ;;  %v3125_v57 = vmul.f32 %v11400_v8, %v3002_v17  ;;  %v13702_v61 = vld [vmem:[#allocation31_spill] sm:$0xff] }
 0x595   :  { %v3126_v52 = vmul.f32 %v11402_v29, %v3004_v58 }
 0x597   :  { %v3008_v27 = vpop.f32.mrb[160].mxu0  ;;  %3304 = vmatprep.mubr.f32.mxu1 %v3126_v52 }
 0x598   :  { %v3010_v14 = vpop.f32.mrb[161].mxu0  ;;  %3305 = vmatmul.mubr.f32.gmra.mrb[142].mxu1 %v3125_v57  ;;  %v3127_v12 = vmul.f32 %v11408_v25, %v3008_v27  ;;  %v13704_v57 = vld [vmem:[#allocation35_spill] sm:$0xff] }
 0x599   :  { %v3128_v37 = vmul.f32 %v11410_v41, %v3010_v14 }
 0x59b   :  { %v3014_v26 = vpop.f32.mrb[162].mxu0  ;;  %3309 = vmatprep.mubr.f32.mxu1 %v3128_v37 }
 0x59c   :  { %v3016_v1 = vpop.f32.mrb[163].mxu0  ;;  %3310 = vmatmul.mubr.f32.gmra.mrb[144].mxu1 %v3127_v12  ;;  %v3129_v53 = vmul.f32 %v11416_v48, %v3014_v26  ;;  %v13706_v12 = vld [vmem:[#allocation38_spill] sm:$0xff] }
 0x59d   :  { %v3130_v38 = vmul.f32 %v11418_v36, %v3016_v1 }
 0x59f   :  { %v3020_v51 = vpop.f32.mrb[164].mxu0  ;;  %3314 = vmatprep.mubr.f32.mxu1 %v3130_v38 }
 0x5a0   :  { %v3022_v29 = vpop.f32.mrb[165].mxu0  ;;  %3315 = vmatmul.mubr.f32.gmra.mrb[146].mxu1 %v3129_v53  ;;  %v3131_v46 = vmul.f32 %v11424_v13, %v3020_v51  ;;  %v13696_v13 = vld [vmem:[#allocation30_spill] sm:$0xff] }
 0x5a1   :  { %v3132_v8 = vmul.f32 %v11426_v15, %v3022_v29 }
 0x5a3   :  { %v3026_v42 = vpop.f32.mrb[166].mxu0  ;;  %3319 = vmatprep.mubr.f32.mxu1 %v3132_v8 }
 0x5a4   :  { %v3028_v41 = vpop.f32.mrb[167].mxu0  ;;  %3320 = vmatmul.mubr.f32.gmra.mrb[148].mxu1 %v3131_v46  ;;  %v3133_v49 = vmul.f32 %v11432_v43, %v3026_v42 }
 0x5a5   :  { %v3134_v25 = vmul.f32 %v11434_v9, %v3028_v41 }
 0x5a7   :  { %v3032_v63 = vpop.f32.mrb[168].mxu0  ;;  %3324 = vmatprep.mubr.f32.mxu1 %v3134_v25 }
 0x5a8   :  { %v3034_v36 = vpop.f32.mrb[169].mxu0  ;;  %3325 = vmatmul.mubr.f32.gmra.mrb[150].mxu1 %v3133_v49  ;;  %v3135_v20 = vmul.f32 %v13695_v21, %v3032_v63 }
 0x5a9   :  { %v3136_v48 = vmul.f32 %v11442_v28, %v3034_v36 }
 0x5ab   :  { %v3038_v3 = vpop.f32.mrb[170].mxu0  ;;  %3329 = vmatprep.mubr.f32.mxu1 %v3136_v48 }
 0x5ac   :  { %v3040_v15 = vpop.f32.mrb[171].mxu0  ;;  %3330 = vmatmul.mubr.f32.gmra.mrb[152].mxu1 %v3135_v20  ;;  %v3137_v40 = vmul.f32 %v13697_v22, %v3038_v3 }
 0x5ad   :  { %v3138_v39 = vmul.f32 %v13696_v13, %v3040_v15 }
 0x5af   :  { %v3044_v2 = vpop.f32.mrb[172].mxu0  ;;  %3334 = vmatprep.mubr.f32.mxu1 %v3138_v39 }
 0x5b0   :  { %v3046_v9 = vpop.f32.mrb[173].mxu0  ;;  %3335 = vmatmul.mubr.f32.gmra.mrb[154].mxu1 %v3137_v40  ;;  %v3139_v60 = vmul.f32 %v13698_v54, %v3044_v2 }
 0x5b1   :  { %v3140_v43 = vmul.f32 %v11458_v44, %v3046_v9 }
 0x5b3   :  { %v3050_v56 = vpop.f32.mrb[174].mxu0  ;;  %3339 = vmatprep.mubr.f32.mxu1 %v3140_v43 }
 0x5b4   :  { %v3052_v28 = vpop.f32.mrb[175].mxu0  ;;  %3340 = vmatmul.mubr.f32.gmra.mrb[156].mxu1 %v3139_v60  ;;  %v3141_v5 = vmul.f32 %v13700_v30, %v3050_v56 }
 0x5b5   :  { %v3142_v31 = vmul.f32 %v13699_v24, %v3052_v28 }
 0x5b7   :  { %v3056_v18 = vpop.f32.mrb[176].mxu0  ;;  %3344 = vmatprep.mubr.f32.mxu1 %v3142_v31 }
 0x5b8   :  { %v3058_v32 = vpop.f32.mrb[177].mxu0  ;;  %3345 = vmatmul.mubr.f32.gmra.mrb[158].mxu1 %v3141_v5  ;;  %v3143_v11 = vmul.f32 %v11472_v47, %v3056_v18  ;;  %v13701_v47 = vld [vmem:[#allocation37_spill] sm:$0xff] }
 0x5b9   :  { %v3144_v7 = vmul.f32 %v11474_v10, %v3058_v32 }
 0x5bb   :  { %v3062_v55 = vpop.f32.mrb[178].mxu0  ;;  %3349 = vmatprep.mubr.f32.mxu1 %v3144_v7 }
 0x5bc   :  { %v3064_v44 = vpop.f32.mrb[179].mxu0  ;;  %3350 = vmatmul.mubr.f32.gmra.mrb[160].mxu1 %v3143_v11  ;;  %v3145_v59 = vmul.f32 %v11480_v0, %v3062_v55  ;;  %v13703_v0 = vld [vmem:[#allocation39_spill] sm:$0xff] }
 0x5bd   :  { %v3146_v4 = vmul.f32 %v11482_v34, %v3064_v44 }
 0x5bf   :  { %v3068_v16 = vpop.f32.mrb[180].mxu0  ;;  %3354 = vmatprep.mubr.f32.mxu1 %v3146_v4 }
 0x5c0   :  { %v3070_v6 = vpop.f32.mrb[181].mxu0  ;;  %3355 = vmatmul.mubr.f32.gmra.mrb[162].mxu1 %v3145_v59  ;;  %v3147_v50 = vmul.f32 %v11488_v62, %v3068_v16  ;;  %v13705_v62 = vld [vmem:[#allocation41_spill] sm:$0xff] }
 0x5c1   :  { %v3148_v33 = vmul.f32 %v11490_v35, %v3070_v6 }
 0x5c3   :  { %v3074_v23 = vpop.f32.mrb[182].mxu0  ;;  %3359 = vmatprep.mubr.f32.mxu1 %v3148_v33 }
 0x5c4   :  { %v3076_v10 = vpop.f32.mrb[183].mxu0  ;;  %3360 = vmatmul.mubr.f32.gmra.mrb[164].mxu1 %v3147_v50  ;;  %v3149_v17 = vmul.f32 %v13702_v61, %v3074_v23 }
 0x5c5   :  { %v3150_v19 = vmul.f32 %v13701_v47, %v3076_v10 }
 0x5c7   :  { %v3080_v58 = vpop.f32.mrb[184].mxu0  ;;  %3364 = vmatprep.mubr.f32.mxu1 %v3150_v19 }
 0x5c8   :  { %v3082_v34 = vpop.f32.mrb[185].mxu0  ;;  %3365 = vmatmul.mubr.f32.gmra.mrb[166].mxu1 %v3149_v17  ;;  %v3151_v27 = vmul.f32 %v13704_v57, %v3080_v58 }
 0x5c9   :  { %v3152_v52 = vmul.f32 %v13703_v0, %v3082_v34 }
 0x5cb   :  { %v3086_v14 = vpop.f32.mrb[186].mxu0  ;;  %3369 = vmatprep.mubr.f32.mxu1 %v3152_v52 }
 0x5cc   :  { %v3088_v35 = vpop.f32.mrb[187].mxu0  ;;  %3370 = vmatmul.mubr.f32.gmra.mrb[168].mxu1 %v3151_v27  ;;  %v3153_v26 = vmul.f32 %v13706_v12, %v3086_v14 }
 0x5cd   :  { %v3154_v37 = vmul.f32 %v13705_v62, %v3088_v35 }
 0x5cf   :  { %3374 = vmatprep.mubr.f32.mxu1 %v3154_v37 }
 0x5d0   :  { %3375 = vmatmul.mubr.f32.gmra.mrb[170].mxu1 %v3153_v26 }
 0x627   :  { %v3221_v1 = vpop.f32.mrb[108].mxu1 }
 0x628   :  { %v3223_v38 = vpop.f32.mrb[109].mxu1 }
 0x629   :  { %v7331_v38 = vld [vmem:[%s13455_s8] ss:$0 sm:$0xff] }
 0x62b   :  { %v3226_v53 = vpop.f32.mrb[110].mxu1 }
 0x62c   :  { %v3228_v51 = vpop.f32.mrb[111].mxu1 }
 0x62f   :  { %v3231_v29 = vpop.f32.mrb[112].mxu1 }
 0x630   :  { %v3233_v8 = vpop.f32.mrb[113].mxu1 }
 0x633   :  { %v3236_v46 = vpop.f32.mrb[114].mxu1 }
 0x634   :  { %v3238_v42 = vpop.f32.mrb[115].mxu1 }
 0x637   :  { %v3241_v41 = vpop.f32.mrb[116].mxu1 }
 0x638   :  { %v3243_v25 = vpop.f32.mrb[117].mxu1 }
 0x63b   :  { %v3246_v49 = vpop.f32.mrb[118].mxu1 }
 0x63c   :  { %v3248_v63 = vpop.f32.mrb[119].mxu1 }
 0x63f   :  { %v3251_v36 = vpop.f32.mrb[120].mxu1 }
 0x640   :  { %v3253_v48 = vpop.f32.mrb[121].mxu1 }
 0x641   :  { %v13707_v48 = vld [vmem:[#allocation7_spill] sm:$0xff] }
 0x643   :  { %v3256_v21 = vpop.f32.mrb[122].mxu1 }
 0x644   :  { %v3258_v20 = vpop.f32.mrb[123].mxu1 }
 0x645   :  { %v13708_v20 = vld [vmem:[#allocation9_spill] sm:$0xff] }
 0x647   :  { %v3261_v3 = vpop.f32.mrb[124].mxu1 }
 0x648   :  { %v3380_v15 = vadd.f32 %v3261_v3, %v3221_v1  ;;  %v3263_v13 = vpop.f32.mrb[125].mxu1  ;;  %v13709_v3 = vld [vmem:[#allocation17_spill] sm:$0xff] }
 0x64b   :  { %v3266_v39 = vpop.f32.mrb[126].mxu1 }
 0x64c   :  { %v3381_v22 = vadd.f32 %v3266_v39, %v3226_v53  ;;  %v3268_v40 = vpop.f32.mrb[127].mxu1 }
 0x64d   :  { %v13711_v40 = vld [vmem:[#allocation18_spill] sm:$0xff] }
 0x64f   :  { %v3271_v2 = vpop.f32.mrb[128].mxu1 }
 0x650   :  { %v3382_v9 = vadd.f32 %v3271_v2, %v3231_v29  ;;  %v3273_v43 = vpop.f32.mrb[129].mxu1 }
 0x653   :  { %v3276_v54 = vpop.f32.mrb[130].mxu1 }
 0x654   :  { %v3383_v60 = vadd.f32 %v3276_v54, %v3236_v46  ;;  %v3278_v56 = vpop.f32.mrb[131].mxu1 }
 0x657   :  { %v3281_v28 = vpop.f32.mrb[132].mxu1 }
 0x658   :  { %v3384_v24 = vadd.f32 %v3281_v28, %v3241_v41  ;;  %v3283_v31 = vpop.f32.mrb[133].mxu1 }
 0x65b   :  { %v3286_v30 = vpop.f32.mrb[134].mxu1 }
 0x65c   :  { %v3385_v5 = vadd.f32 %v3286_v30, %v3246_v49  ;;  %v3288_v18 = vpop.f32.mrb[135].mxu1 }
 0x65f   :  { %v3291_v32 = vpop.f32.mrb[136].mxu1 }
 0x660   :  { %v3386_v7 = vadd.f32 %v3291_v32, %v3251_v36  ;;  %v3293_v11 = vpop.f32.mrb[137].mxu1 }
 0x663   :  { %v3296_v55 = vpop.f32.mrb[138].mxu1 }
 0x664   :  { %v3387_v44 = vadd.f32 %v3296_v55, %v3256_v21  ;;  %v3298_v4 = vpop.f32.mrb[139].mxu1 }
 0x665   :  { %v13713_v4 = vld [vmem:[#allocation21_spill] sm:$0xff] }
 0x667   :  { %v3301_v59 = vpop.f32.mrb[140].mxu1 }
 0x668   :  { %v3388_v16 = vadd.f32 %v3380_v15, %v3301_v59  ;;  %v3303_v6 = vpop.f32.mrb[141].mxu1  ;;  %v13714_v59 = vld [vmem:[#allocation13_spill] sm:$0xff] }
 0x669   :  { %v13716_v6 = vld [vmem:[#allocation14_spill] sm:$0xff] }
 0x66b   :  { %v3306_v33 = vpop.f32.mrb[142].mxu1 }
 0x66c   :  { %v3389_v50 = vadd.f32 %v3381_v22, %v3306_v33  ;;  %v3308_v23 = vpop.f32.mrb[143].mxu1  ;;  %v13710_v22 = vld [vmem:[#allocation8_spill] sm:$0xff]  ;;  %v13717_v33 = vld [vmem:[#allocation25_spill] sm:$0xff] }
 0x66d   :  { %v13719_v23 = vld [vmem:[#allocation26_spill] sm:$0xff] }
 0x66f   :  { %v3311_v10 = vpop.f32.mrb[144].mxu1 }
 0x670   :  { %v3390_v47 = vadd.f32 %v3382_v9, %v3311_v10  ;;  %v3313_v19 = vpop.f32.mrb[145].mxu1  ;;  %v13720_v10 = vld [vmem:[#allocation19_spill] sm:$0xff] }
 0x671   :  { %v13722_v19 = vld [vmem:[#allocation20_spill] sm:$0xff] }
 0x673   :  { %v3316_v61 = vpop.f32.mrb[146].mxu1 }
 0x674   :  { %v3391_v17 = vadd.f32 %v3383_v60, %v3316_v61  ;;  %v3318_v58 = vpop.f32.mrb[147].mxu1  ;;  %v13723_v61 = vld [vmem:[#allocation29_spill] sm:$0xff] }
 0x675   :  { %v13724_v58 = vld [vmem:[#allocation23_spill] sm:$0xff] }
 0x677   :  { %v3321_v34 = vpop.f32.mrb[148].mxu1 }
 0x678   :  { %v3392_v0 = vadd.f32 %v3384_v24, %v3321_v34  ;;  %v3323_v52 = vpop.f32.mrb[149].mxu1  ;;  %v13725_v34 = vld [vmem:[#allocation24_spill] sm:$0xff] }
 0x67b   :  { %v3326_v57 = vpop.f32.mrb[150].mxu1 }
 0x67c   :  { %v3393_v27 = vadd.f32 %v3385_v5, %v3326_v57  ;;  %v3328_v14 = vpop.f32.mrb[151].mxu1 }
 0x67f   :  { %v3331_v35 = vpop.f32.mrb[152].mxu1 }
 0x680   :  { %v3394_v62 = vadd.f32 %v3386_v7, %v3331_v35  ;;  %v3333_v37 = vpop.f32.mrb[153].mxu1  ;;  %v9514_v35 = vld [vmem:[%s13451_s4] sm:$0xff] }
 0x683   :  { %v3336_v12 = vpop.f32.mrb[154].mxu1 }
 0x684   :  { %v3395_v26 = vadd.f32 %v3387_v44, %v3336_v12  ;;  %v3338_v1 = vpop.f32.mrb[155].mxu1  ;;  %v13712_v44 = vld [vmem:[#allocation11_spill] sm:$0xff] }
 0x687   :  { %v3341_v53 = vpop.f32.mrb[156].mxu1 }
 0x688   :  { %v3396_v51 = vadd.f32 %v3388_v16, %v3341_v53  ;;  %v3343_v29 = vpop.f32.mrb[157].mxu1  ;;  %v13715_v16 = vld [vmem:[#allocation22_spill] sm:$0xff] }
 0x68a   :  { %v11651_v8 = vadd.f32 %v7331_v38, %v3396_v51 }
 0x68b   :  { %v3346_v46 = vpop.f32.mrb[158].mxu1 }
 0x68c   :  { %v3397_v42 = vadd.f32 %v3389_v50, %v3346_v46  ;;  %v3348_v41 = vpop.f32.mrb[159].mxu1  ;;  %8354 = vmatprep.mubr.msk.f32.mxu0 %vm325_vm1, %v11651_v8  ;;  %8414 = vmatprep.mubr.msk.f32.mxu1 %vm325_vm1, %v11651_v8  ;;  %v13718_v50 = vld [vmem:[#allocation16_spill] sm:$0xff] }
 0x68e   :  { %v11657_v25 = vadd.f32 %v7331_v38, %v3397_v42 }
 0x68f   :  { %v3351_v49 = vpop.f32.mrb[160].mxu1 }
 0x690   :  { %v3398_v63 = vadd.f32 %v3390_v47, %v3351_v49  ;;  %v3353_v36 = vpop.f32.mrb[161].mxu1  ;;  %8355 = vmatmul.mubr.msk.f32.vlgmr.msra.gmra.mrb[188].mxu0 %vm325_vm1, %v11657_v25  ;;  %8415 = vmatmul.mubr.msk.f32.vlgmr.msra.gmra.mrb[172].mxu1 %vm325_vm1, %v11657_v25  ;;  %v13721_v47 = vld [vmem:[#allocation28_spill] sm:$0xff] }
 0x691   :  { %8877 = vmatpush3.bf16.msra.mxu0 %v13707_v48  ;;  %8909 = vmatpush3.bf16.msra.mxu1 %v13694_v45 }
 0x692   :  { %v11665_v21 = vadd.f32 %v7331_v38, %v3398_v63  ;;  %8879 = vmatprep.subr.bf16.mxu0 %v13708_v20  ;;  %8911 = vmatprep.subr.bf16.mxu1 %v13709_v3  ;;  %v9515_v63 = vld [vmem:[%s13453_s6 + $0x48] sm:$0xff] }
 0x693   :  { %v3356_v15 = vpop.f32.mrb[162].mxu1 }
 0x694   :  { %v3399_v13 = vadd.f32 %v3391_v17, %v3356_v15  ;;  %v3358_v39 = vpop.f32.mrb[163].mxu1  ;;  %8357 = vmatprep.mubr.msk.f32.mxu0 %vm325_vm1, %v11665_v21  ;;  %8417 = vmatprep.mubr.msk.f32.mxu1 %vm325_vm1, %v11665_v21  ;;  %v9513_v17 = vld.sshfl [vmem:[%s13459_s12] sm:$0x33 pattern:$0x76325410] }
 0x695   :  { %8881 = vmatpush3.bf16.msra.mxu0 %v13708_v20  ;;  %8913 = vmatpush3.bf16.msra.mxu1 %v13709_v3  ;;  %v9516_v20 = vld [vmem:[%s13453_s6 + $0x40] sm:$0xff] }
 0x696   :  { %v11675_v45 = vadd.f32 %v7331_v38, %v3399_v13  ;;  %8883 = vmatprep.subr.bf16.mxu0 %v13710_v22  ;;  %8923 = vmatprep.subr.bf16.mxu1 %v13711_v40 }
 0x697   :  { %v3361_v2 = vpop.f32.mrb[164].mxu1 }
 0x698   :  { %v3400_v9 = vadd.f32 %v3392_v0, %v3361_v2  ;;  %v3363_v43 = vpop.f32.mrb[165].mxu1  ;;  %8358 = vmatmul.mubr.msk.f32.gmra.mrb[190].mxu0 %vm325_vm1, %v11675_v45  ;;  %8418 = vmatmul.mubr.msk.f32.gmra.mrb[174].mxu1 %vm325_vm1, %v11675_v45  ;;  %v13726_v0 = vld [vmem:[#allocation27_spill] sm:$0xff] }
 0x69a   :  { %v11683_v54 = vadd.f32 %v7331_v38, %v3400_v9  ;;  %v9518_v9 = vld [vmem:[%s13453_s6 + $0x50] sm:$0xff] }
 0x69b   :  { %v3366_v60 = vpop.f32.mrb[166].mxu1 }
 0x69c   :  { %v3401_v56 = vadd.f32 %v3393_v27, %v3366_v60  ;;  %v3368_v28 = vpop.f32.mrb[167].mxu1  ;;  %8360 = vmatprep.mubr.msk.f32.mxu0 %vm325_vm1, %v11683_v54  ;;  %8420 = vmatprep.mubr.msk.f32.mxu1 %vm325_vm1, %v11683_v54 }
 0x69d   :  { %v9519_v28 = vld [vmem:[%s13453_s6 + $0x68] sm:$0xff] }
 0x69e   :  { %v11689_v24 = vadd.f32 %v7331_v38, %v3401_v56 }
 0x69f   :  { %v3371_v31 = vpop.f32.mrb[168].mxu1 }
 0x6a0   :  { %v3402_v30 = vadd.f32 %v3394_v62, %v3371_v31  ;;  %v3373_v5 = vpop.f32.mrb[169].mxu1  ;;  %8361 = vmatmul.mubr.msk.f32.gmra.mrb[192].mxu0 %vm325_vm1, %v11689_v24  ;;  %8421 = vmatmul.mubr.msk.f32.gmra.mrb[176].mxu1 %vm325_vm1, %v11689_v24 }
 0x6a1   :  { %v9520_v5 = vld [vmem:[%s13453_s6 + $0x60] sm:$0xff] }
 0x6a2   :  { %v11695_v18 = vadd.f32 %v7331_v38, %v3402_v30 }
 0x6a3   :  { %v3376_v32 = vpop.f32.mrb[170].mxu1 }
 0x6a4   :  { %v3403_v7 = vadd.f32 %v3395_v26, %v3376_v32  ;;  %v3378_v11 = vpop.f32.mrb[171].mxu1  ;;  %8363 = vmatprep.mubr.msk.f32.mxu0 %vm325_vm1, %v11695_v18  ;;  %8423 = vmatprep.mubr.msk.f32.mxu1 %vm325_vm1, %v11695_v18 }
 0x6a6   :  { %v11701_v55 = vadd.f32 %v7331_v38, %v3403_v7 }
 0x6a8   :  { %8364 = vmatmul.mubr.msk.f32.gmra.mrb[194].mxu0 %vm325_vm1, %v11701_v55  ;;  %8424 = vmatmul.mubr.msk.f32.gmra.mrb[178].mxu1 %vm325_vm1, %v11701_v55 }
 0x6a9   :  { %8374 = vmatprep.mubr.msk.f32.mxu0 %vm325_vm1, %v11651_v8  ;;  %8454 = vmatprep.mubr.msk.f32.mxu1 %vm325_vm1, %v11651_v8 }
 0x6ac   :  { %8375 = vmatmul.mubr.msk.f32.vlgmr.msra.gmra.mrb[196].mxu0 %vm325_vm1, %v11657_v25  ;;  %8455 = vmatmul.mubr.msk.f32.vlgmr.msra.gmra.mrb[180].mxu1 %vm325_vm1, %v11657_v25 }
 0x6ad   :  { %8885 = vmatpush3.bf16.msra.mxu0 %v13710_v22  ;;  %8377 = vmatprep.mubr.msk.f32.mxu0 %vm325_vm1, %v11665_v21 }
 0x6ae   :  { %8457 = vmatprep.mubr.msk.f32.mxu1 %vm325_vm1, %v11665_v21  ;;  %8887 = vmatprep.subr.bf16.mxu0 %v13712_v44 }
 0x6af   :  { %8925 = vmatpush3.bf16.msra.mxu1 %v13711_v40 }
 0x6b0   :  { %8378 = vmatmul.mubr.msk.f32.gmra.mrb[198].mxu0 %vm325_vm1, %v11675_v45  ;;  %8458 = vmatmul.mubr.msk.f32.gmra.mrb[182].mxu1 %vm325_vm1, %v11675_v45 }
 0x6b1   :  { %8380 = vmatprep.mubr.msk.f32.mxu0 %vm325_vm1, %v11683_v54  ;;  %8460 = vmatprep.mubr.msk.f32.mxu1 %vm325_vm1, %v11683_v54 }
 0x6b2   :  { %8889 = vmatpush3.bf16.msra.mxu0 %v13712_v44  ;;  %8927 = vmatprep.subr.bf16.mxu1 %v13713_v4 }
 0x6b3   :  { %8929 = vmatpush3.bf16.msra.mxu1 %v13713_v4  ;;  %8899 = vmatprep.subr.bf16.mxu0 %v13714_v59 }
 0x6b4   :  { %8381 = vmatmul.mubr.msk.f32.gmra.mrb[200].mxu0 %vm325_vm1, %v11689_v24  ;;  %8461 = vmatmul.mubr.msk.f32.gmra.mrb[184].mxu1 %vm325_vm1, %v11689_v24 }
 0x6b5   :  { %8383 = vmatprep.mubr.msk.f32.mxu0 %vm325_vm1, %v11695_v18  ;;  %8463 = vmatprep.mubr.msk.f32.mxu1 %vm325_vm1, %v11695_v18 }
 0x6b6   :  { %8939 = vmatprep.subr.bf16.mxu1 %v13715_v16 }
 0x6b8   :  { %8384 = vmatmul.mubr.msk.f32.gmra.mrb[202].mxu0 %vm325_vm1, %v11701_v55  ;;  %8464 = vmatmul.mubr.msk.f32.gmra.mrb[186].mxu1 %vm325_vm1, %v11701_v55 }
 0x6b9   :  { %8394 = vmatprep.mubr.msk.f32.mxu0 %vm325_vm1, %v11651_v8  ;;  %8494 = vmatprep.mubr.msk.f32.mxu1 %vm325_vm1, %v11651_v8 }
 0x6bc   :  { %8395 = vmatmul.mubr.msk.f32.vlgmr.msra.gmra.mrb[204].mxu0 %vm325_vm1, %v11657_v25  ;;  %8495 = vmatmul.mubr.msk.f32.vlgmr.msra.gmra.mrb[188].mxu1 %vm325_vm1, %v11657_v25 }
 0x6bd   :  { %8901 = vmatpush3.bf16.msra.mxu0 %v13714_v59  ;;  %8397 = vmatprep.mubr.msk.f32.mxu0 %vm325_vm1, %v11665_v21 }
 0x6be   :  { %8497 = vmatprep.mubr.msk.f32.mxu1 %vm325_vm1, %v11665_v21  ;;  %8903 = vmatprep.subr.bf16.mxu0 %v13716_v6 }
 0x6bf   :  { %8941 = vmatpush3.bf16.msra.mxu1 %v13715_v16  ;;  %v9522_v16 = vld [vmem:[%s13453_s6 + $0x70] sm:$0xff] }
 0x6c0   :  { %8398 = vmatmul.mubr.msk.f32.gmra.mrb[206].mxu0 %vm325_vm1, %v11675_v45  ;;  %8498 = vmatmul.mubr.msk.f32.gmra.mrb[190].mxu1 %vm325_vm1, %v11675_v45 }
 0x6c1   :  { %8400 = vmatprep.mubr.msk.f32.mxu0 %vm325_vm1, %v11683_v54  ;;  %8500 = vmatprep.mubr.msk.f32.mxu1 %vm325_vm1, %v11683_v54 }
 0x6c2   :  { %8905 = vmatpush3.bf16.msra.mxu0 %v13716_v6  ;;  %8943 = vmatprep.subr.bf16.mxu1 %v13717_v33 }
 0x6c3   :  { %8945 = vmatpush3.bf16.msra.mxu1 %v13717_v33  ;;  %8915 = vmatprep.subr.bf16.mxu0 %v13718_v50  ;;  %v9532_v33 = vld [vmem:[%s13453_s6] sm:$0xff] }
 0x6c4   :  { %8401 = vmatmul.mubr.msk.f32.gmra.mrb[208].mxu0 %vm325_vm1, %v11689_v24  ;;  %8501 = vmatmul.mubr.msk.f32.gmra.mrb[192].mxu1 %vm325_vm1, %v11689_v24 }
 0x6c5   :  { %8403 = vmatprep.mubr.msk.f32.mxu0 %vm325_vm1, %v11695_v18  ;;  %8503 = vmatprep.mubr.msk.f32.mxu1 %vm325_vm1, %v11695_v18 }
 0x6c6   :  { %8955 = vmatprep.subr.bf16.mxu1 %v13719_v23 }
 0x6c8   :  { %8404 = vmatmul.mubr.msk.f32.gmra.mrb[210].mxu0 %vm325_vm1, %v11701_v55  ;;  %8504 = vmatmul.mubr.msk.f32.gmra.mrb[194].mxu1 %vm325_vm1, %v11701_v55 }
 0x6c9   :  { %8434 = vmatprep.mubr.msk.f32.mxu0 %vm325_vm1, %v11651_v8  ;;  %8534 = vmatprep.mubr.msk.f32.mxu1 %vm325_vm1, %v11651_v8 }
 0x6cc   :  { %8435 = vmatmul.mubr.msk.f32.vlgmr.msra.gmra.mrb[212].mxu0 %vm325_vm1, %v11657_v25  ;;  %8535 = vmatmul.mubr.msk.f32.vlgmr.msra.gmra.mrb[196].mxu1 %vm325_vm1, %v11657_v25 }
 0x6cd   :  { %8917 = vmatpush3.bf16.msra.mxu0 %v13718_v50  ;;  %8437 = vmatprep.mubr.msk.f32.mxu0 %vm325_vm1, %v11665_v21 }
 0x6ce   :  { %8537 = vmatprep.mubr.msk.f32.mxu1 %vm325_vm1, %v11665_v21  ;;  %8919 = vmatprep.subr.bf16.mxu0 %v13720_v10 }
 0x6cf   :  { %8957 = vmatpush3.bf16.msra.mxu1 %v13719_v23 }
 0x6d0   :  { %8438 = vmatmul.mubr.msk.f32.gmra.mrb[214].mxu0 %vm325_vm1, %v11675_v45  ;;  %8538 = vmatmul.mubr.msk.f32.gmra.mrb[198].mxu1 %vm325_vm1, %v11675_v45 }
 0x6d1   :  { %8440 = vmatprep.mubr.msk.f32.mxu0 %vm325_vm1, %v11683_v54  ;;  %8540 = vmatprep.mubr.msk.f32.mxu1 %vm325_vm1, %v11683_v54 }
 0x6d2   :  { %8921 = vmatpush3.bf16.msra.mxu0 %v13720_v10  ;;  %8959 = vmatprep.subr.bf16.mxu1 %v13721_v47  ;;  %v9523_v10 = vld [vmem:[%s13453_s6 + $0xc8] sm:$0xff] }
 0x6d3   :  { %8961 = vmatpush3.bf16.msra.mxu1 %v13721_v47  ;;  %8931 = vmatprep.subr.bf16.mxu0 %v13722_v19 }
 0x6d4   :  { %8441 = vmatmul.mubr.msk.f32.gmra.mrb[216].mxu0 %vm325_vm1, %v11689_v24  ;;  %8541 = vmatmul.mubr.msk.f32.gmra.mrb[200].mxu1 %vm325_vm1, %v11689_v24 }
 0x6d5   :  { %8443 = vmatprep.mubr.msk.f32.mxu0 %vm325_vm1, %v11695_v18  ;;  %8543 = vmatprep.mubr.msk.f32.mxu1 %vm325_vm1, %v11695_v18 }
 0x6d6   :  { %5503 = vmatprep.subr.mxu1 %v13723_v61 }
 0x6d8   :  { %8444 = vmatmul.mubr.msk.f32.gmra.mrb[218].mxu0 %vm325_vm1, %v11701_v55  ;;  %8544 = vmatmul.mubr.msk.f32.gmra.mrb[202].mxu1 %vm325_vm1, %v11701_v55 }
 0x6d9   :  { %8474 = vmatprep.mubr.msk.f32.mxu0 %vm325_vm1, %v11651_v8  ;;  %8574 = vmatprep.mubr.msk.f32.mxu1 %vm325_vm1, %v11651_v8 }
 0x6dc   :  { %8475 = vmatmul.mubr.msk.f32.vlgmr.msra.gmra.mrb[220].mxu0 %vm325_vm1, %v11657_v25  ;;  %8575 = vmatmul.mubr.msk.f32.vlgmr.msra.gmra.mrb[204].mxu1 %vm325_vm1, %v11657_v25 }
 0x6dd   :  { %8477 = vmatprep.mubr.msk.f32.mxu0 %vm325_vm1, %v11665_v21  ;;  %8577 = vmatprep.mubr.msk.f32.mxu1 %vm325_vm1, %v11665_v21 }
 0x6de   :  { %8933 = vmatpush3.bf16.msra.mxu0 %v13722_v19  ;;  %5504 = vmatpush1.xpose.msra.mxu1 %v9513_v17  ;;  %v9524_v17 = vld [vmem:[%s13453_s6 + $0xc0] sm:$0xff] }
 0x6df   :  { %8935 = vmatprep.subr.bf16.mxu0 %v13724_v58  ;;  %7492 = vmatprep.subr.msk.mxu1 %vm2829_vm3, %v13723_v61 }
 0x6e0   :  { %8478 = vmatmul.mubr.msk.f32.gmra.mrb[222].mxu0 %vm325_vm1, %v11675_v45  ;;  %8578 = vmatmul.mubr.msk.f32.gmra.mrb[206].mxu1 %vm325_vm1, %v11675_v45 }
 0x6e1   :  { %8480 = vmatprep.mubr.msk.f32.mxu0 %vm325_vm1, %v11683_v54  ;;  %8580 = vmatprep.mubr.msk.f32.mxu1 %vm325_vm1, %v11683_v54 }
 0x6e2   :  { %8937 = vmatpush3.bf16.msra.mxu0 %v13724_v58 }
 0x6e3   :  { %8947 = vmatprep.subr.bf16.mxu0 %v13725_v34 }
 0x6e4   :  { %8481 = vmatmul.mubr.msk.f32.gmra.mrb[224].mxu0 %vm325_vm1, %v11689_v24  ;;  %8581 = vmatmul.mubr.msk.f32.gmra.mrb[208].mxu1 %vm325_vm1, %v11689_v24 }
 0x6e5   :  { %8483 = vmatprep.mubr.msk.f32.mxu0 %vm325_vm1, %v11695_v18  ;;  %8583 = vmatprep.mubr.msk.f32.mxu1 %vm325_vm1, %v11695_v18 }
 0x6e8   :  { %8484 = vmatmul.mubr.msk.f32.gmra.mrb[226].mxu0 %vm325_vm1, %v11701_v55  ;;  %8584 = vmatmul.mubr.msk.f32.gmra.mrb[210].mxu1 %vm325_vm1, %v11701_v55 }
 0x6e9   :  { %8514 = vmatprep.mubr.msk.f32.mxu0 %vm325_vm1, %v11651_v8 }
 0x6ec   :  { %8515 = vmatmul.mubr.msk.f32.vlgmr.msra.gmra.mrb[228].mxu0 %vm325_vm1, %v11657_v25 }
 0x6ed   :  { %8517 = vmatprep.mubr.msk.f32.mxu0 %vm325_vm1, %v11665_v21  ;;  %8949 = vmatpush3.bf16.msra.mxu0 %v13725_v34 }
 0x6ee   :  { %8951 = vmatprep.subr.bf16.mxu0 %v13726_v0 }
 0x6f0   :  { %8518 = vmatmul.mubr.msk.f32.gmra.mrb[230].mxu0 %vm325_vm1, %v11675_v45 }
 0x6f1   :  { %8520 = vmatprep.mubr.msk.f32.mxu0 %vm325_vm1, %v11683_v54  ;;  %8953 = vmatpush3.bf16.msra.mxu0 %v13726_v0 }
 0x6f4   :  { %8521 = vmatmul.mubr.msk.f32.gmra.mrb[232].mxu0 %vm325_vm1, %v11689_v24 }
 0x6f5   :  { %8523 = vmatprep.mubr.msk.f32.mxu0 %vm325_vm1, %v11695_v18 }
 0x6f8   :  { %8524 = vmatmul.mubr.msk.f32.gmra.mrb[234].mxu0 %vm325_vm1, %v11701_v55 }
 0x6f9   :  { %8554 = vmatprep.mubr.msk.f32.mxu0 %vm325_vm1, %v11651_v8 }
 0x6fc   :  { %8555 = vmatmul.mubr.msk.f32.vlgmr.msra.gmra.mrb[236].mxu0 %vm325_vm1, %v11657_v25 }
 0x6fd   :  { %8557 = vmatprep.mubr.msk.f32.mxu0 %vm325_vm1, %v11665_v21 }
 0x700   :  { %8558 = vmatmul.mubr.msk.f32.gmra.mrb[238].mxu0 %vm325_vm1, %v11675_v45  ;;  %v9517_v45 = vld [vmem:[%s13453_s6 + $0x58] sm:$0xff] }
 0x701   :  { %8560 = vmatprep.mubr.msk.f32.mxu0 %vm325_vm1, %v11683_v54  ;;  %v9533_v54 = vld [vmem:[%s13453_s6 + $0x18] sm:$0xff] }
 0x704   :  { %8561 = vmatmul.mubr.msk.f32.gmra.mrb[240].mxu0 %vm325_vm1, %v11689_v24 }
 0x705   :  { %8563 = vmatprep.mubr.msk.f32.mxu0 %vm325_vm1, %v11695_v18 }
 0x708   :  { %8564 = vmatmul.mubr.msk.f32.gmra.mrb[242].mxu0 %vm325_vm1, %v11701_v55  ;;  %v9521_v55 = vld [vmem:[%s13453_s6 + $0x78] sm:$0xff] }
 0x763   :  { %v11903_v52 = vpop.f32.mrb[188].mxu0  ;;  %v11905_v57 = vpop.f32.mrb[172].mxu1 }
 0x764   :  { %13727 = vst [vmem:[#allocation40_spill] sm:$0xff] %v11905_v57  ;;  %v3508_v27 = vpop.f32.mrb[189].mxu0  ;;  %v11907_v14 = vpop.f32.mrb[173].mxu1 }
 0x765   :  { %13728 = vst [vmem:[#allocation43_spill] sm:$0xff] %v11907_v14  ;;  %v11912_v62 = vadd.f32 %v9514_v35, %v3508_v27  ;;  %v9525_v35 = vld [vmem:[%s13453_s6 + $0xd8] sm:$0xff] }
 0x767   :  { %7988 = vmatprep.mubr.msk.f32.mxu0 %vm191_vm0, %v11912_v62 }
 0x76b   :  { %v11916_v37 = vpop.f32.mrb[190].mxu0  ;;  %v11918_v12 = vpop.f32.mrb[174].mxu1 }
 0x76c   :  { %13729 = vst [vmem:[#allocation44_spill] sm:$0xff] %v11918_v12  ;;  %v11920_v26 = vpop.f32.mrb[191].mxu0  ;;  %v11922_v1 = vpop.f32.mrb[175].mxu1 }
 0x76d   :  { %13730 = vst [vmem:[#allocation6_spill] sm:$0xff] %v11922_v1 }
 0x773   :  { %v11924_v38 = vpop.f32.mrb[192].mxu0  ;;  %v11926_v53 = vpop.f32.mrb[176].mxu1 }
 0x774   :  { %13731 = vst [vmem:[#allocation10_spill] sm:$0xff] %v11926_v53  ;;  %v11928_v51 = vpop.f32.mrb[193].mxu0  ;;  %v11930_v29 = vpop.f32.mrb[177].mxu1 }
 0x775   :  { %13732 = vst [vmem:[#allocation12_spill] sm:$0xff] %v11930_v29 }
 0x77b   :  { %v11932_v8 = vpop.f32.mrb[194].mxu0  ;;  %v11934_v46 = vpop.f32.mrb[178].mxu1 }
 0x77c   :  { %13733 = vst [vmem:[#allocation15_spill] sm:$0xff] %v11934_v46  ;;  %v11936_v42 = vpop.f32.mrb[195].mxu0  ;;  %v11938_v41 = vpop.f32.mrb[179].mxu1 }
 0x77d   :  { %13734 = vst [vmem:[#allocation5_spill] sm:$0xff] %v11938_v41 }
 0x77f   :  { %v11940_v25 = vpop.f32.mrb[196].mxu0  ;;  %v8456_v49 = vpop.f32.mrb[180].mxu1 }
 0x780   :  { %v11945_v36 = vadd.f32 %v9515_v63, %v8456_v49  ;;  %v11947_v48 = vpop.f32.mrb[197].mxu0  ;;  %v4065_v21 = vpop.f32.mrb[181].mxu1 }
 0x781   :  { %v11952_v3 = vadd.f32 %v9516_v20, %v4065_v21  ;;  %v9526_v20 = vld [vmem:[%s13453_s6 + $0xd0] sm:$0xff] }
 0x783   :  { %v11956_v13 = vpop.f32.mrb[198].mxu0  ;;  %v8459_v39 = vpop.f32.mrb[182].mxu1 }
 0x784   :  { %v11961_v22 = vadd.f32 %v9517_v45, %v8459_v39  ;;  %v11963_v40 = vpop.f32.mrb[199].mxu0  ;;  %v4075_v2 = vpop.f32.mrb[183].mxu1 }
 0x785   :  { %v11968_v43 = vadd.f32 %v9518_v9, %v4075_v2 }
 0x787   :  { %v11972_v60 = vpop.f32.mrb[200].mxu0  ;;  %v8462_v56 = vpop.f32.mrb[184].mxu1 }
 0x788   :  { %v11977_v24 = vadd.f32 %v9519_v28, %v8462_v56  ;;  %v11979_v31 = vpop.f32.mrb[201].mxu0  ;;  %v4085_v30 = vpop.f32.mrb[185].mxu1  ;;  %v9527_v56 = vld [vmem:[%s13453_s6 + $0xe8] sm:$0xff] }
 0x789   :  { %v11984_v18 = vadd.f32 %v9520_v5, %v4085_v30 }
 0x78b   :  { %v11988_v7 = vpop.f32.mrb[202].mxu0  ;;  %v8465_v11 = vpop.f32.mrb[186].mxu1 }
 0x78c   :  { %13735 = vst [vmem:[#allocation30_spill] sm:$0xff] %v11988_v7  ;;  %v11993_v44 = vadd.f32 %v9521_v55, %v8465_v11  ;;  %v11995_v4 = vpop.f32.mrb[203].mxu0  ;;  %v4095_v59 = vpop.f32.mrb[187].mxu1  ;;  %v9528_v11 = vld [vmem:[%s13453_s6 + $0xe0] sm:$0xff] }
 0x78d   :  { %v12000_v6 = vadd.f32 %v9522_v16, %v4095_v59 }
 0x78f   :  { %v12004_v50 = vpop.f32.mrb[204].mxu0  ;;  %v8496_v23 = vpop.f32.mrb[188].mxu1 }
 0x790   :  { %13736 = vst [vmem:[#allocation32_spill] sm:$0xff] %v12004_v50  ;;  %v12009_v47 = vadd.f32 %v9523_v10, %v8496_v23  ;;  %v12011_v19 = vpop.f32.mrb[205].mxu0  ;;  %v4275_v61 = vpop.f32.mrb[189].mxu1  ;;  %v9529_v10 = vld [vmem:[%s13453_s6 + $0xf8] sm:$0xff] }
 0x791   :  { %13737 = vst [vmem:[#allocation36_spill] sm:$0xff] %v12011_v19  ;;  %v12016_v58 = vadd.f32 %v9524_v17, %v4275_v61 }
 0x793   :  { %v12020_v0 = vpop.f32.mrb[206].mxu0  ;;  %v8499_v27 = vpop.f32.mrb[190].mxu1 }
 0x794   :  { %13738 = vst [vmem:[#allocation33_spill] sm:$0xff] %v12020_v0  ;;  %v12025_v49 = vadd.f32 %v9525_v35, %v8499_v27  ;;  %v12027_v63 = vpop.f32.mrb[207].mxu0  ;;  %v4285_v21 = vpop.f32.mrb[191].mxu1  ;;  %v9530_v35 = vld [vmem:[%s13453_s6 + $0xf0] sm:$0xff] }
 0x795   :  { %13739 = vst [vmem:[#allocation34_spill] sm:$0xff] %v12027_v63  ;;  %v12032_v39 = vadd.f32 %v9526_v20, %v4285_v21 }
 0x797   :  { %v12036_v2 = vpop.f32.mrb[208].mxu0  ;;  %v8502_v9 = vpop.f32.mrb[192].mxu1 }
 0x798   :  { %13740 = vst [vmem:[#allocation37_spill] sm:$0xff] %v12036_v2  ;;  %v12041_v28 = vadd.f32 %v9527_v56, %v8502_v9  ;;  %v12043_v30 = vpop.f32.mrb[209].mxu0  ;;  %v4295_v5 = vpop.f32.mrb[193].mxu1 }
 0x799   :  { %13741 = vst [vmem:[#allocation31_spill] sm:$0xff] %v12043_v30  ;;  %v12048_v55 = vadd.f32 %v9528_v11, %v4295_v5  ;;  %v9531_v5 = vld [vmem:[%s13453_s6 + $0x8] sm:$0xff]  ;;  %v9542_v30 = vld [vmem:[%s13453_s6 + $0x90] sm:$0xff] }
 0x79b   :  { %v12052_v16 = vpop.f32.mrb[210].mxu0  ;;  %v8505_v23 = vpop.f32.mrb[194].mxu1 }
 0x79c   :  { %13742 = vst [vmem:[#allocation39_spill] sm:$0xff] %v12052_v16  ;;  %v12057_v61 = vadd.f32 %v9529_v10, %v8505_v23  ;;  %v12059_v17 = vpop.f32.mrb[211].mxu0  ;;  %v4305_v27 = vpop.f32.mrb[195].mxu1 }
 0x79d   :  { %13743 = vst [vmem:[#allocation35_spill] sm:$0xff] %v12059_v17  ;;  %v12064_v21 = vadd.f32 %v9530_v35, %v4305_v27  ;;  %v9541_v17 = vld [vmem:[%s13453_s6 + $0x98] sm:$0xff] }
 0x79f   :  { %v8436_v9 = vpop.f32.mrb[212].mxu0  ;;  %v12068_v56 = vpop.f32.mrb[196].mxu1 }
 0x7a0   :  { %v4315_v11 = vadd.f32 %v9531_v5, %v8436_v9  ;;  %v3960_v23 = vpop.f32.mrb[213].mxu0  ;;  %v12073_v10 = vpop.f32.mrb[197].mxu1 }
 0x7a1   :  { %v4314_v27 = vadd.f32 %v9532_v33, %v3960_v23  ;;  %v9534_v33 = vld [vmem:[%s13453_s6 + $0x10] sm:$0xff] }
 0x7a3   :  { %v8965_v20 = vpack.c.bf16 %v4315_v11, %v4314_v27  ;;  %v8439_v32 = vpop.f32.mrb[214].mxu0  ;;  %v12080_v59 = vpop.f32.mrb[198].mxu1 }
 0x7a4   :  { %v12085_v9 = vadd.f32 %v9533_v54, %v8439_v32  ;;  %v3970_v5 = vpop.f32.mrb[215].mxu0  ;;  %v12087_v45 = vpop.f32.mrb[199].mxu1  ;;  %v9535_v54 = vld [vmem:[%s13453_s6 + $0x28] sm:$0xff] }
 0x7a5   :  { %v12092_v23 = vadd.f32 %v9534_v33, %v3970_v5  ;;  %v9536_v5 = vld [vmem:[%s13453_s6 + $0x20] sm:$0xff] }
 0x7a7   :  { %v8442_v35 = vpop.f32.mrb[216].mxu0  ;;  %v12098_v15 = vpop.f32.mrb[200].mxu1 }
 0x7a8   :  { %v12103_v32 = vadd.f32 %v9535_v54, %v8442_v35  ;;  %v3980_v34 = vpop.f32.mrb[217].mxu0  ;;  %v12105_v46 = vpop.f32.mrb[201].mxu1  ;;  %v9537_v35 = vld [vmem:[%s13453_s6 + $0x38] sm:$0xff] }
 0x7a9   :  { %v12110_v33 = vadd.f32 %v9536_v5, %v3980_v34  ;;  %v9538_v34 = vld [vmem:[%s13453_s6 + $0x30] sm:$0xff] }
 0x7ab   :  { %v8977_v27 = vpack.c.bf16 %v12103_v32, %v12110_v33  ;;  %v8445_v41 = vpop.f32.mrb[218].mxu0  ;;  %v12116_v53 = vpop.f32.mrb[202].mxu1 }
 0x7ac   :  { %v12121_v54 = vadd.f32 %v9537_v35, %v8445_v41  ;;  %v3990_v29 = vpop.f32.mrb[219].mxu0  ;;  %v12123_v12 = vpop.f32.mrb[203].mxu1  ;;  %v9539_v41 = vld [vmem:[%s13453_s6 + $0x88] sm:$0xff] }
 0x7ad   :  { %v12128_v5 = vadd.f32 %v9538_v34, %v3990_v29  ;;  %v9540_v29 = vld [vmem:[%s13453_s6 + $0x80] sm:$0xff] }
 0x7af   :  { %v8983_v33 = vpack.c.bf16 %v12121_v54, %v12128_v5  ;;  %v8476_v11 = vpop.f32.mrb[220].mxu0  ;;  %v12134_v1 = vpop.f32.mrb[204].mxu1 }
 0x7b0   :  { %v4331_v35 = vadd.f32 %v9539_v41, %v8476_v11  ;;  %v4170_v57 = vpop.f32.mrb[221].mxu0  ;;  %v12139_v14 = vpop.f32.mrb[205].mxu1 }
 0x7b1   :  { %v4330_v34 = vadd.f32 %v9540_v29, %v4170_v57 }
 0x7b3   :  { %v8962_v54 = vpack.c.bf16 %v4331_v35, %v4330_v34  ;;  %v8479_v5 = vpop.f32.mrb[222].mxu0  ;;  %v12146_v16 = vpop.f32.mrb[206].mxu1 }
 0x7b4   :  { %v4333_v11 = vadd.f32 %v9541_v17, %v8479_v5  ;;  %v4180_v41 = vpop.f32.mrb[223].mxu0  ;;  %v12151_v2 = vpop.f32.mrb[207].mxu1  ;;  %v9543_v5 = vld [vmem:[%s13453_s6 + $0xa8] sm:$0xff] }
 0x7b5   :  { %v4332_v57 = vadd.f32 %v9542_v30, %v4180_v41  ;;  %8964 = vmatprep.subr.msk.bf16.mxu0 %vm10403_vm2, %v8962_v54  ;;  %v9544_v41 = vld [vmem:[%s13453_s6 + $0xa0] sm:$0xff] }
 0x7b6   :  { %8967 = vmatpush3.bf16.xpose.msk.msra.mxu0 %vm10403_vm2, %v8965_v20 }
 0x7b7   :  { %v8968_v34 = vpack.c.bf16 %v4333_v11, %v4332_v57  ;;  %v8482_v32 = vpop.f32.mrb[224].mxu0  ;;  %v12162_v17 = vpop.f32.mrb[208].mxu1 }
 0x7b8   :  { %13745 = vst [vmem:[#allocation41_spill] sm:$0xff] %v12162_v17  ;;  %v4335_v0 = vadd.f32 %v9543_v5, %v8482_v32  ;;  %v4190_v63 = vpop.f32.mrb[225].mxu0  ;;  %v12167_v30 = vpop.f32.mrb[209].mxu1  ;;  %v9545_v32 = vld [vmem:[%s13453_s6 + $0xb8] sm:$0xff] }
 0x7b9   :  { %13746 = vst [vmem:[#allocation38_spill] sm:$0xff] %v12167_v30  ;;  %v4334_v54 = vadd.f32 %v9544_v41, %v4190_v63  ;;  %8970 = vmatprep.subr.msk.bf16.mxu0 %vm10403_vm2, %v8968_v34  ;;  %v9546_v63 = vld [vmem:[%s13453_s6 + $0xb0] sm:$0xff] }
 0x7bb   :  { %v8974_v11 = vpack.c.bf16 %v4335_v0, %v4334_v54  ;;  %v8485_v57 = vpop.f32.mrb[226].mxu0  ;;  %v12176_v29 = vpop.f32.mrb[210].mxu1  ;;  %v13747_v0 = vpack.c.bf16 %v12085_v9, %v12092_v23 }
 0x7bc   :  { %v4337_v5 = vadd.f32 %v9545_v32, %v8485_v57  ;;  %v4200_v50 = vpop.f32.mrb[227].mxu0  ;;  %v12181_v19 = vpop.f32.mrb[211].mxu1 }
 0x7bd   :  { %v4336_v41 = vadd.f32 %v9546_v63, %v4200_v50  ;;  %v9056_v34 = vpack.c.bf16 %v12176_v29, %v12181_v19  ;;  %v9565_v19 = vld [vmem:[%s13451_s4 + $0x98] sm:$0xff]  ;;  %v13770_v29 = vld [vmem:[#allocation33_spill] sm:$0xff] }
 0x7be   :  { %8973 = vmatpush3.bf16.xpose.msk.msra.mxu0 %vm10403_vm2, %v13747_v0 }
 0x7bf   :  { %v8980_v54 = vpack.c.bf16 %v4337_v5, %v4336_v41  ;;  %v8516_v20 = vpop.f32.mrb[228].mxu0  ;;  %8976 = vmatprep.subr.msk.bf16.mxu0 %vm10403_vm2, %v8974_v11 }
 0x7c0   :  { %v4412_v57 = vpop.f32.mrb[229].mxu0 }
 0x7c1   :  { %v9011_v32 = vpack.c.bf16 %v8516_v20, %v4412_v57 }
 0x7c3   :  { %v8519_v30 = vpop.f32.mrb[230].mxu0 }
 0x7c4   :  { %v4422_v17 = vpop.f32.mrb[231].mxu0 }
 0x7c5   :  { %v9014_v7 = vpack.c.bf16 %v8519_v30, %v4422_v17  ;;  %v13748_v17 = vpack.c.bf16 %v12009_v47, %v12016_v58  ;;  %v13750_v58 = vpack.c.bf16 %v12025_v49, %v12032_v39  ;;  %v13752_v49 = vpack.c.bf16 %v12041_v28, %v12048_v55  ;;  %v9552_v55 = vld [vmem:[%s13451_s4 + $0x30] sm:$0xff] }
 0x7c6   :  { %8979 = vmatpush3.bf16.xpose.msk.msra.mxu0 %vm10403_vm2, %v8977_v27  ;;  %v13753_v39 = vpack.c.bf16 %v11977_v24, %v11984_v18  ;;  %v9547_v24 = vld [vmem:[%s13451_s4 + $0x8] sm:$0xff] }
 0x7c7   :  { %v8522_v50 = vpop.f32.mrb[232].mxu0  ;;  %8982 = vmatprep.subr.msk.bf16.mxu0 %vm10403_vm2, %v8980_v54  ;;  %v13749_v54 = vpack.c.bf16 %v11945_v36, %v11952_v3  ;;  %v13751_v3 = vpack.c.bf16 %v11961_v22, %v11968_v43  ;;  %v13755_v22 = vpack.c.bf16 %v11993_v44, %v12000_v6  ;;  %v13756_v43 = vmov 0.0|0.0   ;;  %v9548_v44 = vld [vmem:[%s13451_s4 + $0x10] sm:$0xff] }
 0x7c8   :  { %v4432_v9 = vpop.f32.mrb[233].mxu0  ;;  %v3863_v18 = vadd.f32 %v9547_v24, %v11903_v52  ;;  %v3864_v6 = vadd.f32 %v9548_v44, %v11920_v26  ;;  %v9549_v52 = vld [vmem:[%s13451_s4 + $0x18] sm:$0xff]  ;;  %v9550_v26 = vld [vmem:[%s13451_s4 + $0x20] sm:$0xff] }
 0x7c9   :  { %v9017_v23 = vpack.c.bf16 %v8522_v50, %v4432_v9  ;;  %v13775_v44 = vld [vmem:[#allocation43_spill] sm:$0xff] }
 0x7cb   :  { %v8525_v63 = vpop.f32.mrb[234].mxu0 }
 0x7cc   :  { %v4442_v5 = vpop.f32.mrb[235].mxu0 }
 0x7cd   :  { %v9020_v41 = vpack.c.bf16 %v8525_v63, %v4442_v5  ;;  %v13754_v5 = vpack.c.bf16 %v12057_v61, %v12064_v21  ;;  %v3868_v61 = vadd.f32 %v9552_v55, %v11936_v42  ;;  %v9553_v21 = vld [vmem:[%s13451_s4 + $0x38] sm:$0xff]  ;;  %v13759_v42 = vpack.c.bf16 %v12098_v15, %v12105_v46  ;;  %v9555_v46 = vld [vmem:[%s13451_s4 + $0x48] sm:$0xff]  ;;  %v13778_v55 = vld [vmem:[#allocation44_spill] sm:$0xff] }
 0x7ce   :  { %8985 = vmatpush3.bf16.xpose.msk.msra.mxu0 %vm10403_vm2, %v8983_v33  ;;  %v3871_v15 = vadd.f32 %v9555_v46, %v11940_v25  ;;  %v9557_v25 = vld [vmem:[%s13451_s4 + $0x58] sm:$0xff]  ;;  %v13781_v46 = vld [vmem:[#allocation5_spill] sm:$0xff] }
 0x7cf   :  { %v12201_v11 = vpop.f32.mrb[236].mxu0  ;;  %8988 = vmatprep.subr.msk.bf16.mxu0 %vm10403_vm2, %v13748_v17 }
 0x7d0   :  { %v12208_v27 = vpop.f32.mrb[237].mxu0 }
 0x7d1   :  { %v9035_v30 = vpack.c.bf16 %v12201_v11, %v12208_v27  ;;  %v13765_v11 = vld [vmem:[#allocation38_spill] sm:$0xff] }
 0x7d3   :  { %v12212_v20 = vpop.f32.mrb[238].mxu0 }
 0x7d4   :  { %v12214_v0 = vpop.f32.mrb[239].mxu0 }
 0x7d5   :  { %v9038_v33 = vpack.c.bf16 %v12212_v20, %v12214_v0  ;;  %v13768_v20 = vld [vmem:[#allocation32_spill] sm:$0xff] }
 0x7d6   :  { %8991 = vmatpush3.bf16.xpose.msk.msra.mxu0 %vm10403_vm2, %v13749_v54  ;;  %v13769_v54 = vld [vmem:[#allocation34_spill] sm:$0xff] }
 0x7d7   :  { %v12223_v47 = vpop.f32.mrb[240].mxu0  ;;  %8994 = vmatprep.subr.msk.bf16.mxu0 %vm10403_vm2, %v13750_v58  ;;  %v9566_v58 = vld [vmem:[%s13451_s4 + $0xa0] sm:$0xff] }
 0x7d8   :  { %v12230_v57 = vpop.f32.mrb[241].mxu0 }
 0x7d9   :  { %v9041_v50 = vpack.c.bf16 %v12223_v47, %v12230_v57  ;;  %v13771_v57 = vld [vmem:[#allocation31_spill] sm:$0xff] }
 0x7db   :  { %v12234_v9 = vpop.f32.mrb[242].mxu0 }
 0x7dc   :  { %v12236_v63 = vpop.f32.mrb[243].mxu0 }
 0x7dd   :  { %v9044_v36 = vpack.c.bf16 %v12234_v9, %v12236_v63  ;;  %v9567_v9 = vld [vmem:[%s13451_s4 + $0xa8] sm:$0xff] }
 0x7de   :  { %8997 = vmatpush3.bf16.xpose.msk.msra.mxu0 %vm10403_vm2, %v13751_v3  ;;  %v13772_v63 = vld [vmem:[#allocation37_spill] sm:$0xff]  ;;  %v9568_v3 = vld [vmem:[%s13451_s4 + $0xb0] sm:$0xff] }
 0x7df   :  { %9000 = vmatprep.subr.msk.bf16.mxu0 %vm10403_vm2, %v13752_v49  ;;  %v13773_v49 = vld [vmem:[#allocation35_spill] sm:$0xff] }
 0x7e6   :  { %9003 = vmatpush3.bf16.xpose.msk.msra.mxu0 %vm10403_vm2, %v13753_v39  ;;  %v3884_v39 = vadd.f32 %v9568_v3, %v13773_v49 }
 0x7e7   :  { %9006 = vmatprep.subr.msk.bf16.mxu0 %vm10403_vm2, %v13754_v5  ;;  %v9569_v5 = vld [vmem:[%s13451_s4 + $0xb8] sm:$0xff] }
 0x7ee   :  { %9009 = vmatpush3.bf16.xpose.msk.msra.mxu0 %vm10403_vm2, %v13755_v22  ;;  %v13774_v22 = vld [vmem:[#allocation39_spill] sm:$0xff] }
 0x7ef   :  { %9010 = vmatprep.subr.bf16.mxu0 %v13756_v43  ;;  %v3885_v24 = vadd.f32 %v9569_v5, %v13774_v22  ;;  %v9588_v5 = vld [vmem:[%s13458_s11 + $0x50] sm:$0xff] }
 0x7f5   :  { %7989 = vmatmul.mubr.msk.f32.vlgmr.msra.gmra.mrb[244].mxu0 %vm191_vm0, %v11912_v62  ;;  %v3865_v62 = vadd.f32 %v9549_v52, %v11916_v37  ;;  %v9551_v37 = vld [vmem:[%s13451_s4 + $0x28] sm:$0xff] }
 0x7f6   :  { %7990 = vmatprep.mubr.msk.f32.mxu0 %vm191_vm0, %v3863_v18  ;;  %9012 = vmatpush1.bf16.msra.mxu0 %v9011_v32  ;;  %v3867_v28 = vadd.f32 %v9551_v37, %v11924_v38  ;;  %v13758_v38 = vpack.c.bf16 %v12080_v59, %v12087_v45  ;;  %v9554_v45 = vld [vmem:[%s13451_s4 + $0x40] sm:$0xff]  ;;  %v9560_v32 = vld [vmem:[%s13451_s4 + $0x70] sm:$0xff]  ;;  %v9571_v52 = vld [vmem:[%s13451_s4 + $0xc8] sm:$0xff] }
 0x7f7   :  { %9013 = vmatprep.subr.bf16.mxu0 %v13756_v43  ;;  %v3870_v59 = vadd.f32 %v9554_v45, %v11947_v48  ;;  %v3873_v48 = vadd.f32 %v9557_v25, %v11956_v13  ;;  %v9559_v13 = vld [vmem:[%s13451_s4 + $0x68] sm:$0xff]  ;;  %v13777_v37 = vld [vmem:[#allocation6_spill] sm:$0xff] }
 0x7f8   :  { %v3875_v35 = vadd.f32 %v9559_v13, %v11972_v60  ;;  %v13762_v60 = vpack.c.bf16 %v12146_v16, %v12151_v2  ;;  %v9562_v2 = vld [vmem:[%s13451_s4 + $0x80] sm:$0xff]  ;;  %v13780_v45 = vld [vmem:[#allocation10_spill] sm:$0xff] }
 0x7f9   :  { %7991 = vmatmul.mubr.msk.f32.gmra.mrb[246].mxu0 %vm191_vm0, %v3863_v18  ;;  %v13767_v16 = vld [vmem:[#allocation36_spill] sm:$0xff] }
 0x7fa   :  { %7992 = vmatprep.mubr.msk.f32.mxu0 %vm191_vm0, %v3864_v6  ;;  %9015 = vmatpush1.bf16.msra.mxu0 %v9014_v7  ;;  %v3866_v7 = vadd.f32 %v9550_v26, %v11928_v51  ;;  %v13757_v51 = vpack.c.bf16 %v12068_v56, %v12073_v10  ;;  %v3869_v56 = vadd.f32 %v9553_v21, %v11932_v8  ;;  %v9570_v18 = vld [vmem:[%s13451_s4 + $0xc0] sm:$0xff] }
 0x7fb   :  { %9016 = vmatprep.subr.bf16.mxu0 %v13756_v43  ;;  %v13760_v8 = vpack.c.bf16 %v12116_v53, %v12123_v12  ;;  %v9556_v12 = vld [vmem:[%s13451_s4 + $0x50] sm:$0xff]  ;;  %v3878_v27 = vadd.f32 %v9562_v2, %v13767_v16  ;;  %v13779_v21 = vld [vmem:[#allocation12_spill] sm:$0xff] }
 0x7fc   :  { %v3872_v53 = vadd.f32 %v9556_v12, %v11963_v40  ;;  %v9558_v40 = vld [vmem:[%s13451_s4 + $0x60] sm:$0xff]  ;;  %v9577_v12 = vld [vmem:[%s13451_s4 + $0xf8] sm:$0xff] }
 0x7fd   :  { %7993 = vmatmul.mubr.msk.f32.gmra.mrb[248].mxu0 %vm191_vm0, %v3864_v6  ;;  %v3874_v10 = vadd.f32 %v9558_v40, %v11979_v31  ;;  %v13761_v31 = vpack.c.bf16 %v12134_v1, %v12139_v14  ;;  %v9561_v14 = vld [vmem:[%s13451_s4 + $0x78] sm:$0xff]  ;;  %v13763_v1 = vld [vmem:[#allocation30_spill] sm:$0xff]  ;;  %v3886_v6 = vadd.f32 %v9570_v18, %v13775_v44  ;;  %v9578_v40 = vld [vmem:[%s13458_s11] sm:$0xff] }
 0x7fe   :  { %7994 = vmatprep.mubr.msk.f32.mxu0 %vm191_vm0, %v3865_v62  ;;  %9018 = vmatpush1.bf16.msra.mxu0 %v9017_v23  ;;  %v3876_v23 = vadd.f32 %v9560_v32, %v11995_v4  ;;  %v13764_v4 = vld [vmem:[#allocation41_spill] sm:$0xff]  ;;  %v9582_v2 = vld [vmem:[%s13458_s11 + $0x20] sm:$0xff]  ;;  %v9589_v18 = vld [vmem:[%s13458_s11 + $0x58] sm:$0xff] }
 0x7ff   :  { %9019 = vmatprep.subr.bf16.mxu0 %v13756_v43  ;;  %v13766_v17 = vpack.c.bf16 %v13764_v4, %v13765_v11 }
 0x801   :  { %7995 = vmatmul.mubr.msk.f32.gmra.mrb[250].mxu0 %vm191_vm0, %v3865_v62  ;;  %v13776_v62 = vld [vmem:[#allocation40_spill] sm:$0xff] }
 0x802   :  { %7996 = vmatprep.mubr.msk.f32.mxu0 %vm191_vm0, %v3866_v7  ;;  %9021 = vmatpush1.bf16.msra.mxu0 %v9020_v41  ;;  %v3877_v41 = vadd.f32 %v9561_v14, %v13763_v1  ;;  %v3887_v26 = vadd.f32 %v9571_v52, %v13776_v62  ;;  %v9590_v62 = vld [vmem:[%s13458_s11 + $0x60] sm:$0xff] }
 0x803   :  { %9022 = vmatprep.subr.bf16.mxu0 %v13756_v43 }
 0x805   :  { %7997 = vmatmul.mubr.msk.f32.gmra.mrb[252].mxu0 %vm191_vm0, %v3866_v7  ;;  %v9572_v7 = vld [vmem:[%s13451_s4 + $0xd0] sm:$0xff] }
 0x806   :  { %7998 = vmatprep.mubr.msk.f32.mxu0 %vm191_vm0, %v3867_v28  ;;  %9024 = vmatpush1.bf16.msra.mxu0 %v13757_v51  ;;  %v9573_v51 = vld [vmem:[%s13451_s4 + $0xd8] sm:$0xff] }
 0x807   :  { %9025 = vmatprep.subr.bf16.mxu0 %v13756_v43 }
 0x809   :  { %7999 = vmatmul.mubr.msk.f32.gmra.mrb[254].mxu0 %vm191_vm0, %v3867_v28  ;;  %v3888_v28 = vadd.f32 %v9572_v7, %v13777_v37  ;;  %v9591_v37 = vld [vmem:[%s13458_s11 + $0x68] sm:$0xff] }
 0x80a   :  { %8000 = vmatprep.mubr.msk.f32.mxu0 %vm191_vm0, %v3868_v61  ;;  %9027 = vmatpush1.bf16.msra.mxu0 %v13758_v38  ;;  %v9574_v38 = vld [vmem:[%s13451_s4 + $0xe0] sm:$0xff] }
 0x80b   :  { %9028 = vmatprep.subr.bf16.mxu0 %v13756_v43 }
 0x80d   :  { %8001 = vmatmul.mubr.msk.f32.gmra.mrb[0].mxu0 %vm191_vm0, %v3868_v61  ;;  %v3889_v61 = vadd.f32 %v9573_v51, %v13778_v55 }
 0x80e   :  { %8002 = vmatprep.mubr.msk.f32.mxu0 %vm191_vm0, %v3869_v56  ;;  %9030 = vmatpush1.bf16.msra.mxu0 %v13759_v42  ;;  %v9575_v42 = vld [vmem:[%s13451_s4 + $0xe8] sm:$0xff] }
 0x80f   :  { %9031 = vmatprep.subr.bf16.mxu0 %v13756_v43 }
 0x811   :  { %8003 = vmatmul.mubr.msk.f32.gmra.mrb[2].mxu0 %vm191_vm0, %v3869_v56  ;;  %v3890_v56 = vadd.f32 %v9574_v38, %v13779_v21 }
 0x812   :  { %8004 = vmatprep.mubr.msk.f32.mxu0 %vm191_vm0, %v3870_v59  ;;  %9033 = vmatpush1.bf16.msra.mxu0 %v13760_v8  ;;  %v9576_v8 = vld [vmem:[%s13451_s4 + $0xf0] sm:$0xff] }
 0x813   :  { %9034 = vmatprep.subr.bf16.mxu0 %v13756_v43 }
 0x815   :  { %8005 = vmatmul.mubr.msk.f32.gmra.mrb[4].mxu0 %vm191_vm0, %v3870_v59  ;;  %v3891_v59 = vadd.f32 %v9575_v42, %v13780_v45 }
 0x816   :  { %8006 = vmatprep.mubr.msk.f32.mxu0 %vm191_vm0, %v3871_v15  ;;  %9036 = vmatpush1.bf16.msra.mxu0 %v9035_v30  ;;  %v9563_v30 = vld [vmem:[%s13451_s4 + $0x88] sm:$0xff] }
 0x817   :  { %9037 = vmatprep.subr.bf16.mxu0 %v13756_v43  ;;  %v3879_v0 = vadd.f32 %v9563_v30, %v13768_v20  ;;  %v9583_v30 = vld [vmem:[%s13458_s11 + $0x28] sm:$0xff] }
 0x819   :  { %8007 = vmatmul.mubr.msk.f32.gmra.mrb[6].mxu0 %vm191_vm0, %v3871_v15  ;;  %v3892_v15 = vadd.f32 %v9576_v8, %v13781_v46  ;;  %v9594_v8 = vld [vmem:[%s13458_s11 + $0x80] sm:$0xff] }
 0x81a   :  { %8008 = vmatprep.mubr.msk.f32.mxu0 %vm191_vm0, %v3872_v53  ;;  %9039 = vmatpush1.bf16.msra.mxu0 %v9038_v33  ;;  %v9564_v33 = vld [vmem:[%s13451_s4 + $0x90] sm:$0xff] }
 0x81b   :  { %9040 = vmatprep.subr.bf16.mxu0 %v13756_v43  ;;  %v3880_v47 = vadd.f32 %v9564_v33, %v13769_v54  ;;  %v9584_v54 = vld [vmem:[%s13458_s11 + $0x30] sm:$0xff] }
 0x81d   :  { %8009 = vmatmul.mubr.msk.f32.gmra.mrb[8].mxu0 %vm191_vm0, %v3872_v53  ;;  %v13782_v53 = vld [vmem:[#allocation15_spill] sm:$0xff] }
 0x81e   :  { %8010 = vmatprep.mubr.msk.f32.mxu0 %vm191_vm0, %v3873_v48  ;;  %9042 = vmatpush1.bf16.msra.mxu0 %v9041_v50  ;;  %v3882_v50 = vadd.f32 %v9566_v58, %v13771_v57  ;;  %v3893_v25 = vadd.f32 %v9577_v12, %v13782_v53  ;;  %v9595_v12 = vld [vmem:[%s13458_s11 + $0x88] sm:$0xff] }
 0x81f   :  { %9043 = vmatprep.subr.bf16.mxu0 %v13756_v43 }
 0x821   :  { %8011 = vmatmul.mubr.msk.f32.gmra.mrb[10].mxu0 %vm191_vm0, %v3873_v48 }
 0x822   :  { %8012 = vmatprep.mubr.msk.f32.mxu0 %vm191_vm0, %v3874_v10  ;;  %9045 = vmatpush1.bf16.msra.mxu0 %v9044_v36  ;;  %v3883_v36 = vadd.f32 %v9567_v9, %v13772_v63 }
 0x823   :  { %9046 = vmatprep.subr.bf16.mxu0 %v13756_v43 }
 0x825   :  { %8013 = vmatmul.mubr.msk.f32.gmra.mrb[12].mxu0 %vm191_vm0, %v3874_v10 }
 0x826   :  { %8014 = vmatprep.mubr.msk.f32.mxu0 %vm191_vm0, %v3875_v35  ;;  %9048 = vmatpush1.bf16.msra.mxu0 %v13761_v31 }
 0x827   :  { %9049 = vmatprep.subr.bf16.mxu0 %v13756_v43 }
 0x829   :  { %8015 = vmatmul.mubr.msk.f32.gmra.mrb[14].mxu0 %vm191_vm0, %v3875_v35  ;;  %v9579_v35 = vld [vmem:[%s13458_s11 + $0x8] sm:$0xff] }
 0x82a   :  { %8016 = vmatprep.mubr.msk.f32.mxu0 %vm191_vm0, %v3876_v23  ;;  %9051 = vmatpush1.bf16.msra.mxu0 %v13762_v60  ;;  %v9580_v60 = vld [vmem:[%s13458_s11 + $0x10] sm:$0xff] }
 0x82b   :  { %9052 = vmatprep.subr.bf16.mxu0 %v13756_v43 }
 0x82d   :  { %8017 = vmatmul.mubr.msk.f32.gmra.mrb[16].mxu0 %vm191_vm0, %v3876_v23 }
 0x82e   :  { %8018 = vmatprep.mubr.msk.f32.mxu0 %vm191_vm0, %v3877_v41  ;;  %9054 = vmatpush1.bf16.msra.mxu0 %v13766_v17 }
 0x82f   :  { %9055 = vmatprep.subr.bf16.mxu0 %v13756_v43 }
 0x831   :  { %8019 = vmatmul.mubr.msk.f32.gmra.mrb[18].mxu0 %vm191_vm0, %v3877_v41  ;;  %v9581_v41 = vld [vmem:[%s13458_s11 + $0x18] sm:$0xff] }
 0x832   :  { %8020 = vmatprep.mubr.msk.f32.mxu0 %vm191_vm0, %v3878_v27  ;;  %9057 = vmatpush1.bf16.msra.mxu0 %v9056_v34  ;;  %v3881_v34 = vadd.f32 %v9565_v19, %v13770_v29  ;;  %v9585_v29 = vld [vmem:[%s13458_s11 + $0x38] sm:$0xff] }
 0x835   :  { %8021 = vmatmul.mubr.msk.f32.gmra.mrb[20].mxu0 %vm191_vm0, %v3878_v27 }
 0x836   :  { %8022 = vmatprep.mubr.msk.f32.mxu0 %vm191_vm0, %v3879_v0 }
 0x839   :  { %8023 = vmatmul.mubr.msk.f32.gmra.mrb[22].mxu0 %vm191_vm0, %v3879_v0 }
 0x83a   :  { %8024 = vmatprep.mubr.msk.f32.mxu0 %vm191_vm0, %v3880_v47 }
 0x83d   :  { %8025 = vmatmul.mubr.msk.f32.gmra.mrb[24].mxu0 %vm191_vm0, %v3880_v47 }
 0x83e   :  { %8026 = vmatprep.mubr.msk.f32.mxu0 %vm191_vm0, %v3881_v34 }
 0x841   :  { %8027 = vmatmul.mubr.msk.f32.gmra.mrb[26].mxu0 %vm191_vm0, %v3881_v34 }
 0x842   :  { %8028 = vmatprep.mubr.msk.f32.mxu0 %vm191_vm0, %v3882_v50 }
 0x845   :  { %8029 = vmatmul.mubr.msk.f32.gmra.mrb[28].mxu0 %vm191_vm0, %v3882_v50  ;;  %v9586_v50 = vld [vmem:[%s13458_s11 + $0x40] sm:$0xff] }
 0x846   :  { %8030 = vmatprep.mubr.msk.f32.mxu0 %vm191_vm0, %v3883_v36 }
 0x849   :  { %8031 = vmatmul.mubr.msk.f32.gmra.mrb[30].mxu0 %vm191_vm0, %v3883_v36  ;;  %v9587_v36 = vld [vmem:[%s13458_s11 + $0x48] sm:$0xff] }
 0x84a   :  { %8032 = vmatprep.mubr.msk.f32.mxu0 %vm191_vm0, %v3884_v39 }
 0x84d   :  { %8033 = vmatmul.mubr.msk.f32.gmra.mrb[32].mxu0 %vm191_vm0, %v3884_v39 }
 0x84e   :  { %8034 = vmatprep.mubr.msk.f32.mxu0 %vm191_vm0, %v3885_v24 }
 0x851   :  { %8035 = vmatmul.mubr.msk.f32.gmra.mrb[34].mxu0 %vm191_vm0, %v3885_v24 }
 0x852   :  { %8036 = vmatprep.mubr.msk.f32.mxu0 %vm191_vm0, %v3886_v6 }
 0x855   :  { %8037 = vmatmul.mubr.msk.f32.gmra.mrb[36].mxu0 %vm191_vm0, %v3886_v6 }
 0x856   :  { %8038 = vmatprep.mubr.msk.f32.mxu0 %vm191_vm0, %v3887_v26 }
 0x859   :  { %8039 = vmatmul.mubr.msk.f32.gmra.mrb[38].mxu0 %vm191_vm0, %v3887_v26 }
 0x85a   :  { %8040 = vmatprep.mubr.msk.f32.mxu0 %vm191_vm0, %v3888_v28 }
 0x85d   :  { %8041 = vmatmul.mubr.msk.f32.gmra.mrb[40].mxu0 %vm191_vm0, %v3888_v28 }
 0x85e   :  { %8042 = vmatprep.mubr.msk.f32.mxu0 %vm191_vm0, %v3889_v61 }
 0x861   :  { %8043 = vmatmul.mubr.msk.f32.gmra.mrb[42].mxu0 %vm191_vm0, %v3889_v61  ;;  %v9592_v61 = vld [vmem:[%s13458_s11 + $0x70] sm:$0xff] }
 0x862   :  { %8044 = vmatprep.mubr.msk.f32.mxu0 %vm191_vm0, %v3890_v56 }
 0x865   :  { %8045 = vmatmul.mubr.msk.f32.gmra.mrb[44].mxu0 %vm191_vm0, %v3890_v56  ;;  %v9593_v56 = vld [vmem:[%s13458_s11 + $0x78] sm:$0xff] }
 0x866   :  { %8046 = vmatprep.mubr.msk.f32.mxu0 %vm191_vm0, %v3891_v59 }
 0x869   :  { %8047 = vmatmul.mubr.msk.f32.gmra.mrb[46].mxu0 %vm191_vm0, %v3891_v59 }
 0x86a   :  { %8048 = vmatprep.mubr.msk.f32.mxu0 %vm191_vm0, %v3892_v15 }
 0x86d   :  { %8049 = vmatmul.mubr.msk.f32.gmra.mrb[48].mxu0 %vm191_vm0, %v3892_v15 }
 0x86e   :  { %8050 = vmatprep.mubr.msk.f32.mxu0 %vm191_vm0, %v3893_v25 }
 0x871   :  { %8051 = vmatmul.mubr.msk.f32.gmra.mrb[50].mxu0 %vm191_vm0, %v3893_v25 }
 0x8c8   :  { %v5024_v48 = vpop.f32.mrb[244].mxu0 }
 0x8c9   :  { %v12508_v10 = vadd.f32 %v9578_v40, %v5024_v48  ;;  %v5026_v13 = vpop.f32.mrb[245].mxu0  ;;  %v9596_v40 = vld [vmem:[%s13458_s11 + $0x90] sm:$0xff] }
 0x8ca   :  { %v12513_v31 = vadd.f32 %v9579_v35, %v5026_v13 }
 0x8cc   :  { %v5030_v32 = vpop.f32.mrb[246].mxu0  ;;  %v5215_v23 = vmax.f32 %v12508_v10, %v12513_v31 }
 0x8cd   :  { %v12520_v14 = vadd.f32 %v9580_v60, %v5030_v32  ;;  %v5032_v1 = vpop.f32.mrb[247].mxu0  ;;  %v9597_v32 = vld [vmem:[%s13458_s11 + $0x98] sm:$0xff] }
 0x8ce   :  { %v12525_v4 = vadd.f32 %v9581_v41, %v5032_v1  ;;  %5216 = vmax.xlane.f32.xlu0 %v5215_v23  ;;  %v9598_v41 = vld [vmem:[%s13458_s11 + $0xa0] sm:$0xff] }
 0x8d0   :  { %v5036_v11 = vpop.f32.mrb[248].mxu0  ;;  %v5218_v17 = vmax.f32 %v12520_v14, %v12525_v4 }
 0x8d1   :  { %v12532_v16 = vadd.f32 %v9582_v2, %v5036_v11  ;;  %v5038_v27 = vpop.f32.mrb[249].mxu0  ;;  %v9599_v2 = vld [vmem:[%s13458_s11 + $0xa8] sm:$0xff] }
 0x8d2   :  { %v12537_v20 = vadd.f32 %v9583_v30, %v5038_v27  ;;  %5219 = vmax.xlane.f32.xlu1 %v5218_v17 }
 0x8d4   :  { %v5042_v0 = vpop.f32.mrb[250].mxu0  ;;  %v5221_v33 = vmax.f32 %v12532_v16, %v12537_v20 }
 0x8d5   :  { %v12544_v47 = vadd.f32 %v9584_v54, %v5042_v0  ;;  %v5044_v19 = vpop.f32.mrb[251].mxu0 }
 0x8d6   :  { %v12549_v34 = vadd.f32 %v9585_v29, %v5044_v19  ;;  %5222 = vmax.xlane.f32.xlu0 %v5221_v33  ;;  %v9600_v33 = vld [vmem:[%s13458_s11 + $0xb0] sm:$0xff]  ;;  %v9601_v29 = vld [vmem:[%s13458_s11 + $0xb8] sm:$0xff] }
 0x8d8   :  { %v5048_v58 = vpop.f32.mrb[252].mxu0  ;;  %v5224_v57 = vmax.f32 %v12544_v47, %v12549_v34 }
 0x8d9   :  { %v12556_v9 = vadd.f32 %v9586_v50, %v5048_v58  ;;  %v5050_v63 = vpop.f32.mrb[253].mxu0 }
 0x8da   :  { %v12561_v3 = vadd.f32 %v9587_v36, %v5050_v63  ;;  %5225 = vmax.xlane.f32.xlu1 %v5224_v57  ;;  %v9602_v63 = vld [vmem:[%s13458_s11 + $0xc0] sm:$0xff] }
 0x8dc   :  { %v5054_v49 = vpop.f32.mrb[254].mxu0  ;;  %v5227_v39 = vmax.f32 %v12556_v9, %v12561_v3 }
 0x8dd   :  { %v12568_v22 = vadd.f32 %v9588_v5, %v5054_v49  ;;  %v5056_v24 = vpop.f32.mrb[255].mxu0 }
 0x8de   :  { %v12573_v44 = vadd.f32 %v9589_v18, %v5056_v24  ;;  %5228 = vmax.xlane.f32.xlu0 %v5227_v39  ;;  %v9603_v39 = vld [vmem:[%s13458_s11 + $0xc8] sm:$0xff] }
 0x8e0   :  { %v5060_v6 = vpop.f32.mrb[0].mxu0  ;;  %v5230_v52 = vmax.f32 %v12568_v22, %v12573_v44 }
 0x8e1   :  { %v12580_v26 = vadd.f32 %v9590_v62, %v5060_v6  ;;  %v5062_v7 = vpop.f32.mrb[1].mxu0  ;;  %v9604_v6 = vld [vmem:[%s13458_s11 + $0xd0] sm:$0xff] }
 0x8e2   :  { %v12585_v28 = vadd.f32 %v9591_v37, %v5062_v7  ;;  %5231 = vmax.xlane.f32.xlu1 %v5230_v52  ;;  %v9605_v7 = vld [vmem:[%s13458_s11 + $0xd8] sm:$0xff] }
 0x8e4   :  { %v5066_v51 = vpop.f32.mrb[2].mxu0  ;;  %v5233_v55 = vmax.f32 %v12580_v26, %v12585_v28 }
 0x8e5   :  { %v12592_v38 = vadd.f32 %v9592_v61, %v5066_v51  ;;  %v5068_v21 = vpop.f32.mrb[3].mxu0  ;;  %v9606_v61 = vld [vmem:[%s13458_s11 + $0xe0] sm:$0xff] }
 0x8e6   :  { %v12597_v42 = vadd.f32 %v9593_v56, %v5068_v21  ;;  %5234 = vmax.xlane.f32.xlu0 %v5233_v55 }
 0x8e8   :  { %v5072_v45 = vpop.f32.mrb[4].mxu0  ;;  %v5236_v59 = vmax.f32 %v12592_v38, %v12597_v42 }
 0x8e9   :  { %v12604_v46 = vadd.f32 %v9594_v8, %v5072_v45  ;;  %v5074_v15 = vpop.f32.mrb[5].mxu0  ;;  %v9607_v45 = vld [vmem:[%s13458_s11 + $0xe8] sm:$0xff] }
 0x8ea   :  { %v12609_v53 = vadd.f32 %v9595_v12, %v5074_v15  ;;  %5237 = vmax.xlane.f32.xlu1 %v5236_v59  ;;  %v9608_v12 = vld [vmem:[%s13458_s11 + $0xf0] sm:$0xff] }
 0x8ec   :  { %v5078_v25 = vpop.f32.mrb[6].mxu0  ;;  %v5239_v48 = vmax.f32 %v12604_v46, %v12609_v53 }
 0x8ed   :  { %v12616_v13 = vadd.f32 %v9596_v40, %v5078_v25  ;;  %v5080_v35 = vpop.f32.mrb[7].mxu0  ;;  %v9609_v40 = vld [vmem:[%s13458_s11 + $0xf8] sm:$0xff] }
 0x8ee   :  { %v12621_v23 = vadd.f32 %v9597_v32, %v5080_v35  ;;  %5240 = vmax.xlane.f32.xlu0 %v5239_v48 }
 0x8f0   :  { %v5084_v60 = vpop.f32.mrb[8].mxu0  ;;  %v5242_v1 = vmax.f32 %v12616_v13, %v12621_v23 }
 0x8f1   :  { %v12628_v11 = vadd.f32 %v9598_v41, %v5084_v60  ;;  %v5086_v17 = vpop.f32.mrb[9].mxu0 }
 0x8f2   :  { %v12633_v27 = vadd.f32 %v9599_v2, %v5086_v17  ;;  %5243 = vmax.xlane.f32.xlu1 %v5242_v1  ;;  %v9610_v1 = vld [vmem:[%s13458_s11 + $0x100] sm:$0xff]  ;;  %v9611_v2 = vld [vmem:[%s13458_s11 + $0x108] sm:$0xff] }
 0x8f4   :  { %v5090_v30 = vpop.f32.mrb[10].mxu0  ;;  %v5245_v0 = vmax.f32 %v12628_v11, %v12633_v27 }
 0x8f5   :  { %v12640_v54 = vadd.f32 %v9600_v33, %v5090_v30  ;;  %v5092_v19 = vpop.f32.mrb[11].mxu0 }
 0x8f6   :  { %v12645_v58 = vadd.f32 %v9601_v29, %v5092_v19  ;;  %5246 = vmax.xlane.f32.xlu0 %v5245_v0  ;;  %v9612_v19 = vld [vmem:[%s13458_s11 + $0x110] sm:$0xff] }
 0x8f8   :  { %v5096_v57 = vpop.f32.mrb[12].mxu0  ;;  %v5248_v50 = vmax.f32 %v12640_v54, %v12645_v58 }
 0x8f9   :  { %v12652_v36 = vadd.f32 %v9602_v63, %v5096_v57  ;;  %v5098_v49 = vpop.f32.mrb[13].mxu0 }
 0x8fa   :  { %v12657_v5 = vadd.f32 %v9603_v39, %v5098_v49  ;;  %5249 = vmax.xlane.f32.xlu1 %v5248_v50  ;;  %v9613_v50 = vld [vmem:[%s13458_s11 + $0x118] sm:$0xff] }
 0x8fc   :  { %v5102_v24 = vpop.f32.mrb[14].mxu0  ;;  %v5251_v18 = vmax.f32 %v12652_v36, %v12657_v5 }
 0x8fd   :  { %v12664_v52 = vadd.f32 %v9604_v6, %v5102_v24  ;;  %v5104_v62 = vpop.f32.mrb[15].mxu0  ;;  %v9614_v24 = vld [vmem:[%s13458_s11 + $0x120] sm:$0xff] }
 0x8fe   :  { %v12669_v37 = vadd.f32 %v9605_v7, %v5104_v62  ;;  %5252 = vmax.xlane.f32.xlu0 %v5251_v18  ;;  %v9615_v62 = vld [vmem:[%s13458_s11 + $0x128] sm:$0xff] }
 0x900   :  { %v5108_v51 = vpop.f32.mrb[16].mxu0  ;;  %v5254_v55 = vmax.f32 %v12664_v52, %v12669_v37 }
 0x901   :  { %v12676_v21 = vadd.f32 %v9606_v61, %v5108_v51  ;;  %v5110_v56 = vpop.f32.mrb[17].mxu0  ;;  %v9616_v61 = vld [vmem:[%s13458_s11 + $0x130] sm:$0xff] }
 0x902   :  { %v12681_v59 = vadd.f32 %v9607_v45, %v5110_v56  ;;  %5255 = vmax.xlane.f32.xlu1 %v5254_v55 }
 0x904   :  { %v5114_v8 = vpop.f32.mrb[18].mxu0  ;;  %v5257_v15 = vmax.f32 %v12676_v21, %v12681_v59 }
 0x905   :  { %v12688_v25 = vadd.f32 %v9608_v12, %v5114_v8  ;;  %v5116_v48 = vpop.f32.mrb[19].mxu0  ;;  %v9617_v8 = vld [vmem:[%s13458_s11 + $0x138] sm:$0xff] }
 0x906   :  { %v12693_v35 = vadd.f32 %v9609_v40, %v5116_v48  ;;  %5258 = vmax.xlane.f32.xlu0 %v5257_v15  ;;  %v9618_v40 = vld [vmem:[%s13458_s11 + $0x140] sm:$0xff] }
 0x908   :  { %v5120_v32 = vpop.f32.mrb[20].mxu0  ;;  %v5260_v60 = vmax.f32 %v12688_v25, %v12693_v35 }
 0x909   :  { %v12700_v41 = vadd.f32 %v9610_v1, %v5120_v32  ;;  %v5122_v17 = vpop.f32.mrb[21].mxu0  ;;  %v9619_v1 = vld [vmem:[%s13458_s11 + $0x148] sm:$0xff] }
 0x90a   :  { %v12705_v30 = vadd.f32 %v9611_v2, %v5122_v17  ;;  %5261 = vmax.xlane.f32.xlu1 %v5260_v60 }
 0x90c   :  { %v5126_v0 = vpop.f32.mrb[22].mxu0  ;;  %v5263_v33 = vmax.f32 %v12700_v41, %v12705_v30 }
 0x90d   :  { %v12712_v29 = vadd.f32 %v9612_v19, %v5126_v0  ;;  %v5128_v57 = vpop.f32.mrb[23].mxu0 }
 0x90e   :  { %v12717_v63 = vadd.f32 %v9613_v50, %v5128_v57  ;;  %5264 = vmax.xlane.f32.xlu0 %v5263_v33  ;;  %v9620_v33 = vld [vmem:[%s13458_s11 + $0x150] sm:$0xff]  ;;  %v9621_v50 = vld [vmem:[%s13458_s11 + $0x158] sm:$0xff] }
 0x910   :  { %v5132_v49 = vpop.f32.mrb[24].mxu0  ;;  %v5266_v39 = vmax.f32 %v12712_v29, %v12717_v63 }
 0x911   :  { %v12724_v18 = vadd.f32 %v9614_v24, %v5132_v49  ;;  %v5134_v6 = vpop.f32.mrb[25].mxu0 }
 0x912   :  { %v12729_v7 = vadd.f32 %v9615_v62, %v5134_v6  ;;  %5267 = vmax.xlane.f32.xlu1 %v5266_v39  ;;  %v9622_v6 = vld [vmem:[%s13458_s11 + $0x160] sm:$0xff] }
 0x914   :  { %v5138_v51 = vpop.f32.mrb[26].mxu0  ;;  %v5269_v55 = vmax.f32 %v12724_v18, %v12729_v7 }
 0x915   :  { %v12736_v56 = vadd.f32 %v9616_v61, %v5138_v51  ;;  %v5140_v45 = vpop.f32.mrb[27].mxu0 }
 0x916   :  { %v12741_v15 = vadd.f32 %v9617_v8, %v5140_v45  ;;  %5270 = vmax.xlane.f32.xlu0 %v5269_v55  ;;  %v9623_v55 = vld [vmem:[%s13458_s11 + $0x168] sm:$0xff] }
 0x918   :  { %v5144_v12 = vpop.f32.mrb[28].mxu0  ;;  %v5272_v48 = vmax.f32 %v12736_v56, %v12741_v15 }
 0x919   :  { %v12748_v32 = vadd.f32 %v9618_v40, %v5144_v12  ;;  %v5146_v60 = vpop.f32.mrb[29].mxu0  ;;  %v9624_v12 = vld [vmem:[%s13458_s11 + $0x170] sm:$0xff] }
 0x91a   :  { %v12753_v17 = vadd.f32 %v9619_v1, %v5146_v60  ;;  %5273 = vmax.xlane.f32.xlu1 %v5272_v48  ;;  %v9625_v60 = vld [vmem:[%s13458_s11 + $0x178] sm:$0xff] }
 0x91c   :  { %v5150_v2 = vpop.f32.mrb[30].mxu0  ;;  %v5275_v0 = vmax.f32 %v12748_v32, %v12753_v17 }
 0x91d   :  { %v12760_v19 = vadd.f32 %v9620_v33, %v5150_v2  ;;  %v5152_v57 = vpop.f32.mrb[31].mxu0  ;;  %v9626_v33 = vld [vmem:[%s13458_s11 + $0x180] sm:$0xff] }
 0x91e   :  { %v12765_v49 = vadd.f32 %v9621_v50, %v5152_v57  ;;  %5276 = vmax.xlane.f32.xlu0 %v5275_v0 }
 0x920   :  { %v5156_v39 = vpop.f32.mrb[32].mxu0  ;;  %v5278_v24 = vmax.f32 %v12760_v19, %v12765_v49 }
 0x921   :  { %v12772_v62 = vadd.f32 %v9622_v6, %v5156_v39  ;;  %v5158_v51 = vpop.f32.mrb[33].mxu0  ;;  %v9627_v39 = vld [vmem:[%s13458_s11 + $0x188] sm:$0xff] }
 0x922   :  { %v12777_v61 = vadd.f32 %v9623_v55, %v5158_v51  ;;  %5279 = vmax.xlane.f32.xlu1 %v5278_v24  ;;  %v9628_v55 = vld [vmem:[%s13458_s11 + $0x190] sm:$0xff] }
 0x924   :  { %v5162_v45 = vpop.f32.mrb[34].mxu0  ;;  %v5281_v8 = vmax.f32 %v12772_v62, %v12777_v61 }
 0x925   :  { %v12784_v48 = vadd.f32 %v9624_v12, %v5162_v45  ;;  %v5164_v40 = vpop.f32.mrb[35].mxu0  ;;  %v9629_v12 = vld [vmem:[%s13458_s11 + $0x198] sm:$0xff] }
 0x926   :  { %v12789_v1 = vadd.f32 %v9625_v60, %v5164_v40  ;;  %5282 = vmax.xlane.f32.xlu0 %v5281_v8 }
 0x928   :  { %v5168_v2 = vpop.f32.mrb[36].mxu0  ;;  %v5284_v0 = vmax.f32 %v12784_v48, %v12789_v1 }
 0x929   :  { %v12796_v57 = vadd.f32 %v9626_v33, %v5168_v2  ;;  %v5170_v50 = vpop.f32.mrb[37].mxu0 }
 0x92a   :  { %v12801_v24 = vadd.f32 %v9627_v39, %v5170_v50  ;;  %5285 = vmax.xlane.f32.xlu1 %v5284_v0  ;;  %v9630_v0 = vld [vmem:[%s13458_s11 + $0x1a0] sm:$0xff]  ;;  %v9631_v39 = vld [vmem:[%s13458_s11 + $0x1a8] sm:$0xff] }
 0x92c   :  { %13783 = vst [vmem:[#allocation7_spill] sm:$0xff] %v12801_v24  ;;  %v5174_v6 = vpop.f32.mrb[38].mxu0  ;;  %v5287_v51 = vmax.f32 %v12796_v57, %v12801_v24 }
 0x92d   :  { %v12808_v45 = vadd.f32 %v9628_v55, %v5174_v6  ;;  %v5176_v8 = vpop.f32.mrb[39].mxu0 }
 0x92e   :  { %v12813_v40 = vadd.f32 %v9629_v12, %v5176_v8  ;;  %5288 = vmax.xlane.f32.xlu0 %v5287_v51  ;;  %v9632_v8 = vld [vmem:[%s13458_s11 + $0x1b0] sm:$0xff] }
 0x92f   :  { %13784 = vst [vmem:[#allocation9_spill] sm:$0xff] %v12808_v45 }
 0x930   :  { %13785 = vst [vmem:[#allocation17_spill] sm:$0xff] %v12813_v40  ;;  %v5180_v60 = vpop.f32.mrb[40].mxu0  ;;  %v5290_v2 = vmax.f32 %v12808_v45, %v12813_v40 }
 0x931   :  { %v12820_v33 = vadd.f32 %v9630_v0, %v5180_v60  ;;  %v5182_v50 = vpop.f32.mrb[41].mxu0  ;;  %v9633_v0 = vld [vmem:[%s13458_s11 + $0x1b8] sm:$0xff] }
 0x932   :  { %v12825_v6 = vadd.f32 %v9631_v39, %v5182_v50  ;;  %5291 = vmax.xlane.f32.xlu1 %v5290_v2  ;;  %v9634_v39 = vld [vmem:[%s13458_s11 + $0x1c0] sm:$0xff] }
 0x933   :  { %13786 = vst [vmem:[#allocation8_spill] sm:$0xff] %v12820_v33 }
 0x934   :  { %13787 = vst [vmem:[#allocation18_spill] sm:$0xff] %v12825_v6  ;;  %v5186_v55 = vpop.f32.mrb[42].mxu0  ;;  %v5293_v51 = vmax.f32 %v12820_v33, %v12825_v6 }
 0x935   :  { %v12832_v12 = vadd.f32 %v9632_v8, %v5186_v55  ;;  %v5188_v60 = vpop.f32.mrb[43].mxu0  ;;  %v9635_v8 = vld [vmem:[%s13458_s11 + $0x1c8] sm:$0xff] }
 0x936   :  { %v12837_v40 = vadd.f32 %v9633_v0, %v5188_v60  ;;  %5294 = vmax.xlane.f32.xlu0 %v5293_v51  ;;  %v9636_v0 = vld [vmem:[%s13458_s11 + $0x1d0] sm:$0xff] }
 0x937   :  { %13788 = vst [vmem:[#allocation11_spill] sm:$0xff] %v12832_v12 }
 0x938   :  { %13789 = vst [vmem:[#allocation21_spill] sm:$0xff] %v12837_v40  ;;  %v5192_v50 = vpop.f32.mrb[44].mxu0  ;;  %v5296_v2 = vmax.f32 %v12832_v12, %v12837_v40 }
 0x939   :  { %v12844_v6 = vadd.f32 %v9634_v39, %v5192_v50  ;;  %v5194_v55 = vpop.f32.mrb[45].mxu0  ;;  %v9637_v39 = vld [vmem:[%s13458_s11 + $0x1d8] sm:$0xff] }
 0x93a   :  { %v12849_v33 = vadd.f32 %v9635_v8, %v5194_v55  ;;  %5297 = vmax.xlane.f32.xlu1 %v5296_v2  ;;  %v9638_v8 = vld [vmem:[%s13458_s11 + $0x1e0] sm:$0xff] }
 0x93b   :  { %13790 = vst [vmem:[#allocation13_spill] sm:$0xff] %v12844_v6 }
 0x93c   :  { %13791 = vst [vmem:[#allocation22_spill] sm:$0xff] %v12849_v33  ;;  %v5198_v60 = vpop.f32.mrb[46].mxu0  ;;  %v5299_v51 = vmax.f32 %v12844_v6, %v12849_v33 }
 0x93d   :  { %v12856_v40 = vadd.f32 %v9636_v0, %v5198_v60  ;;  %v5200_v50 = vpop.f32.mrb[47].mxu0  ;;  %v9639_v0 = vld [vmem:[%s13458_s11 + $0x1e8] sm:$0xff] }
 0x93e   :  { %v12861_v12 = vadd.f32 %v9637_v39, %v5200_v50  ;;  %5300 = vmax.xlane.f32.xlu0 %v5299_v51  ;;  %v9640_v39 = vld [vmem:[%s13458_s11 + $0x1f0] sm:$0xff] }
 0x93f   :  { %13792 = vst [vmem:[#allocation14_spill] sm:$0xff] %v12856_v40 }
 0x940   :  { %13793 = vst [vmem:[#allocation25_spill] sm:$0xff] %v12861_v12  ;;  %v5204_v55 = vpop.f32.mrb[48].mxu0  ;;  %v5302_v2 = vmax.f32 %v12856_v40, %v12861_v12 }
 0x941   :  { %v12868_v33 = vadd.f32 %v9638_v8, %v5204_v55  ;;  %v5206_v60 = vpop.f32.mrb[49].mxu0  ;;  %v9641_v8 = vld [vmem:[%s13458_s11 + $0x1f8] sm:$0xff] }
 0x942   :  { %v12873_v6 = vadd.f32 %v9639_v0, %v5206_v60  ;;  %5303 = vmax.xlane.f32.xlu1 %v5302_v2 }
 0x943   :  { %13794 = vst [vmem:[#allocation16_spill] sm:$0xff] %v12868_v33 }
 0x944   :  { %13795 = vst [vmem:[#allocation26_spill] sm:$0xff] %v12873_v6  ;;  %v5210_v50 = vpop.f32.mrb[50].mxu0  ;;  %v5305_v51 = vmax.f32 %v12868_v33, %v12873_v6 }
 0x945   :  { %v12880_v12 = vadd.f32 %v9640_v39, %v5210_v50  ;;  %v5212_v55 = vpop.f32.mrb[51].mxu0 }
 0x946   :  { %v12885_v40 = vadd.f32 %v9641_v8, %v5212_v55  ;;  %5306 = vmax.xlane.f32.xlu0 %v5305_v51 }
 0x948   :  { %13796 = vst [vmem:[#allocation19_spill] sm:$0xff] %v12885_v40  ;;  %v5308_v2 = vmax.f32 %v12880_v12, %v12885_v40 }
 0x94a   :  { %5309 = vmax.xlane.f32.xlu1 %v5308_v2 }
 0x95b   :  { %v5217_v60 = vpop.xlane.xlu0 %5216 }
 0x95c   :  { %v5311_v0 = vsub.f32 %v12508_v10, %v5217_v60  ;;  %v5312_v6 = vsub.f32 %v12513_v31, %v5217_v60 }
 0x95e   :  { %v5375_v33 = vmul.f32 1.442695, %v5311_v0  ;;  %v5377_v50 = vmul.f32 1.442695, %v5312_v6 }
 0x95f   :  { %v5220_v39 = vpop.xlane.xlu1 %5219 }
 0x960   :  { %9321 = vpow2.f32 %v5375_v33  ;;  %v5313_v45 = vsub.f32 %v12520_v14, %v5220_v39  ;;  %v5314_v24 = vsub.f32 %v12525_v4, %v5220_v39 }
 0x961   :  { %9323 = vpow2.f32 %v5377_v50  ;;  %v9642_v50 = vld.sshfl [vmem:[%s13459_s12] sm:$0x33 pattern:$0x76325410] }
 0x962   :  { %v5379_v55 = vmul.f32 1.442695, %v5313_v45  ;;  %v5381_v51 = vmul.f32 1.442695, %v5314_v24 }
 0x963   :  { %v5223_v8 = vpop.xlane.xlu0 %5222 }
 0x964   :  { %9325 = vpow2.f32 %v5379_v55  ;;  %v5315_v2 = vsub.f32 %v12532_v16, %v5223_v8  ;;  %v5316_v40 = vsub.f32 %v12537_v20, %v5223_v8 }
 0x965   :  { %9327 = vpow2.f32 %v5381_v51 }
 0x966   :  { %v5383_v10 = vmul.f32 1.442695, %v5315_v2  ;;  %v5385_v31 = vmul.f32 1.442695, %v5316_v40 }
 0x967   :  { %v5226_v60 = vpop.xlane.xlu1 %5225 }
 0x968   :  { %9329 = vpow2.f32 %v5383_v10  ;;  %v5317_v33 = vsub.f32 %v12544_v47, %v5226_v60  ;;  %v5318_v14 = vsub.f32 %v12549_v34, %v5226_v60 }
 0x969   :  { %9331 = vpow2.f32 %v5385_v31 }
 0x96a   :  { %v12897_v4 = vpop.eup %9321  ;;  %v5387_v45 = vmul.f32 1.442695, %v5317_v33  ;;  %v5389_v24 = vmul.f32 1.442695, %v5318_v14 }
 0x96b   :  { %v12899_v6 = vpop.eup %9323  ;;  %v5229_v0 = vpop.xlane.xlu0 %5228 }
 0x96c   :  { %9333 = vpow2.f32 %v5387_v45  ;;  %5567 = vmatprep.mubr.f32.mxu1 %v12899_v6  ;;  %v5319_v16 = vsub.f32 %v12556_v9, %v5229_v0  ;;  %v5320_v20 = vsub.f32 %v12561_v3, %v5229_v0 }
 0x96d   :  { %9335 = vpow2.f32 %v5389_v24  ;;  %5568 = vmatmul.mubr.f32.vlgmr.msra.gmra.mrb[212].mxu1 %v12897_v4 }
 0x96e   :  { %v12905_v47 = vpop.eup %9325  ;;  %v5391_v34 = vmul.f32 1.442695, %v5319_v16  ;;  %v5393_v40 = vmul.f32 1.442695, %v5320_v20  ;;  %7493 = vmatpush1.msk.msra.mxu1 %vm2829_vm3, %v9642_v50 }
 0x96f   :  { %v12911_v39 = vpop.eup %9327  ;;  %v5232_v55 = vpop.xlane.xlu1 %5231  ;;  %9058 = vmatprep.subr.bf16.mxu1 %v13756_v43 }
 0x970   :  { %9337 = vpow2.f32 %v5391_v34  ;;  %v5321_v9 = vsub.f32 %v12568_v22, %v5232_v55  ;;  %v5322_v3 = vsub.f32 %v12573_v44, %v5232_v55  ;;  %5572 = vmatprep.mubr.f32.mxu1 %v12911_v39 }
 0x971   :  { %9339 = vpow2.f32 %v5393_v40  ;;  %5573 = vmatmul.mubr.f32.gmra.mrb[214].mxu1 %v12905_v47 }
 0x972   :  { %v12918_v51 = vpop.eup %9329  ;;  %v5395_v8 = vmul.f32 1.442695, %v5321_v9  ;;  %v5397_v2 = vmul.f32 1.442695, %v5322_v3 }
 0x973   :  { %v12920_v10 = vpop.eup %9331  ;;  %v5235_v31 = vpop.xlane.xlu0 %5234 }
 0x974   :  { %9341 = vpow2.f32 %v5395_v8  ;;  %5577 = vmatprep.mubr.f32.mxu1 %v12920_v10  ;;  %v5323_v60 = vsub.f32 %v12580_v26, %v5235_v31  ;;  %v5324_v22 = vsub.f32 %v12585_v28, %v5235_v31 }
 0x975   :  { %9343 = vpow2.f32 %v5397_v2  ;;  %5578 = vmatmul.mubr.f32.gmra.mrb[216].mxu1 %v12918_v51 }
 0x976   :  { %v12926_v44 = vpop.eup %9333  ;;  %v5399_v33 = vmul.f32 1.442695, %v5323_v60  ;;  %v5401_v14 = vmul.f32 1.442695, %v5324_v22 }
 0x977   :  { %v12928_v45 = vpop.eup %9335  ;;  %v5238_v24 = vpop.xlane.xlu1 %5237 }
 0x978   :  { %9345 = vpow2.f32 %v5399_v33  ;;  %v5325_v0 = vsub.f32 %v12592_v38, %v5238_v24  ;;  %v5326_v16 = vsub.f32 %v12597_v42, %v5238_v24  ;;  %5582 = vmatprep.mubr.f32.mxu1 %v12928_v45 }
 0x979   :  { %9347 = vpow2.f32 %v5401_v14  ;;  %5583 = vmatmul.mubr.f32.gmra.mrb[218].mxu1 %v12926_v44 }
 0x97a   :  { %v12934_v26 = vpop.eup %9337  ;;  %v5403_v28 = vmul.f32 1.442695, %v5325_v0  ;;  %v5405_v20 = vmul.f32 1.442695, %v5326_v16 }
 0x97b   :  { %v12936_v34 = vpop.eup %9339  ;;  %v5241_v40 = vpop.xlane.xlu0 %5240 }
 0x97c   :  { %9349 = vpow2.f32 %v5403_v28  ;;  %5587 = vmatprep.mubr.f32.mxu1 %v12936_v34  ;;  %v5327_v50 = vsub.f32 %v12604_v46, %v5241_v40  ;;  %v5328_v38 = vsub.f32 %v12609_v53, %v5241_v40 }
 0x97d   :  { %9351 = vpow2.f32 %v5405_v20  ;;  %5588 = vmatmul.mubr.f32.gmra.mrb[220].mxu1 %v12934_v26 }
 0x97e   :  { %v12942_v42 = vpop.eup %9341  ;;  %v5407_v55 = vmul.f32 1.442695, %v5327_v50  ;;  %v5409_v9 = vmul.f32 1.442695, %v5328_v38 }
 0x97f   :  { %v12944_v3 = vpop.eup %9343  ;;  %v5244_v8 = vpop.xlane.xlu1 %5243 }
 0x980   :  { %9353 = vpow2.f32 %v5407_v55  ;;  %v5329_v2 = vsub.f32 %v12616_v13, %v5244_v8  ;;  %v5330_v31 = vsub.f32 %v12621_v23, %v5244_v8  ;;  %5592 = vmatprep.mubr.f32.mxu1 %v12944_v3 }
 0x981   :  { %9355 = vpow2.f32 %v5409_v9  ;;  %5593 = vmatmul.mubr.f32.gmra.mrb[222].mxu1 %v12942_v42 }
 0x982   :  { %v12950_v46 = vpop.eup %9345  ;;  %v5411_v53 = vmul.f32 1.442695, %v5329_v2  ;;  %v5413_v60 = vmul.f32 1.442695, %v5330_v31 }
 0x983   :  { %v12952_v22 = vpop.eup %9347  ;;  %v5247_v33 = vpop.xlane.xlu0 %5246 }
 0x984   :  { %9357 = vpow2.f32 %v5411_v53  ;;  %5597 = vmatprep.mubr.f32.mxu1 %v12952_v22  ;;  %v5331_v14 = vsub.f32 %v12628_v11, %v5247_v33  ;;  %v5332_v13 = vsub.f32 %v12633_v27, %v5247_v33 }
 0x985   :  { %9359 = vpow2.f32 %v5413_v60  ;;  %5598 = vmatmul.mubr.f32.gmra.mrb[224].mxu1 %v12950_v46 }
 0x986   :  { %v12958_v23 = vpop.eup %9349  ;;  %v5415_v24 = vmul.f32 1.442695, %v5331_v14  ;;  %v5417_v0 = vmul.f32 1.442695, %v5332_v13 }
 0x987   :  { %v12960_v16 = vpop.eup %9351  ;;  %v5250_v28 = vpop.xlane.xlu1 %5249 }
 0x988   :  { %9361 = vpow2.f32 %v5415_v24  ;;  %v5333_v20 = vsub.f32 %v12640_v54, %v5250_v28  ;;  %v5334_v40 = vsub.f32 %v12645_v58, %v5250_v28  ;;  %5602 = vmatprep.mubr.f32.mxu1 %v12960_v16 }
 0x989   :  { %9363 = vpow2.f32 %v5417_v0  ;;  %5603 = vmatmul.mubr.f32.gmra.mrb[226].mxu1 %v12958_v23 }
 0x98a   :  { %v12966_v11 = vpop.eup %9353  ;;  %v5419_v27 = vmul.f32 1.442695, %v5333_v20  ;;  %v5421_v50 = vmul.f32 1.442695, %v5334_v40 }
 0x98b   :  { %v12968_v38 = vpop.eup %9355  ;;  %v5253_v55 = vpop.xlane.xlu0 %5252 }
 0x98c   :  { %9365 = vpow2.f32 %v5419_v27  ;;  %5607 = vmatprep.mubr.f32.mxu1 %v12968_v38  ;;  %v5335_v9 = vsub.f32 %v12652_v36, %v5253_v55  ;;  %v5336_v54 = vsub.f32 %v12657_v5, %v5253_v55 }
 0x98d   :  { %9367 = vpow2.f32 %v5421_v50  ;;  %5608 = vmatmul.mubr.f32.gmra.mrb[228].mxu1 %v12966_v11 }
 0x98e   :  { %v12974_v58 = vpop.eup %9357  ;;  %v5423_v8 = vmul.f32 1.442695, %v5335_v9  ;;  %v5425_v2 = vmul.f32 1.442695, %v5336_v54 }
 0x98f   :  { %v12976_v31 = vpop.eup %9359  ;;  %v5256_v53 = vpop.xlane.xlu1 %5255 }
 0x990   :  { %9369 = vpow2.f32 %v5423_v8  ;;  %v5337_v60 = vsub.f32 %v12664_v52, %v5256_v53  ;;  %v5338_v33 = vsub.f32 %v12669_v37, %v5256_v53  ;;  %5612 = vmatprep.mubr.f32.mxu1 %v12976_v31 }
 0x991   :  { %9371 = vpow2.f32 %v5425_v2  ;;  %5613 = vmatmul.mubr.f32.gmra.mrb[230].mxu1 %v12974_v58 }
 0x992   :  { %v12982_v36 = vpop.eup %9361  ;;  %v5427_v5 = vmul.f32 1.442695, %v5337_v60  ;;  %v5429_v14 = vmul.f32 1.442695, %v5338_v33 }
 0x993   :  { %v12984_v13 = vpop.eup %9363  ;;  %v5259_v24 = vpop.xlane.xlu0 %5258 }
 0x994   :  { %9373 = vpow2.f32 %v5427_v5  ;;  %5617 = vmatprep.mubr.f32.mxu1 %v12984_v13  ;;  %v5339_v0 = vsub.f32 %v12676_v21, %v5259_v24  ;;  %v5340_v52 = vsub.f32 %v12681_v59, %v5259_v24 }
 0x995   :  { %9375 = vpow2.f32 %v5429_v14  ;;  %5618 = vmatmul.mubr.f32.gmra.mrb[232].mxu1 %v12982_v36 }
 0x996   :  { %v12990_v37 = vpop.eup %9365  ;;  %v5431_v28 = vmul.f32 1.442695, %v5339_v0  ;;  %v5433_v20 = vmul.f32 1.442695, %v5340_v52 }
 0x997   :  { %v12992_v40 = vpop.eup %9367  ;;  %v5262_v27 = vpop.xlane.xlu1 %5261 }
 0x998   :  { %9377 = vpow2.f32 %v5431_v28  ;;  %v5341_v50 = vsub.f32 %v12688_v25, %v5262_v27  ;;  %v5342_v55 = vsub.f32 %v12693_v35, %v5262_v27  ;;  %5622 = vmatprep.mubr.f32.mxu1 %v12992_v40 }
 0x999   :  { %9379 = vpow2.f32 %v5433_v20  ;;  %5623 = vmatmul.mubr.f32.gmra.mrb[234].mxu1 %v12990_v37 }
 0x99a   :  { %v12998_v21 = vpop.eup %9369  ;;  %v5435_v59 = vmul.f32 1.442695, %v5341_v50  ;;  %v5437_v9 = vmul.f32 1.442695, %v5342_v55 }
 0x99b   :  { %v13000_v54 = vpop.eup %9371  ;;  %v5265_v8 = vpop.xlane.xlu0 %5264 }
 0x99c   :  { %9381 = vpow2.f32 %v5435_v59  ;;  %5627 = vmatprep.mubr.f32.mxu1 %v13000_v54  ;;  %v5343_v2 = vsub.f32 %v12700_v41, %v5265_v8  ;;  %v5344_v25 = vsub.f32 %v12705_v30, %v5265_v8 }
 0x99d   :  { %9383 = vpow2.f32 %v5437_v9  ;;  %5628 = vmatmul.mubr.f32.gmra.mrb[236].mxu1 %v12998_v21 }
 0x99e   :  { %v13006_v35 = vpop.eup %9373  ;;  %v5439_v53 = vmul.f32 1.442695, %v5343_v2  ;;  %v5441_v60 = vmul.f32 1.442695, %v5344_v25 }
 0x99f   :  { %v13008_v33 = vpop.eup %9375  ;;  %v5268_v5 = vpop.xlane.xlu1 %5267 }
 0x9a0   :  { %9385 = vpow2.f32 %v5439_v53  ;;  %v5345_v14 = vsub.f32 %v12712_v29, %v5268_v5  ;;  %v5346_v24 = vsub.f32 %v12717_v63, %v5268_v5  ;;  %5632 = vmatprep.mubr.f32.mxu1 %v13008_v33 }
 0x9a1   :  { %9387 = vpow2.f32 %v5441_v60  ;;  %5633 = vmatmul.mubr.f32.gmra.mrb[238].mxu1 %v13006_v35 }
 0x9a2   :  { %v13014_v41 = vpop.eup %9377  ;;  %v5443_v30 = vmul.f32 1.442695, %v5345_v14  ;;  %v5445_v0 = vmul.f32 1.442695, %v5346_v24 }
 0x9a3   :  { %v13016_v52 = vpop.eup %9379  ;;  %v5271_v28 = vpop.xlane.xlu0 %5270 }
 0x9a4   :  { %9389 = vpow2.f32 %v5443_v30  ;;  %5637 = vmatprep.mubr.f32.mxu1 %v13016_v52  ;;  %v5347_v20 = vsub.f32 %v12724_v18, %v5271_v28  ;;  %v5348_v29 = vsub.f32 %v12729_v7, %v5271_v28 }
 0x9a5   :  { %9391 = vpow2.f32 %v5445_v0  ;;  %5638 = vmatmul.mubr.f32.gmra.mrb[240].mxu1 %v13014_v41 }
 0x9a6   :  { %v13022_v63 = vpop.eup %9381  ;;  %v5447_v27 = vmul.f32 1.442695, %v5347_v20  ;;  %v5449_v50 = vmul.f32 1.442695, %v5348_v29 }
 0x9a7   :  { %v13024_v55 = vpop.eup %9383  ;;  %v5274_v59 = vpop.xlane.xlu1 %5273 }
 0x9a8   :  { %9393 = vpow2.f32 %v5447_v27  ;;  %v5349_v9 = vsub.f32 %v12736_v56, %v5274_v59  ;;  %v5350_v8 = vsub.f32 %v12741_v15, %v5274_v59  ;;  %5642 = vmatprep.mubr.f32.mxu1 %v13024_v55 }
 0x9a9   :  { %9395 = vpow2.f32 %v5449_v50  ;;  %5643 = vmatmul.mubr.f32.gmra.mrb[242].mxu1 %v13022_v63 }
 0x9aa   :  { %v13030_v18 = vpop.eup %9385  ;;  %v5451_v7 = vmul.f32 1.442695, %v5349_v9  ;;  %v5453_v2 = vmul.f32 1.442695, %v5350_v8 }
 0x9ab   :  { %v13032_v25 = vpop.eup %9387  ;;  %v5277_v53 = vpop.xlane.xlu0 %5276 }
 0x9ac   :  { %9397 = vpow2.f32 %v5451_v7  ;;  %5647 = vmatprep.mubr.f32.mxu1 %v13032_v25  ;;  %v5351_v60 = vsub.f32 %v12748_v32, %v5277_v53  ;;  %v5352_v56 = vsub.f32 %v12753_v17, %v5277_v53 }
 0x9ad   :  { %9399 = vpow2.f32 %v5453_v2  ;;  %5648 = vmatmul.mubr.f32.gmra.mrb[244].mxu1 %v13030_v18 }
 0x9ae   :  { %v13038_v15 = vpop.eup %9389  ;;  %v5455_v5 = vmul.f32 1.442695, %v5351_v60  ;;  %v5457_v14 = vmul.f32 1.442695, %v5352_v56 }
 0x9af   :  { %v13040_v24 = vpop.eup %9391  ;;  %v5280_v30 = vpop.xlane.xlu1 %5279 }
 0x9b0   :  { %9401 = vpow2.f32 %v5455_v5  ;;  %v5353_v0 = vsub.f32 %v12760_v19, %v5280_v30  ;;  %v5354_v28 = vsub.f32 %v12765_v49, %v5280_v30  ;;  %5652 = vmatprep.mubr.f32.mxu1 %v13040_v24 }
 0x9b1   :  { %9403 = vpow2.f32 %v5457_v14  ;;  %5653 = vmatmul.mubr.f32.gmra.mrb[246].mxu1 %v13038_v15 }
 0x9b2   :  { %v13046_v32 = vpop.eup %9393  ;;  %v5459_v17 = vmul.f32 1.442695, %v5353_v0  ;;  %v5461_v20 = vmul.f32 1.442695, %v5354_v28 }
 0x9b3   :  { %v13048_v29 = vpop.eup %9395  ;;  %v5283_v27 = vpop.xlane.xlu0 %5282 }
 0x9b4   :  { %9405 = vpow2.f32 %v5459_v17  ;;  %5657 = vmatprep.mubr.f32.mxu1 %v13048_v29  ;;  %v5355_v50 = vsub.f32 %v12772_v62, %v5283_v27  ;;  %v5356_v19 = vsub.f32 %v12777_v61, %v5283_v27  ;;  %v13798_v27 = vld [vmem:[#allocation9_spill] sm:$0xff] }
 0x9b5   :  { %9407 = vpow2.f32 %v5461_v20  ;;  %5658 = vmatmul.mubr.f32.gmra.mrb[248].mxu1 %v13046_v32 }
 0x9b6   :  { %v13054_v49 = vpop.eup %9397  ;;  %v5463_v59 = vmul.f32 1.442695, %v5355_v50  ;;  %v5465_v9 = vmul.f32 1.442695, %v5356_v19  ;;  %v13799_v19 = vld [vmem:[#allocation17_spill] sm:$0xff] }
 0x9b7   :  { %v13056_v8 = vpop.eup %9399  ;;  %v5286_v7 = vpop.xlane.xlu1 %5285 }
 0x9b8   :  { %9409 = vpow2.f32 %v5463_v59  ;;  %v5357_v2 = vsub.f32 %v12784_v48, %v5286_v7  ;;  %v5358_v53 = vsub.f32 %v12789_v1, %v5286_v7  ;;  %5662 = vmatprep.mubr.f32.mxu1 %v13056_v8  ;;  %v13797_v48 = vld [vmem:[#allocation7_spill] sm:$0xff] }
 0x9b9   :  { %9411 = vpow2.f32 %v5465_v9  ;;  %5663 = vmatmul.mubr.f32.gmra.mrb[250].mxu1 %v13054_v49 }
 0x9ba   :  { %v13062_v62 = vpop.eup %9401  ;;  %v5467_v61 = vmul.f32 1.442695, %v5357_v2  ;;  %v5469_v60 = vmul.f32 1.442695, %v5358_v53 }
 0x9bb   :  { %v13064_v56 = vpop.eup %9403  ;;  %v5289_v5 = vpop.xlane.xlu0 %5288 }
 0x9bc   :  { %9413 = vpow2.f32 %v5467_v61  ;;  %5667 = vmatprep.mubr.f32.mxu1 %v13064_v56  ;;  %v5359_v14 = vsub.f32 %v12796_v57, %v5289_v5  ;;  %v5360_v30 = vsub.f32 %v13797_v48, %v5289_v5  ;;  %v13801_v61 = vld [vmem:[#allocation8_spill] sm:$0xff]  ;;  %v13802_v5 = vld [vmem:[#allocation18_spill] sm:$0xff] }
 0x9bd   :  { %9415 = vpow2.f32 %v5469_v60  ;;  %5668 = vmatmul.mubr.f32.gmra.mrb[252].mxu1 %v13062_v62 }
 0x9be   :  { %v13070_v1 = vpop.eup %9405  ;;  %v5471_v0 = vmul.f32 1.442695, %v5359_v14  ;;  %v5473_v28 = vmul.f32 1.442695, %v5360_v30 }
 0x9bf   :  { %v13072_v17 = vpop.eup %9407  ;;  %v5292_v20 = vpop.xlane.xlu1 %5291 }
 0x9c0   :  { %9417 = vpow2.f32 %v5471_v0  ;;  %v5361_v50 = vsub.f32 %v13798_v27, %v5292_v20  ;;  %v5362_v59 = vsub.f32 %v13799_v19, %v5292_v20  ;;  %5672 = vmatprep.mubr.f32.mxu1 %v13072_v17  ;;  %v13805_v27 = vld [vmem:[#allocation11_spill] sm:$0xff]  ;;  %v13806_v19 = vld [vmem:[#allocation21_spill] sm:$0xff] }
 0x9c1   :  { %9419 = vpow2.f32 %v5473_v28  ;;  %5673 = vmatmul.mubr.f32.gmra.mrb[254].mxu1 %v13070_v1 }
 0x9c2   :  { %v13078_v57 = vpop.eup %9409  ;;  %v5475_v9 = vmul.f32 1.442695, %v5361_v50  ;;  %v5477_v7 = vmul.f32 1.442695, %v5362_v59 }
 0x9c3   :  { %13800 = vst [vmem:[#allocation28_spill] sm:$0xff] %v13078_v57  ;;  %v13080_v2 = vpop.eup %9411  ;;  %v5295_v53 = vpop.xlane.xlu0 %5294 }
 0x9c4   :  { %9421 = vpow2.f32 %v5475_v9  ;;  %5677 = vmatprep.mubr.f32.mxu1 %v13080_v2  ;;  %v5363_v60 = vsub.f32 %v13801_v61, %v5295_v53  ;;  %v5364_v14 = vsub.f32 %v13802_v5, %v5295_v53  ;;  %v13808_v5 = vld [vmem:[#allocation13_spill] sm:$0xff] }
 0x9c5   :  { %9423 = vpow2.f32 %v5477_v7  ;;  %5678 = vmatmul.mubr.f32.gmra.mrb[0].mxu1 %v13078_v57 }
 0x9c6   :  { %v13086_v48 = vpop.eup %9413  ;;  %v5479_v30 = vmul.f32 1.442695, %v5363_v60  ;;  %v5481_v0 = vmul.f32 1.442695, %v5364_v14 }
 0x9c7   :  { %13803 = vst [vmem:[#allocation20_spill] sm:$0xff] %v13086_v48  ;;  %v13088_v28 = vpop.eup %9415  ;;  %v5298_v20 = vpop.xlane.xlu1 %5297 }
 0x9c8   :  { %13804 = vst [vmem:[#allocation29_spill] sm:$0xff] %v13088_v28  ;;  %9425 = vpow2.f32 %v5479_v30  ;;  %v5365_v50 = vsub.f32 %v13805_v27, %v5298_v20  ;;  %v5366_v59 = vsub.f32 %v13806_v19, %v5298_v20  ;;  %5682 = vmatprep.mubr.f32.mxu1 %v13088_v28  ;;  %v13809_v30 = vld [vmem:[#allocation22_spill] sm:$0xff] }
 0x9c9   :  { %9427 = vpow2.f32 %v5481_v0  ;;  %5683 = vmatmul.mubr.f32.gmra.mrb[2].mxu1 %v13086_v48 }
 0x9ca   :  { %v13094_v9 = vpop.eup %9417  ;;  %v5483_v7 = vmul.f32 1.442695, %v5365_v50  ;;  %v5485_v53 = vmul.f32 1.442695, %v5366_v59  ;;  %v13811_v59 = vld [vmem:[#allocation14_spill] sm:$0xff] }
 0x9cb   :  { %13807 = vst [vmem:[#allocation23_spill] sm:$0xff] %v13094_v9  ;;  %v13096_v61 = vpop.eup %9419  ;;  %v5301_v60 = vpop.xlane.xlu0 %5300 }
 0x9cc   :  { %9429 = vpow2.f32 %v5483_v7  ;;  %5687 = vmatprep.mubr.f32.mxu1 %v13096_v61  ;;  %v5367_v14 = vsub.f32 %v13808_v5, %v5301_v60  ;;  %v5368_v27 = vsub.f32 %v13809_v30, %v5301_v60  ;;  %v13812_v7 = vld [vmem:[#allocation25_spill] sm:$0xff] }
 0x9cd   :  { %9431 = vpow2.f32 %v5485_v53  ;;  %5688 = vmatmul.mubr.f32.gmra.mrb[4].mxu1 %v13094_v9 }
 0x9ce   :  { %v13102_v0 = vpop.eup %9421  ;;  %v5487_v20 = vmul.f32 1.442695, %v5367_v14  ;;  %v5489_v19 = vmul.f32 1.442695, %v5368_v27  ;;  %v13814_v27 = vld [vmem:[#allocation16_spill] sm:$0xff] }
 0x9cf   :  { %13810 = vst [vmem:[#allocation24_spill] sm:$0xff] %v13102_v0  ;;  %v13104_v48 = vpop.eup %9423  ;;  %v5304_v50 = vpop.xlane.xlu1 %5303 }
 0x9d0   :  { %9433 = vpow2.f32 %v5487_v20  ;;  %v5369_v28 = vsub.f32 %v13811_v59, %v5304_v50  ;;  %v5370_v57 = vsub.f32 %v13812_v7, %v5304_v50  ;;  %5692 = vmatprep.mubr.f32.mxu1 %v13104_v48  ;;  %v13815_v59 = vld [vmem:[#allocation26_spill] sm:$0xff] }
 0x9d1   :  { %9435 = vpow2.f32 %v5489_v19  ;;  %5693 = vmatmul.mubr.f32.gmra.mrb[6].mxu1 %v13102_v0 }
 0x9d2   :  { %v13110_v53 = vpop.eup %9425  ;;  %v5491_v60 = vmul.f32 1.442695, %v5369_v28  ;;  %v5493_v5 = vmul.f32 1.442695, %v5370_v57 }
 0x9d3   :  { %v13112_v30 = vpop.eup %9427  ;;  %v5307_v14 = vpop.xlane.xlu0 %5306 }
 0x9d4   :  { %13813 = vst [vmem:[#allocation27_spill] sm:$0xff] %v13112_v30  ;;  %9437 = vpow2.f32 %v5491_v60  ;;  %5697 = vmatprep.mubr.f32.mxu1 %v13112_v30  ;;  %v5371_v20 = vsub.f32 %v13814_v27, %v5307_v14  ;;  %v5372_v9 = vsub.f32 %v13815_v59, %v5307_v14  ;;  %v13816_v60 = vld [vmem:[#allocation19_spill] sm:$0xff] }
 0x9d5   :  { %9439 = vpow2.f32 %v5493_v5  ;;  %5698 = vmatmul.mubr.f32.gmra.mrb[8].mxu1 %v13110_v53 }
 0x9d6   :  { %v13118_v19 = vpop.eup %9429  ;;  %v5495_v50 = vmul.f32 1.442695, %v5371_v20  ;;  %v5497_v7 = vmul.f32 1.442695, %v5372_v9 }
 0x9d7   :  { %v13120_v0 = vpop.eup %9431  ;;  %v5310_v57 = vpop.xlane.xlu1 %5309 }
 0x9d8   :  { %9441 = vpow2.f32 %v5495_v50  ;;  %5702 = vmatprep.mubr.f32.mxu1 %v13120_v0  ;;  %v5373_v28 = vsub.f32 %v12880_v12, %v5310_v57  ;;  %v5374_v30 = vsub.f32 %v13816_v60, %v5310_v57  ;;  %v13825_v57 = vmov 0.0  }
 0x9d9   :  { %9443 = vpow2.f32 %v5497_v7  ;;  %5703 = vmatmul.mubr.f32.gmra.mrb[10].mxu1 %v13118_v19 }
 0x9da   :  { %v13126_v5 = vpop.eup %9433  ;;  %v5499_v14 = vmul.f32 1.442695, %v5373_v28  ;;  %v5501_v27 = vmul.f32 1.442695, %v5374_v30 }
 0x9db   :  { %13817 = vst [vmem:[#allocation42_spill] sm:$0xff] %v13126_v5  ;;  %v13128_v59 = vpop.eup %9435 }
 0x9dc   :  { %13818 = vst [vmem:[#allocation30_spill] sm:$0xff] %v13128_v59  ;;  %9445 = vpow2.f32 %v5499_v14  ;;  %5707 = vmatprep.mubr.f32.mxu1 %v13128_v59 }
 0x9dd   :  { %9447 = vpow2.f32 %v5501_v27  ;;  %5708 = vmatmul.mubr.f32.gmra.mrb[12].mxu1 %v13126_v5 }
 0x9de   :  { %v13132_v9 = vpop.eup %9437 }
 0x9df   :  { %13819 = vst [vmem:[#allocation41_spill] sm:$0xff] %v13132_v9  ;;  %v13134_v12 = vpop.eup %9439 }
 0x9e0   :  { %13820 = vst [vmem:[#allocation38_spill] sm:$0xff] %v13134_v12  ;;  %5712 = vmatprep.mubr.f32.mxu1 %v13134_v12 }
 0x9e1   :  { %5713 = vmatmul.mubr.f32.gmra.mrb[14].mxu1 %v13132_v9 }
 0x9e2   :  { %v13138_v20 = vpop.eup %9441 }
 0x9e3   :  { %13821 = vst [vmem:[#allocation36_spill] sm:$0xff] %v13138_v20  ;;  %v13140_v50 = vpop.eup %9443 }
 0x9e4   :  { %13822 = vst [vmem:[#allocation32_spill] sm:$0xff] %v13140_v50  ;;  %5717 = vmatprep.mubr.f32.mxu1 %v13140_v50 }
 0x9e5   :  { %5718 = vmatmul.mubr.f32.gmra.mrb[16].mxu1 %v13138_v20 }
 0x9e6   :  { %v13144_v30 = vpop.eup %9445 }
 0x9e7   :  { %13823 = vst [vmem:[#allocation34_spill] sm:$0xff] %v13144_v30  ;;  %v13146_v7 = vpop.eup %9447 }
 0x9e8   :  { %13824 = vst [vmem:[#allocation33_spill] sm:$0xff] %v13146_v7  ;;  %5722 = vmatprep.mubr.f32.mxu1 %v13146_v7 }
 0x9e9   :  { %5723 = vmatmul.mubr.f32.gmra.mrb[18].mxu1 %v13144_v30 }
 0x9ea   :  { %5920 = vmatprep.mubr.f32.mxu1 %v13825_v57 }
 0xa40   :  { %v5569_v28 = vpop.f32.mrb[212].mxu1 }
 0xa41   :  { %9449 = vrcp.f32 %v5569_v28  ;;  %v5571_v60 = vpop.f32.mrb[213].mxu1 }
 0xa44   :  { %v5574_v14 = vpop.f32.mrb[214].mxu1 }
 0xa45   :  { %9451 = vrcp.f32 %v5574_v14  ;;  %v5576_v27 = vpop.f32.mrb[215].mxu1 }
 0xa48   :  { %v5579_v9 = vpop.f32.mrb[216].mxu1 }
 0xa49   :  { %9453 = vrcp.f32 %v5579_v9  ;;  %v5581_v50 = vpop.f32.mrb[217].mxu1 }
 0xa4b   :  { %v9450_v20 = vpop.eup %9449 }
 0xa4c   :  { %v5584_v12 = vpop.f32.mrb[218].mxu1  ;;  %7494 = vmatmul.mubr.msk.f32.vlgmr.msra.gmra.mrb[20].mxu1 %vm2732_vm4, %v9450_v20 }
 0xa4d   :  { %9455 = vrcp.f32 %v5584_v12  ;;  %v5586_v5 = vpop.f32.mrb[219].mxu1  ;;  %5926 = vmatprep.mubr.f32.mxu1 %v13825_v57 }
 0xa4f   :  { %v9452_v30 = vpop.eup %9451 }
 0xa50   :  { %v5589_v7 = vpop.f32.mrb[220].mxu1  ;;  %7495 = vmatmul.mubr.msk.f32.gmra.mrb[22].mxu1 %vm2732_vm4, %v9452_v30 }
 0xa51   :  { %9457 = vrcp.f32 %v5589_v7  ;;  %v5591_v28 = vpop.f32.mrb[221].mxu1  ;;  %5932 = vmatprep.mubr.f32.mxu1 %v13825_v57 }
 0xa53   :  { %v9454_v60 = vpop.eup %9453 }
 0xa54   :  { %v5594_v14 = vpop.f32.mrb[222].mxu1  ;;  %7496 = vmatmul.mubr.msk.f32.gmra.mrb[24].mxu1 %vm2732_vm4, %v9454_v60 }
 0xa55   :  { %9459 = vrcp.f32 %v5594_v14  ;;  %v5596_v9 = vpop.f32.mrb[223].mxu1  ;;  %5938 = vmatprep.mubr.f32.mxu1 %v13825_v57 }
 0xa57   :  { %v9456_v12 = vpop.eup %9455 }
 0xa58   :  { %v5599_v5 = vpop.f32.mrb[224].mxu1  ;;  %7497 = vmatmul.mubr.msk.f32.gmra.mrb[26].mxu1 %vm2732_vm4, %v9456_v12 }
 0xa59   :  { %9461 = vrcp.f32 %v5599_v5  ;;  %v5601_v20 = vpop.f32.mrb[225].mxu1  ;;  %5944 = vmatprep.mubr.f32.mxu1 %v13825_v57 }
 0xa5b   :  { %v9458_v50 = vpop.eup %9457 }
 0xa5c   :  { %v5604_v30 = vpop.f32.mrb[226].mxu1  ;;  %7498 = vmatmul.mubr.msk.f32.gmra.mrb[28].mxu1 %vm2732_vm4, %v9458_v50 }
 0xa5d   :  { %9463 = vrcp.f32 %v5604_v30  ;;  %v5606_v7 = vpop.f32.mrb[227].mxu1  ;;  %5950 = vmatprep.mubr.f32.mxu1 %v13825_v57 }
 0xa5f   :  { %v9460_v27 = vpop.eup %9459 }
 0xa60   :  { %v5609_v28 = vpop.f32.mrb[228].mxu1  ;;  %7499 = vmatmul.mubr.msk.f32.gmra.mrb[30].mxu1 %vm2732_vm4, %v9460_v27 }
 0xa61   :  { %9465 = vrcp.f32 %v5609_v28  ;;  %v5611_v60 = vpop.f32.mrb[229].mxu1  ;;  %5956 = vmatprep.mubr.f32.mxu1 %v13825_v57 }
 0xa63   :  { %v9462_v14 = vpop.eup %9461 }
 0xa64   :  { %v5614_v9 = vpop.f32.mrb[230].mxu1  ;;  %7500 = vmatmul.mubr.msk.f32.gmra.mrb[32].mxu1 %vm2732_vm4, %v9462_v14 }
 0xa65   :  { %9467 = vrcp.f32 %v5614_v9  ;;  %v5616_v12 = vpop.f32.mrb[231].mxu1  ;;  %5962 = vmatprep.mubr.f32.mxu1 %v13825_v57 }
 0xa67   :  { %v9464_v5 = vpop.eup %9463 }
 0xa68   :  { %v5619_v20 = vpop.f32.mrb[232].mxu1  ;;  %7501 = vmatmul.mubr.msk.f32.gmra.mrb[34].mxu1 %vm2732_vm4, %v9464_v5 }
 0xa69   :  { %9469 = vrcp.f32 %v5619_v20  ;;  %v5621_v50 = vpop.f32.mrb[233].mxu1  ;;  %5968 = vmatprep.mubr.f32.mxu1 %v13825_v57 }
 0xa6b   :  { %v9466_v30 = vpop.eup %9465 }
 0xa6c   :  { %v5624_v7 = vpop.f32.mrb[234].mxu1  ;;  %7502 = vmatmul.mubr.msk.f32.gmra.mrb[36].mxu1 %vm2732_vm4, %v9466_v30 }
 0xa6d   :  { %9471 = vrcp.f32 %v5624_v7  ;;  %v5626_v27 = vpop.f32.mrb[235].mxu1  ;;  %5974 = vmatprep.mubr.f32.mxu1 %v13825_v57 }
 0xa6f   :  { %v9468_v28 = vpop.eup %9467 }
 0xa70   :  { %v5629_v60 = vpop.f32.mrb[236].mxu1  ;;  %7503 = vmatmul.mubr.msk.f32.gmra.mrb[38].mxu1 %vm2732_vm4, %v9468_v28 }
 0xa71   :  { %9473 = vrcp.f32 %v5629_v60  ;;  %v5631_v14 = vpop.f32.mrb[237].mxu1  ;;  %5980 = vmatprep.mubr.f32.mxu1 %v13825_v57 }
 0xa73   :  { %v9470_v9 = vpop.eup %9469 }
 0xa74   :  { %v5634_v12 = vpop.f32.mrb[238].mxu1  ;;  %7504 = vmatmul.mubr.msk.f32.gmra.mrb[40].mxu1 %vm2732_vm4, %v9470_v9 }
 0xa75   :  { %9475 = vrcp.f32 %v5634_v12  ;;  %v5636_v5 = vpop.f32.mrb[239].mxu1  ;;  %5986 = vmatprep.mubr.f32.mxu1 %v13825_v57 }
 0xa77   :  { %v9472_v20 = vpop.eup %9471 }
 0xa78   :  { %v5639_v50 = vpop.f32.mrb[240].mxu1  ;;  %7505 = vmatmul.mubr.msk.f32.gmra.mrb[42].mxu1 %vm2732_vm4, %v9472_v20 }
 0xa79   :  { %9477 = vrcp.f32 %v5639_v50  ;;  %v5641_v30 = vpop.f32.mrb[241].mxu1  ;;  %5992 = vmatprep.mubr.f32.mxu1 %v13825_v57 }
 0xa7b   :  { %v9474_v7 = vpop.eup %9473 }
 0xa7c   :  { %v5644_v27 = vpop.f32.mrb[242].mxu1  ;;  %7506 = vmatmul.mubr.msk.f32.gmra.mrb[44].mxu1 %vm2732_vm4, %v9474_v7 }
 0xa7d   :  { %9479 = vrcp.f32 %v5644_v27  ;;  %v5646_v28 = vpop.f32.mrb[243].mxu1  ;;  %5998 = vmatprep.mubr.f32.mxu1 %v13825_v57 }
 0xa7f   :  { %v9476_v60 = vpop.eup %9475 }
 0xa80   :  { %v5649_v14 = vpop.f32.mrb[244].mxu1  ;;  %7507 = vmatmul.mubr.msk.f32.gmra.mrb[46].mxu1 %vm2732_vm4, %v9476_v60 }
 0xa81   :  { %9481 = vrcp.f32 %v5649_v14  ;;  %v5651_v9 = vpop.f32.mrb[245].mxu1  ;;  %6004 = vmatprep.mubr.f32.mxu1 %v13825_v57 }
 0xa83   :  { %v9478_v12 = vpop.eup %9477 }
 0xa84   :  { %v5654_v5 = vpop.f32.mrb[246].mxu1  ;;  %7508 = vmatmul.mubr.msk.f32.gmra.mrb[48].mxu1 %vm2732_vm4, %v9478_v12 }
 0xa85   :  { %9483 = vrcp.f32 %v5654_v5  ;;  %v5656_v20 = vpop.f32.mrb[247].mxu1  ;;  %6010 = vmatprep.mubr.f32.mxu1 %v13825_v57 }
 0xa87   :  { %v9480_v50 = vpop.eup %9479 }
 0xa88   :  { %v5659_v30 = vpop.f32.mrb[248].mxu1  ;;  %7509 = vmatmul.mubr.msk.f32.gmra.mrb[50].mxu1 %vm2732_vm4, %v9480_v50 }
 0xa89   :  { %9485 = vrcp.f32 %v5659_v30  ;;  %v5661_v7 = vpop.f32.mrb[249].mxu1  ;;  %6016 = vmatprep.mubr.f32.mxu1 %v13825_v57 }
 0xa8b   :  { %v9482_v27 = vpop.eup %9481 }
 0xa8c   :  { %v5664_v28 = vpop.f32.mrb[250].mxu1  ;;  %7510 = vmatmul.mubr.msk.f32.gmra.mrb[52].mxu1 %vm2732_vm4, %v9482_v27 }
 0xa8d   :  { %9487 = vrcp.f32 %v5664_v28  ;;  %v5666_v60 = vpop.f32.mrb[251].mxu1  ;;  %6022 = vmatprep.mubr.f32.mxu1 %v13825_v57 }
 0xa8f   :  { %v9484_v14 = vpop.eup %9483 }
 0xa90   :  { %v5669_v9 = vpop.f32.mrb[252].mxu1  ;;  %7511 = vmatmul.mubr.msk.f32.gmra.mrb[54].mxu1 %vm2732_vm4, %v9484_v14 }
 0xa91   :  { %9489 = vrcp.f32 %v5669_v9  ;;  %v5671_v12 = vpop.f32.mrb[253].mxu1  ;;  %6028 = vmatprep.mubr.f32.mxu1 %v13825_v57 }
 0xa93   :  { %v9486_v5 = vpop.eup %9485 }
 0xa94   :  { %v5674_v20 = vpop.f32.mrb[254].mxu1  ;;  %7512 = vmatmul.mubr.msk.f32.gmra.mrb[56].mxu1 %vm2732_vm4, %v9486_v5 }
 0xa95   :  { %9491 = vrcp.f32 %v5674_v20  ;;  %v5676_v50 = vpop.f32.mrb[255].mxu1  ;;  %6034 = vmatprep.mubr.f32.mxu1 %v13825_v57 }
 0xa97   :  { %v9488_v30 = vpop.eup %9487 }
 0xa98   :  { %v5679_v7 = vpop.f32.mrb[0].mxu1  ;;  %7513 = vmatmul.mubr.msk.f32.gmra.mrb[58].mxu1 %vm2732_vm4, %v9488_v30 }
 0xa99   :  { %9493 = vrcp.f32 %v5679_v7  ;;  %v5681_v27 = vpop.f32.mrb[1].mxu1  ;;  %6040 = vmatprep.mubr.f32.mxu1 %v13825_v57 }
 0xa9b   :  { %v9490_v28 = vpop.eup %9489 }
 0xa9c   :  { %v5684_v60 = vpop.f32.mrb[2].mxu1  ;;  %7514 = vmatmul.mubr.msk.f32.gmra.mrb[60].mxu1 %vm2732_vm4, %v9490_v28 }
 0xa9d   :  { %9495 = vrcp.f32 %v5684_v60  ;;  %v5686_v14 = vpop.f32.mrb[3].mxu1  ;;  %6046 = vmatprep.mubr.f32.mxu1 %v13825_v57 }
 0xa9f   :  { %v9492_v9 = vpop.eup %9491 }
 0xaa0   :  { %v5689_v12 = vpop.f32.mrb[4].mxu1  ;;  %7515 = vmatmul.mubr.msk.f32.gmra.mrb[62].mxu1 %vm2732_vm4, %v9492_v9 }
 0xaa1   :  { %9497 = vrcp.f32 %v5689_v12  ;;  %v5691_v5 = vpop.f32.mrb[5].mxu1  ;;  %6052 = vmatprep.mubr.f32.mxu1 %v13825_v57 }
 0xaa3   :  { %v9494_v20 = vpop.eup %9493 }
 0xaa4   :  { %v5694_v50 = vpop.f32.mrb[6].mxu1  ;;  %7516 = vmatmul.mubr.msk.f32.gmra.mrb[64].mxu1 %vm2732_vm4, %v9494_v20 }
 0xaa5   :  { %9499 = vrcp.f32 %v5694_v50  ;;  %v5696_v30 = vpop.f32.mrb[7].mxu1  ;;  %6058 = vmatprep.mubr.f32.mxu1 %v13825_v57 }
 0xaa7   :  { %v9496_v7 = vpop.eup %9495 }
 0xaa8   :  { %v5699_v27 = vpop.f32.mrb[8].mxu1  ;;  %7517 = vmatmul.mubr.msk.f32.gmra.mrb[66].mxu1 %vm2732_vm4, %v9496_v7 }
 0xaa9   :  { %9501 = vrcp.f32 %v5699_v27  ;;  %v5701_v28 = vpop.f32.mrb[9].mxu1  ;;  %6064 = vmatprep.mubr.f32.mxu1 %v13825_v57 }
 0xaab   :  { %v9498_v60 = vpop.eup %9497 }
 0xaac   :  { %v5704_v14 = vpop.f32.mrb[10].mxu1  ;;  %7518 = vmatmul.mubr.msk.f32.gmra.mrb[68].mxu1 %vm2732_vm4, %v9498_v60 }
 0xaad   :  { %9503 = vrcp.f32 %v5704_v14  ;;  %v5706_v9 = vpop.f32.mrb[11].mxu1  ;;  %6070 = vmatprep.mubr.f32.mxu1 %v13825_v57 }
 0xaaf   :  { %v9500_v12 = vpop.eup %9499 }
 0xab0   :  { %v5709_v5 = vpop.f32.mrb[12].mxu1  ;;  %7519 = vmatmul.mubr.msk.f32.gmra.mrb[70].mxu1 %vm2732_vm4, %v9500_v12 }
 0xab1   :  { %9505 = vrcp.f32 %v5709_v5  ;;  %v5711_v20 = vpop.f32.mrb[13].mxu1  ;;  %6076 = vmatprep.mubr.f32.mxu1 %v13825_v57 }
 0xab3   :  { %v9502_v50 = vpop.eup %9501 }
 0xab4   :  { %v5714_v30 = vpop.f32.mrb[14].mxu1  ;;  %7520 = vmatmul.mubr.msk.f32.gmra.mrb[72].mxu1 %vm2732_vm4, %v9502_v50 }
 0xab5   :  { %9507 = vrcp.f32 %v5714_v30  ;;  %v5716_v7 = vpop.f32.mrb[15].mxu1  ;;  %6082 = vmatprep.mubr.f32.mxu1 %v13825_v57 }
 0xab7   :  { %v9504_v27 = vpop.eup %9503 }
 0xab8   :  { %v5719_v28 = vpop.f32.mrb[16].mxu1  ;;  %7521 = vmatmul.mubr.msk.f32.gmra.mrb[74].mxu1 %vm2732_vm4, %v9504_v27  ;;  %v6442_v27 = vld [vmem:[%s13456_s9] sm:$0xff] }
 0xab9   :  { %9509 = vrcp.f32 %v5719_v28  ;;  %v5721_v60 = vpop.f32.mrb[17].mxu1  ;;  %6088 = vmatprep.mubr.f32.mxu1 %v13825_v57  ;;  %v6443_v28 = vld [vmem:[%s13456_s9 + $0x8] sm:$0xff] }
 0xabb   :  { %v9506_v14 = vpop.eup %9505 }
 0xabc   :  { %v5724_v9 = vpop.f32.mrb[18].mxu1  ;;  %7522 = vmatmul.mubr.msk.f32.gmra.mrb[76].mxu1 %vm2732_vm4, %v9506_v14  ;;  %v9059_v14 = vpack.c.bf16 %v6443_v28, %v6442_v27 }
 0xabd   :  { %9511 = vrcp.f32 %v5724_v9  ;;  %v5726_v12 = vpop.f32.mrb[19].mxu1  ;;  %6094 = vmatprep.mubr.f32.mxu1 %v13825_v57 }
 0xabe   :  { %9060 = vmatpush3.bf16.msra.mxu1 %v9059_v14 }
 0xabf   :  { %v9508_v5 = vpop.eup %9507  ;;  %9061 = vmatprep.subr.bf16.mxu1 %v13756_v43 }
 0xac0   :  { %7523 = vmatmul.mubr.msk.f32.gmra.mrb[78].mxu1 %vm2732_vm4, %v9508_v5 }
 0xac1   :  { %6100 = vmatprep.mubr.f32.mxu1 %v13825_v57 }
 0xac3   :  { %v9510_v20 = vpop.eup %9509 }
 0xac4   :  { %7524 = vmatmul.mubr.msk.f32.gmra.mrb[80].mxu1 %vm2732_vm4, %v9510_v20 }
 0xac5   :  { %6106 = vmatprep.mubr.f32.mxu1 %v13825_v57 }
 0xac7   :  { %v9512_v50 = vpop.eup %9511 }
 0xac8   :  { %7525 = vmatmul.mubr.msk.f32.gmra.mrb[82].mxu1 %vm2732_vm4, %v9512_v50 }
 0xb1f   :  { %v5922_v30 = vpop.f32.mrb[20].mxu1 }
 0xb20   :  { %v5924_v7 = vpop.f32.mrb[21].mxu1  ;;  %v6113_v9 = vmul.f32 %v12897_v4, %v5922_v30 }
 0xb21   :  { %v6114_v60 = vmul.f32 %v12899_v6, %v5924_v7 }
 0xb23   :  { %v5928_v12 = vpop.f32.mrb[22].mxu1  ;;  %6241 = vmatprep.mubr.f32.mxu0 %v6114_v60 }
 0xb24   :  { %v5930_v5 = vpop.f32.mrb[23].mxu1  ;;  %6242 = vmatmul.mubr.f32.vlgmr.msra.gmra.mrb[52].mxu0 %v6113_v9  ;;  %v6115_v50 = vmul.f32 %v12905_v47, %v5928_v12 }
 0xb25   :  { %v6116_v20 = vmul.f32 %v12911_v39, %v5930_v5 }
 0xb27   :  { %v5934_v57 = vpop.f32.mrb[24].mxu1  ;;  %6246 = vmatprep.mubr.f32.mxu0 %v6116_v20 }
 0xb28   :  { %v5936_v59 = vpop.f32.mrb[25].mxu1  ;;  %6247 = vmatmul.mubr.f32.gmra.mrb[54].mxu0 %v6115_v50  ;;  %v6117_v7 = vmul.f32 %v12918_v51, %v5934_v57 }
 0xb29   :  { %v6118_v6 = vmul.f32 %v12920_v10, %v5936_v59 }
 0xb2b   :  { %v5940_v4 = vpop.f32.mrb[26].mxu1  ;;  %6251 = vmatprep.mubr.f32.mxu0 %v6118_v6 }
 0xb2c   :  { %v5942_v30 = vpop.f32.mrb[27].mxu1  ;;  %6252 = vmatmul.mubr.f32.gmra.mrb[56].mxu0 %v6117_v7  ;;  %v6119_v28 = vmul.f32 %v12926_v44, %v5940_v4 }
 0xb2d   :  { %v6120_v27 = vmul.f32 %v12928_v45, %v5942_v30 }
 0xb2f   :  { %v5946_v60 = vpop.f32.mrb[28].mxu1  ;;  %6256 = vmatprep.mubr.f32.mxu0 %v6120_v27 }
 0xb30   :  { %v5948_v39 = vpop.f32.mrb[29].mxu1  ;;  %6257 = vmatmul.mubr.f32.gmra.mrb[58].mxu0 %v6119_v28  ;;  %v6121_v14 = vmul.f32 %v12934_v26, %v5946_v60 }
 0xb31   :  { %v6122_v47 = vmul.f32 %v12936_v34, %v5948_v39 }
 0xb33   :  { %v5952_v9 = vpop.f32.mrb[30].mxu1  ;;  %6261 = vmatprep.mubr.f32.mxu0 %v6122_v47 }
 0xb34   :  { %v5954_v10 = vpop.f32.mrb[31].mxu1  ;;  %6262 = vmatmul.mubr.f32.gmra.mrb[60].mxu0 %v6121_v14  ;;  %v6123_v59 = vmul.f32 %v12942_v42, %v5952_v9 }
 0xb35   :  { %v6124_v51 = vmul.f32 %v12944_v3, %v5954_v10 }
 0xb37   :  { %v5958_v57 = vpop.f32.mrb[32].mxu1  ;;  %6266 = vmatprep.mubr.f32.mxu0 %v6124_v51 }
 0xb38   :  { %v5960_v45 = vpop.f32.mrb[33].mxu1  ;;  %6267 = vmatmul.mubr.f32.gmra.mrb[62].mxu0 %v6123_v59  ;;  %v6125_v12 = vmul.f32 %v12950_v46, %v5958_v57 }
 0xb39   :  { %v6126_v44 = vmul.f32 %v12952_v22, %v5960_v45 }
 0xb3b   :  { %v5964_v5 = vpop.f32.mrb[34].mxu1  ;;  %6271 = vmatprep.mubr.f32.mxu0 %v6126_v44 }
 0xb3c   :  { %v5966_v34 = vpop.f32.mrb[35].mxu1  ;;  %6272 = vmatmul.mubr.f32.gmra.mrb[64].mxu0 %v6125_v12  ;;  %v6127_v20 = vmul.f32 %v12958_v23, %v5964_v5 }
 0xb3d   :  { %v6128_v26 = vmul.f32 %v12960_v16, %v5966_v34 }
 0xb3f   :  { %v5970_v50 = vpop.f32.mrb[36].mxu1  ;;  %6276 = vmatprep.mubr.f32.mxu0 %v6128_v26 }
 0xb40   :  { %v5972_v3 = vpop.f32.mrb[37].mxu1  ;;  %6277 = vmatmul.mubr.f32.gmra.mrb[66].mxu0 %v6127_v20  ;;  %v6129_v6 = vmul.f32 %v12966_v11, %v5970_v50 }
 0xb41   :  { %v6130_v42 = vmul.f32 %v12968_v38, %v5972_v3 }
 0xb43   :  { %v5976_v7 = vpop.f32.mrb[38].mxu1  ;;  %6281 = vmatprep.mubr.f32.mxu0 %v6130_v42 }
 0xb44   :  { %v5978_v22 = vpop.f32.mrb[39].mxu1  ;;  %6282 = vmatmul.mubr.f32.gmra.mrb[68].mxu0 %v6129_v6  ;;  %v6131_v4 = vmul.f32 %v12974_v58, %v5976_v7 }
 0xb45   :  { %v6132_v46 = vmul.f32 %v12976_v31, %v5978_v22 }
 0xb47   :  { %v5982_v30 = vpop.f32.mrb[40].mxu1  ;;  %6286 = vmatprep.mubr.f32.mxu0 %v6132_v46  ;;  %v13826_v46 = vld [vmem:[#allocation28_spill] sm:$0xff] }
 0xb48   :  { %v5984_v16 = vpop.f32.mrb[41].mxu1  ;;  %6287 = vmatmul.mubr.f32.gmra.mrb[70].mxu0 %v6131_v4  ;;  %v6133_v27 = vmul.f32 %v12982_v36, %v5982_v30 }
 0xb49   :  { %v6134_v23 = vmul.f32 %v12984_v13, %v5984_v16 }
 0xb4b   :  { %v5988_v28 = vpop.f32.mrb[42].mxu1  ;;  %6291 = vmatprep.mubr.f32.mxu0 %v6134_v23  ;;  %v13828_v23 = vld [vmem:[#allocation20_spill] sm:$0xff] }
 0xb4c   :  { %v5990_v38 = vpop.f32.mrb[43].mxu1  ;;  %6292 = vmatmul.mubr.f32.gmra.mrb[72].mxu0 %v6133_v27  ;;  %v6135_v60 = vmul.f32 %v12990_v37, %v5988_v28 }
 0xb4d   :  { %v6136_v11 = vmul.f32 %v12992_v40, %v5990_v38  ;;  %v13829_v38 = vld [vmem:[#allocation23_spill] sm:$0xff] }
 0xb4f   :  { %v5994_v39 = vpop.f32.mrb[44].mxu1  ;;  %6296 = vmatprep.mubr.f32.mxu0 %v6136_v11 }
 0xb50   :  { %v5996_v31 = vpop.f32.mrb[45].mxu1  ;;  %6297 = vmatmul.mubr.f32.gmra.mrb[74].mxu0 %v6135_v60  ;;  %v6137_v47 = vmul.f32 %v12998_v21, %v5994_v39 }
 0xb51   :  { %v6138_v58 = vmul.f32 %v13000_v54, %v5996_v31  ;;  %v13830_v31 = vld [vmem:[#allocation24_spill] sm:$0xff] }
 0xb53   :  { %v6000_v14 = vpop.f32.mrb[46].mxu1  ;;  %6301 = vmatprep.mubr.f32.mxu0 %v6138_v58 }
 0xb54   :  { %v6002_v13 = vpop.f32.mrb[47].mxu1  ;;  %6302 = vmatmul.mubr.f32.gmra.mrb[76].mxu0 %v6137_v47  ;;  %v6139_v9 = vmul.f32 %v13006_v35, %v6000_v14 }
 0xb55   :  { %v6140_v36 = vmul.f32 %v13008_v33, %v6002_v13  ;;  %v13831_v13 = vld [vmem:[#allocation27_spill] sm:$0xff] }
 0xb57   :  { %v6006_v10 = vpop.f32.mrb[48].mxu1  ;;  %6306 = vmatprep.mubr.f32.mxu0 %v6140_v36 }
 0xb58   :  { %v6008_v40 = vpop.f32.mrb[49].mxu1  ;;  %6307 = vmatmul.mubr.f32.gmra.mrb[78].mxu0 %v6139_v9  ;;  %v6141_v51 = vmul.f32 %v13014_v41, %v6006_v10 }
 0xb59   :  { %v6142_v37 = vmul.f32 %v13016_v52, %v6008_v40 }
 0xb5b   :  { %v6012_v59 = vpop.f32.mrb[50].mxu1  ;;  %6311 = vmatprep.mubr.f32.mxu0 %v6142_v37 }
 0xb5c   :  { %v6014_v54 = vpop.f32.mrb[51].mxu1  ;;  %6312 = vmatmul.mubr.f32.gmra.mrb[80].mxu0 %v6141_v51  ;;  %v6143_v57 = vmul.f32 %v13022_v63, %v6012_v59  ;;  %v13832_v59 = vld [vmem:[#allocation30_spill] sm:$0xff] }
 0xb5d   :  { %v6144_v21 = vmul.f32 %v13024_v55, %v6014_v54 }
 0xb5f   :  { %v6018_v45 = vpop.f32.mrb[52].mxu1  ;;  %6316 = vmatprep.mubr.f32.mxu0 %v6144_v21  ;;  %v13833_v21 = vld [vmem:[#allocation42_spill] sm:$0xff] }
 0xb60   :  { %v6020_v33 = vpop.f32.mrb[53].mxu1  ;;  %6317 = vmatmul.mubr.f32.gmra.mrb[82].mxu0 %v6143_v57  ;;  %v6145_v44 = vmul.f32 %v13030_v18, %v6018_v45 }
 0xb61   :  { %v6146_v35 = vmul.f32 %v13032_v25, %v6020_v33 }
 0xb63   :  { %v6024_v12 = vpop.f32.mrb[54].mxu1  ;;  %6321 = vmatprep.mubr.f32.mxu0 %v6146_v35 }
 0xb64   :  { %v6026_v52 = vpop.f32.mrb[55].mxu1  ;;  %6322 = vmatmul.mubr.f32.gmra.mrb[84].mxu0 %v6145_v44  ;;  %v6147_v5 = vmul.f32 %v13038_v15, %v6024_v12  ;;  %v13835_v44 = vld [vmem:[#allocation41_spill] sm:$0xff] }
 0xb65   :  { %v6148_v41 = vmul.f32 %v13040_v24, %v6026_v52 }
 0xb67   :  { %v6030_v34 = vpop.f32.mrb[56].mxu1  ;;  %6326 = vmatprep.mubr.f32.mxu0 %v6148_v41 }
 0xb68   :  { %v6032_v55 = vpop.f32.mrb[57].mxu1  ;;  %6327 = vmatmul.mubr.f32.gmra.mrb[86].mxu0 %v6147_v5  ;;  %v6149_v26 = vmul.f32 %v13046_v32, %v6030_v34  ;;  %v13837_v5 = vld [vmem:[#allocation36_spill] sm:$0xff] }
 0xb69   :  { %v6150_v63 = vmul.f32 %v13048_v29, %v6032_v55 }
 0xb6b   :  { %v6036_v20 = vpop.f32.mrb[58].mxu1  ;;  %6331 = vmatprep.mubr.f32.mxu0 %v6150_v63 }
 0xb6c   :  { %v6038_v25 = vpop.f32.mrb[59].mxu1  ;;  %6332 = vmatmul.mubr.f32.gmra.mrb[88].mxu0 %v6149_v26  ;;  %v6151_v50 = vmul.f32 %v13054_v49, %v6036_v20  ;;  %v6444_v26 = vld [vmem:[%s13456_s9 + $0x10] sm:$0xff]  ;;  %v6445_v20 = vld [vmem:[%s13456_s9 + $0x18] sm:$0xff] }
 0xb6d   :  { %v6152_v18 = vmul.f32 %v13056_v8, %v6038_v25  ;;  %v13838_v25 = vld [vmem:[#allocation33_spill] sm:$0xff] }
 0xb6f   :  { %v6042_v3 = vpop.f32.mrb[60].mxu1  ;;  %6336 = vmatprep.mubr.f32.mxu0 %v6152_v18 }
 0xb70   :  { %v6044_v24 = vpop.f32.mrb[61].mxu1  ;;  %6337 = vmatmul.mubr.f32.gmra.mrb[90].mxu0 %v6151_v50  ;;  %v6153_v42 = vmul.f32 %v13062_v62, %v6042_v3  ;;  %v13827_v62 = vld [vmem:[#allocation29_spill] sm:$0xff]  ;;  %v9062_v50 = vpack.c.bf16 %v6445_v20, %v6444_v26  ;;  %v13839_v3 = vld [vmem:[#allocation34_spill] sm:$0xff] }
 0xb71   :  { %v6154_v15 = vmul.f32 %v13064_v56, %v6044_v24 }
 0xb72   :  { %9063 = vmatpush3.bf16.msra.mxu1 %v9062_v50 }
 0xb73   :  { %v6048_v6 = vpop.f32.mrb[62].mxu1  ;;  %6341 = vmatprep.mubr.f32.mxu0 %v6154_v15  ;;  %9064 = vmatprep.subr.bf16.mxu1 %v13756_v43  ;;  %v13840_v15 = vmov 0.0  }
 0xb74   :  { %v6050_v29 = vpop.f32.mrb[63].mxu1  ;;  %6342 = vmatmul.mubr.f32.gmra.mrb[92].mxu0 %v6153_v42  ;;  %v6155_v7 = vmul.f32 %v13070_v1, %v6048_v6  ;;  %8594 = vmatprep.mubr.msk.f32.mxu1 %vm9670_vm5, %v13840_v15 }
 0xb75   :  { %v6156_v32 = vmul.f32 %v13072_v17, %v6050_v29 }
 0xb77   :  { %v6054_v22 = vpop.f32.mrb[64].mxu1  ;;  %6346 = vmatprep.mubr.f32.mxu0 %v6156_v32 }
 0xb78   :  { %v6056_v8 = vpop.f32.mrb[65].mxu1  ;;  %6347 = vmatmul.mubr.f32.gmra.mrb[94].mxu0 %v6155_v7  ;;  %v6157_v4 = vmul.f32 %v13826_v46, %v6054_v22 }
 0xb79   :  { %v6158_v49 = vmul.f32 %v13080_v2, %v6056_v8 }
 0xb7b   :  { %v6060_v30 = vpop.f32.mrb[66].mxu1  ;;  %6351 = vmatprep.mubr.f32.mxu0 %v6158_v49 }
 0xb7c   :  { %v6062_v56 = vpop.f32.mrb[67].mxu1  ;;  %6352 = vmatmul.mubr.f32.gmra.mrb[96].mxu0 %v6157_v4  ;;  %v6159_v27 = vmul.f32 %v13828_v23, %v6060_v30 }
 0xb7d   :  { %v6160_v16 = vmul.f32 %v13827_v62, %v6062_v56 }
 0xb7f   :  { %v6066_v28 = vpop.f32.mrb[68].mxu1  ;;  %6356 = vmatprep.mubr.f32.mxu0 %v6160_v16 }
 0xb80   :  { %v6068_v17 = vpop.f32.mrb[69].mxu1  ;;  %6357 = vmatmul.mubr.f32.gmra.mrb[98].mxu0 %v6159_v27  ;;  %v6161_v11 = vmul.f32 %v13829_v38, %v6066_v28 }
 0xb81   :  { %v6162_v1 = vmul.f32 %v13096_v61, %v6068_v17 }
 0xb83   :  { %v6072_v60 = vpop.f32.mrb[70].mxu1  ;;  %6361 = vmatprep.mubr.f32.mxu0 %v6162_v1 }
 0xb84   :  { %v6074_v2 = vpop.f32.mrb[71].mxu1  ;;  %6362 = vmatmul.mubr.f32.gmra.mrb[100].mxu0 %v6161_v11  ;;  %v6163_v58 = vmul.f32 %v13830_v31, %v6072_v60 }
 0xb85   :  { %v6164_v39 = vmul.f32 %v13104_v48, %v6074_v2 }
 0xb87   :  { %v6078_v47 = vpop.f32.mrb[72].mxu1  ;;  %6366 = vmatprep.mubr.f32.mxu0 %v6164_v39 }
 0xb88   :  { %v6080_v14 = vpop.f32.mrb[73].mxu1  ;;  %6367 = vmatmul.mubr.f32.gmra.mrb[102].mxu0 %v6163_v58  ;;  %v6165_v9 = vmul.f32 %v13110_v53, %v6078_v47  ;;  %v13834_v53 = vld [vmem:[#allocation38_spill] sm:$0xff] }
 0xb89   :  { %v6166_v36 = vmul.f32 %v13831_v13, %v6080_v14 }
 0xb8b   :  { %v6084_v10 = vpop.f32.mrb[74].mxu1  ;;  %6371 = vmatprep.mubr.f32.mxu0 %v6166_v36 }
 0xb8c   :  { %v6086_v61 = vpop.f32.mrb[75].mxu1  ;;  %6372 = vmatmul.mubr.f32.gmra.mrb[104].mxu0 %v6165_v9  ;;  %v6167_v37 = vmul.f32 %v13118_v19, %v6084_v10  ;;  %v13836_v19 = vld [vmem:[#allocation32_spill] sm:$0xff] }
 0xb8d   :  { %v6168_v40 = vmul.f32 %v13120_v0, %v6086_v61 }
 0xb8f   :  { %v6090_v51 = vpop.f32.mrb[76].mxu1  ;;  %6376 = vmatprep.mubr.f32.mxu0 %v6168_v40 }
 0xb90   :  { %v6092_v48 = vpop.f32.mrb[77].mxu1  ;;  %6377 = vmatmul.mubr.f32.gmra.mrb[106].mxu0 %v6167_v37  ;;  %v6169_v57 = vmul.f32 %v13833_v21, %v6090_v51 }
 0xb91   :  { %v6170_v54 = vmul.f32 %v13832_v59, %v6092_v48 }
 0xb93   :  { %v6096_v45 = vpop.f32.mrb[78].mxu1  ;;  %6381 = vmatprep.mubr.f32.mxu0 %v6170_v54 }
 0xb94   :  { %v6098_v33 = vpop.f32.mrb[79].mxu1  ;;  %6382 = vmatmul.mubr.f32.gmra.mrb[108].mxu0 %v6169_v57  ;;  %v6171_v12 = vmul.f32 %v13835_v44, %v6096_v45 }
 0xb95   :  { %v6172_v35 = vmul.f32 %v13834_v53, %v6098_v33 }
 0xb97   :  { %v6102_v52 = vpop.f32.mrb[80].mxu1  ;;  %6386 = vmatprep.mubr.f32.mxu0 %v6172_v35 }
 0xb98   :  { %v6104_v0 = vpop.f32.mrb[81].mxu1  ;;  %6387 = vmatmul.mubr.f32.gmra.mrb[110].mxu0 %v6171_v12  ;;  %v6173_v34 = vmul.f32 %v13837_v5, %v6102_v52 }
 0xb99   :  { %v6174_v41 = vmul.f32 %v13836_v19, %v6104_v0 }
 0xb9b   :  { %v6108_v55 = vpop.f32.mrb[82].mxu1  ;;  %6391 = vmatprep.mubr.f32.mxu0 %v6174_v41 }
 0xb9c   :  { %v6110_v63 = vpop.f32.mrb[83].mxu1  ;;  %6392 = vmatmul.mubr.f32.gmra.mrb[112].mxu0 %v6173_v34  ;;  %v6175_v24 = vmul.f32 %v13839_v3, %v6108_v55 }
 0xb9d   :  { %v6176_v18 = vmul.f32 %v13838_v25, %v6110_v63 }
 0xb9f   :  { %6396 = vmatprep.mubr.f32.mxu0 %v6176_v18 }
 0xba0   :  { %6397 = vmatmul.mubr.f32.gmra.mrb[114].mxu0 %v6175_v24 }
 0xbf7   :  { %v6243_v42 = vpop.f32.mrb[52].mxu0 }
 0xbf8   :  { %v6245_v6 = vpop.f32.mrb[53].mxu0 }
 0xbfb   :  { %v6248_v29 = vpop.f32.mrb[54].mxu0 }
 0xbfc   :  { %v6250_v32 = vpop.f32.mrb[55].mxu0 }
 0xbfd   :  { %v7529_v32 = vld [vmem:[%s13456_s9 + $0x28] sm:$0xff] }
 0xbff   :  { %v6253_v7 = vpop.f32.mrb[56].mxu0 }
 0xc00   :  { %v6255_v22 = vpop.f32.mrb[57].mxu0 }
 0xc03   :  { %v6258_v8 = vpop.f32.mrb[58].mxu0 }
 0xc04   :  { %v6260_v49 = vpop.f32.mrb[59].mxu0 }
 0xc07   :  { %v6263_v46 = vpop.f32.mrb[60].mxu0 }
 0xc08   :  { %v6265_v4 = vpop.f32.mrb[61].mxu0 }
 0xc0b   :  { %v6268_v30 = vpop.f32.mrb[62].mxu0 }
 0xc0c   :  { %v6270_v56 = vpop.f32.mrb[63].mxu0 }
 0xc0d   :  { %v7531_v56 = vld [vmem:[%s13456_s9 + $0x38] sm:$0xff] }
 0xc0f   :  { %v6273_v62 = vpop.f32.mrb[64].mxu0 }
 0xc10   :  { %v6275_v16 = vpop.f32.mrb[65].mxu0 }
 0xc13   :  { %v6278_v23 = vpop.f32.mrb[66].mxu0 }
 0xc14   :  { %v6280_v27 = vpop.f32.mrb[67].mxu0 }
 0xc17   :  { %v6283_v28 = vpop.f32.mrb[68].mxu0 }
 0xc18   :  { %v6402_v17 = vadd.f32 %v6283_v28, %v6243_v42  ;;  %v6285_v1 = vpop.f32.mrb[69].mxu0  ;;  %v7533_v28 = vld [vmem:[%s13456_s9 + $0x40] sm:$0xff] }
 0xc1b   :  { %v6288_v38 = vpop.f32.mrb[70].mxu0 }
 0xc1c   :  { %v6403_v11 = vadd.f32 %v6288_v38, %v6248_v29  ;;  %v6290_v60 = vpop.f32.mrb[71].mxu0  ;;  %v7528_v29 = vld [vmem:[%s13456_s9 + $0x20] sm:$0xff] }
 0xc1d   :  { %v9065_v49 = vpack.c.bf16 %v7529_v32, %v7528_v29 }
 0xc1f   :  { %v6293_v2 = vpop.f32.mrb[72].mxu0 }
 0xc20   :  { %v6404_v39 = vadd.f32 %v6293_v2, %v6253_v7  ;;  %v6295_v31 = vpop.f32.mrb[73].mxu0 }
 0xc21   :  { %v7536_v31 = vld [vmem:[%s13456_s9 + $0x58] sm:$0xff] }
 0xc23   :  { %v6298_v58 = vpop.f32.mrb[74].mxu0 }
 0xc24   :  { %v6405_v47 = vadd.f32 %v6298_v58, %v6258_v8  ;;  %v6300_v14 = vpop.f32.mrb[75].mxu0 }
 0xc27   :  { %v6303_v13 = vpop.f32.mrb[76].mxu0 }
 0xc28   :  { %v6406_v36 = vadd.f32 %v6303_v13, %v6263_v46  ;;  %v6305_v9 = vpop.f32.mrb[77].mxu0  ;;  %v13307_v46 = vld [vmem:[%s13455_s8] ss:$0 sm:$0xff] }
 0xc29   :  { %v7539_v9 = vld [vmem:[%s13456_s9 + $0x68] sm:$0xff] }
 0xc2b   :  { %v6308_v10 = vpop.f32.mrb[78].mxu0 }
 0xc2c   :  { %v6407_v61 = vadd.f32 %v6308_v10, %v6268_v30  ;;  %v6310_v40 = vpop.f32.mrb[79].mxu0  ;;  %v7530_v30 = vld [vmem:[%s13456_s9 + $0x30] sm:$0xff] }
 0xc2d   :  { %v9068_v27 = vpack.c.bf16 %v7531_v56, %v7530_v30 }
 0xc2f   :  { %v6313_v37 = vpop.f32.mrb[80].mxu0 }
 0xc30   :  { %v6408_v51 = vadd.f32 %v6313_v37, %v6273_v62  ;;  %v6315_v48 = vpop.f32.mrb[81].mxu0 }
 0xc31   :  { %v7540_v48 = vld [vmem:[%s13456_s9 + $0x70] sm:$0xff] }
 0xc33   :  { %v6318_v59 = vpop.f32.mrb[82].mxu0 }
 0xc34   :  { %v6409_v54 = vadd.f32 %v6318_v59, %v6278_v23  ;;  %v6320_v21 = vpop.f32.mrb[83].mxu0  ;;  %v7541_v59 = vld [vmem:[%s13456_s9 + $0x78] sm:$0xff] }
 0xc37   :  { %v6323_v57 = vpop.f32.mrb[84].mxu0 }
 0xc38   :  { %v6410_v45 = vadd.f32 %v6402_v17, %v6323_v57  ;;  %v6325_v33 = vpop.f32.mrb[85].mxu0  ;;  %v7534_v17 = vld [vmem:[%s13456_s9 + $0x48] sm:$0xff] }
 0xc39   :  { %v9071_v60 = vpack.c.bf16 %v7534_v17, %v7533_v28  ;;  %v7543_v33 = vld [vmem:[%s13456_s9 + $0x80] sm:$0xff] }
 0xc3a   :  { %v7526_v28 = vld [vmem:[%s13457_s10] ss:$0 sm:$0xff] }
 0xc3b   :  { %v6328_v53 = vpop.f32.mrb[86].mxu0 }
 0xc3c   :  { %v6411_v35 = vadd.f32 %v6403_v11, %v6328_v53  ;;  %v6330_v44 = vpop.f32.mrb[87].mxu0  ;;  %v7544_v53 = vld [vmem:[%s13456_s9 + $0x88] sm:$0xff] }
 0xc3f   :  { %v6333_v12 = vpop.f32.mrb[88].mxu0 }
 0xc40   :  { %v6412_v52 = vadd.f32 %v6404_v39, %v6333_v12  ;;  %v6335_v0 = vpop.f32.mrb[89].mxu0  ;;  %v7535_v39 = vld [vmem:[%s13456_s9 + $0x50] sm:$0xff] }
 0xc41   :  { %v9074_v13 = vpack.c.bf16 %v7536_v31, %v7535_v39 }
 0xc43   :  { %v6338_v19 = vpop.f32.mrb[90].mxu0 }
 0xc44   :  { %v6413_v41 = vadd.f32 %v6405_v47, %v6338_v19  ;;  %v6340_v5 = vpop.f32.mrb[91].mxu0  ;;  %v7545_v19 = vld [vmem:[%s13456_s9 + $0x90] sm:$0xff] }
 0xc47   :  { %v6343_v34 = vpop.f32.mrb[92].mxu0 }
 0xc48   :  { %v6414_v55 = vadd.f32 %v6406_v36, %v6343_v34  ;;  %v6345_v63 = vpop.f32.mrb[93].mxu0  ;;  %v7538_v36 = vld [vmem:[%s13456_s9 + $0x60] sm:$0xff] }
 0xc49   :  { %v9077_v37 = vpack.c.bf16 %v7539_v9, %v7538_v36 }
 0xc4b   :  { %v6348_v26 = vpop.f32.mrb[94].mxu0 }
 0xc4c   :  { %v6415_v20 = vadd.f32 %v6407_v61, %v6348_v26  ;;  %v6350_v25 = vpop.f32.mrb[95].mxu0  ;;  %v7548_v26 = vld [vmem:[%s13456_s9 + $0xa0] sm:$0xff] }
 0xc4f   :  { %v6353_v18 = vpop.f32.mrb[96].mxu0 }
 0xc50   :  { %v13294_v50 = vadd.f32 %v6408_v51, %v6353_v18  ;;  %v6355_v3 = vpop.f32.mrb[97].mxu0 }
 0xc51   :  { %v7551_v3 = vld [vmem:[%s13456_s9 + $0xb8] sm:$0xff] }
 0xc53   :  { %v6358_v24 = vpop.f32.mrb[98].mxu0 }
 0xc54   :  { %v13296_v42 = vadd.f32 %v6409_v54, %v6358_v24  ;;  %v6360_v6 = vpop.f32.mrb[99].mxu0 }
 0xc55   :  { %v7554_v6 = vld [vmem:[%s13456_s9 + $0xc8] sm:$0xff] }
 0xc57   :  { %v6363_v7 = vpop.f32.mrb[100].mxu0 }
 0xc58   :  { %v6418_v22 = vadd.f32 %v6410_v45, %v6363_v7  ;;  %v6365_v8 = vpop.f32.mrb[101].mxu0  ;;  %v9080_v45 = vpack.c.bf16 %v7541_v59, %v7540_v48  ;;  %v7555_v7 = vld [vmem:[%s13456_s9 + $0xd0] sm:$0xff] }
 0xc5a   :  { %v6426_v4 = vadd.f32 %v13307_v46, %v6418_v22  ;;  %v7556_v22 = vld [vmem:[%s13456_s9 + $0xd8] sm:$0xff] }
 0xc5b   :  { %v6368_v62 = vpop.f32.mrb[102].mxu0  ;;  %v9098_v8 = vpack.c.bf16 %v7556_v22, %v7555_v7 }
 0xc5c   :  { %v6419_v16 = vadd.f32 %v6411_v35, %v6368_v62  ;;  %v6370_v23 = vpop.f32.mrb[103].mxu0  ;;  %8595 = vmatmul.mubr.msk.f32.vlgmr.msra.gmra.mrb[84].mxu1 %vm325_vm1, %v6426_v4  ;;  %v7559_v4 = vld [vmem:[%s13456_s9 + $0xe8] sm:$0xff]  ;;  %v7560_v62 = vld [vmem:[%s13456_s9 + $0xf0] sm:$0xff] }
 0xc5d   :  { %9066 = vmatpush3.bf16.msra.mxu1 %v9065_v49  ;;  %8605 = vmatprep.mubr.msk.f32.mxu1 %vm9670_vm5, %v13840_v15  ;;  %v7558_v49 = vld [vmem:[%s13456_s9 + $0xe0] sm:$0xff] }
 0xc5e   :  { %9067 = vmatprep.subr.bf16.mxu1 %v13756_v43  ;;  %v6427_v2 = vadd.f32 %v13307_v46, %v6419_v16  ;;  %v9101_v30 = vpack.c.bf16 %v7559_v4, %v7558_v49  ;;  %v7561_v16 = vld [vmem:[%s13456_s9 + $0xf8] sm:$0xff] }
 0xc5f   :  { %v6373_v1 = vpop.f32.mrb[104].mxu0  ;;  %v9104_v23 = vpack.c.bf16 %v7561_v16, %v7560_v62 }
 0xc60   :  { %v6420_v38 = vadd.f32 %v6412_v52, %v6373_v1  ;;  %v6375_v11 = vpop.f32.mrb[105].mxu0  ;;  %v9083_v52 = vpack.c.bf16 %v7544_v53, %v7543_v33 }
 0xc61   :  { %9069 = vmatpush3.bf16.msra.mxu1 %v9068_v27 }
 0xc62   :  { %9070 = vmatprep.subr.bf16.mxu1 %v13756_v43  ;;  %v6428_v51 = vadd.f32 %v13307_v46, %v6420_v38 }
 0xc63   :  { %v6378_v58 = vpop.f32.mrb[106].mxu0 }
 0xc64   :  { %v6421_v47 = vadd.f32 %v6413_v41, %v6378_v58  ;;  %v6380_v14 = vpop.f32.mrb[107].mxu0  ;;  %8606 = vmatmul.mubr.msk.f32.vlgmr.msra.gmra.mrb[84].mxu1 %vm325_vm1, %v6427_v2  ;;  %v7546_v41 = vld [vmem:[%s13456_s9 + $0x98] sm:$0xff] }
 0xc65   :  { %9072 = vmatpush3.bf16.msra.mxu1 %v9071_v60  ;;  %8616 = vmatprep.mubr.msk.f32.mxu1 %vm9670_vm5, %v13840_v15  ;;  %v9086_v63 = vpack.c.bf16 %v7546_v41, %v7545_v19 }
 0xc66   :  { %9073 = vmatprep.subr.bf16.mxu1 %v13756_v43  ;;  %v6429_v0 = vadd.f32 %v13307_v46, %v6421_v47 }
 0xc67   :  { %v6383_v10 = vpop.f32.mrb[108].mxu0 }
 0xc68   :  { %v6422_v61 = vadd.f32 %v6414_v55, %v6383_v10  ;;  %v6385_v40 = vpop.f32.mrb[109].mxu0 }
 0xc69   :  { %9075 = vmatpush3.bf16.msra.mxu1 %v9074_v13 }
 0xc6a   :  { %9076 = vmatprep.subr.bf16.mxu1 %v13756_v43  ;;  %v6430_v18 = vadd.f32 %v13307_v46, %v6422_v61 }
 0xc6b   :  { %v6388_v54 = vpop.f32.mrb[110].mxu0 }
 0xc6c   :  { %v6423_v21 = vadd.f32 %v6415_v20, %v6388_v54  ;;  %v6390_v57 = vpop.f32.mrb[111].mxu0  ;;  %8617 = vmatmul.mubr.msk.f32.vlgmr.msra.gmra.mrb[84].mxu1 %vm325_vm1, %v6428_v51  ;;  %v7549_v20 = vld [vmem:[%s13456_s9 + $0xa8] sm:$0xff] }
 0xc6d   :  { %9078 = vmatpush3.bf16.msra.mxu1 %v9077_v37  ;;  %8627 = vmatprep.mubr.msk.f32.mxu1 %vm9670_vm5, %v13840_v15  ;;  %v9089_v25 = vpack.c.bf16 %v7549_v20, %v7548_v26 }
 0xc6e   :  { %9079 = vmatprep.subr.bf16.mxu1 %v13756_v43  ;;  %v6431_v32 = vadd.f32 %v13307_v46, %v6423_v21 }
 0xc6f   :  { %v6393_v35 = vpop.f32.mrb[112].mxu0 }
 0xc70   :  { %v6424_v44 = vadd.f32 %v13294_v50, %v6393_v35  ;;  %v6395_v12 = vpop.f32.mrb[113].mxu0  ;;  %v7550_v50 = vld [vmem:[%s13456_s9 + $0xb0] sm:$0xff] }
 0xc71   :  { %9081 = vmatpush3.bf16.msra.mxu1 %v9080_v45  ;;  %v9092_v24 = vpack.c.bf16 %v7551_v3, %v7550_v50 }
 0xc72   :  { %9082 = vmatprep.subr.bf16.mxu1 %v13756_v43  ;;  %v6432_v56 = vadd.f32 %v13307_v46, %v6424_v44 }
 0xc73   :  { %v6398_v5 = vpop.f32.mrb[114].mxu0 }
 0xc74   :  { %v6425_v34 = vadd.f32 %v13296_v42, %v6398_v5  ;;  %v6400_v55 = vpop.f32.mrb[115].mxu0  ;;  %8628 = vmatmul.mubr.msk.f32.vlgmr.msra.gmra.mrb[84].mxu1 %vm325_vm1, %v6429_v0  ;;  %v7553_v42 = vld [vmem:[%s13456_s9 + $0xc0] sm:$0xff]  ;;  %s9671_s9 = smov [#allocation2]  }
 0xc75   :  { %9084 = vmatpush3.bf16.msra.mxu1 %v9083_v52  ;;  %8638 = vmatprep.mubr.msk.f32.mxu1 %vm9670_vm5, %v13840_v15  ;;  %v9095_v29 = vpack.c.bf16 %v7554_v6, %v7553_v42  ;;  %s7083_s26 = sshll.u32 %s9671_s9, 4  ;;  %s7084_s26 = int_to_ptr.vmem [resolvable:$true] %s7083_s26 }
 0xc76   :  { %9085 = vmatprep.subr.bf16.mxu1 %v13756_v43  ;;  %v6433_v27 = vadd.f32 %v13307_v46, %v6425_v34  ;;  %s9644_s27 = scalar_lea.vmem %s7084_s26, 128  ;;  %p9649_p1 = scmp.lt.s32.totalorder %s7084_s26, %s7084_s26 }
 0xc77   :  { %p9645_p0 = scmp.ne.s32.totalorder %s7084_s26, %s9644_s27  ;;  %p9650_p2 = scmp.lt.s32.totalorder %s9644_s27, %s9644_s27 }
 0xc79   :  { %9087 = vmatpush3.bf16.msra.mxu1 %v9086_v63  ;;  %p9651_p3 = por %p9650_p2, %p9649_p1 }
 0xc7a   :  { %9088 = vmatprep.subr.bf16.mxu1 %v13756_v43 }
 0xc7b   :  { %p9652_p4 = pnand %p9651_p3, %p9645_p0 }
 0xc7c   :  { %8639 = vmatmul.mubr.msk.f32.vlgmr.msra.gmra.mrb[84].mxu1 %vm325_vm1, %v6430_v18 }
 0xc7d   :  { %9090 = vmatpush3.bf16.msra.mxu1 %v9089_v25  ;;  %8649 = vmatprep.mubr.msk.f32.mxu1 %vm9670_vm5, %v13840_v15 }
 0xc7e   :  { %9091 = vmatprep.subr.bf16.mxu1 %v13756_v43 }
 0xc81   :  { %9093 = vmatpush3.bf16.msra.mxu1 %v9092_v24 }
 0xc82   :  { %9094 = vmatprep.subr.bf16.mxu1 %v13756_v43 }
 0xc84   :  { %8650 = vmatmul.mubr.msk.f32.vlgmr.msra.gmra.mrb[84].mxu1 %vm325_vm1, %v6431_v32 }
 0xc85   :  { %9096 = vmatpush3.bf16.msra.mxu1 %v9095_v29  ;;  %8660 = vmatprep.mubr.msk.f32.mxu1 %vm9670_vm5, %v13840_v15 }
 0xc86   :  { %9097 = vmatprep.subr.bf16.mxu1 %v13756_v43 }
 0xc89   :  { %9099 = vmatpush3.bf16.msra.mxu1 %v9098_v8 }
 0xc8a   :  { %9100 = vmatprep.subr.bf16.mxu1 %v13756_v43 }
 0xc8c   :  { %8661 = vmatmul.mubr.msk.f32.vlgmr.msra.gmra.mrb[84].mxu1 %vm325_vm1, %v6432_v56 }
 0xc8d   :  { %9102 = vmatpush3.bf16.msra.mxu1 %v9101_v30  ;;  %8671 = vmatprep.mubr.msk.f32.mxu1 %vm9670_vm5, %v13840_v15 }
 0xc8e   :  { %9103 = vmatprep.subr.bf16.mxu1 %v13756_v43 }
 0xc91   :  { %9105 = vmatpush3.bf16.msra.mxu1 %v9104_v23 }
 0xc94   :  { %8672 = vmatmul.mubr.msk.f32.vlgmr.msra.gmra.mrb[84].mxu1 %vm325_vm1, %v6433_v27 }
 0xd67   :  { %v7068_v17 = vpop.f32.mrb[84].mxu1 }
 0xd68   :  { %v9110_v1 = vadd.f32 %v7526_v28, %v7068_v17  ;;  %v8673_v38 = vpop.f32.mrb[85].mxu1 }
 0xd6a   :  { %v7074_v11 = vmul.f32 0.01, %v9110_v1  ;;  %vm7073_vm6 = vcmp.ge.f32.partialorder %v9110_v1, 0.0 }
 0xd6c   :  { %v7075_v15 = vsel %vm7073_vm6, %v9110_v1, %v7074_v11 }
 0xd6d   :  { %7076 = vst [vmem:[#allocation2] sm:$0xff] %v7075_v15 }
 0xd6e   :  { %9655 = shalt.err (!%p9652_p4)
}
 0xd6f   :  { %s9656_s10 = scalar_lea.hbm %s13460_s13, 128 }
 0xd70   :  { %p9657_p5 = scmp.ne.s32.totalorder %s13460_s13, %s9656_s10  ;;  %p9660_p6 = scmp.lt.u32.totalorder %s9656_s10, %s13460_s13 }
 0xd72   :  { %p9662_p7 = pnand %p9660_p6, %p9657_p5 }
 0xd74   :  { %9665 = shalt.err (!%p9662_p7)
}
 0xd75   :  { %7086 = dma.vmem_to_hbm [thread:$0]  %s7084_s26, 128, %s13460_s13, [#allocation3]  }
 0xd76   :  { %9666 = dma.done.wait [#allocation3], 128  }
 0xd77   :  { %9667 = vsyncadd [#allocation3], 4294967168 }
 0xd78   :  { %7090 = vsyncpa [#allocation3], 1 }

</bundles_post_ra>
